<compile_context>
chip_gen: v5e
topology: v5e:2x2
jax: 0.10.0
libtpu: 0.0.40
codegen_flags: <defaults>
</compile_context>

<pallas_src>
import functools

import jax
import jax.numpy as jnp
from jax import lax
from jax.experimental import pallas as pl
from jax.experimental.pallas import tpu as pltpu

LEAKY_SLOPE = 0.2
BN_EPS = 1e-5


# ---------------------------------------------------------------------------
# Kernels
# ---------------------------------------------------------------------------
def _conv_s2d_lrelu_kernel(x_ref, w_ref, shift_ref, o_ref, *, negative_slope):
    """Stride-1 2x2 conv over a space-to-depth input, + per-channel shift + LeakyReLU.

    x_ref    : (B, OH+1, OW+1, Cin_sd)  space-to-depth'd padded activations (VMEM)
    w_ref    : (2, 2, Cin_sd, Cout)     rearranged weights (BN scale pre-folded)
    shift_ref: (1, Cout)                per-channel shift (zeros if no BN)
    o_ref    : (B, OH, OW, Cout)
    """
    B, OH, OW, cout = o_ref.shape
    cin = x_ref.shape[-1]
    M = B * OH * OW

    acc = jnp.zeros((M, cout), jnp.float32)
    for a in range(2):
        for b in range(2):
            patch = x_ref[:, a:a + OH, b:b + OW, :].reshape(M, cin)
            acc += jnp.dot(patch, w_ref[a, b], preferred_element_type=jnp.float32)

    acc = acc + shift_ref[...]                      # folded BN shift (or zeros)
    out = jnp.where(acc >= 0.0, acc, negative_slope * acc)   # LeakyReLU(0.2)
    o_ref[...] = out.reshape(B, OH, OW, cout).astype(o_ref.dtype)


def _heads_kernel(f_ref, w_ref, oa_ref, oc_ref):
    """Both heads as one full-contraction matmul.

    f_ref : (N, F)            flattened 4x4x256 body features
    w_ref : (F, 1+n_classes)  concatenated head weights
    oa_ref: (N, 1)            sigmoid(adversarial head)
    oc_ref: (N, n_classes)    class head (logits)
    """
    out = jnp.dot(f_ref[...], w_ref[...], preferred_element_type=jnp.float32)
    adv = out[:, 0:1]
    oa_ref[...] = (1.0 / (1.0 + jnp.exp(-adv))).astype(oa_ref.dtype)
    oc_ref[...] = out[:, 1:].astype(oc_ref.dtype)


# ---------------------------------------------------------------------------
# Wrapper helpers
# ---------------------------------------------------------------------------
def _batch_tile(n, cap=8):
    """Largest batch tile <= cap that divides n while keeping >= 2 grid steps."""
    best = 1
    for b in range(1, min(cap, n) + 1):
        if n % b == 0 and n // b >= 2:
            best = b
    return best


def _space_to_depth2(x_nhwc):
    """(N, H, W, C) with even H, W  ->  (N, H/2, W/2, 4C), phase index = 2r + c."""
    n, h, w, c = x_nhwc.shape
    x = x_nhwc.reshape(n, h // 2, 2, w // 2, 2, c)
    x = jnp.transpose(x, (0, 1, 3, 2, 4, 5))
    return x.reshape(n, h // 2, w // 2, 4 * c)


def _s2d_weight(w_hwio):
    """Rearrange a (k,k,Cin,Cout) stride-2 conv weight (k in {3,4}) into the equivalent
    (2,2,4*Cin,Cout) weight of a stride-1 2x2 conv over the space-to-depth input."""
    k, _, cin, cout = w_hwio.shape
    w_sd = jnp.zeros((2, 2, 4 * cin, cout), w_hwio.dtype)
    for a in range(2):
        for b in range(2):
            for r in range(2):
                for c in range(2):
                    kh, kw = 2 * a + r, 2 * b + c
                    if kh < k and kw < k:
                        p = 2 * r + c
                        w_sd = w_sd.at[a, b, p * cin:(p + 1) * cin, :].set(w_hwio[kh, kw])
    return w_sd


def _bn_fold(gamma, beta, mean, var):
    scale = gamma / jnp.sqrt(var + BN_EPS)
    shift = beta - mean * scale
    return scale, shift


def _conv_s2d_layer(x_nhwc, w_sd, shift, batch_tile):
    """One body layer: pad(1) + space-to-depth (XLA glue) -> Pallas 4-tap conv kernel."""
    n, h, w, _ = x_nhwc.shape
    assert h % 2 == 0 and w % 2 == 0
    oh, ow = h // 2, w // 2
    cout = w_sd.shape[3]

    x_pad = jnp.pad(x_nhwc, ((0, 0), (1, 1), (1, 1), (0, 0)))
    x_sd = _space_to_depth2(x_pad)                         # (n, oh+1, ow+1, 4C)

    # Pad the contraction dim up to a multiple of 8 (only matters for the first layer).
    cin_sd = w_sd.shape[2]
    pad_c = (-cin_sd) % 8
    if pad_c:
        x_sd = jnp.pad(x_sd, ((0, 0), (0, 0), (0, 0), (0, pad_c)))
        w_sd = jnp.pad(w_sd, ((0, 0), (0, 0), (0, pad_c), (0, 0)))
        cin_sd += pad_c

    grid = (n // batch_tile,)
    flops = 2 * n * oh * ow * 4 * cin_sd * cout
    bytes_accessed = 4 * (x_sd.size + w_sd.size + shift.size + n * oh * ow * cout)

    kernel = functools.partial(_conv_s2d_lrelu_kernel, negative_slope=LEAKY_SLOPE)
    return pl.pallas_call(
        kernel,
        out_shape=jax.ShapeDtypeStruct((n, oh, ow, cout), x_nhwc.dtype),
        grid_spec=pltpu.PrefetchScalarGridSpec(
            num_scalar_prefetch=0,
            grid=grid,
            in_specs=[
                pl.BlockSpec((batch_tile, oh + 1, ow + 1, cin_sd),
                             lambda i: (i, 0, 0, 0)),
                pl.BlockSpec((2, 2, cin_sd, cout), lambda i: (0, 0, 0, 0)),
                pl.BlockSpec((1, cout), lambda i: (0, 0)),
            ],
            out_specs=pl.BlockSpec((batch_tile, oh, ow, cout),
                                   lambda i: (i, 0, 0, 0)),
        ),
        compiler_params=pltpu.CompilerParams(dimension_semantics=("parallel",)),
        cost_estimate=pl.CostEstimate(flops=flops, transcendentals=0,
                                      bytes_accessed=bytes_accessed),
    )(x_sd, w_sd, shift)


def _heads_call(feat_flat, w_heads, n_classes):
    n, f = feat_flat.shape
    return pl.pallas_call(
        _heads_kernel,
        out_shape=(jax.ShapeDtypeStruct((n, 1), feat_flat.dtype),
                   jax.ShapeDtypeStruct((n, n_classes), feat_flat.dtype)),
        grid_spec=pltpu.PrefetchScalarGridSpec(
            num_scalar_prefetch=0,
            grid=(1,),
            in_specs=[
                pl.BlockSpec((n, f), lambda i: (0, 0)),
                pl.BlockSpec((f, 1 + n_classes), lambda i: (0, 0)),
            ],
            out_specs=(pl.BlockSpec((n, 1), lambda i: (0, 0)),
                       pl.BlockSpec((n, n_classes), lambda i: (0, 0))),
        ),
        compiler_params=pltpu.CompilerParams(dimension_semantics=("arbitrary",)),
        cost_estimate=pl.CostEstimate(
            flops=2 * n * f * (1 + n_classes), transcendentals=n,
            bytes_accessed=4 * (feat_flat.size + w_heads.size + n * (1 + n_classes))),
    )(feat_flat, w_heads)


# ---------------------------------------------------------------------------
# Forward pass
# ---------------------------------------------------------------------------
def accnn_discriminator_forward(x_nchw, params):
    """x_nchw: (N, n_channels, H, W) f32, H and W multiples of 8 (canonical: 32x32).

    Returns [adv (N,1,1,1) after sigmoid, cls (N,n_classes,1,1)] like the PyTorch module.
    """
    n, _, h, w = x_nchw.shape
    assert h % 8 == 0 and w % 8 == 0
    bt = _batch_tile(n)

    x = jnp.transpose(x_nchw, (0, 2, 3, 1))            # NCHW -> NHWC (boundary only)

    # Layer 1: Conv(nc->64, k4 s2 p1) + LeakyReLU (no BN).
    w1_sd = _s2d_weight(params["w1"])
    shift1 = jnp.zeros((1, params["w1"].shape[3]), x.dtype)
    hact = _conv_s2d_layer(x, w1_sd, shift1, bt)

    # Layer 2: Conv(64->128, k4 s2 p1) + BN + LeakyReLU (BN folded into weights/shift).
    scale2, shift2 = _bn_fold(*params["bn2"])
    w2_sd = _s2d_weight(params["w2"] * scale2[None, None, None, :])
    hact = _conv_s2d_layer(hact, w2_sd, shift2[None, :].astype(x.dtype), bt)

    # Layer 3: Conv(128->256, k3 s2 p1) + BN + LeakyReLU.
    scale3, shift3 = _bn_fold(*params["bn3"])
    w3_sd = _s2d_weight(params["w3"] * scale3[None, None, None, :])
    hact = _conv_s2d_layer(hact, w3_sd, shift3[None, :].astype(x.dtype), bt)

    # Heads: k4 s1 p0 conv on a 4x4 feature map == full-contraction matmul.
    # (Covers the canonical 32x32 discriminator input; body output must be 4x4.)
    assert hact.shape[1] == 4 and hact.shape[2] == 4, "heads expect a 4x4 body output"
    feat = hact.reshape(n, -1)                                        # (N, 4096)
    n_classes = params["wh_cls"].shape[3]
    w_adv = params["wh_adv"].reshape(-1, 1)                           # (4096, 1)
    w_cls = params["wh_cls"].reshape(-1, n_classes)                   # (4096, n_classes)
    w_heads = jnp.concatenate([w_adv, w_cls], axis=1)                 # (4096, 1+nc)
    out_adv, out_cls = _heads_call(feat, w_heads, n_classes)

    return [out_adv[:, :, None, None], out_cls[:, :, None, None]]    # back to NCHW


# ---------------------------------------------------------------------------
# Pure-JAX reference (lax.conv) for correctness check
# ---------------------------------------------------------------------------
def _reference_forward(x_nchw, params):
    def conv(x, w_hwio, stride, pad):
        return lax.conv_general_dilated(
            x, jnp.transpose(w_hwio, (3, 2, 0, 1)),                  # HWIO -> OIHW
            window_strides=(stride, stride), padding=((pad, pad), (pad, pad)),
            dimension_numbers=("NCHW", "OIHW", "NCHW"))

    def lrelu(x):
        return jnp.where(x >= 0, x, LEAKY_SLOPE * x)

    def bn(x, gamma, beta, mean, var):
        scale = gamma / jnp.sqrt(var + BN_EPS)
        shift = beta - mean * scale
        return x * scale[None, :, None, None] + shift[None, :, None, None]

    hact = lrelu(conv(x_nchw, params["w1"], 2, 1))
    hact = lrelu(bn(conv(hact, params["w2"], 2, 1), *params["bn2"]))
    hact = lrelu(bn(conv(hact, params["w3"], 2, 1), *params["bn3"]))
    adv = jax.nn.sigmoid(conv(hact, params["wh_adv"], 1, 0))
    cls = conv(hact, params["wh_cls"], 1, 0)
    return adv, cls


if __name__ == "__main__":
    key = jax.random.PRNGKey(0)
    ks = jax.random.split(key, 10)

    N, NC, H, W, NCLS = 2, 1, 32, 32, 10
    x = jax.random.normal(ks[0], (N, NC, H, W), jnp.float32)

    # weights_init(): conv weights ~ N(0, 0.02); BN gamma ~ N(1, 0.02), beta = 0.
    # BN running stats chosen deterministically (inference-mode BN).
    params = {
        "w1": 0.02 * jax.random.normal(ks[1], (4, 4, NC, 64), jnp.float32),
        "w2": 0.02 * jax.random.normal(ks[2], (4, 4, 64, 128), jnp.float32),
        "w3": 0.02 * jax.random.normal(ks[3], (3, 3, 128, 256), jnp.float32),
        "wh_adv": 0.02 * jax.random.normal(ks[4], (4, 4, 256, 1), jnp.float32),
        "wh_cls": 0.02 * jax.random.normal(ks[5], (4, 4, 256, NCLS), jnp.float32),
        "bn2": (1.0 + 0.02 * jax.random.normal(ks[6], (128,), jnp.float32),
                jnp.zeros((128,), jnp.float32),
                0.05 * jax.random.normal(ks[7], (128,), jnp.float32),
                1.0 + 0.05 * jnp.abs(jax.random.normal(ks[8], (128,), jnp.float32))),
        "bn3": (1.0 + 0.02 * jax.random.normal(ks[9], (256,), jnp.float32),
                jnp.zeros((256,), jnp.float32),
                jnp.zeros((256,), jnp.float32),
                jnp.ones((256,), jnp.float32)),
    }

    fwd = jax.jit(accnn_discriminator_forward)
    out_adv, out_cls = jax.block_until_ready(fwd(x, params))

    ref_adv, ref_cls = jax.block_until_ready(_reference_forward(x, params))

    assert out_adv.shape == (N, 1, 1, 1) and out_cls.shape == (N, NCLS, 1, 1)
    assert jnp.allclose(out_adv, ref_adv, atol=1e-4, rtol=1e-4), "adv head mismatch"
    assert jnp.allclose(out_cls, ref_cls, atol=1e-4, rtol=1e-4), "class head mismatch"

    print("KERNEL_OK")
</pallas_src>

<mosaic_0001>
module attributes {stable_mosaic.version = 11 : i64} {
  func.func @_conv_s2d_lrelu_kernel(%arg0: i32, %arg1: memref<1x17x17x8xf32, #tpu.memory_space<vmem>>, %arg2: memref<2x2x8x64xf32, #tpu.memory_space<vmem>>, %arg3: memref<1x64xf32, #tpu.memory_space<vmem>>, %arg4: memref<1x16x16x64xf32, #tpu.memory_space<vmem>>) attributes {dimension_semantics = [#tpu.dimension_semantics<parallel>], iteration_bounds = array<i64: 2>, scalar_prefetch = 0 : i64, scratch_operands = 0 : i64, tpu.core_type = #tpu.core_type<tc>, window_params = [{transform_indices = @transform_0, window_bounds = array<i64: 1, 17, 17, 8>}, {pipeline_mode = #tpu.pipeline_mode<synchronous>, transform_indices = @transform_1, window_bounds = array<i64: 2, 2, 8, 64>}, {pipeline_mode = #tpu.pipeline_mode<synchronous>, transform_indices = @transform_2, window_bounds = array<i64: 1, 64>}, {transform_indices = @transform_3, window_bounds = array<i64: 1, 16, 16, 64>}]} {
    %cst = arith.constant 0.000000e+00 : f32
    %0 = vector.broadcast %cst : f32 to vector<256x64xf32>
    %c0 = arith.constant 0 : index
    %c0_0 = arith.constant 0 : index
    %c0_1 = arith.constant 0 : index
    %c0_2 = arith.constant 0 : index
    %1 = vector.load %arg1[%c0, %c0_0, %c0_1, %c0_2] : memref<1x17x17x8xf32, #tpu.memory_space<vmem>>, vector<1x16x16x8xf32>
    %2 = vector.shape_cast %1 : vector<1x16x16x8xf32> to vector<256x8xf32>
    %c0_3 = arith.constant 0 : index
    %c0_4 = arith.constant 0 : index
    %c0_5 = arith.constant 0 : index
    %c0_6 = arith.constant 0 : index
    %3 = vector.load %arg2[%c0_3, %c0_4, %c0_5, %c0_6] : memref<2x2x8x64xf32, #tpu.memory_space<vmem>>, vector<1x1x8x64xf32>
    %4 = vector.shape_cast %3 : vector<1x1x8x64xf32> to vector<8x64xf32>
    %cst_7 = arith.constant dense<0.000000e+00> : vector<256x64xf32>
    %5 = tpu.matmul %2, %4, %cst_7 {dimension_numbers = #tpu.dot_dimension_numbers<[1], [0], [0], [1], [0, 0, 1, 1], [], []>} : vector<256x8xf32>, vector<8x64xf32>, vector<256x64xf32> -> vector<256x64xf32>
    %6 = arith.addf %0, %5 : vector<256x64xf32>
    %c0_8 = arith.constant 0 : index
    %c0_9 = arith.constant 0 : index
    %c1 = arith.constant 1 : index
    %c0_10 = arith.constant 0 : index
    %7 = vector.load %arg1[%c0_8, %c0_9, %c1, %c0_10] : memref<1x17x17x8xf32, #tpu.memory_space<vmem>>, vector<1x16x16x8xf32>
    %8 = vector.shape_cast %7 : vector<1x16x16x8xf32> to vector<256x8xf32>
    %c0_11 = arith.constant 0 : index
    %c1_12 = arith.constant 1 : index
    %c0_13 = arith.constant 0 : index
    %c0_14 = arith.constant 0 : index
    %9 = vector.load %arg2[%c0_11, %c1_12, %c0_13, %c0_14] : memref<2x2x8x64xf32, #tpu.memory_space<vmem>>, vector<1x1x8x64xf32>
    %10 = vector.shape_cast %9 : vector<1x1x8x64xf32> to vector<8x64xf32>
    %cst_15 = arith.constant dense<0.000000e+00> : vector<256x64xf32>
    %11 = tpu.matmul %8, %10, %cst_15 {dimension_numbers = #tpu.dot_dimension_numbers<[1], [0], [0], [1], [0, 0, 1, 1], [], []>} : vector<256x8xf32>, vector<8x64xf32>, vector<256x64xf32> -> vector<256x64xf32>
    %12 = arith.addf %6, %11 : vector<256x64xf32>
    %c0_16 = arith.constant 0 : index
    %c1_17 = arith.constant 1 : index
    %c0_18 = arith.constant 0 : index
    %c0_19 = arith.constant 0 : index
    %13 = vector.load %arg1[%c0_16, %c1_17, %c0_18, %c0_19] : memref<1x17x17x8xf32, #tpu.memory_space<vmem>>, vector<1x16x16x8xf32>
    %14 = vector.shape_cast %13 : vector<1x16x16x8xf32> to vector<256x8xf32>
    %c1_20 = arith.constant 1 : index
    %c0_21 = arith.constant 0 : index
    %c0_22 = arith.constant 0 : index
    %c0_23 = arith.constant 0 : index
    %15 = vector.load %arg2[%c1_20, %c0_21, %c0_22, %c0_23] : memref<2x2x8x64xf32, #tpu.memory_space<vmem>>, vector<1x1x8x64xf32>
    %16 = vector.shape_cast %15 : vector<1x1x8x64xf32> to vector<8x64xf32>
    %cst_24 = arith.constant dense<0.000000e+00> : vector<256x64xf32>
    %17 = tpu.matmul %14, %16, %cst_24 {dimension_numbers = #tpu.dot_dimension_numbers<[1], [0], [0], [1], [0, 0, 1, 1], [], []>} : vector<256x8xf32>, vector<8x64xf32>, vector<256x64xf32> -> vector<256x64xf32>
    %18 = arith.addf %12, %17 : vector<256x64xf32>
    %c0_25 = arith.constant 0 : index
    %c1_26 = arith.constant 1 : index
    %c1_27 = arith.constant 1 : index
    %c0_28 = arith.constant 0 : index
    %19 = vector.load %arg1[%c0_25, %c1_26, %c1_27, %c0_28] : memref<1x17x17x8xf32, #tpu.memory_space<vmem>>, vector<1x16x16x8xf32>
    %20 = vector.shape_cast %19 : vector<1x16x16x8xf32> to vector<256x8xf32>
    %c1_29 = arith.constant 1 : index
    %c1_30 = arith.constant 1 : index
    %c0_31 = arith.constant 0 : index
    %c0_32 = arith.constant 0 : index
    %21 = vector.load %arg2[%c1_29, %c1_30, %c0_31, %c0_32] : memref<2x2x8x64xf32, #tpu.memory_space<vmem>>, vector<1x1x8x64xf32>
    %22 = vector.shape_cast %21 : vector<1x1x8x64xf32> to vector<8x64xf32>
    %cst_33 = arith.constant dense<0.000000e+00> : vector<256x64xf32>
    %23 = tpu.matmul %20, %22, %cst_33 {dimension_numbers = #tpu.dot_dimension_numbers<[1], [0], [0], [1], [0, 0, 1, 1], [], []>} : vector<256x8xf32>, vector<8x64xf32>, vector<256x64xf32> -> vector<256x64xf32>
    %24 = arith.addf %18, %23 : vector<256x64xf32>
    %c0_34 = arith.constant 0 : index
    %c0_35 = arith.constant 0 : index
    %25 = vector.load %arg3[%c0_34, %c0_35] : memref<1x64xf32, #tpu.memory_space<vmem>>, vector<1x64xf32>
    %26 = vector.broadcast %25 : vector<1x64xf32> to vector<256x64xf32>
    %27 = arith.addf %24, %26 : vector<256x64xf32>
    %cst_36 = arith.constant 0.000000e+00 : f32
    %28 = vector.broadcast %cst_36 : f32 to vector<256x64xf32>
    %29 = arith.cmpf oge, %27, %28 : vector<256x64xf32>
    %cst_37 = arith.constant 2.000000e-01 : f32
    %30 = vector.broadcast %cst_37 : f32 to vector<256x64xf32>
    %31 = arith.mulf %30, %27 : vector<256x64xf32>
    %32 = arith.select %29, %27, %31 : vector<256x64xi1>, vector<256x64xf32>
    %33 = vector.shape_cast %32 : vector<256x64xf32> to vector<1x16x16x64xf32>
    %c0_38 = arith.constant 0 : index
    %c0_39 = arith.constant 0 : index
    %c0_40 = arith.constant 0 : index
    %c0_41 = arith.constant 0 : index
    %34 = vector.load %arg4[%c0_38, %c0_39, %c0_40, %c0_41] : memref<1x16x16x64xf32, #tpu.memory_space<vmem>>, vector<1x16x16x64xf32>
    tpu.vector_store %arg4[%c0_38, %c0_39, %c0_40, %c0_41], %33 {strides = array<i32>} : memref<1x16x16x64xf32, #tpu.memory_space<vmem>>, vector<1x16x16x64xf32>,
    return
  }
  func.func @transform_0(%arg0: i32) -> (i32, i32, i32, i32) {
    %c0_i32 = arith.constant 0 : i32
    %c0_i32_0 = arith.constant 0 : i32
    %c0_i32_1 = arith.constant 0 : i32
    %c0_i32_2 = arith.constant 0 : i32
    return %arg0, %c0_i32, %c0_i32_0, %c0_i32_1 : i32, i32, i32, i32
  }
  func.func @transform_1(%arg0: i32) -> (i32, i32, i32, i32) {
    %c0_i32 = arith.constant 0 : i32
    %c0_i32_0 = arith.constant 0 : i32
    %c0_i32_1 = arith.constant 0 : i32
    %c0_i32_2 = arith.constant 0 : i32
    %c0_i32_3 = arith.constant 0 : i32
    return %c0_i32, %c0_i32_0, %c0_i32_1, %c0_i32_2 : i32, i32, i32, i32
  }
  func.func @transform_2(%arg0: i32) -> (i32, i32) {
    %c0_i32 = arith.constant 0 : i32
    %c0_i32_0 = arith.constant 0 : i32
    %c0_i32_1 = arith.constant 0 : i32
    return %c0_i32, %c0_i32_0 : i32, i32
  }
  func.func @transform_3(%arg0: i32) -> (i32, i32, i32, i32) {
    %c0_i32 = arith.constant 0 : i32
    %c0_i32_0 = arith.constant 0 : i32
    %c0_i32_1 = arith.constant 0 : i32
    %c0_i32_2 = arith.constant 0 : i32
    return %arg0, %c0_i32, %c0_i32_0, %c0_i32_1 : i32, i32, i32, i32
  }
}

module attributes {stable_mosaic.version = 11 : i64} {
  func.func @_conv_s2d_lrelu_kernel(%arg0: i32, %arg1: memref<1x9x9x256xf32, #tpu.memory_space<vmem>>, %arg2: memref<2x2x256x128xf32, #tpu.memory_space<vmem>>, %arg3: memref<1x128xf32, #tpu.memory_space<vmem>>, %arg4: memref<1x8x8x128xf32, #tpu.memory_space<vmem>>) attributes {dimension_semantics = [#tpu.dimension_semantics<parallel>], iteration_bounds = array<i64: 2>, scalar_prefetch = 0 : i64, scratch_operands = 0 : i64, tpu.core_type = #tpu.core_type<tc>, window_params = [{transform_indices = @transform_0, window_bounds = array<i64: 1, 9, 9, 256>}, {pipeline_mode = #tpu.pipeline_mode<synchronous>, transform_indices = @transform_1, window_bounds = array<i64: 2, 2, 256, 128>}, {pipeline_mode = #tpu.pipeline_mode<synchronous>, transform_indices = @transform_2, window_bounds = array<i64: 1, 128>}, {transform_indices = @transform_3, window_bounds = array<i64: 1, 8, 8, 128>}]} {
    %cst = arith.constant 0.000000e+00 : f32
    %0 = vector.broadcast %cst : f32 to vector<64x128xf32>
    %c0 = arith.constant 0 : index
    %c0_0 = arith.constant 0 : index
    %c0_1 = arith.constant 0 : index
    %c0_2 = arith.constant 0 : index
    %1 = vector.load %arg1[%c0, %c0_0, %c0_1, %c0_2] : memref<1x9x9x256xf32, #tpu.memory_space<vmem>>, vector<1x8x8x256xf32>
    %2 = vector.shape_cast %1 : vector<1x8x8x256xf32> to vector<64x256xf32>
    %c0_3 = arith.constant 0 : index
    %c0_4 = arith.constant 0 : index
    %c0_5 = arith.constant 0 : index
    %c0_6 = arith.constant 0 : index
    %3 = vector.load %arg2[%c0_3, %c0_4, %c0_5, %c0_6] : memref<2x2x256x128xf32, #tpu.memory_space<vmem>>, vector<1x1x256x128xf32>
    %4 = vector.shape_cast %3 : vector<1x1x256x128xf32> to vector<256x128xf32>
    %cst_7 = arith.constant dense<0.000000e+00> : vector<64x128xf32>
    %5 = tpu.matmul %2, %4, %cst_7 {dimension_numbers = #tpu.dot_dimension_numbers<[1], [0], [0], [1], [0, 0, 1, 1], [], []>} : vector<64x256xf32>, vector<256x128xf32>, vector<64x128xf32> -> vector<64x128xf32>
    %6 = arith.addf %0, %5 : vector<64x128xf32>
    %c0_8 = arith.constant 0 : index
    %c0_9 = arith.constant 0 : index
    %c1 = arith.constant 1 : index
    %c0_10 = arith.constant 0 : index
    %7 = vector.load %arg1[%c0_8, %c0_9, %c1, %c0_10] : memref<1x9x9x256xf32, #tpu.memory_space<vmem>>, vector<1x8x8x256xf32>
    %8 = vector.shape_cast %7 : vector<1x8x8x256xf32> to vector<64x256xf32>
    %c0_11 = arith.constant 0 : index
    %c1_12 = arith.constant 1 : index
    %c0_13 = arith.constant 0 : index
    %c0_14 = arith.constant 0 : index
    %9 = vector.load %arg2[%c0_11, %c1_12, %c0_13, %c0_14] : memref<2x2x256x128xf32, #tpu.memory_space<vmem>>, vector<1x1x256x128xf32>
    %10 = vector.shape_cast %9 : vector<1x1x256x128xf32> to vector<256x128xf32>
    %cst_15 = arith.constant dense<0.000000e+00> : vector<64x128xf32>
    %11 = tpu.matmul %8, %10, %cst_15 {dimension_numbers = #tpu.dot_dimension_numbers<[1], [0], [0], [1], [0, 0, 1, 1], [], []>} : vector<64x256xf32>, vector<256x128xf32>, vector<64x128xf32> -> vector<64x128xf32>
    %12 = arith.addf %6, %11 : vector<64x128xf32>
    %c0_16 = arith.constant 0 : index
    %c1_17 = arith.constant 1 : index
    %c0_18 = arith.constant 0 : index
    %c0_19 = arith.constant 0 : index
    %13 = vector.load %arg1[%c0_16, %c1_17, %c0_18, %c0_19] : memref<1x9x9x256xf32, #tpu.memory_space<vmem>>, vector<1x8x8x256xf32>
    %14 = vector.shape_cast %13 : vector<1x8x8x256xf32> to vector<64x256xf32>
    %c1_20 = arith.constant 1 : index
    %c0_21 = arith.constant 0 : index
    %c0_22 = arith.constant 0 : index
    %c0_23 = arith.constant 0 : index
    %15 = vector.load %arg2[%c1_20, %c0_21, %c0_22, %c0_23] : memref<2x2x256x128xf32, #tpu.memory_space<vmem>>, vector<1x1x256x128xf32>
    %16 = vector.shape_cast %15 : vector<1x1x256x128xf32> to vector<256x128xf32>
    %cst_24 = arith.constant dense<0.000000e+00> : vector<64x128xf32>
    %17 = tpu.matmul %14, %16, %cst_24 {dimension_numbers = #tpu.dot_dimension_numbers<[1], [0], [0], [1], [0, 0, 1, 1], [], []>} : vector<64x256xf32>, vector<256x128xf32>, vector<64x128xf32> -> vector<64x128xf32>
    %18 = arith.addf %12, %17 : vector<64x128xf32>
    %c0_25 = arith.constant 0 : index
    %c1_26 = arith.constant 1 : index
    %c1_27 = arith.constant 1 : index
    %c0_28 = arith.constant 0 : index
    %19 = vector.load %arg1[%c0_25, %c1_26, %c1_27, %c0_28] : memref<1x9x9x256xf32, #tpu.memory_space<vmem>>, vector<1x8x8x256xf32>
    %20 = vector.shape_cast %19 : vector<1x8x8x256xf32> to vector<64x256xf32>
    %c1_29 = arith.constant 1 : index
    %c1_30 = arith.constant 1 : index
    %c0_31 = arith.constant 0 : index
    %c0_32 = arith.constant 0 : index
    %21 = vector.load %arg2[%c1_29, %c1_30, %c0_31, %c0_32] : memref<2x2x256x128xf32, #tpu.memory_space<vmem>>, vector<1x1x256x128xf32>
    %22 = vector.shape_cast %21 : vector<1x1x256x128xf32> to vector<256x128xf32>
    %cst_33 = arith.constant dense<0.000000e+00> : vector<64x128xf32>
    %23 = tpu.matmul %20, %22, %cst_33 {dimension_numbers = #tpu.dot_dimension_numbers<[1], [0], [0], [1], [0, 0, 1, 1], [], []>} : vector<64x256xf32>, vector<256x128xf32>, vector<64x128xf32> -> vector<64x128xf32>
    %24 = arith.addf %18, %23 : vector<64x128xf32>
    %c0_34 = arith.constant 0 : index
    %c0_35 = arith.constant 0 : index
    %25 = vector.load %arg3[%c0_34, %c0_35] : memref<1x128xf32, #tpu.memory_space<vmem>>, vector<1x128xf32>
    %26 = vector.broadcast %25 : vector<1x128xf32> to vector<64x128xf32>
    %27 = arith.addf %24, %26 : vector<64x128xf32>
    %cst_36 = arith.constant 0.000000e+00 : f32
    %28 = vector.broadcast %cst_36 : f32 to vector<64x128xf32>
    %29 = arith.cmpf oge, %27, %28 : vector<64x128xf32>
    %cst_37 = arith.constant 2.000000e-01 : f32
    %30 = vector.broadcast %cst_37 : f32 to vector<64x128xf32>
    %31 = arith.mulf %30, %27 : vector<64x128xf32>
    %32 = arith.select %29, %27, %31 : vector<64x128xi1>, vector<64x128xf32>
    %33 = vector.shape_cast %32 : vector<64x128xf32> to vector<1x8x8x128xf32>
    %c0_38 = arith.constant 0 : index
    %c0_39 = arith.constant 0 : index
    %c0_40 = arith.constant 0 : index
    %c0_41 = arith.constant 0 : index
    %34 = vector.load %arg4[%c0_38, %c0_39, %c0_40, %c0_41] : memref<1x8x8x128xf32, #tpu.memory_space<vmem>>, vector<1x8x8x128xf32>
    tpu.vector_store %arg4[%c0_38, %c0_39, %c0_40, %c0_41], %33 {strides = array<i32>} : memref<1x8x8x128xf32, #tpu.memory_space<vmem>>, vector<1x8x8x128xf32>,
    return
  }
  func.func @transform_0(%arg0: i32) -> (i32, i32, i32, i32) {
    %c0_i32 = arith.constant 0 : i32
    %c0_i32_0 = arith.constant 0 : i32
    %c0_i32_1 = arith.constant 0 : i32
    %c0_i32_2 = arith.constant 0 : i32
    return %arg0, %c0_i32, %c0_i32_0, %c0_i32_1 : i32, i32, i32, i32
  }
  func.func @transform_1(%arg0: i32) -> (i32, i32, i32, i32) {
    %c0_i32 = arith.constant 0 : i32
    %c0_i32_0 = arith.constant 0 : i32
    %c0_i32_1 = arith.constant 0 : i32
    %c0_i32_2 = arith.constant 0 : i32
    %c0_i32_3 = arith.constant 0 : i32
    return %c0_i32, %c0_i32_0, %c0_i32_1, %c0_i32_2 : i32, i32, i32, i32
  }
  func.func @transform_2(%arg0: i32) -> (i32, i32) {
    %c0_i32 = arith.constant 0 : i32
    %c0_i32_0 = arith.constant 0 : i32
    %c0_i32_1 = arith.constant 0 : i32
    return %c0_i32, %c0_i32_0 : i32, i32
  }
  func.func @transform_3(%arg0: i32) -> (i32, i32, i32, i32) {
    %c0_i32 = arith.constant 0 : i32
    %c0_i32_0 = arith.constant 0 : i32
    %c0_i32_1 = arith.constant 0 : i32
    %c0_i32_2 = arith.constant 0 : i32
    return %arg0, %c0_i32, %c0_i32_0, %c0_i32_1 : i32, i32, i32, i32
  }
}

module attributes {stable_mosaic.version = 11 : i64} {
  func.func @_conv_s2d_lrelu_kernel(%arg0: i32, %arg1: memref<1x5x5x512xf32, #tpu.memory_space<vmem>>, %arg2: memref<2x2x512x256xf32, #tpu.memory_space<vmem>>, %arg3: memref<1x256xf32, #tpu.memory_space<vmem>>, %arg4: memref<1x4x4x256xf32, #tpu.memory_space<vmem>>) attributes {dimension_semantics = [#tpu.dimension_semantics<parallel>], iteration_bounds = array<i64: 2>, scalar_prefetch = 0 : i64, scratch_operands = 0 : i64, tpu.core_type = #tpu.core_type<tc>, window_params = [{transform_indices = @transform_0, window_bounds = array<i64: 1, 5, 5, 512>}, {pipeline_mode = #tpu.pipeline_mode<synchronous>, transform_indices = @transform_1, window_bounds = array<i64: 2, 2, 512, 256>}, {pipeline_mode = #tpu.pipeline_mode<synchronous>, transform_indices = @transform_2, window_bounds = array<i64: 1, 256>}, {transform_indices = @transform_3, window_bounds = array<i64: 1, 4, 4, 256>}]} {
    %cst = arith.constant 0.000000e+00 : f32
    %0 = vector.broadcast %cst : f32 to vector<16x256xf32>
    %c0 = arith.constant 0 : index
    %c0_0 = arith.constant 0 : index
    %c0_1 = arith.constant 0 : index
    %c0_2 = arith.constant 0 : index
    %1 = vector.load %arg1[%c0, %c0_0, %c0_1, %c0_2] : memref<1x5x5x512xf32, #tpu.memory_space<vmem>>, vector<1x4x4x512xf32>
    %2 = vector.shape_cast %1 : vector<1x4x4x512xf32> to vector<16x512xf32>
    %c0_3 = arith.constant 0 : index
    %c0_4 = arith.constant 0 : index
    %c0_5 = arith.constant 0 : index
    %c0_6 = arith.constant 0 : index
    %3 = vector.load %arg2[%c0_3, %c0_4, %c0_5, %c0_6] : memref<2x2x512x256xf32, #tpu.memory_space<vmem>>, vector<1x1x512x256xf32>
    %4 = vector.shape_cast %3 : vector<1x1x512x256xf32> to vector<512x256xf32>
    %cst_7 = arith.constant dense<0.000000e+00> : vector<16x256xf32>
    %5 = tpu.matmul %2, %4, %cst_7 {dimension_numbers = #tpu.dot_dimension_numbers<[1], [0], [0], [1], [0, 0, 1, 1], [], []>} : vector<16x512xf32>, vector<512x256xf32>, vector<16x256xf32> -> vector<16x256xf32>
    %6 = arith.addf %0, %5 : vector<16x256xf32>
    %c0_8 = arith.constant 0 : index
    %c0_9 = arith.constant 0 : index
    %c1 = arith.constant 1 : index
    %c0_10 = arith.constant 0 : index
    %7 = vector.load %arg1[%c0_8, %c0_9, %c1, %c0_10] : memref<1x5x5x512xf32, #tpu.memory_space<vmem>>, vector<1x4x4x512xf32>
    %8 = vector.shape_cast %7 : vector<1x4x4x512xf32> to vector<16x512xf32>
    %c0_11 = arith.constant 0 : index
    %c1_12 = arith.constant 1 : index
    %c0_13 = arith.constant 0 : index
    %c0_14 = arith.constant 0 : index
    %9 = vector.load %arg2[%c0_11, %c1_12, %c0_13, %c0_14] : memref<2x2x512x256xf32, #tpu.memory_space<vmem>>, vector<1x1x512x256xf32>
    %10 = vector.shape_cast %9 : vector<1x1x512x256xf32> to vector<512x256xf32>
    %cst_15 = arith.constant dense<0.000000e+00> : vector<16x256xf32>
    %11 = tpu.matmul %8, %10, %cst_15 {dimension_numbers = #tpu.dot_dimension_numbers<[1], [0], [0], [1], [0, 0, 1, 1], [], []>} : vector<16x512xf32>, vector<512x256xf32>, vector<16x256xf32> -> vector<16x256xf32>
    %12 = arith.addf %6, %11 : vector<16x256xf32>
    %c0_16 = arith.constant 0 : index
    %c1_17 = arith.constant 1 : index
    %c0_18 = arith.constant 0 : index
    %c0_19 = arith.constant 0 : index
    %13 = vector.load %arg1[%c0_16, %c1_17, %c0_18, %c0_19] : memref<1x5x5x512xf32, #tpu.memory_space<vmem>>, vector<1x4x4x512xf32>
    %14 = vector.shape_cast %13 : vector<1x4x4x512xf32> to vector<16x512xf32>
    %c1_20 = arith.constant 1 : index
    %c0_21 = arith.constant 0 : index
    %c0_22 = arith.constant 0 : index
    %c0_23 = arith.constant 0 : index
    %15 = vector.load %arg2[%c1_20, %c0_21, %c0_22, %c0_23] : memref<2x2x512x256xf32, #tpu.memory_space<vmem>>, vector<1x1x512x256xf32>
    %16 = vector.shape_cast %15 : vector<1x1x512x256xf32> to vector<512x256xf32>
    %cst_24 = arith.constant dense<0.000000e+00> : vector<16x256xf32>
    %17 = tpu.matmul %14, %16, %cst_24 {dimension_numbers = #tpu.dot_dimension_numbers<[1], [0], [0], [1], [0, 0, 1, 1], [], []>} : vector<16x512xf32>, vector<512x256xf32>, vector<16x256xf32> -> vector<16x256xf32>
    %18 = arith.addf %12, %17 : vector<16x256xf32>
    %c0_25 = arith.constant 0 : index
    %c1_26 = arith.constant 1 : index
    %c1_27 = arith.constant 1 : index
    %c0_28 = arith.constant 0 : index
    %19 = vector.load %arg1[%c0_25, %c1_26, %c1_27, %c0_28] : memref<1x5x5x512xf32, #tpu.memory_space<vmem>>, vector<1x4x4x512xf32>
    %20 = vector.shape_cast %19 : vector<1x4x4x512xf32> to vector<16x512xf32>
    %c1_29 = arith.constant 1 : index
    %c1_30 = arith.constant 1 : index
    %c0_31 = arith.constant 0 : index
    %c0_32 = arith.constant 0 : index
    %21 = vector.load %arg2[%c1_29, %c1_30, %c0_31, %c0_32] : memref<2x2x512x256xf32, #tpu.memory_space<vmem>>, vector<1x1x512x256xf32>
    %22 = vector.shape_cast %21 : vector<1x1x512x256xf32> to vector<512x256xf32>
    %cst_33 = arith.constant dense<0.000000e+00> : vector<16x256xf32>
    %23 = tpu.matmul %20, %22, %cst_33 {dimension_numbers = #tpu.dot_dimension_numbers<[1], [0], [0], [1], [0, 0, 1, 1], [], []>} : vector<16x512xf32>, vector<512x256xf32>, vector<16x256xf32> -> vector<16x256xf32>
    %24 = arith.addf %18, %23 : vector<16x256xf32>
    %c0_34 = arith.constant 0 : index
    %c0_35 = arith.constant 0 : index
    %25 = vector.load %arg3[%c0_34, %c0_35] : memref<1x256xf32, #tpu.memory_space<vmem>>, vector<1x256xf32>
    %26 = vector.broadcast %25 : vector<1x256xf32> to vector<16x256xf32>
    %27 = arith.addf %24, %26 : vector<16x256xf32>
    %cst_36 = arith.constant 0.000000e+00 : f32
    %28 = vector.broadcast %cst_36 : f32 to vector<16x256xf32>
    %29 = arith.cmpf oge, %27, %28 : vector<16x256xf32>
    %cst_37 = arith.constant 2.000000e-01 : f32
    %30 = vector.broadcast %cst_37 : f32 to vector<16x256xf32>
    %31 = arith.mulf %30, %27 : vector<16x256xf32>
    %32 = arith.select %29, %27, %31 : vector<16x256xi1>, vector<16x256xf32>
    %33 = vector.shape_cast %32 : vector<16x256xf32> to vector<1x4x4x256xf32>
    %c0_38 = arith.constant 0 : index
    %c0_39 = arith.constant 0 : index
    %c0_40 = arith.constant 0 : index
    %c0_41 = arith.constant 0 : index
    %34 = vector.load %arg4[%c0_38, %c0_39, %c0_40, %c0_41] : memref<1x4x4x256xf32, #tpu.memory_space<vmem>>, vector<1x4x4x256xf32>
    tpu.vector_store %arg4[%c0_38, %c0_39, %c0_40, %c0_41], %33 {strides = array<i32>} : memref<1x4x4x256xf32, #tpu.memory_space<vmem>>, vector<1x4x4x256xf32>,
    return
  }
  func.func @transform_0(%arg0: i32) -> (i32, i32, i32, i32) {
    %c0_i32 = arith.constant 0 : i32
    %c0_i32_0 = arith.constant 0 : i32
    %c0_i32_1 = arith.constant 0 : i32
    %c0_i32_2 = arith.constant 0 : i32
    return %arg0, %c0_i32, %c0_i32_0, %c0_i32_1 : i32, i32, i32, i32
  }
  func.func @transform_1(%arg0: i32) -> (i32, i32, i32, i32) {
    %c0_i32 = arith.constant 0 : i32
    %c0_i32_0 = arith.constant 0 : i32
    %c0_i32_1 = arith.constant 0 : i32
    %c0_i32_2 = arith.constant 0 : i32
    %c0_i32_3 = arith.constant 0 : i32
    return %c0_i32, %c0_i32_0, %c0_i32_1, %c0_i32_2 : i32, i32, i32, i32
  }
  func.func @transform_2(%arg0: i32) -> (i32, i32) {
    %c0_i32 = arith.constant 0 : i32
    %c0_i32_0 = arith.constant 0 : i32
    %c0_i32_1 = arith.constant 0 : i32
    return %c0_i32, %c0_i32_0 : i32, i32
  }
  func.func @transform_3(%arg0: i32) -> (i32, i32, i32, i32) {
    %c0_i32 = arith.constant 0 : i32
    %c0_i32_0 = arith.constant 0 : i32
    %c0_i32_1 = arith.constant 0 : i32
    %c0_i32_2 = arith.constant 0 : i32
    return %arg0, %c0_i32, %c0_i32_0, %c0_i32_1 : i32, i32, i32, i32
  }
}

module attributes {stable_mosaic.version = 11 : i64} {
  func.func @_heads_kernel(%arg0: i32, %arg1: memref<2x4096xf32, #tpu.memory_space<vmem>>, %arg2: memref<4096x11xf32, #tpu.memory_space<vmem>>, %arg3: memref<2x1xf32, #tpu.memory_space<vmem>>, %arg4: memref<2x10xf32, #tpu.memory_space<vmem>>) attributes {dimension_semantics = [#tpu.dimension_semantics<arbitrary>], iteration_bounds = array<i64: 1>, scalar_prefetch = 0 : i64, scratch_operands = 0 : i64, tpu.core_type = #tpu.core_type<tc>, window_params = [{pipeline_mode = #tpu.pipeline_mode<synchronous>, transform_indices = @transform_0, window_bounds = array<i64: 2, 4096>}, {pipeline_mode = #tpu.pipeline_mode<synchronous>, transform_indices = @transform_1, window_bounds = array<i64: 4096, 11>}, {pipeline_mode = #tpu.pipeline_mode<synchronous>, transform_indices = @transform_2, window_bounds = array<i64: 2, 1>}, {pipeline_mode = #tpu.pipeline_mode<synchronous>, transform_indices = @transform_3, window_bounds = array<i64: 2, 10>}]} {
    %c0 = arith.constant 0 : index
    %c0_0 = arith.constant 0 : index
    %0 = vector.load %arg1[%c0, %c0_0] : memref<2x4096xf32, #tpu.memory_space<vmem>>, vector<2x4096xf32>
    %c0_1 = arith.constant 0 : index
    %c0_2 = arith.constant 0 : index
    %1 = vector.load %arg2[%c0_1, %c0_2] : memref<4096x11xf32, #tpu.memory_space<vmem>>, vector<4096x11xf32>
    %cst = arith.constant dense<0.000000e+00> : vector<2x11xf32>
    %2 = tpu.matmul %0, %1, %cst {dimension_numbers = #tpu.dot_dimension_numbers<[1], [0], [0], [1], [0, 0, 1, 1], [], []>} : vector<2x4096xf32>, vector<4096x11xf32>, vector<2x11xf32> -> vector<2x11xf32>
    %3 = vector.extract_strided_slice %2 {offsets = [0, 0], sizes = [2, 1], strides = [1, 1]} : vector<2x11xf32> to vector<2x1xf32>
    %cst_3 = arith.constant 0.000000e+00 : f32
    %4 = vector.broadcast %cst_3 : f32 to vector<2x1xf32>
    %5 = arith.subf %4, %3 : vector<2x1xf32>
    %6 = math.exp %5 : vector<2x1xf32>
    %cst_4 = arith.constant 1.000000e+00 : f32
    %7 = vector.broadcast %cst_4 : f32 to vector<2x1xf32>
    %8 = arith.addf %7, %6 : vector<2x1xf32>
    %cst_5 = arith.constant 1.000000e+00 : f32
    %9 = vector.broadcast %cst_5 : f32 to vector<2x1xf32>
    %10 = arith.divf %9, %8 : vector<2x1xf32>
    %c0_6 = arith.constant 0 : index
    %c0_7 = arith.constant 0 : index
    %11 = vector.load %arg3[%c0_6, %c0_7] : memref<2x1xf32, #tpu.memory_space<vmem>>, vector<2x1xf32>
    tpu.vector_store %arg3[%c0_6, %c0_7], %10 {strides = array<i32>} : memref<2x1xf32, #tpu.memory_space<vmem>>, vector<2x1xf32>,
    %12 = vector.extract_strided_slice %2 {offsets = [0, 1], sizes = [2, 10], strides = [1, 1]} : vector<2x11xf32> to vector<2x10xf32>
    %c0_8 = arith.constant 0 : index
    %c0_9 = arith.constant 0 : index
    %13 = vector.load %arg4[%c0_8, %c0_9] : memref<2x10xf32, #tpu.memory_space<vmem>>, vector<2x10xf32>
    tpu.vector_store %arg4[%c0_8, %c0_9], %12 {strides = array<i32>} : memref<2x10xf32, #tpu.memory_space<vmem>>, vector<2x10xf32>,
    return
  }
  func.func @transform_0(%arg0: i32) -> (i32, i32) {
    %c0_i32 = arith.constant 0 : i32
    %c0_i32_0 = arith.constant 0 : i32
    %c0_i32_1 = arith.constant 0 : i32
    return %c0_i32, %c0_i32_0 : i32, i32
  }
  func.func @transform_1(%arg0: i32) -> (i32, i32) {
    %c0_i32 = arith.constant 0 : i32
    %c0_i32_0 = arith.constant 0 : i32
    %c0_i32_1 = arith.constant 0 : i32
    return %c0_i32, %c0_i32_0 : i32, i32
  }
  func.func @transform_2(%arg0: i32) -> (i32, i32) {
    %c0_i32 = arith.constant 0 : i32
    %c0_i32_0 = arith.constant 0 : i32
    %c0_i32_1 = arith.constant 0 : i32
    return %c0_i32, %c0_i32_0 : i32, i32
  }
  func.func @transform_3(%arg0: i32) -> (i32, i32) {
    %c0_i32 = arith.constant 0 : i32
    %c0_i32_0 = arith.constant 0 : i32
    %c0_i32_1 = arith.constant 0 : i32
    return %c0_i32, %c0_i32_0 : i32, i32
  }
}

</mosaic_0001>

<bundles_post_ra>
// kernel: accnn_discriminator_forward.4
= control target key start
LH: loop header
LB: loop body
LE: loop exit
PB: predicated region body
PF: predicated region fallthrough
CT: control target
= control target key end

     0   :  { %s1672_s12 = smov 0   ;;  %s2006_s0 = inlined_call_operand.vmem [shape: f32[2,17,17,8], index: 0, kind: input, shape index: {}]   ;;  %s2007_s1 = inlined_call_operand.vmem [shape: f32[2,2,8,64], index: 1, kind: input, shape index: {}]   ;;  %s2008_s2 = inlined_call_operand.vmem [shape: f32[1,64], index: 2, kind: input, shape index: {}]   ;;  %s2009_s3 = inlined_call_operand.vmem [shape: f32[2,16,16,64], index: 3, kind: output, shape index: {}]  }
   0x1 LB: > { %s1428_s13 = sadd.s32 4294967295, %s1650_s12   ;;  %p1432_p0 = scmp.ge.s32.totalorder %s1650_s12, 1  ;;  %s1650_s12 = sphi %s1672_s12, %s13_s12  }
   0x2   : > { %p137_p1 = scmp.lt.s32.totalorder %s1650_s12, 3 }
   0x4   : > { %p138_p2 = pnand %p1432_p0, %p137_p1 }
   0x5   : > { %p161_p3 = scmp.lt.s32.totalorder (!%p138_p2), %s1428_s13, 1 }
   0x6   : > { %141 = sbr.rel (%p138_p2) target bundleno = 406 (0x196), region = 32 }
   0xb   : > { %v1533_v0 = vld [vmem:[%s2007_s1 + $0x10] sm:$0xff]  ;;  %v1598_v1 = vld [vmem:[%s2007_s1 + $0x18] sm:$0xff]  ;;  %v1436_v2 = vld [vmem:[%s2007_s1 + $0x8] sm:$0xff]  ;;  %s2011_s13 = smov (!%p161_p3, %s1428_s13), 1  ;;  %vm238_vm0 = vcmask 64512   ;;  %vm1340_vm2 = vcmask 523264  }
   0xc   : > { %803 = vmatpush.msra.mxu2 %v1533_v0  ;;  %1078 = vmatpush.msra.mxu3 %v1598_v1  ;;  %v203_v3 = vld [vmem:[%s2007_s1] sm:$0xff]  ;;  %s1634_s22 = smul.u32 408, %s2011_s13  ;;  %s1633_s28 = sshll.u32 %s2011_s13, 8 }
   0xd   : > { %350 = vmatpush.msra.mxu0 %v1436_v2  ;;  %559 = vmatpush.msra.mxu1 %v203_v3  ;;  %v1809_v48 = vld [vmem:[%s2008_s2] ss:$0 sm:$0xff]  ;;  %s1822_s4 = scalar_lea.vmem %s2009_s3, %s1633_s28 }
   0xe   : > { %s1698_s25 = scalar_lea.vmem %s2006_s0, %s1634_s22 }
   0xf   : > { %v1501_v4 = vld [vmem:[%s1698_s25 + $0x18] sm:$0xff]  ;;  %v204_v6 = vld [vmem:[%s1698_s25 + $0x1] sm:$0xff]  ;;  %v205_v10 = vld [vmem:[%s1698_s25 + $0x9] sm:$0xff] }
  0x10   : > { %v1566_v5 = vld [vmem:[%s1698_s25 + $0x19] sm:$0xff]  ;;  %1534 = vmatmul.msk.f32.vlgmr.msra.gmra.mxu2 %vm238_vm0, %v1501_v4  ;;  %1437 = vmatmul.msk.f32.vlgmr.msra.gmra.mxu0 %vm238_vm0, %v204_v6  ;;  %v1567_v9 = vld [vmem:[%s1698_s25 + $0x21] sm:$0xff]  ;;  %v1503_v12 = vld [vmem:[%s1698_s25 + $0x30] sm:$0xff] }
  0x11   : > { %1599 = vmatmul.msk.f32.vlgmr.msra.gmra.mxu3 %vm238_vm0, %v1566_v5  ;;  %v171_v7 = vld [vmem:[%s1698_s25] sm:$0xff]  ;;  %v172_v11 = vld [vmem:[%s1698_s25 + $0x8] sm:$0xff]  ;;  %v1568_v13 = vld [vmem:[%s1698_s25 + $0x31] sm:$0xff] }
  0x12   : > { %1469 = vmatmul.msk.f32.vlgmr.msra.gmra.mxu1 %vm238_vm0, %v171_v7  ;;  %v1502_v8 = vld [vmem:[%s1698_s25 + $0x20] sm:$0xff]  ;;  %v1504_v14 = vld [vmem:[%s1698_s25 + $0x38] sm:$0xff]  ;;  %v1505_v16 = vld [vmem:[%s1698_s25 + $0x48] sm:$0xff] }
  0x13   : > { %v1569_v15 = vld [vmem:[%s1698_s25 + $0x39] sm:$0xff]  ;;  %v1570_v17 = vld [vmem:[%s1698_s25 + $0x49] sm:$0xff]  ;;  %v1571_v19 = vld [vmem:[%s1698_s25 + $0x51] sm:$0xff] }
  0x14   : > { %v1506_v18 = vld [vmem:[%s1698_s25 + $0x50] sm:$0xff]  ;;  %v1507_v20 = vld [vmem:[%s1698_s25 + $0x60] sm:$0xff]  ;;  %v1508_v22 = vld [vmem:[%s1698_s25 + $0x68] sm:$0xff] }
  0x15   : > { %v1572_v21 = vld [vmem:[%s1698_s25 + $0x61] sm:$0xff]  ;;  %v1573_v23 = vld [vmem:[%s1698_s25 + $0x69] sm:$0xff]  ;;  %v1509_v24 = vld [vmem:[%s1698_s25 + $0x78] sm:$0xff] }
  0x16   : > { %v1574_v25 = vld [vmem:[%s1698_s25 + $0x79] sm:$0xff]  ;;  %v1575_v27 = vld [vmem:[%s1698_s25 + $0x81] sm:$0xff]  ;;  %v1511_v28 = vld [vmem:[%s1698_s25 + $0x90] sm:$0xff] }
  0x17   : > { %v1510_v26 = vld [vmem:[%s1698_s25 + $0x80] sm:$0xff]  ;;  %v1576_v29 = vld [vmem:[%s1698_s25 + $0x91] sm:$0xff]  ;;  %v1513_v32 = vld [vmem:[%s1698_s25 + $0xa8] sm:$0xff] }
  0x18   : > { %1535 = vmatmul.msk.f32.gmra.mxu2 %vm238_vm0, %v1502_v8  ;;  %1438 = vmatmul.msk.f32.gmra.mxu0 %vm238_vm0, %v205_v10  ;;  %v1512_v30 = vld [vmem:[%s1698_s25 + $0x98] sm:$0xff]  ;;  %v1578_v33 = vld [vmem:[%s1698_s25 + $0xa9] sm:$0xff]  ;;  %v1515_v36 = vld [vmem:[%s1698_s25 + $0xc0] sm:$0xff] }
  0x19   : > { %1600 = vmatmul.msk.f32.gmra.mxu3 %vm238_vm0, %v1567_v9  ;;  %v1577_v31 = vld [vmem:[%s1698_s25 + $0x99] sm:$0xff]  ;;  %v1514_v34 = vld [vmem:[%s1698_s25 + $0xb0] sm:$0xff]  ;;  %v1580_v37 = vld [vmem:[%s1698_s25 + $0xc1] sm:$0xff] }
  0x1a   : > { %1470 = vmatmul.msk.f32.gmra.mxu1 %vm238_vm0, %v172_v11  ;;  %v1579_v35 = vld [vmem:[%s1698_s25 + $0xb1] sm:$0xff]  ;;  %v1516_v38 = vld [vmem:[%s1698_s25 + $0xc8] sm:$0xff]  ;;  %v1582_v41 = vld [vmem:[%s1698_s25 + $0xd9] sm:$0xff] }
  0x1b   : > { %v1581_v39 = vld [vmem:[%s1698_s25 + $0xc9] sm:$0xff]  ;;  %v1517_v40 = vld [vmem:[%s1698_s25 + $0xd8] sm:$0xff]  ;;  %v1518_v49 = vld [vmem:[%s1698_s25 + $0xe0] sm:$0xff] }
  0x1c   : > { %v1583_v50 = vld [vmem:[%s1698_s25 + $0xe1] sm:$0xff]  ;;  %v1519_v61 = vld [vmem:[%s1698_s25 + $0xf0] sm:$0xff]  ;;  %v1585_v10 = vld [vmem:[%s1698_s25 + $0xf9] sm:$0xff] }
  0x1d   : > { %v1584_v62 = vld [vmem:[%s1698_s25 + $0xf1] sm:$0xff] }
  0x20   : > { %1536 = vmatmul.msk.f32.gmra.mxu2 %vm238_vm0, %v1503_v12  ;;  %1439 = vmatmul.msk.f32.gmra.mxu0 %vm238_vm0, %v1566_v5 }
  0x21   : > { %1601 = vmatmul.msk.f32.gmra.mxu3 %vm238_vm0, %v1568_v13 }
  0x22   : > { %1471 = vmatmul.msk.f32.gmra.mxu1 %vm238_vm0, %v1501_v4 }
  0x28   : > { %1537 = vmatmul.msk.f32.gmra.mxu2 %vm238_vm0, %v1504_v14  ;;  %1440 = vmatmul.msk.f32.gmra.mxu0 %vm238_vm0, %v1567_v9  ;;  %v1520_v9 = vld [vmem:[%s1698_s25 + $0xf8] sm:$0xff] }
  0x29   : > { %1602 = vmatmul.msk.f32.gmra.mxu3 %vm238_vm0, %v1569_v15 }
  0x2a   : > { %1472 = vmatmul.msk.f32.gmra.mxu1 %vm238_vm0, %v1502_v8 }
  0x30   : > { %1538 = vmatmul.msk.f32.gmra.mxu2 %vm238_vm0, %v1505_v16  ;;  %1441 = vmatmul.msk.f32.gmra.mxu0 %vm238_vm0, %v1568_v13 }
  0x31   : > { %1603 = vmatmul.msk.f32.gmra.mxu3 %vm238_vm0, %v1570_v17 }
  0x32   : > { %1473 = vmatmul.msk.f32.gmra.mxu1 %vm238_vm0, %v1503_v12 }
  0x38   : > { %1539 = vmatmul.msk.f32.gmra.mxu2 %vm238_vm0, %v1506_v18  ;;  %1442 = vmatmul.msk.f32.gmra.mxu0 %vm238_vm0, %v1569_v15 }
  0x39   : > { %1604 = vmatmul.msk.f32.gmra.mxu3 %vm238_vm0, %v1571_v19 }
  0x3a   : > { %1474 = vmatmul.msk.f32.gmra.mxu1 %vm238_vm0, %v1504_v14 }
  0x40   : > { %1540 = vmatmul.msk.f32.gmra.mxu2 %vm238_vm0, %v1507_v20  ;;  %1443 = vmatmul.msk.f32.gmra.mxu0 %vm238_vm0, %v1570_v17 }
  0x41   : > { %1605 = vmatmul.msk.f32.gmra.mxu3 %vm238_vm0, %v1572_v21 }
  0x42   : > { %1475 = vmatmul.msk.f32.gmra.mxu1 %vm238_vm0, %v1505_v16 }
  0x48   : > { %1541 = vmatmul.msk.f32.gmra.mxu2 %vm238_vm0, %v1508_v22  ;;  %1444 = vmatmul.msk.f32.gmra.mxu0 %vm238_vm0, %v1571_v19 }
  0x49   : > { %1606 = vmatmul.msk.f32.gmra.mxu3 %vm238_vm0, %v1573_v23 }
  0x4a   : > { %1476 = vmatmul.msk.f32.gmra.mxu1 %vm238_vm0, %v1506_v18 }
  0x50   : > { %1542 = vmatmul.msk.f32.gmra.mxu2 %vm238_vm0, %v1509_v24  ;;  %1445 = vmatmul.msk.f32.gmra.mxu0 %vm238_vm0, %v1572_v21  ;;  %v1521_v21 = vld [vmem:[%s1698_s25 + $0x108] sm:$0xff] }
  0x51   : > { %1607 = vmatmul.msk.f32.gmra.mxu3 %vm238_vm0, %v1574_v25 }
  0x52   : > { %1477 = vmatmul.msk.f32.gmra.mxu1 %vm238_vm0, %v1507_v20 }
  0x58   : > { %1543 = vmatmul.msk.f32.gmra.mxu2 %vm238_vm0, %v1510_v26  ;;  %1446 = vmatmul.msk.f32.gmra.mxu0 %vm238_vm0, %v1573_v23 }
  0x59   : > { %1608 = vmatmul.msk.f32.gmra.mxu3 %vm238_vm0, %v1575_v27 }
  0x5a   : > { %1478 = vmatmul.msk.f32.gmra.mxu1 %vm238_vm0, %v1508_v22  ;;  %v1586_v22 = vld [vmem:[%s1698_s25 + $0x109] sm:$0xff] }
  0x60   : > { %1544 = vmatmul.msk.f32.gmra.mxu2 %vm238_vm0, %v1511_v28  ;;  %1447 = vmatmul.msk.f32.gmra.mxu0 %vm238_vm0, %v1574_v25 }
  0x61   : > { %1609 = vmatmul.msk.f32.gmra.mxu3 %vm238_vm0, %v1576_v29 }
  0x62   : > { %1479 = vmatmul.msk.f32.gmra.mxu1 %vm238_vm0, %v1509_v24 }
  0x68   : > { %1545 = vmatmul.msk.f32.gmra.mxu2 %vm238_vm0, %v1512_v30  ;;  %1448 = vmatmul.msk.f32.gmra.mxu0 %vm238_vm0, %v1575_v27 }
  0x69   : > { %1610 = vmatmul.msk.f32.gmra.mxu3 %vm238_vm0, %v1577_v31 }
  0x6a   : > { %1480 = vmatmul.msk.f32.gmra.mxu1 %vm238_vm0, %v1510_v26 }
  0x70   : > { %1546 = vmatmul.msk.f32.gmra.mxu2 %vm238_vm0, %v1513_v32  ;;  %1449 = vmatmul.msk.f32.gmra.mxu0 %vm238_vm0, %v1576_v29 }
  0x71   : > { %1611 = vmatmul.msk.f32.gmra.mxu3 %vm238_vm0, %v1578_v33 }
  0x72   : > { %1481 = vmatmul.msk.f32.gmra.mxu1 %vm238_vm0, %v1511_v28 }
  0x78   : > { %1547 = vmatmul.msk.f32.gmra.mxu2 %vm238_vm0, %v1514_v34  ;;  %1450 = vmatmul.msk.f32.gmra.mxu0 %vm238_vm0, %v1577_v31 }
  0x79   : > { %1612 = vmatmul.msk.f32.gmra.mxu3 %vm238_vm0, %v1579_v35 }
  0x7a   : > { %1482 = vmatmul.msk.f32.gmra.mxu1 %vm238_vm0, %v1512_v30 }
  0x80   : > { %1548 = vmatmul.msk.f32.gmra.mxu2 %vm238_vm0, %v1515_v36  ;;  %1451 = vmatmul.msk.f32.gmra.mxu0 %vm238_vm0, %v1578_v33  ;;  %v1522_v33 = vld [vmem:[%s1698_s25 + $0x110] sm:$0xff] }
  0x81   : > { %1613 = vmatmul.msk.f32.gmra.mxu3 %vm238_vm0, %v1580_v37 }
  0x82   : > { %1483 = vmatmul.msk.f32.gmra.mxu1 %vm238_vm0, %v1513_v32 }
  0x88   : > { %1549 = vmatmul.msk.f32.gmra.mxu2 %vm238_vm0, %v1516_v38  ;;  %1452 = vmatmul.msk.f32.gmra.mxu0 %vm238_vm0, %v1579_v35 }
  0x89   : > { %1614 = vmatmul.msk.f32.gmra.mxu3 %vm238_vm0, %v1581_v39 }
  0x8a   : > { %1484 = vmatmul.msk.f32.gmra.mxu1 %vm238_vm0, %v1514_v34  ;;  %v1587_v34 = vld [vmem:[%s1698_s25 + $0x111] sm:$0xff] }
  0x8d   : > { %v352_v42 = vpop.f32.mrf.mxu0 }
  0x8f   : > { %v561_v43 = vpop.f32.mrf.mxu1 }
  0x90   : > { %1550 = vmatmul.msk.f32.gmra.mxu2 %vm238_vm0, %v1517_v40  ;;  %v562_v44 = vadd.f32 %v561_v43, %v352_v42  ;;  %1453 = vmatmul.msk.f32.gmra.mxu0 %vm238_vm0, %v1580_v37 }
  0x91   : > { %1615 = vmatmul.msk.f32.gmra.mxu3 %vm238_vm0, %v1582_v41 }
  0x92   : > { %1485 = vmatmul.msk.f32.gmra.mxu1 %vm238_vm0, %v1515_v36 }
  0x93   : > { %v805_v45 = vpop.f32.mrf.mxu2 }
  0x94   : > { %v1080_v46 = vpop.f32.mrf.mxu3  ;;  %v901_v47 = vadd.f32 %v805_v45, %v562_v44  ;;  %v1523_v45 = vld [vmem:[%s1698_s25 + $0x120] sm:$0xff] }
  0x95   : > { %v355_v52 = vpop.f32.mrf.mxu0 }
  0x96   : > { %v1176_v51 = vadd.f32 %v1080_v46, %v901_v47  ;;  %v1588_v46 = vld [vmem:[%s1698_s25 + $0x121] sm:$0xff] }
  0x97   : > { %v564_v53 = vpop.f32.mrf.mxu1 }
  0x98   : > { %v1212_v54 = vadd.f32 %v1809_v48, %v1176_v51  ;;  %1551 = vmatmul.msk.f32.gmra.mxu2 %vm238_vm0, %v1518_v49  ;;  %v565_v55 = vadd.f32 %v564_v53, %v355_v52  ;;  %1454 = vmatmul.msk.f32.gmra.mxu0 %vm238_vm0, %v1581_v39 }
  0x99   : > { %1616 = vmatmul.msk.f32.gmra.mxu3 %vm238_vm0, %v1583_v50 }
  0x9a   : > { %1486 = vmatmul.msk.f32.gmra.mxu1 %vm238_vm0, %v1516_v38  ;;  %vm1244_vm1 = vcmp.ge.f32.partialorder %v1212_v54, 0.0  ;;  %v1276_v56 = vmul.f32 0.2, %v1212_v54 }
  0x9b   : > { %v808_v57 = vpop.f32.mrf.mxu2 }
  0x9c   : > { %v1083_v58 = vpop.f32.mrf.mxu3  ;;  %v1308_v59 = vsel %vm1244_vm1, %v1212_v54, %v1276_v56  ;;  %v902_v60 = vadd.f32 %v808_v57, %v565_v55 }
  0x9d   : > { %1341 = vst.msk [vmem:[%s1822_s4] sm:$0xff] %vm1340_vm2, %v1308_v59  ;;  %v358_v0 = vpop.f32.mrf.mxu0  ;;  %v1589_v59 = vld [vmem:[%s1698_s25 + $0x129] sm:$0xff] }
  0x9e   : > { %v1177_v63 = vadd.f32 %v1083_v58, %v902_v60  ;;  %v1524_v58 = vld [vmem:[%s1698_s25 + $0x128] sm:$0xff] }
  0x9f   : > { %v567_v1 = vpop.f32.mrf.mxu1 }
  0xa0   : > { %v1213_v2 = vadd.f32 %v1809_v48, %v1177_v63  ;;  %1552 = vmatmul.msk.f32.gmra.mxu2 %vm238_vm0, %v1519_v61  ;;  %v568_v3 = vadd.f32 %v567_v1, %v358_v0  ;;  %1455 = vmatmul.msk.f32.gmra.mxu0 %vm238_vm0, %v1582_v41 }
  0xa1   : > { %1617 = vmatmul.msk.f32.gmra.mxu3 %vm238_vm0, %v1584_v62 }
  0xa2   : > { %1487 = vmatmul.msk.f32.gmra.mxu1 %vm238_vm0, %v1517_v40  ;;  %vm1245_vm3 = vcmp.ge.f32.partialorder %v1213_v2, 0.0  ;;  %v1277_v4 = vmul.f32 0.2, %v1213_v2 }
  0xa3   : > { %v811_v5 = vpop.f32.mrf.mxu2 }
  0xa4   : > { %v1086_v6 = vpop.f32.mrf.mxu3  ;;  %v1309_v7 = vsel %vm1245_vm3, %v1213_v2, %v1277_v4  ;;  %v903_v8 = vadd.f32 %v811_v5, %v568_v3 }
  0xa5   : > { %1342 = vst.msk [vmem:[%s1822_s4 + $0x8] sm:$0xff] %vm1340_vm2, %v1309_v7  ;;  %v361_v12 = vpop.f32.mrf.mxu0  ;;  %v1590_v7 = vld [vmem:[%s1698_s25 + $0x139] sm:$0xff] }
  0xa6   : > { %v1178_v11 = vadd.f32 %v1086_v6, %v903_v8  ;;  %v1525_v6 = vld [vmem:[%s1698_s25 + $0x138] sm:$0xff] }
  0xa7   : > { %v570_v13 = vpop.f32.mrf.mxu1 }
  0xa8   : > { %v1214_v14 = vadd.f32 %v1809_v48, %v1178_v11  ;;  %1553 = vmatmul.msk.f32.gmra.mxu2 %vm238_vm0, %v1520_v9  ;;  %v571_v15 = vadd.f32 %v570_v13, %v361_v12  ;;  %1456 = vmatmul.msk.f32.gmra.mxu0 %vm238_vm0, %v1583_v50 }
  0xa9   : > { %1618 = vmatmul.msk.f32.gmra.mxu3 %vm238_vm0, %v1585_v10 }
  0xaa   : > { %1488 = vmatmul.msk.f32.gmra.mxu1 %vm238_vm0, %v1518_v49  ;;  %vm1246_vm4 = vcmp.ge.f32.partialorder %v1214_v14, 0.0  ;;  %v1278_v16 = vmul.f32 0.2, %v1214_v14 }
  0xab   : > { %v814_v17 = vpop.f32.mrf.mxu2 }
  0xac   : > { %v1089_v18 = vpop.f32.mrf.mxu3  ;;  %v1310_v19 = vsel %vm1246_vm4, %v1214_v14, %v1278_v16  ;;  %v904_v20 = vadd.f32 %v814_v17, %v571_v15 }
  0xad   : > { %1343 = vst.msk [vmem:[%s1822_s4 + $0x10] sm:$0xff] %vm1340_vm2, %v1310_v19  ;;  %v364_v24 = vpop.f32.mrf.mxu0  ;;  %v1591_v19 = vld [vmem:[%s1698_s25 + $0x141] sm:$0xff] }
  0xae   : > { %v1179_v23 = vadd.f32 %v1089_v18, %v904_v20  ;;  %v1526_v18 = vld [vmem:[%s1698_s25 + $0x140] sm:$0xff] }
  0xaf   : > { %v573_v25 = vpop.f32.mrf.mxu1 }
  0xb0   : > { %v1215_v26 = vadd.f32 %v1809_v48, %v1179_v23  ;;  %1554 = vmatmul.msk.f32.gmra.mxu2 %vm238_vm0, %v1521_v21  ;;  %v574_v27 = vadd.f32 %v573_v25, %v364_v24  ;;  %1457 = vmatmul.msk.f32.gmra.mxu0 %vm238_vm0, %v1584_v62 }
  0xb1   : > { %1619 = vmatmul.msk.f32.gmra.mxu3 %vm238_vm0, %v1586_v22 }
  0xb2   : > { %1489 = vmatmul.msk.f32.gmra.mxu1 %vm238_vm0, %v1519_v61  ;;  %vm1247_vm5 = vcmp.ge.f32.partialorder %v1215_v26, 0.0  ;;  %v1279_v28 = vmul.f32 0.2, %v1215_v26 }
  0xb3   : > { %v817_v29 = vpop.f32.mrf.mxu2 }
  0xb4   : > { %v1092_v30 = vpop.f32.mrf.mxu3  ;;  %v1311_v31 = vsel %vm1247_vm5, %v1215_v26, %v1279_v28  ;;  %v905_v32 = vadd.f32 %v817_v29, %v574_v27 }
  0xb5   : > { %1344 = vst.msk [vmem:[%s1822_s4 + $0x18] sm:$0xff] %vm1340_vm2, %v1311_v31  ;;  %v367_v36 = vpop.f32.mrf.mxu0  ;;  %v1592_v31 = vld [vmem:[%s1698_s25 + $0x151] sm:$0xff] }
  0xb6   : > { %v1180_v35 = vadd.f32 %v1092_v30, %v905_v32  ;;  %v1527_v30 = vld [vmem:[%s1698_s25 + $0x150] sm:$0xff] }
  0xb7   : > { %v576_v37 = vpop.f32.mrf.mxu1 }
  0xb8   : > { %v1216_v38 = vadd.f32 %v1809_v48, %v1180_v35  ;;  %1555 = vmatmul.msk.f32.gmra.mxu2 %vm238_vm0, %v1522_v33  ;;  %v577_v39 = vadd.f32 %v576_v37, %v367_v36  ;;  %1458 = vmatmul.msk.f32.gmra.mxu0 %vm238_vm0, %v1585_v10 }
  0xb9   : > { %1620 = vmatmul.msk.f32.gmra.mxu3 %vm238_vm0, %v1587_v34 }
  0xba   : > { %1490 = vmatmul.msk.f32.gmra.mxu1 %vm238_vm0, %v1520_v9  ;;  %vm1248_vm6 = vcmp.ge.f32.partialorder %v1216_v38, 0.0  ;;  %v1280_v40 = vmul.f32 0.2, %v1216_v38 }
  0xbb   : > { %v820_v41 = vpop.f32.mrf.mxu2 }
  0xbc   : > { %v1095_v42 = vpop.f32.mrf.mxu3  ;;  %v1312_v43 = vsel %vm1248_vm6, %v1216_v38, %v1280_v40  ;;  %v906_v44 = vadd.f32 %v820_v41, %v577_v39 }
  0xbd   : > { %1345 = vst.msk [vmem:[%s1822_s4 + $0x20] sm:$0xff] %vm1340_vm2, %v1312_v43  ;;  %v370_v49 = vpop.f32.mrf.mxu0  ;;  %v1593_v43 = vld [vmem:[%s1698_s25 + $0x159] sm:$0xff] }
  0xbe   : > { %v1181_v47 = vadd.f32 %v1095_v42, %v906_v44  ;;  %v1528_v42 = vld [vmem:[%s1698_s25 + $0x158] sm:$0xff] }
  0xbf   : > { %v579_v50 = vpop.f32.mrf.mxu1 }
  0xc0   : > { %v1217_v51 = vadd.f32 %v1809_v48, %v1181_v47  ;;  %1556 = vmatmul.msk.f32.gmra.mxu2 %vm238_vm0, %v1523_v45  ;;  %v580_v52 = vadd.f32 %v579_v50, %v370_v49  ;;  %1459 = vmatmul.msk.f32.gmra.mxu0 %vm238_vm0, %v1586_v22 }
  0xc1   : > { %1621 = vmatmul.msk.f32.gmra.mxu3 %vm238_vm0, %v1588_v46 }
  0xc2   : > { %1491 = vmatmul.msk.f32.gmra.mxu1 %vm238_vm0, %v1521_v21  ;;  %vm1249_vm7 = vcmp.ge.f32.partialorder %v1217_v51, 0.0  ;;  %v1281_v53 = vmul.f32 0.2, %v1217_v51 }
  0xc3   : > { %v823_v54 = vpop.f32.mrf.mxu2 }
  0xc4   : > { %v1098_v55 = vpop.f32.mrf.mxu3  ;;  %v1313_v56 = vsel %vm1249_vm7, %v1217_v51, %v1281_v53  ;;  %v907_v57 = vadd.f32 %v823_v54, %v580_v52 }
  0xc5   : > { %1346 = vst.msk [vmem:[%s1822_s4 + $0x28] sm:$0xff] %vm1340_vm2, %v1313_v56  ;;  %v373_v61 = vpop.f32.mrf.mxu0  ;;  %v1594_v56 = vld [vmem:[%s1698_s25 + $0x169] sm:$0xff] }
  0xc6   : > { %v1182_v60 = vadd.f32 %v1098_v55, %v907_v57  ;;  %v1529_v55 = vld [vmem:[%s1698_s25 + $0x168] sm:$0xff] }
  0xc7   : > { %v582_v62 = vpop.f32.mrf.mxu1 }
  0xc8   : > { %v1218_v63 = vadd.f32 %v1809_v48, %v1182_v60  ;;  %1557 = vmatmul.msk.f32.gmra.mxu2 %vm238_vm0, %v1524_v58  ;;  %v583_v0 = vadd.f32 %v582_v62, %v373_v61  ;;  %1460 = vmatmul.msk.f32.gmra.mxu0 %vm238_vm0, %v1587_v34 }
  0xc9   : > { %1622 = vmatmul.msk.f32.gmra.mxu3 %vm238_vm0, %v1589_v59 }
  0xca   : > { %1492 = vmatmul.msk.f32.gmra.mxu1 %vm238_vm0, %v1522_v33  ;;  %vm1250_vm8 = vcmp.ge.f32.partialorder %v1218_v63, 0.0  ;;  %v1282_v1 = vmul.f32 0.2, %v1218_v63 }
  0xcb   : > { %v826_v2 = vpop.f32.mrf.mxu2 }
  0xcc   : > { %v1101_v3 = vpop.f32.mrf.mxu3  ;;  %v1314_v4 = vsel %vm1250_vm8, %v1218_v63, %v1282_v1  ;;  %v908_v5 = vadd.f32 %v826_v2, %v583_v0 }
  0xcd   : > { %1347 = vst.msk [vmem:[%s1822_s4 + $0x30] sm:$0xff] %vm1340_vm2, %v1314_v4  ;;  %v376_v9 = vpop.f32.mrf.mxu0  ;;  %v1595_v4 = vld [vmem:[%s1698_s25 + $0x171] sm:$0xff] }
  0xce   : > { %v1183_v8 = vadd.f32 %v1101_v3, %v908_v5  ;;  %v1530_v3 = vld [vmem:[%s1698_s25 + $0x170] sm:$0xff] }
  0xcf   : > { %v585_v10 = vpop.f32.mrf.mxu1 }
  0xd0   : > { %v1219_v11 = vadd.f32 %v1809_v48, %v1183_v8  ;;  %1558 = vmatmul.msk.f32.gmra.mxu2 %vm238_vm0, %v1525_v6  ;;  %v586_v12 = vadd.f32 %v585_v10, %v376_v9  ;;  %1461 = vmatmul.msk.f32.gmra.mxu0 %vm238_vm0, %v1588_v46 }
  0xd1   : > { %1623 = vmatmul.msk.f32.gmra.mxu3 %vm238_vm0, %v1590_v7 }
  0xd2   : > { %1493 = vmatmul.msk.f32.gmra.mxu1 %vm238_vm0, %v1523_v45  ;;  %vm1251_vm9 = vcmp.ge.f32.partialorder %v1219_v11, 0.0  ;;  %v1283_v13 = vmul.f32 0.2, %v1219_v11 }
  0xd3   : > { %v829_v14 = vpop.f32.mrf.mxu2 }
  0xd4   : > { %v1104_v15 = vpop.f32.mrf.mxu3  ;;  %v1315_v16 = vsel %vm1251_vm9, %v1219_v11, %v1283_v13  ;;  %v909_v17 = vadd.f32 %v829_v14, %v586_v12 }
  0xd5   : > { %1348 = vst.msk [vmem:[%s1822_s4 + $0x38] sm:$0xff] %vm1340_vm2, %v1315_v16  ;;  %v379_v21 = vpop.f32.mrf.mxu0  ;;  %v1596_v16 = vld [vmem:[%s1698_s25 + $0x181] sm:$0xff] }
  0xd6   : > { %v1184_v20 = vadd.f32 %v1104_v15, %v909_v17  ;;  %v1531_v15 = vld [vmem:[%s1698_s25 + $0x180] sm:$0xff] }
  0xd7   : > { %v588_v22 = vpop.f32.mrf.mxu1 }
  0xd8   : > { %v1220_v23 = vadd.f32 %v1809_v48, %v1184_v20  ;;  %1559 = vmatmul.msk.f32.gmra.mxu2 %vm238_vm0, %v1526_v18  ;;  %v589_v24 = vadd.f32 %v588_v22, %v379_v21  ;;  %1462 = vmatmul.msk.f32.gmra.mxu0 %vm238_vm0, %v1589_v59 }
  0xd9   : > { %1624 = vmatmul.msk.f32.gmra.mxu3 %vm238_vm0, %v1591_v19 }
  0xda   : > { %1494 = vmatmul.msk.f32.gmra.mxu1 %vm238_vm0, %v1524_v58  ;;  %vm1252_vm10 = vcmp.ge.f32.partialorder %v1220_v23, 0.0  ;;  %v1284_v25 = vmul.f32 0.2, %v1220_v23 }
  0xdb   : > { %v832_v26 = vpop.f32.mrf.mxu2 }
  0xdc   : > { %v1107_v27 = vpop.f32.mrf.mxu3  ;;  %v1316_v28 = vsel %vm1252_vm10, %v1220_v23, %v1284_v25  ;;  %v910_v29 = vadd.f32 %v832_v26, %v589_v24 }
  0xdd   : > { %1349 = vst.msk [vmem:[%s1822_s4 + $0x40] sm:$0xff] %vm1340_vm2, %v1316_v28  ;;  %v382_v33 = vpop.f32.mrf.mxu0  ;;  %v1597_v28 = vld [vmem:[%s1698_s25 + $0x189] sm:$0xff] }
  0xde   : > { %v1185_v32 = vadd.f32 %v1107_v27, %v910_v29  ;;  %v1532_v27 = vld [vmem:[%s1698_s25 + $0x188] sm:$0xff] }
  0xdf   : > { %v591_v34 = vpop.f32.mrf.mxu1 }
  0xe0   : > { %v1221_v35 = vadd.f32 %v1809_v48, %v1185_v32  ;;  %1560 = vmatmul.msk.f32.gmra.mxu2 %vm238_vm0, %v1527_v30  ;;  %v592_v36 = vadd.f32 %v591_v34, %v382_v33  ;;  %1463 = vmatmul.msk.f32.gmra.mxu0 %vm238_vm0, %v1590_v7 }
  0xe1   : > { %1625 = vmatmul.msk.f32.gmra.mxu3 %vm238_vm0, %v1592_v31 }
  0xe2   : > { %1495 = vmatmul.msk.f32.gmra.mxu1 %vm238_vm0, %v1525_v6  ;;  %vm1253_vm11 = vcmp.ge.f32.partialorder %v1221_v35, 0.0  ;;  %v1285_v37 = vmul.f32 0.2, %v1221_v35 }
  0xe3   : > { %v835_v38 = vpop.f32.mrf.mxu2 }
  0xe4   : > { %v1110_v39 = vpop.f32.mrf.mxu3  ;;  %v1317_v40 = vsel %vm1253_vm11, %v1221_v35, %v1285_v37  ;;  %v911_v41 = vadd.f32 %v835_v38, %v592_v36 }
  0xe5   : > { %1350 = vst.msk [vmem:[%s1822_s4 + $0x48] sm:$0xff] %vm1340_vm2, %v1317_v40  ;;  %v385_v45 = vpop.f32.mrf.mxu0 }
  0xe6   : > { %v1186_v44 = vadd.f32 %v1110_v39, %v911_v41 }
  0xe7   : > { %v594_v46 = vpop.f32.mrf.mxu1 }
  0xe8   : > { %v1222_v47 = vadd.f32 %v1809_v48, %v1186_v44  ;;  %1561 = vmatmul.msk.f32.gmra.mxu2 %vm238_vm0, %v1528_v42  ;;  %v595_v49 = vadd.f32 %v594_v46, %v385_v45  ;;  %1464 = vmatmul.msk.f32.gmra.mxu0 %vm238_vm0, %v1591_v19 }
  0xe9   : > { %1626 = vmatmul.msk.f32.gmra.mxu3 %vm238_vm0, %v1593_v43 }
  0xea   : > { %1496 = vmatmul.msk.f32.gmra.mxu1 %vm238_vm0, %v1526_v18  ;;  %vm1254_vm12 = vcmp.ge.f32.partialorder %v1222_v47, 0.0  ;;  %v1286_v50 = vmul.f32 0.2, %v1222_v47 }
  0xeb   : > { %v838_v51 = vpop.f32.mrf.mxu2 }
  0xec   : > { %v1113_v52 = vpop.f32.mrf.mxu3  ;;  %v1318_v53 = vsel %vm1254_vm12, %v1222_v47, %v1286_v50  ;;  %v912_v54 = vadd.f32 %v838_v51, %v595_v49 }
  0xed   : > { %1351 = vst.msk [vmem:[%s1822_s4 + $0x50] sm:$0xff] %vm1340_vm2, %v1318_v53  ;;  %v388_v58 = vpop.f32.mrf.mxu0 }
  0xee   : > { %v1187_v57 = vadd.f32 %v1113_v52, %v912_v54 }
  0xef   : > { %v597_v59 = vpop.f32.mrf.mxu1 }
  0xf0   : > { %v1223_v60 = vadd.f32 %v1809_v48, %v1187_v57  ;;  %1562 = vmatmul.msk.f32.gmra.mxu2 %vm238_vm0, %v1529_v55  ;;  %v598_v61 = vadd.f32 %v597_v59, %v388_v58  ;;  %1465 = vmatmul.msk.f32.gmra.mxu0 %vm238_vm0, %v1592_v31 }
  0xf1   : > { %1627 = vmatmul.msk.f32.gmra.mxu3 %vm238_vm0, %v1594_v56 }
  0xf2   : > { %1497 = vmatmul.msk.f32.gmra.mxu1 %vm238_vm0, %v1527_v30  ;;  %vm1255_vm13 = vcmp.ge.f32.partialorder %v1223_v60, 0.0  ;;  %v1287_v62 = vmul.f32 0.2, %v1223_v60 }
  0xf3   : > { %v841_v63 = vpop.f32.mrf.mxu2 }
  0xf4   : > { %v1116_v0 = vpop.f32.mrf.mxu3  ;;  %v1319_v1 = vsel %vm1255_vm13, %v1223_v60, %v1287_v62  ;;  %v913_v2 = vadd.f32 %v841_v63, %v598_v61 }
  0xf5   : > { %1352 = vst.msk [vmem:[%s1822_s4 + $0x58] sm:$0xff] %vm1340_vm2, %v1319_v1  ;;  %v391_v6 = vpop.f32.mrf.mxu0 }
  0xf6   : > { %v1188_v5 = vadd.f32 %v1116_v0, %v913_v2 }
  0xf7   : > { %v600_v7 = vpop.f32.mrf.mxu1 }
  0xf8   : > { %v1224_v8 = vadd.f32 %v1809_v48, %v1188_v5  ;;  %1563 = vmatmul.msk.f32.gmra.mxu2 %vm238_vm0, %v1530_v3  ;;  %v601_v9 = vadd.f32 %v600_v7, %v391_v6  ;;  %1466 = vmatmul.msk.f32.gmra.mxu0 %vm238_vm0, %v1593_v43 }
  0xf9   : > { %1628 = vmatmul.msk.f32.gmra.mxu3 %vm238_vm0, %v1595_v4 }
  0xfa   : > { %1498 = vmatmul.msk.f32.gmra.mxu1 %vm238_vm0, %v1528_v42  ;;  %vm1256_vm14 = vcmp.ge.f32.partialorder %v1224_v8, 0.0  ;;  %v1288_v10 = vmul.f32 0.2, %v1224_v8 }
  0xfb   : > { %v844_v11 = vpop.f32.mrf.mxu2 }
  0xfc   : > { %v1119_v12 = vpop.f32.mrf.mxu3  ;;  %v1320_v13 = vsel %vm1256_vm14, %v1224_v8, %v1288_v10  ;;  %v914_v14 = vadd.f32 %v844_v11, %v601_v9 }
  0xfd   : > { %1353 = vst.msk [vmem:[%s1822_s4 + $0x60] sm:$0xff] %vm1340_vm2, %v1320_v13  ;;  %v394_v18 = vpop.f32.mrf.mxu0 }
  0xfe   : > { %v1189_v17 = vadd.f32 %v1119_v12, %v914_v14 }
  0xff   : > { %v603_v19 = vpop.f32.mrf.mxu1 }
 0x100   : > { %v1225_v20 = vadd.f32 %v1809_v48, %v1189_v17  ;;  %1564 = vmatmul.msk.f32.gmra.mxu2 %vm238_vm0, %v1531_v15  ;;  %v604_v21 = vadd.f32 %v603_v19, %v394_v18  ;;  %1467 = vmatmul.msk.f32.gmra.mxu0 %vm238_vm0, %v1594_v56 }
 0x101   : > { %1629 = vmatmul.msk.f32.gmra.mxu3 %vm238_vm0, %v1596_v16 }
 0x102   : > { %1499 = vmatmul.msk.f32.gmra.mxu1 %vm238_vm0, %v1529_v55  ;;  %vm1257_vm15 = vcmp.ge.f32.partialorder %v1225_v20, 0.0  ;;  %v1289_v22 = vmul.f32 0.2, %v1225_v20 }
 0x103   : > { %v847_v23 = vpop.f32.mrf.mxu2 }
 0x104   : > { %v1122_v24 = vpop.f32.mrf.mxu3  ;;  %v1321_v25 = vsel %vm1257_vm15, %v1225_v20, %v1289_v22  ;;  %v915_v26 = vadd.f32 %v847_v23, %v604_v21 }
 0x105   : > { %1354 = vst.msk [vmem:[%s1822_s4 + $0x68] sm:$0xff] %vm1340_vm2, %v1321_v25  ;;  %v397_v30 = vpop.f32.mrf.mxu0 }
 0x106   : > { %v1190_v29 = vadd.f32 %v1122_v24, %v915_v26 }
 0x107   : > { %v606_v31 = vpop.f32.mrf.mxu1 }
 0x108   : > { %v1226_v32 = vadd.f32 %v1809_v48, %v1190_v29  ;;  %1565 = vmatmul.msk.f32.gmra.mxu2 %vm238_vm0, %v1532_v27  ;;  %v607_v33 = vadd.f32 %v606_v31, %v397_v30  ;;  %1468 = vmatmul.msk.f32.gmra.mxu0 %vm238_vm0, %v1595_v4 }
 0x109   : > { %1630 = vmatmul.msk.f32.gmra.mxu3 %vm238_vm0, %v1597_v28 }
 0x10a   : > { %1500 = vmatmul.msk.f32.gmra.mxu1 %vm238_vm0, %v1530_v3  ;;  %vm1258_vm1 = vcmp.ge.f32.partialorder %v1226_v32, 0.0  ;;  %v1290_v34 = vmul.f32 0.2, %v1226_v32 }
 0x10b   : > { %v850_v35 = vpop.f32.mrf.mxu2 }
 0x10c   : > { %v1125_v36 = vpop.f32.mrf.mxu3  ;;  %v1322_v37 = vsel %vm1258_vm1, %v1226_v32, %v1290_v34  ;;  %v916_v38 = vadd.f32 %v850_v35, %v607_v33 }
 0x10d   : > { %1355 = vst.msk [vmem:[%s1822_s4 + $0x70] sm:$0xff] %vm1340_vm2, %v1322_v37  ;;  %v400_v40 = vpop.f32.mrf.mxu0 }
 0x10e   : > { %v1191_v39 = vadd.f32 %v1125_v36, %v916_v38 }
 0x10f   : > { %v609_v41 = vpop.f32.mrf.mxu1 }
 0x110   : > { %v1227_v42 = vadd.f32 %v1809_v48, %v1191_v39  ;;  %v610_v43 = vadd.f32 %v609_v41, %v400_v40 }
 0x112   : > { %vm1259_vm3 = vcmp.ge.f32.partialorder %v1227_v42, 0.0  ;;  %v1291_v44 = vmul.f32 0.2, %v1227_v42 }
 0x113   : > { %v853_v45 = vpop.f32.mrf.mxu2 }
 0x114   : > { %v1128_v46 = vpop.f32.mrf.mxu3  ;;  %v1323_v47 = vsel %vm1259_vm3, %v1227_v42, %v1291_v44  ;;  %v917_v49 = vadd.f32 %v853_v45, %v610_v43 }
 0x115   : > { %1356 = vst.msk [vmem:[%s1822_s4 + $0x78] sm:$0xff] %vm1340_vm2, %v1323_v47  ;;  %v403_v51 = vpop.f32.mrf.mxu0 }
 0x116   : > { %v1192_v50 = vadd.f32 %v1128_v46, %v917_v49 }
 0x117   : > { %v612_v52 = vpop.f32.mrf.mxu1 }
 0x118   : > { %v1228_v53 = vadd.f32 %v1809_v48, %v1192_v50  ;;  %v613_v54 = vadd.f32 %v612_v52, %v403_v51 }
 0x11a   : > { %vm1260_vm0 = vcmp.ge.f32.partialorder %v1228_v53, 0.0  ;;  %v1292_v55 = vmul.f32 0.2, %v1228_v53 }
 0x11b   : > { %v856_v56 = vpop.f32.mrf.mxu2 }
 0x11c   : > { %v1131_v57 = vpop.f32.mrf.mxu3  ;;  %v1324_v58 = vsel %vm1260_vm0, %v1228_v53, %v1292_v55  ;;  %v918_v59 = vadd.f32 %v856_v56, %v613_v54 }
 0x11d   : > { %1357 = vst.msk [vmem:[%s1822_s4 + $0x80] sm:$0xff] %vm1340_vm2, %v1324_v58  ;;  %v406_v61 = vpop.f32.mrf.mxu0 }
 0x11e   : > { %v1193_v60 = vadd.f32 %v1131_v57, %v918_v59 }
 0x11f   : > { %v615_v62 = vpop.f32.mrf.mxu1 }
 0x120   : > { %v1229_v63 = vadd.f32 %v1809_v48, %v1193_v60  ;;  %v616_v0 = vadd.f32 %v615_v62, %v406_v61 }
 0x122   : > { %vm1261_vm4 = vcmp.ge.f32.partialorder %v1229_v63, 0.0  ;;  %v1293_v1 = vmul.f32 0.2, %v1229_v63 }
 0x123   : > { %v859_v2 = vpop.f32.mrf.mxu2 }
 0x124   : > { %v1134_v3 = vpop.f32.mrf.mxu3  ;;  %v1325_v4 = vsel %vm1261_vm4, %v1229_v63, %v1293_v1  ;;  %v919_v5 = vadd.f32 %v859_v2, %v616_v0 }
 0x125   : > { %1358 = vst.msk [vmem:[%s1822_s4 + $0x88] sm:$0xff] %vm1340_vm2, %v1325_v4  ;;  %v409_v7 = vpop.f32.mrf.mxu0 }
 0x126   : > { %v1194_v6 = vadd.f32 %v1134_v3, %v919_v5 }
 0x127   : > { %v618_v8 = vpop.f32.mrf.mxu1 }
 0x128   : > { %v1230_v9 = vadd.f32 %v1809_v48, %v1194_v6  ;;  %v619_v10 = vadd.f32 %v618_v8, %v409_v7 }
 0x12a   : > { %vm1262_vm5 = vcmp.ge.f32.partialorder %v1230_v9, 0.0  ;;  %v1294_v11 = vmul.f32 0.2, %v1230_v9 }
 0x12b   : > { %v862_v12 = vpop.f32.mrf.mxu2 }
 0x12c   : > { %v1137_v13 = vpop.f32.mrf.mxu3  ;;  %v1326_v14 = vsel %vm1262_vm5, %v1230_v9, %v1294_v11  ;;  %v920_v15 = vadd.f32 %v862_v12, %v619_v10 }
 0x12d   : > { %1359 = vst.msk [vmem:[%s1822_s4 + $0x90] sm:$0xff] %vm1340_vm2, %v1326_v14  ;;  %v412_v17 = vpop.f32.mrf.mxu0 }
 0x12e   : > { %v1195_v16 = vadd.f32 %v1137_v13, %v920_v15 }
 0x12f   : > { %v621_v18 = vpop.f32.mrf.mxu1 }
 0x130   : > { %v1231_v19 = vadd.f32 %v1809_v48, %v1195_v16  ;;  %v622_v20 = vadd.f32 %v621_v18, %v412_v17 }
 0x132   : > { %vm1263_vm6 = vcmp.ge.f32.partialorder %v1231_v19, 0.0  ;;  %v1295_v21 = vmul.f32 0.2, %v1231_v19 }
 0x133   : > { %v865_v22 = vpop.f32.mrf.mxu2 }
 0x134   : > { %v1140_v23 = vpop.f32.mrf.mxu3  ;;  %v1327_v24 = vsel %vm1263_vm6, %v1231_v19, %v1295_v21  ;;  %v921_v25 = vadd.f32 %v865_v22, %v622_v20 }
 0x135   : > { %1360 = vst.msk [vmem:[%s1822_s4 + $0x98] sm:$0xff] %vm1340_vm2, %v1327_v24  ;;  %v415_v27 = vpop.f32.mrf.mxu0 }
 0x136   : > { %v1196_v26 = vadd.f32 %v1140_v23, %v921_v25 }
 0x137   : > { %v624_v28 = vpop.f32.mrf.mxu1 }
 0x138   : > { %v1232_v29 = vadd.f32 %v1809_v48, %v1196_v26  ;;  %v625_v30 = vadd.f32 %v624_v28, %v415_v27 }
 0x13a   : > { %vm1264_vm7 = vcmp.ge.f32.partialorder %v1232_v29, 0.0  ;;  %v1296_v31 = vmul.f32 0.2, %v1232_v29 }
 0x13b   : > { %v868_v32 = vpop.f32.mrf.mxu2 }
 0x13c   : > { %v1143_v33 = vpop.f32.mrf.mxu3  ;;  %v1328_v34 = vsel %vm1264_vm7, %v1232_v29, %v1296_v31  ;;  %v922_v35 = vadd.f32 %v868_v32, %v625_v30 }
 0x13d   : > { %1361 = vst.msk [vmem:[%s1822_s4 + $0xa0] sm:$0xff] %vm1340_vm2, %v1328_v34  ;;  %v418_v37 = vpop.f32.mrf.mxu0 }
 0x13e   : > { %v1197_v36 = vadd.f32 %v1143_v33, %v922_v35 }
 0x13f   : > { %v627_v38 = vpop.f32.mrf.mxu1 }
 0x140   : > { %v1233_v39 = vadd.f32 %v1809_v48, %v1197_v36  ;;  %v628_v40 = vadd.f32 %v627_v38, %v418_v37 }
 0x142   : > { %vm1265_vm8 = vcmp.ge.f32.partialorder %v1233_v39, 0.0  ;;  %v1297_v41 = vmul.f32 0.2, %v1233_v39 }
 0x143   : > { %v871_v42 = vpop.f32.mrf.mxu2 }
 0x144   : > { %v1146_v43 = vpop.f32.mrf.mxu3  ;;  %v1329_v44 = vsel %vm1265_vm8, %v1233_v39, %v1297_v41  ;;  %v923_v45 = vadd.f32 %v871_v42, %v628_v40 }
 0x145   : > { %1362 = vst.msk [vmem:[%s1822_s4 + $0xa8] sm:$0xff] %vm1340_vm2, %v1329_v44  ;;  %v421_v47 = vpop.f32.mrf.mxu0 }
 0x146   : > { %v1198_v46 = vadd.f32 %v1146_v43, %v923_v45 }
 0x147   : > { %v630_v49 = vpop.f32.mrf.mxu1 }
 0x148   : > { %v1234_v50 = vadd.f32 %v1809_v48, %v1198_v46  ;;  %v631_v51 = vadd.f32 %v630_v49, %v421_v47 }
 0x14a   : > { %vm1266_vm9 = vcmp.ge.f32.partialorder %v1234_v50, 0.0  ;;  %v1298_v52 = vmul.f32 0.2, %v1234_v50 }
 0x14b   : > { %v874_v53 = vpop.f32.mrf.mxu2 }
 0x14c   : > { %v1149_v54 = vpop.f32.mrf.mxu3  ;;  %v1330_v55 = vsel %vm1266_vm9, %v1234_v50, %v1298_v52  ;;  %v924_v56 = vadd.f32 %v874_v53, %v631_v51 }
 0x14d   : > { %1363 = vst.msk [vmem:[%s1822_s4 + $0xb0] sm:$0xff] %vm1340_vm2, %v1330_v55  ;;  %v424_v58 = vpop.f32.mrf.mxu0 }
 0x14e   : > { %v1199_v57 = vadd.f32 %v1149_v54, %v924_v56 }
 0x14f   : > { %v633_v59 = vpop.f32.mrf.mxu1 }
 0x150   : > { %v1235_v60 = vadd.f32 %v1809_v48, %v1199_v57  ;;  %v634_v61 = vadd.f32 %v633_v59, %v424_v58 }
 0x152   : > { %vm1267_vm10 = vcmp.ge.f32.partialorder %v1235_v60, 0.0  ;;  %v1299_v62 = vmul.f32 0.2, %v1235_v60 }
 0x153   : > { %v877_v63 = vpop.f32.mrf.mxu2 }
 0x154   : > { %v1152_v0 = vpop.f32.mrf.mxu3  ;;  %v1331_v1 = vsel %vm1267_vm10, %v1235_v60, %v1299_v62  ;;  %v925_v2 = vadd.f32 %v877_v63, %v634_v61 }
 0x155   : > { %1364 = vst.msk [vmem:[%s1822_s4 + $0xb8] sm:$0xff] %vm1340_vm2, %v1331_v1  ;;  %v427_v4 = vpop.f32.mrf.mxu0 }
 0x156   : > { %v1200_v3 = vadd.f32 %v1152_v0, %v925_v2 }
 0x157   : > { %v636_v5 = vpop.f32.mrf.mxu1 }
 0x158   : > { %v1236_v6 = vadd.f32 %v1809_v48, %v1200_v3  ;;  %v637_v7 = vadd.f32 %v636_v5, %v427_v4 }
 0x15a   : > { %vm1268_vm11 = vcmp.ge.f32.partialorder %v1236_v6, 0.0  ;;  %v1300_v8 = vmul.f32 0.2, %v1236_v6 }
 0x15b   : > { %v880_v9 = vpop.f32.mrf.mxu2 }
 0x15c   : > { %v1155_v10 = vpop.f32.mrf.mxu3  ;;  %v1332_v11 = vsel %vm1268_vm11, %v1236_v6, %v1300_v8  ;;  %v926_v12 = vadd.f32 %v880_v9, %v637_v7 }
 0x15d   : > { %1365 = vst.msk [vmem:[%s1822_s4 + $0xc0] sm:$0xff] %vm1340_vm2, %v1332_v11  ;;  %v430_v14 = vpop.f32.mrf.mxu0 }
 0x15e   : > { %v1201_v13 = vadd.f32 %v1155_v10, %v926_v12 }
 0x15f   : > { %v639_v15 = vpop.f32.mrf.mxu1 }
 0x160   : > { %v1237_v16 = vadd.f32 %v1809_v48, %v1201_v13  ;;  %v640_v17 = vadd.f32 %v639_v15, %v430_v14 }
 0x162   : > { %vm1269_vm12 = vcmp.ge.f32.partialorder %v1237_v16, 0.0  ;;  %v1301_v18 = vmul.f32 0.2, %v1237_v16 }
 0x163   : > { %v883_v19 = vpop.f32.mrf.mxu2 }
 0x164   : > { %v1158_v20 = vpop.f32.mrf.mxu3  ;;  %v1333_v21 = vsel %vm1269_vm12, %v1237_v16, %v1301_v18  ;;  %v927_v22 = vadd.f32 %v883_v19, %v640_v17 }
 0x165   : > { %1366 = vst.msk [vmem:[%s1822_s4 + $0xc8] sm:$0xff] %vm1340_vm2, %v1333_v21  ;;  %v433_v24 = vpop.f32.mrf.mxu0 }
 0x166   : > { %v1202_v23 = vadd.f32 %v1158_v20, %v927_v22 }
 0x167   : > { %v642_v25 = vpop.f32.mrf.mxu1 }
 0x168   : > { %v1238_v26 = vadd.f32 %v1809_v48, %v1202_v23  ;;  %v643_v27 = vadd.f32 %v642_v25, %v433_v24 }
 0x16a   : > { %vm1270_vm13 = vcmp.ge.f32.partialorder %v1238_v26, 0.0  ;;  %v1302_v28 = vmul.f32 0.2, %v1238_v26 }
 0x16b   : > { %v886_v29 = vpop.f32.mrf.mxu2 }
 0x16c   : > { %v1161_v30 = vpop.f32.mrf.mxu3  ;;  %v1334_v31 = vsel %vm1270_vm13, %v1238_v26, %v1302_v28  ;;  %v928_v32 = vadd.f32 %v886_v29, %v643_v27 }
 0x16d   : > { %1367 = vst.msk [vmem:[%s1822_s4 + $0xd0] sm:$0xff] %vm1340_vm2, %v1334_v31  ;;  %v436_v34 = vpop.f32.mrf.mxu0 }
 0x16e   : > { %v1203_v33 = vadd.f32 %v1161_v30, %v928_v32 }
 0x16f   : > { %v645_v35 = vpop.f32.mrf.mxu1 }
 0x170   : > { %v1239_v36 = vadd.f32 %v1809_v48, %v1203_v33  ;;  %v646_v37 = vadd.f32 %v645_v35, %v436_v34 }
 0x172   : > { %vm1271_vm14 = vcmp.ge.f32.partialorder %v1239_v36, 0.0  ;;  %v1303_v38 = vmul.f32 0.2, %v1239_v36 }
 0x173   : > { %v889_v39 = vpop.f32.mrf.mxu2 }
 0x174   : > { %v1164_v40 = vpop.f32.mrf.mxu3  ;;  %v1335_v41 = vsel %vm1271_vm14, %v1239_v36, %v1303_v38  ;;  %v929_v42 = vadd.f32 %v889_v39, %v646_v37 }
 0x175   : > { %1368 = vst.msk [vmem:[%s1822_s4 + $0xd8] sm:$0xff] %vm1340_vm2, %v1335_v41  ;;  %v439_v44 = vpop.f32.mrf.mxu0 }
 0x176   : > { %v1204_v43 = vadd.f32 %v1164_v40, %v929_v42 }
 0x177   : > { %v648_v45 = vpop.f32.mrf.mxu1 }
 0x178   : > { %v1240_v46 = vadd.f32 %v1809_v48, %v1204_v43  ;;  %v649_v47 = vadd.f32 %v648_v45, %v439_v44 }
 0x17a   : > { %vm1272_vm15 = vcmp.ge.f32.partialorder %v1240_v46, 0.0  ;;  %v1304_v49 = vmul.f32 0.2, %v1240_v46 }
 0x17b   : > { %v892_v50 = vpop.f32.mrf.mxu2 }
 0x17c   : > { %v1167_v51 = vpop.f32.mrf.mxu3  ;;  %v1336_v52 = vsel %vm1272_vm15, %v1240_v46, %v1304_v49  ;;  %v930_v53 = vadd.f32 %v892_v50, %v649_v47 }
 0x17d   : > { %1369 = vst.msk [vmem:[%s1822_s4 + $0xe0] sm:$0xff] %vm1340_vm2, %v1336_v52  ;;  %v442_v55 = vpop.f32.mrf.mxu0 }
 0x17e   : > { %v1205_v54 = vadd.f32 %v1167_v51, %v930_v53 }
 0x17f   : > { %v651_v56 = vpop.f32.mrf.mxu1 }
 0x180   : > { %v1241_v57 = vadd.f32 %v1809_v48, %v1205_v54  ;;  %v652_v58 = vadd.f32 %v651_v56, %v442_v55 }
 0x182   : > { %vm1273_vm1 = vcmp.ge.f32.partialorder %v1241_v57, 0.0  ;;  %v1305_v59 = vmul.f32 0.2, %v1241_v57 }
 0x183   : > { %v895_v60 = vpop.f32.mrf.mxu2 }
 0x184   : > { %v1170_v61 = vpop.f32.mrf.mxu3  ;;  %v1337_v62 = vsel %vm1273_vm1, %v1241_v57, %v1305_v59  ;;  %v931_v63 = vadd.f32 %v895_v60, %v652_v58 }
 0x185   : > { %1370 = vst.msk [vmem:[%s1822_s4 + $0xe8] sm:$0xff] %vm1340_vm2, %v1337_v62  ;;  %v445_v1 = vpop.f32.mrf.mxu0 }
 0x186   : > { %v1206_v0 = vadd.f32 %v1170_v61, %v931_v63 }
 0x187   : > { %v654_v2 = vpop.f32.mrf.mxu1 }
 0x188   : > { %v1242_v3 = vadd.f32 %v1809_v48, %v1206_v0  ;;  %v655_v4 = vadd.f32 %v654_v2, %v445_v1 }
 0x18a   : > { %vm1274_vm3 = vcmp.ge.f32.partialorder %v1242_v3, 0.0  ;;  %v1306_v5 = vmul.f32 0.2, %v1242_v3 }
 0x18b   : > { %v898_v6 = vpop.f32.mrf.mxu2 }
 0x18c   : > { %v1173_v7 = vpop.f32.mrf.mxu3  ;;  %v1338_v8 = vsel %vm1274_vm3, %v1242_v3, %v1306_v5  ;;  %v932_v9 = vadd.f32 %v898_v6, %v655_v4 }
 0x18d   : > { %1371 = vst.msk [vmem:[%s1822_s4 + $0xf0] sm:$0xff] %vm1340_vm2, %v1338_v8 }
 0x18e   : > { %v1207_v10 = vadd.f32 %v1173_v7, %v932_v9 }
 0x190   : > { %v1243_v11 = vadd.f32 %v1809_v48, %v1207_v10 }
 0x192   : > { %vm1275_vm0 = vcmp.ge.f32.partialorder %v1243_v11, 0.0  ;;  %v1307_v12 = vmul.f32 0.2, %v1243_v11 }
 0x194   : > { %v1339_v13 = vsel %vm1275_vm0, %v1243_v11, %v1307_v12 }
 0x195   : > { %1372 = vst.msk [vmem:[%s1822_s4 + $0xf8] sm:$0xff] %vm1340_vm2, %v1339_v13 }
 0x196 PF: > { %s13_s12 = sadd.s32 1, %s1650_s12  }
 0x197   : > { %p10_p4 = scmp.ge.s32.totalorder %s13_s12, 4  }
 0x199   :  { %12 = sbr.rel (!%p10_p4) target bundleno = 1 (0x1), region = 66 }

// kernel: accnn_discriminator_forward.5
= control target key start
LH: loop header
LB: loop body
LE: loop exit
PB: predicated region body
PF: predicated region fallthrough
CT: control target
= control target key end

     0   :  { %s1228_s12 = smov 0   ;;  %s1892_s0 = inlined_call_operand.vmem [shape: f32[2,9,9,256], index: 0, kind: input, shape index: {}]   ;;  %s1893_s1 = inlined_call_operand.vmem [shape: f32[2,2,256,128], index: 1, kind: input, shape index: {}]   ;;  %s1894_s2 = inlined_call_operand.vmem [shape: f32[1,128], index: 2, kind: input, shape index: {}]   ;;  %s1895_s3 = inlined_call_operand.vmem [shape: f32[2,8,8,128], index: 3, kind: output, shape index: {}]  }
   0x1 LB: > { %s1035_s13 = sadd.s32 4294967295, %s1206_s12   ;;  %p1039_p0 = scmp.ge.s32.totalorder %s1206_s12, 1  ;;  %s1206_s12 = sphi %s1228_s12, %s13_s12  }
   0x2   : > { %p137_p1 = scmp.lt.s32.totalorder %s1206_s12, 3 }
   0x4   : > { %p138_p2 = pnand %p1039_p0, %p137_p1 }
   0x5   : > { %p1298_p3 = scmp.lt.s32.totalorder (!%p138_p2), %s1035_s13, 1 }
   0x6   : > { %141 = sbr.rel (%p138_p2) target bundleno = 308 (0x134), region = 32 }
   0xb   : > { %v1058_v0 = vld [vmem:[%s1893_s1 + $0x178] sm:$0xff]  ;;  %v1057_v4 = vld [vmem:[%s1893_s1 + $0x170] sm:$0xff]  ;;  %v1056_v8 = vld [vmem:[%s1893_s1 + $0x168] sm:$0xff]  ;;  %s1898_s13 = smov (!%p1298_p3, %s1035_s13), 1  ;;  %vm283_vm0 = vcmask 1046528  }
   0xc   : > { %v1074_v1 = vld [vmem:[%s1893_s1 + $0x1f8] sm:$0xff]  ;;  %381 = vmatpush.msra.mxu0 %v1058_v0  ;;  %v1073_v5 = vld [vmem:[%s1893_s1 + $0x1f0] sm:$0xff]  ;;  %v1072_v9 = vld [vmem:[%s1893_s1 + $0x1e8] sm:$0xff]  ;;  %s1190_s10 = smul.u32 288, %s1898_s13  ;;  %s1189_s6 = sshll.u32 %s1898_s13, 6 }
   0xd   : > { %v202_v2 = vld [vmem:[%s1893_s1 + $0x78] sm:$0xff]  ;;  %422 = vmatpush.msra.mxu1 %v1074_v1  ;;  %v201_v6 = vld [vmem:[%s1893_s1 + $0x70] sm:$0xff]  ;;  %v200_v10 = vld [vmem:[%s1893_s1 + $0x68] sm:$0xff]  ;;  %s1854_s9 = scalar_lea.vmem %s1895_s3, %s1189_s6 }
   0xe   : > { %v218_v3 = vld [vmem:[%s1893_s1 + $0xf8] sm:$0xff]  ;;  %463 = vmatpush.msra.mxu2 %v202_v2  ;;  %v217_v7 = vld [vmem:[%s1893_s1 + $0xf0] sm:$0xff]  ;;  %382 = vmatpush.msra.mxu0 %v1057_v4  ;;  %v216_v11 = vld [vmem:[%s1893_s1 + $0xe8] sm:$0xff]  ;;  %s1384_s4 = scalar_lea.vmem %s1892_s0, %s1190_s10 }
   0xf   : > { %504 = vmatpush.msra.mxu3 %v218_v3  ;;  %423 = vmatpush.msra.mxu1 %v1073_v5  ;;  %v1055_v12 = vld [vmem:[%s1893_s1 + $0x160] sm:$0xff]  ;;  %v1054_v16 = vld [vmem:[%s1893_s1 + $0x158] sm:$0xff]  ;;  %v1053_v20 = vld [vmem:[%s1893_s1 + $0x150] sm:$0xff] }
  0x10   : > { %464 = vmatpush.msra.mxu2 %v201_v6  ;;  %v1071_v13 = vld [vmem:[%s1893_s1 + $0x1e0] sm:$0xff]  ;;  %383 = vmatpush.msra.mxu0 %v1056_v8  ;;  %v1070_v17 = vld [vmem:[%s1893_s1 + $0x1d8] sm:$0xff]  ;;  %v1069_v21 = vld [vmem:[%s1893_s1 + $0x1d0] sm:$0xff] }
  0x11   : > { %505 = vmatpush.msra.mxu3 %v217_v7  ;;  %424 = vmatpush.msra.mxu1 %v1072_v9  ;;  %v199_v14 = vld [vmem:[%s1893_s1 + $0x60] sm:$0xff]  ;;  %v198_v18 = vld [vmem:[%s1893_s1 + $0x58] sm:$0xff]  ;;  %v197_v22 = vld [vmem:[%s1893_s1 + $0x50] sm:$0xff] }
  0x12   : > { %v215_v15 = vld [vmem:[%s1893_s1 + $0xe0] sm:$0xff]  ;;  %465 = vmatpush.msra.mxu2 %v200_v10  ;;  %384 = vmatpush.msra.mxu0 %v1055_v12  ;;  %v214_v19 = vld [vmem:[%s1893_s1 + $0xd8] sm:$0xff]  ;;  %v213_v23 = vld [vmem:[%s1893_s1 + $0xd0] sm:$0xff] }
  0x13   : > { %506 = vmatpush.msra.mxu3 %v216_v11  ;;  %425 = vmatpush.msra.mxu1 %v1071_v13  ;;  %v1052_v24 = vld [vmem:[%s1893_s1 + $0x148] sm:$0xff]  ;;  %v1051_v28 = vld [vmem:[%s1893_s1 + $0x140] sm:$0xff]  ;;  %v1050_v32 = vld [vmem:[%s1893_s1 + $0x138] sm:$0xff] }
  0x14   : > { %466 = vmatpush.msra.mxu2 %v199_v14  ;;  %385 = vmatpush.msra.mxu0 %v1054_v16  ;;  %v1068_v25 = vld [vmem:[%s1893_s1 + $0x1c8] sm:$0xff]  ;;  %v1067_v29 = vld [vmem:[%s1893_s1 + $0x1c0] sm:$0xff]  ;;  %v1066_v33 = vld [vmem:[%s1893_s1 + $0x1b8] sm:$0xff] }
  0x15   : > { %507 = vmatpush.msra.mxu3 %v215_v15  ;;  %426 = vmatpush.msra.mxu1 %v1070_v17  ;;  %v196_v26 = vld [vmem:[%s1893_s1 + $0x48] sm:$0xff]  ;;  %v195_v30 = vld [vmem:[%s1893_s1 + $0x40] sm:$0xff]  ;;  %v194_v34 = vld [vmem:[%s1893_s1 + $0x38] sm:$0xff] }
  0x16   : > { %467 = vmatpush.msra.mxu2 %v198_v18  ;;  %386 = vmatpush.msra.mxu0 %v1053_v20  ;;  %v212_v27 = vld [vmem:[%s1893_s1 + $0xc8] sm:$0xff]  ;;  %v211_v31 = vld [vmem:[%s1893_s1 + $0xc0] sm:$0xff]  ;;  %v210_v35 = vld [vmem:[%s1893_s1 + $0xb8] sm:$0xff] }
  0x17   : > { %508 = vmatpush.msra.mxu3 %v214_v19  ;;  %427 = vmatpush.msra.mxu1 %v1069_v21  ;;  %v1049_v36 = vld [vmem:[%s1893_s1 + $0x130] sm:$0xff]  ;;  %v1048_v40 = vld [vmem:[%s1893_s1 + $0x128] sm:$0xff]  ;;  %v1047_v44 = vld [vmem:[%s1893_s1 + $0x120] sm:$0xff] }
  0x18   : > { %468 = vmatpush.msra.mxu2 %v197_v22  ;;  %387 = vmatpush.msra.mxu0 %v1052_v24  ;;  %v1065_v37 = vld [vmem:[%s1893_s1 + $0x1b0] sm:$0xff]  ;;  %v1064_v41 = vld [vmem:[%s1893_s1 + $0x1a8] sm:$0xff]  ;;  %v1063_v45 = vld [vmem:[%s1893_s1 + $0x1a0] sm:$0xff] }
  0x19   : > { %509 = vmatpush.msra.mxu3 %v213_v23  ;;  %428 = vmatpush.msra.mxu1 %v1068_v25  ;;  %v193_v38 = vld [vmem:[%s1893_s1 + $0x30] sm:$0xff]  ;;  %v192_v42 = vld [vmem:[%s1893_s1 + $0x28] sm:$0xff]  ;;  %v191_v46 = vld [vmem:[%s1893_s1 + $0x20] sm:$0xff] }
  0x1a   : > { %469 = vmatpush.msra.mxu2 %v196_v26  ;;  %388 = vmatpush.msra.mxu0 %v1051_v28  ;;  %v209_v39 = vld [vmem:[%s1893_s1 + $0xb0] sm:$0xff]  ;;  %v208_v43 = vld [vmem:[%s1893_s1 + $0xa8] sm:$0xff]  ;;  %v207_v47 = vld [vmem:[%s1893_s1 + $0xa0] sm:$0xff] }
  0x1b   : > { %510 = vmatpush.msra.mxu3 %v212_v27  ;;  %429 = vmatpush.msra.mxu1 %v1067_v29  ;;  %v1046_v48 = vld [vmem:[%s1893_s1 + $0x118] sm:$0xff]  ;;  %v219_v52 = vld [vmem:[%s1384_s4] sm:$0xfe]  ;;  %v221_v53 = vld [vmem:[%s1384_s4 + $0x10] sm:$0x1] }
  0x1c   : > { %470 = vmatpush.msra.mxu2 %v195_v30  ;;  %389 = vmatpush.msra.mxu0 %v1050_v32  ;;  %v1062_v49 = vld [vmem:[%s1893_s1 + $0x198] sm:$0xff]  ;;  %v220_v54 = vld [vmem:[%s1384_s4 + $0x8] sm:$0xfe]  ;;  %v1045_v56 = vld [vmem:[%s1893_s1 + $0x110] sm:$0xff]  ;;  %v284_v62 = vrot.slane %v219_v52, 1  ;;  %v285_v63 = vrot.slane %v221_v53, 1 }
  0x1d   : > { %511 = vmatpush.msra.mxu3 %v211_v31  ;;  %430 = vmatpush.msra.mxu1 %v1066_v33  ;;  %v190_v50 = vld [vmem:[%s1893_s1 + $0x18] sm:$0xff]  ;;  %v1061_v57 = vld [vmem:[%s1893_s1 + $0x190] sm:$0xff]  ;;  %v1044_v60 = vld [vmem:[%s1893_s1 + $0x108] sm:$0xff]  ;;  %v287_v0 = vrot.slane %v220_v54, 1 }
  0x1e   : > { %471 = vmatpush.msra.mxu2 %v194_v34  ;;  %390 = vmatpush.msra.mxu0 %v1049_v36  ;;  %v206_v51 = vld [vmem:[%s1893_s1 + $0x98] sm:$0xff]  ;;  %v189_v58 = vld [vmem:[%s1893_s1 + $0x10] sm:$0xff]  ;;  %v1060_v61 = vld [vmem:[%s1893_s1 + $0x188] sm:$0xff]  ;;  %v286_v8 = vsel %vm283_vm0, %v284_v62, %v285_v63 }
  0x1f   : > { %512 = vmatpush.msra.mxu3 %v210_v35  ;;  %431 = vmatpush.msra.mxu1 %v1065_v37  ;;  %v222_v55 = vld [vmem:[%s1384_s4 + $0x18] sm:$0x1]  ;;  %v205_v59 = vld [vmem:[%s1893_s1 + $0x90] sm:$0xff]  ;;  %v188_v2 = vld [vmem:[%s1893_s1 + $0x8] sm:$0xff] }
  0x20   : > { %472 = vmatpush.msra.mxu2 %v193_v38  ;;  %391 = vmatpush.msra.mxu0 %v1048_v40  ;;  %v288_v1 = vrot.slane %v222_v55, 1  ;;  %v204_v3 = vld [vmem:[%s1893_s1 + $0x88] sm:$0xff]  ;;  %v1043_v4 = vld [vmem:[%s1893_s1 + $0x100] sm:$0xff]  ;;  %v225_v13 = vld [vmem:[%s1384_s4 + $0x30] sm:$0x1] }
  0x21   : > { %513 = vmatpush.msra.mxu3 %v209_v39  ;;  %432 = vmatpush.msra.mxu1 %v1064_v41  ;;  %v1059_v5 = vld [vmem:[%s1893_s1 + $0x180] sm:$0xff]  ;;  %v172_v11 = vld [vmem:[%s1384_s4 + $0x8] sm:$0xff]  ;;  %v226_v15 = vld [vmem:[%s1384_s4 + $0x38] sm:$0x1]  ;;  %v291_v23 = vrot.slane %v225_v13, 1 }
  0x22   : > { %473 = vmatpush.msra.mxu2 %v192_v42  ;;  %392 = vmatpush.msra.mxu0 %v1047_v44  ;;  %v187_v6 = vld [vmem:[%s1893_s1] sm:$0xff]  ;;  %v289_v9 = vsel %vm283_vm0, %v287_v0, %v288_v1  ;;  %v224_v14 = vld [vmem:[%s1384_s4 + $0x28] sm:$0xfe]  ;;  %v1170_v16 = vld [vmem:[%s1893_s1 + $0x378] sm:$0xff]  ;;  %v294_v25 = vrot.slane %v226_v15, 1 }
  0x23   : > { %514 = vmatpush.msra.mxu3 %v208_v43  ;;  %433 = vmatpush.msra.mxu1 %v1063_v45  ;;  %v203_v7 = vld [vmem:[%s1893_s1 + $0x80] sm:$0xff]  ;;  %v1186_v17 = vld [vmem:[%s1893_s1 + $0x3f8] sm:$0xff]  ;;  %v1169_v20 = vld [vmem:[%s1893_s1 + $0x370] sm:$0xff]  ;;  %v293_v24 = vrot.slane %v224_v14, 1 }
  0x24   : > { %474 = vmatpush.msra.mxu2 %v191_v46  ;;  %393 = vmatpush.msra.mxu0 %v1046_v48  ;;  %v171_v10 = vld [vmem:[%s1384_s4] sm:$0xff]  ;;  %v1106_v18 = vld [vmem:[%s1893_s1 + $0x278] sm:$0xff]  ;;  %v1185_v21 = vld [vmem:[%s1893_s1 + $0x3f0] sm:$0xff] }
  0x25   : > { %515 = vmatpush.msra.mxu3 %v207_v47  ;;  %434 = vmatpush.msra.mxu1 %v1062_v49  ;;  %v223_v12 = vld [vmem:[%s1384_s4 + $0x20] sm:$0xfe]  ;;  %v1122_v19 = vld [vmem:[%s1893_s1 + $0x2f8] sm:$0xff]  ;;  %v1105_v26 = vld [vmem:[%s1893_s1 + $0x270] sm:$0xff]  ;;  %v295_v33 = vsel %vm283_vm0, %v293_v24, %v294_v25 }
  0x26   : > { %475 = vmatpush.msra.mxu2 %v190_v50  ;;  %394 = vmatpush.msra.mxu0 %v1045_v56  ;;  %v290_v22 = vrot.slane %v223_v12, 1  ;;  %v1121_v27 = vld [vmem:[%s1893_s1 + $0x2f0] sm:$0xff]  ;;  %v1168_v28 = vld [vmem:[%s1893_s1 + $0x368] sm:$0xff]  ;;  %v1497_v34 = vld [vmem:[%s1384_s4 + $0x20] sm:$0xff] }
  0x27   : > { %516 = vmatpush.msra.mxu3 %v206_v51  ;;  %435 = vmatpush.msra.mxu1 %v1061_v57  ;;  %v1184_v29 = vld [vmem:[%s1893_s1 + $0x3e8] sm:$0xff]  ;;  %v227_v36 = vld [vmem:[%s1384_s4 + $0x40] sm:$0xfe]  ;;  %v229_v37 = vld [vmem:[%s1384_s4 + $0x50] sm:$0x1] }
  0x28   : > { %476 = vmatpush.msra.mxu2 %v189_v58  ;;  %395 = vmatpush.msra.mxu0 %v1044_v60  ;;  %v1104_v30 = vld [vmem:[%s1893_s1 + $0x268] sm:$0xff]  ;;  %v292_v32 = vsel %vm283_vm0, %v290_v22, %v291_v23  ;;  %v230_v39 = vld [vmem:[%s1384_s4 + $0x58] sm:$0x1]  ;;  %v1167_v40 = vld [vmem:[%s1893_s1 + $0x360] sm:$0xff]  ;;  %v296_v44 = vrot.slane %v227_v36, 1  ;;  %v297_v45 = vrot.slane %v229_v37, 1 }
  0x29   : > { %517 = vmatpush.msra.mxu3 %v205_v59  ;;  %436 = vmatpush.msra.mxu1 %v1060_v61  ;;  %v1120_v31 = vld [vmem:[%s1893_s1 + $0x2e8] sm:$0xff]  ;;  %v1183_v41 = vld [vmem:[%s1893_s1 + $0x3e0] sm:$0xff]  ;;  %v300_v47 = vrot.slane %v230_v39, 1  ;;  %v1166_v48 = vld [vmem:[%s1893_s1 + $0x358] sm:$0xff] }
  0x2a   : > { %477 = vmatpush.msra.mxu2 %v188_v2  ;;  %396 = vmatpush.msra.mxu0 %v1043_v4  ;;  %v1500_v35 = vld [vmem:[%s1384_s4 + $0x28] sm:$0xff]  ;;  %v1103_v42 = vld [vmem:[%s1893_s1 + $0x260] sm:$0xff]  ;;  %v1182_v49 = vld [vmem:[%s1893_s1 + $0x3d8] sm:$0xff]  ;;  %v298_v56 = vsel %vm283_vm0, %v296_v44, %v297_v45 }
  0x2b   : > { %518 = vmatpush.msra.mxu3 %v204_v3  ;;  %437 = vmatpush.msra.mxu1 %v1059_v5  ;;  %v228_v38 = vld [vmem:[%s1384_s4 + $0x48] sm:$0xfe]  ;;  %v1119_v43 = vld [vmem:[%s1893_s1 + $0x2e0] sm:$0xff]  ;;  %v1102_v50 = vld [vmem:[%s1893_s1 + $0x258] sm:$0xff] }
  0x2c   : > { %478 = vmatpush.msra.mxu2 %v187_v6  ;;  %397 = vmatmul.f32.vlgmr.msra.gmra.mxu0 %v286_v8  ;;  %v299_v46 = vrot.slane %v228_v38, 1  ;;  %v1118_v51 = vld [vmem:[%s1893_s1 + $0x2d8] sm:$0xff]  ;;  %v1165_v52 = vld [vmem:[%s1893_s1 + $0x350] sm:$0xff]  ;;  %v1547_v58 = vld [vmem:[%s1384_s4 + $0x40] sm:$0xff] }
  0x2d   : > { %519 = vmatpush.msra.mxu3 %v203_v7  ;;  %438 = vmatmul.f32.vlgmr.msra.gmra.mxu1 %v289_v9  ;;  %v1181_v53 = vld [vmem:[%s1893_s1 + $0x3d0] sm:$0xff]  ;;  %v1550_v59 = vld [vmem:[%s1384_s4 + $0x48] sm:$0xff]  ;;  %v231_v60 = vld [vmem:[%s1384_s4 + $0x60] sm:$0xfe] }
  0x2e   : > { %479 = vmatmul.f32.vlgmr.msra.gmra.mxu2 %v171_v10  ;;  %520 = vmatmul.f32.vlgmr.msra.gmra.mxu3 %v172_v11  ;;  %v1101_v54 = vld [vmem:[%s1893_s1 + $0x250] sm:$0xff]  ;;  %v301_v57 = vsel %vm283_vm0, %v299_v46, %v300_v47  ;;  %v232_v62 = vld [vmem:[%s1384_s4 + $0x68] sm:$0xfe]  ;;  %v234_v63 = vld [vmem:[%s1384_s4 + $0x78] sm:$0x1]  ;;  %v302_v4 = vrot.slane %v231_v60, 1 }
  0x2f   : > { %846 = vmatpush.msrb.mxu2 %v1170_v16  ;;  %887 = vmatpush.msrb.mxu3 %v1186_v17  ;;  %v1117_v55 = vld [vmem:[%s1893_s1 + $0x2d0] sm:$0xff]  ;;  %v1164_v0 = vld [vmem:[%s1893_s1 + $0x348] sm:$0xff]  ;;  %v305_v6 = vrot.slane %v232_v62, 1  ;;  %v306_v7 = vrot.slane %v234_v63, 1  ;;  %v1163_v8 = vld [vmem:[%s1893_s1 + $0x340] sm:$0xff] }
  0x30   : > { %595 = vmatpush.msrb.mxu0 %v1106_v18  ;;  %636 = vmatpush.msrb.mxu1 %v1122_v19  ;;  %v233_v61 = vld [vmem:[%s1384_s4 + $0x70] sm:$0x1]  ;;  %v1180_v1 = vld [vmem:[%s1893_s1 + $0x3c8] sm:$0xff]  ;;  %v1179_v9 = vld [vmem:[%s1893_s1 + $0x3c0] sm:$0xff] }
  0x31   : > { %847 = vmatpush.msrb.mxu2 %v1169_v20  ;;  %888 = vmatpush.msrb.mxu3 %v1185_v21  ;;  %v1100_v2 = vld [vmem:[%s1893_s1 + $0x248] sm:$0xff]  ;;  %v303_v5 = vrot.slane %v233_v61, 1  ;;  %v1099_v10 = vld [vmem:[%s1893_s1 + $0x240] sm:$0xff]  ;;  %v1162_v12 = vld [vmem:[%s1893_s1 + $0x338] sm:$0xff]  ;;  %v307_v17 = vsel %vm283_vm0, %v305_v6, %v306_v7 }
  0x32   : > { %596 = vmatpush.msrb.mxu0 %v1105_v26  ;;  %637 = vmatpush.msrb.mxu1 %v1121_v27  ;;  %v1116_v3 = vld [vmem:[%s1893_s1 + $0x2c8] sm:$0xff]  ;;  %v1115_v11 = vld [vmem:[%s1893_s1 + $0x2c0] sm:$0xff]  ;;  %v1178_v13 = vld [vmem:[%s1893_s1 + $0x3b8] sm:$0xff] }
  0x33   : > { %848 = vmatpush.msrb.mxu2 %v1168_v28  ;;  %889 = vmatpush.msrb.mxu3 %v1184_v29  ;;  %v1098_v14 = vld [vmem:[%s1893_s1 + $0x238] sm:$0xff]  ;;  %v304_v16 = vsel %vm283_vm0, %v302_v4, %v303_v5  ;;  %v1597_v18 = vld [vmem:[%s1384_s4 + $0x60] sm:$0xff]  ;;  %v1600_v19 = vld [vmem:[%s1384_s4 + $0x68] sm:$0xff] }
  0x34   : > { %597 = vmatpush.msrb.mxu0 %v1104_v30  ;;  %638 = vmatpush.msrb.mxu1 %v1120_v31  ;;  %v1114_v15 = vld [vmem:[%s1893_s1 + $0x2b8] sm:$0xff]  ;;  %v235_v20 = vld [vmem:[%s1384_s4 + $0x80] sm:$0xfe]  ;;  %v237_v21 = vld [vmem:[%s1384_s4 + $0x90] sm:$0x1] }
  0x35   : > { %400 = vmatmul.f32.gmra.mxu0 %v292_v32  ;;  %441 = vmatmul.f32.gmra.mxu1 %v295_v33  ;;  %v236_v22 = vld [vmem:[%s1384_s4 + $0x88] sm:$0xfe]  ;;  %v238_v23 = vld [vmem:[%s1384_s4 + $0x98] sm:$0x1]  ;;  %v1161_v24 = vld [vmem:[%s1893_s1 + $0x330] sm:$0xff]  ;;  %v308_v28 = vrot.slane %v235_v20, 1 }
  0x36   : > { %482 = vmatmul.f32.gmra.mxu2 %v1497_v34  ;;  %523 = vmatmul.f32.gmra.mxu3 %v1500_v35  ;;  %v1177_v25 = vld [vmem:[%s1893_s1 + $0x3b0] sm:$0xff]  ;;  %v309_v29 = vrot.slane %v237_v21, 1  ;;  %v311_v30 = vrot.slane %v236_v22, 1  ;;  %v312_v31 = vrot.slane %v238_v23, 1  ;;  %v1160_v32 = vld [vmem:[%s1893_s1 + $0x328] sm:$0xff]  ;;  %v1159_v38 = vld [vmem:[%s1893_s1 + $0x320] sm:$0xff] }
  0x37   : > { %849 = vmatpush.msrb.mxu2 %v1167_v40  ;;  %890 = vmatpush.msrb.mxu3 %v1183_v41  ;;  %v1097_v26 = vld [vmem:[%s1893_s1 + $0x230] sm:$0xff]  ;;  %v1176_v33 = vld [vmem:[%s1893_s1 + $0x3a8] sm:$0xff]  ;;  %v1175_v39 = vld [vmem:[%s1893_s1 + $0x3a0] sm:$0xff] }
  0x38   : > { %598 = vmatpush.msrb.mxu0 %v1103_v42  ;;  %639 = vmatpush.msrb.mxu1 %v1119_v43  ;;  %v1113_v27 = vld [vmem:[%s1893_s1 + $0x2b0] sm:$0xff]  ;;  %v1096_v36 = vld [vmem:[%s1893_s1 + $0x228] sm:$0xff]  ;;  %v1095_v40 = vld [vmem:[%s1893_s1 + $0x220] sm:$0xff]  ;;  %v310_v42 = vsel %vm283_vm0, %v308_v28, %v309_v29  ;;  %v313_v43 = vsel %vm283_vm0, %v311_v30, %v312_v31 }
  0x39   : > { %850 = vmatpush.msrb.mxu2 %v1166_v48  ;;  %891 = vmatpush.msrb.mxu3 %v1182_v49  ;;  %v1112_v37 = vld [vmem:[%s1893_s1 + $0x2a8] sm:$0xff]  ;;  %v1111_v41 = vld [vmem:[%s1893_s1 + $0x2a0] sm:$0xff]  ;;  %v241_v47 = vld [vmem:[%s1384_s4 + $0xb0] sm:$0x1] }
  0x3a   : > { %599 = vmatpush.msrb.mxu0 %v1102_v50  ;;  %640 = vmatpush.msrb.mxu1 %v1118_v51  ;;  %v1647_v44 = vld [vmem:[%s1384_s4 + $0x80] sm:$0xff]  ;;  %v1650_v45 = vld [vmem:[%s1384_s4 + $0x88] sm:$0xff]  ;;  %v242_v49 = vld [vmem:[%s1384_s4 + $0xb8] sm:$0x1] }
  0x3b   : > { %851 = vmatpush.msrb.mxu2 %v1165_v52  ;;  %892 = vmatpush.msrb.mxu3 %v1181_v53  ;;  %v239_v46 = vld [vmem:[%s1384_s4 + $0xa0] sm:$0xfe]  ;;  %v240_v48 = vld [vmem:[%s1384_s4 + $0xa8] sm:$0xfe]  ;;  %v1158_v50 = vld [vmem:[%s1893_s1 + $0x318] sm:$0xff] }
  0x3c   : > { %600 = vmatpush.msrb.mxu0 %v1101_v54  ;;  %641 = vmatpush.msrb.mxu1 %v1117_v55  ;;  %v1174_v51 = vld [vmem:[%s1893_s1 + $0x398] sm:$0xff]  ;;  %v314_v54 = vrot.slane %v239_v46, 1  ;;  %v315_v55 = vrot.slane %v241_v47, 1  ;;  %v1157_v60 = vld [vmem:[%s1893_s1 + $0x310] sm:$0xff]  ;;  %v1697_v6 = vld [vmem:[%s1384_s4 + $0xa0] sm:$0xff] }
  0x3d   : > { %403 = vmatmul.f32.gmra.mxu0 %v298_v56  ;;  %444 = vmatmul.f32.gmra.mxu1 %v301_v57  ;;  %v1094_v52 = vld [vmem:[%s1893_s1 + $0x218] sm:$0xff]  ;;  %v317_v56 = vrot.slane %v240_v48, 1  ;;  %v318_v57 = vrot.slane %v242_v49, 1  ;;  %v1173_v61 = vld [vmem:[%s1893_s1 + $0x390] sm:$0xff]  ;;  %v1700_v7 = vld [vmem:[%s1384_s4 + $0xa8] sm:$0xff] }
  0x3e   : > { %485 = vmatmul.f32.gmra.mxu2 %v1547_v58  ;;  %526 = vmatmul.f32.gmra.mxu3 %v1550_v59  ;;  %v1110_v53 = vld [vmem:[%s1893_s1 + $0x298] sm:$0xff]  ;;  %v1093_v62 = vld [vmem:[%s1893_s1 + $0x210] sm:$0xff]  ;;  %v316_v4 = vsel %vm283_vm0, %v314_v54, %v315_v55  ;;  %v248_v28 = vld [vmem:[%s1384_s4 + $0xe8] sm:$0xfe] }
  0x3f   : > { %852 = vmatpush.msrb.mxu2 %v1164_v0  ;;  %893 = vmatpush.msrb.mxu3 %v1180_v1  ;;  %v1109_v63 = vld [vmem:[%s1893_s1 + $0x290] sm:$0xff]  ;;  %v1156_v0 = vld [vmem:[%s1893_s1 + $0x308] sm:$0xff]  ;;  %v319_v5 = vsel %vm283_vm0, %v317_v56, %v318_v57  ;;  %v250_v29 = vld [vmem:[%s1384_s4 + $0xf8] sm:$0x1] }
  0x40   : > { %601 = vmatpush.msrb.mxu0 %v1100_v2  ;;  %642 = vmatpush.msrb.mxu1 %v1116_v3  ;;  %v1172_v1 = vld [vmem:[%s1893_s1 + $0x388] sm:$0xff]  ;;  %v1130_v55 = vld [vmem:[%s1384_s4 + $0x58] sm:$0x1] }
  0x41   : > { %853 = vmatpush.msrb.mxu2 %v1163_v8  ;;  %894 = vmatpush.msrb.mxu3 %v1179_v9  ;;  %v1092_v2 = vld [vmem:[%s1893_s1 + $0x208] sm:$0xff]  ;;  %v243_v8 = vld [vmem:[%s1384_s4 + $0xc0] sm:$0xfe]  ;;  %v245_v9 = vld [vmem:[%s1384_s4 + $0xd0] sm:$0x1] }
  0x42   : > { %602 = vmatpush.msrb.mxu0 %v1099_v10  ;;  %643 = vmatpush.msrb.mxu1 %v1115_v11  ;;  %v1108_v3 = vld [vmem:[%s1893_s1 + $0x288] sm:$0xff]  ;;  %v246_v11 = vld [vmem:[%s1384_s4 + $0xd8] sm:$0x1] }
  0x43   : > { %854 = vmatpush.msrb.mxu2 %v1162_v12  ;;  %895 = vmatpush.msrb.mxu3 %v1178_v13  ;;  %v244_v10 = vld [vmem:[%s1384_s4 + $0xc8] sm:$0xfe]  ;;  %v1155_v12 = vld [vmem:[%s1893_s1 + $0x300] sm:$0xff]  ;;  %v324_v21 = vrot.slane %v246_v11, 1  ;;  %v1137_v11 = vld [vmem:[%s1384_s4 + $0x90] sm:$0x1] }
  0x44   : > { %603 = vmatpush.msrb.mxu0 %v1098_v14  ;;  %644 = vmatpush.msrb.mxu1 %v1114_v15  ;;  %v1171_v13 = vld [vmem:[%s1893_s1 + $0x380] sm:$0xff]  ;;  %v323_v20 = vrot.slane %v244_v10, 1  ;;  %v1128_v54 = vld [vmem:[%s1384_s4 + $0x48] sm:$0xfe] }
  0x45   : > { %406 = vmatmul.f32.gmra.mxu0 %v304_v16  ;;  %447 = vmatmul.f32.gmra.mxu1 %v307_v17  ;;  %v1091_v14 = vld [vmem:[%s1893_s1 + $0x200] sm:$0xff]  ;;  %v320_v16 = vrot.slane %v243_v8, 1  ;;  %v321_v17 = vrot.slane %v245_v9, 1 }
  0x46   : > { %488 = vmatmul.f32.gmra.mxu2 %v1597_v18  ;;  %529 = vmatmul.f32.gmra.mxu3 %v1600_v19  ;;  %v1107_v15 = vld [vmem:[%s1893_s1 + $0x280] sm:$0xff]  ;;  %v325_v23 = vsel %vm283_vm0, %v323_v20, %v324_v21  ;;  %v1141_v21 = vld [vmem:[%s1384_s4 + $0xb0] sm:$0x1] }
  0x47   : > { %855 = vmatpush.msrb.mxu2 %v1161_v24  ;;  %896 = vmatpush.msrb.mxu3 %v1177_v25  ;;  %v322_v22 = vsel %vm283_vm0, %v320_v16, %v321_v17  ;;  %v1723_v24 = vld [vmem:[%s1384_s4 + $0xc0] sm:$0xff]  ;;  %v1726_v25 = vld [vmem:[%s1384_s4 + $0xc8] sm:$0xff] }
  0x48   : > { %604 = vmatpush.msrb.mxu0 %v1097_v26  ;;  %645 = vmatpush.msrb.mxu1 %v1113_v27  ;;  %v247_v26 = vld [vmem:[%s1384_s4 + $0xe0] sm:$0xfe]  ;;  %v249_v27 = vld [vmem:[%s1384_s4 + $0xf0] sm:$0x1] }
  0x49   : > { %856 = vmatpush.msrb.mxu2 %v1160_v32  ;;  %897 = vmatpush.msrb.mxu3 %v1176_v33  ;;  %v326_v30 = vrot.slane %v247_v26, 1  ;;  %v327_v31 = vrot.slane %v249_v27, 1  ;;  %v329_v32 = vrot.slane %v248_v28, 1  ;;  %v330_v33 = vrot.slane %v250_v29, 1  ;;  %v1135_v10 = vld [vmem:[%s1384_s4 + $0x80] sm:$0xfe] }
  0x4a   : > { %605 = vmatpush.msrb.mxu0 %v1096_v36  ;;  %646 = vmatpush.msrb.mxu1 %v1112_v37  ;;  %v1139_v20 = vld [vmem:[%s1384_s4 + $0xa0] sm:$0xfe] }
  0x4b   : > { %857 = vmatpush.msrb.mxu2 %v1159_v38  ;;  %898 = vmatpush.msrb.mxu3 %v1175_v39  ;;  %v328_v36 = vsel %vm283_vm0, %v326_v30, %v327_v31  ;;  %v331_v37 = vsel %vm283_vm0, %v329_v32, %v330_v33  ;;  %v1737_v38 = vld [vmem:[%s1384_s4 + $0xe0] sm:$0xff]  ;;  %v1740_v39 = vld [vmem:[%s1384_s4 + $0xe8] sm:$0xff]  ;;  %v1145_v31 = vld [vmem:[%s1384_s4 + $0xd0] sm:$0x1] }
  0x4c   : > { %606 = vmatpush.msrb.mxu0 %v1095_v40  ;;  %647 = vmatpush.msrb.mxu1 %v1111_v41  ;;  %v1123_v40 = vld [vmem:[%s1384_s4 + $0x20] sm:$0xfe]  ;;  %v1125_v41 = vld [vmem:[%s1384_s4 + $0x30] sm:$0x1]  ;;  %v1144_v32 = vld [vmem:[%s1384_s4 + $0xc8] sm:$0xfe] }
  0x4d   : > { %409 = vmatmul.f32.gmra.mxu0 %v310_v42  ;;  %450 = vmatmul.f32.gmra.mxu1 %v313_v43  ;;  %v1124_v42 = vld [vmem:[%s1384_s4 + $0x28] sm:$0xfe]  ;;  %v1126_v43 = vld [vmem:[%s1384_s4 + $0x38] sm:$0x1]  ;;  %v749_v46 = vrot.slane %v1123_v40, 1  ;;  %v750_v47 = vrot.slane %v1125_v41, 1 }
  0x4e   : > { %491 = vmatmul.f32.gmra.mxu2 %v1647_v44  ;;  %532 = vmatmul.f32.gmra.mxu3 %v1650_v45  ;;  %v752_v48 = vrot.slane %v1124_v42, 1  ;;  %v753_v49 = vrot.slane %v1126_v43, 1  ;;  %v1143_v30 = vld [vmem:[%s1384_s4 + $0xc0] sm:$0xfe]  ;;  %v780_v33 = vrot.slane %v1145_v31, 1 }
  0x4f   : > { %858 = vmatpush.msrb.mxu2 %v1158_v50  ;;  %899 = vmatpush.msrb.mxu3 %v1174_v51  ;;  %v751_v50 = vsel %vm283_vm0, %v749_v46, %v750_v47  ;;  %v1147_v42 = vld [vmem:[%s1384_s4 + $0xe0] sm:$0xfe]  ;;  %v1149_v43 = vld [vmem:[%s1384_s4 + $0xf0] sm:$0x1]  ;;  %v1148_v46 = vld [vmem:[%s1384_s4 + $0xe8] sm:$0xfe] }
  0x50   : > { %607 = vmatpush.msrb.mxu0 %v1094_v52  ;;  %648 = vmatpush.msrb.mxu1 %v1110_v53  ;;  %v754_v51 = vsel %vm283_vm0, %v752_v48, %v753_v49  ;;  %v1127_v52 = vld [vmem:[%s1384_s4 + $0x40] sm:$0xfe]  ;;  %v1129_v53 = vld [vmem:[%s1384_s4 + $0x50] sm:$0x1]  ;;  %v786_v47 = vrot.slane %v1149_v43, 1  ;;  %v788_v48 = vrot.slane %v1148_v46, 1 }
  0x51   : > { %859 = vmatpush.msrb.mxu2 %v1157_v60  ;;  %900 = vmatpush.msrb.mxu3 %v1173_v61  ;;  %v755_v56 = vrot.slane %v1127_v52, 1  ;;  %v756_v57 = vrot.slane %v1129_v53, 1  ;;  %v758_v60 = vrot.slane %v1128_v54, 1  ;;  %v759_v61 = vrot.slane %v1130_v55, 1  ;;  %v1151_v52 = vld [vmem:[%s1384_s4 + $0x100] sm:$0xfe] }
  0x52   : > { %608 = vmatpush.msrb.mxu0 %v1093_v62  ;;  %649 = vmatpush.msrb.mxu1 %v1109_v63  ;;  %v1153_v53 = vld [vmem:[%s1384_s4 + $0x110] sm:$0x1]  ;;  %v1152_v54 = vld [vmem:[%s1384_s4 + $0x108] sm:$0xfe]  ;;  %v1154_v55 = vld [vmem:[%s1384_s4 + $0x118] sm:$0x1] }
  0x53   : > { %860 = vmatpush.msrb.mxu2 %v1156_v0  ;;  %901 = vmatpush.msrb.mxu3 %v1172_v1  ;;  %v757_v62 = vsel %vm283_vm0, %v755_v56, %v756_v57  ;;  %v760_v63 = vsel %vm283_vm0, %v758_v60, %v759_v61  ;;  %v1131_v0 = vld [vmem:[%s1384_s4 + $0x60] sm:$0xfe]  ;;  %v1133_v1 = vld [vmem:[%s1384_s4 + $0x70] sm:$0x1]  ;;  %v794_v56 = vrot.slane %v1152_v54, 1  ;;  %v795_v57 = vrot.slane %v1154_v55, 1 }
  0x54   : > { %609 = vmatpush.msrb.mxu0 %v1092_v2  ;;  %650 = vmatpush.msrb.mxu1 %v1108_v3  ;;  %v1132_v2 = vld [vmem:[%s1384_s4 + $0x68] sm:$0xfe]  ;;  %v762_v3 = vrot.slane %v1133_v1, 1  ;;  %v1089_v60 = vld [vmem:[%s1384_s4 + $0x100] sm:$0xff] }
  0x55   : > { %412 = vmatmul.f32.gmra.mxu0 %v316_v4  ;;  %453 = vmatmul.f32.gmra.mxu1 %v319_v5  ;;  %v764_v4 = vrot.slane %v1132_v2, 1  ;;  %v1090_v61 = vld [vmem:[%s1384_s4 + $0x108] sm:$0xff]  ;;  %v1847_v43 = vld [vmem:[%s1894_s2] ss:$0 sm:$0xff] }
  0x56   : > { %494 = vmatmul.f32.gmra.mxu2 %v1697_v6  ;;  %535 = vmatmul.f32.gmra.mxu3 %v1700_v7 }
  0x57   : > { %861 = vmatpush.msrb.mxu2 %v1155_v12  ;;  %902 = vmatpush.msrb.mxu3 %v1171_v13  ;;  %v1136_v12 = vld [vmem:[%s1384_s4 + $0x88] sm:$0xfe]  ;;  %v768_v13 = vrot.slane %v1137_v11, 1 }
  0x58   : > { %610 = vmatpush.msrb.mxu0 %v1091_v14  ;;  %651 = vmatpush.msrb.mxu1 %v1107_v15  ;;  %v770_v14 = vrot.slane %v1136_v12, 1 }
  0x5d   : > { %415 = vmatmul.f32.gmra.mxu0 %v322_v22  ;;  %456 = vmatmul.f32.gmra.mxu1 %v325_v23  ;;  %v1140_v22 = vld [vmem:[%s1384_s4 + $0xa8] sm:$0xfe]  ;;  %v774_v23 = vrot.slane %v1141_v21, 1 }
  0x5e   : > { %497 = vmatmul.f32.gmra.mxu2 %v1723_v24  ;;  %538 = vmatmul.f32.gmra.mxu3 %v1726_v25  ;;  %v776_v26 = vrot.slane %v1140_v22, 1 }
  0x65   : > { %418 = vmatmul.f32.gmra.mxu0 %v328_v36  ;;  %459 = vmatmul.f32.gmra.mxu1 %v331_v37  ;;  %v782_v36 = vrot.slane %v1144_v32, 1 }
  0x66   : > { %500 = vmatmul.f32.gmra.mxu2 %v1737_v38  ;;  %541 = vmatmul.f32.gmra.mxu3 %v1740_v39 }
  0x6d   : > { %611 = vmatmul.f32.vlgmr.msrb.gmra.mxu0 %v1497_v34  ;;  %652 = vmatmul.f32.vlgmr.msrb.gmra.mxu1 %v1500_v35  ;;  %v1134_v34 = vld [vmem:[%s1384_s4 + $0x78] sm:$0x1]  ;;  %v761_v35 = vrot.slane %v1131_v0, 1 }
  0x6e   : > { %862 = vmatmul.f32.vlgmr.msrb.gmra.mxu2 %v751_v50  ;;  %903 = vmatmul.f32.vlgmr.msrb.gmra.mxu3 %v754_v51  ;;  %v765_v5 = vrot.slane %v1134_v34, 1 }
  0x6f   : > { %v763_v8 = vsel %vm283_vm0, %v761_v35, %v762_v3 }
  0x70   : > { %v766_v9 = vsel %vm283_vm0, %v764_v4, %v765_v5 }
  0x75   : > { %614 = vmatmul.f32.gmra.mxu0 %v1547_v58  ;;  %655 = vmatmul.f32.gmra.mxu1 %v1550_v59  ;;  %v1138_v58 = vld [vmem:[%s1384_s4 + $0x98] sm:$0x1]  ;;  %v767_v59 = vrot.slane %v1135_v10, 1 }
  0x76   : > { %865 = vmatmul.f32.gmra.mxu2 %v757_v62  ;;  %906 = vmatmul.f32.gmra.mxu3 %v760_v63  ;;  %v771_v15 = vrot.slane %v1138_v58, 1  ;;  %v796_v63 = vsel %vm283_vm0, %v794_v56, %v795_v57 }
  0x77   : > { %v769_v16 = vsel %vm283_vm0, %v767_v59, %v768_v13 }
  0x78   : > { %v772_v17 = vsel %vm283_vm0, %v770_v14, %v771_v15 }
  0x7d   : > { %617 = vmatmul.f32.gmra.mxu0 %v1597_v18  ;;  %658 = vmatmul.f32.gmra.mxu1 %v1600_v19  ;;  %v1142_v18 = vld [vmem:[%s1384_s4 + $0xb8] sm:$0x1]  ;;  %v773_v19 = vrot.slane %v1139_v20, 1 }
  0x7e   : > { %868 = vmatmul.f32.gmra.mxu2 %v763_v8  ;;  %909 = vmatmul.f32.gmra.mxu3 %v766_v9  ;;  %v777_v27 = vrot.slane %v1142_v18, 1 }
  0x7f   : > { %v775_v28 = vsel %vm283_vm0, %v773_v19, %v774_v23 }
  0x80   : > { %v778_v29 = vsel %vm283_vm0, %v776_v26, %v777_v27 }
  0x85   : > { %620 = vmatmul.f32.gmra.mxu0 %v1647_v44  ;;  %661 = vmatmul.f32.gmra.mxu1 %v1650_v45  ;;  %v1146_v44 = vld [vmem:[%s1384_s4 + $0xd8] sm:$0x1]  ;;  %v779_v45 = vrot.slane %v1143_v30, 1 }
  0x86   : > { %871 = vmatmul.f32.gmra.mxu2 %v769_v16  ;;  %912 = vmatmul.f32.gmra.mxu3 %v772_v17  ;;  %v783_v37 = vrot.slane %v1146_v44, 1 }
  0x87   : > { %v781_v40 = vsel %vm283_vm0, %v779_v45, %v780_v33 }
  0x88   : > { %v784_v41 = vsel %vm283_vm0, %v782_v36, %v783_v37 }
  0x8d   : > { %623 = vmatmul.f32.gmra.mxu0 %v1697_v6  ;;  %664 = vmatmul.f32.gmra.mxu1 %v1700_v7  ;;  %v1150_v6 = vld [vmem:[%s1384_s4 + $0xf8] sm:$0x1]  ;;  %v785_v7 = vrot.slane %v1147_v42, 1 }
  0x8e   : > { %874 = vmatmul.f32.gmra.mxu2 %v775_v28  ;;  %915 = vmatmul.f32.gmra.mxu3 %v778_v29  ;;  %v789_v49 = vrot.slane %v1150_v6, 1 }
  0x8f   : > { %v787_v50 = vsel %vm283_vm0, %v785_v7, %v786_v47 }
  0x90   : > { %v790_v51 = vsel %vm283_vm0, %v788_v48, %v789_v49 }
  0x95   : > { %626 = vmatmul.f32.gmra.mxu0 %v1723_v24  ;;  %667 = vmatmul.f32.gmra.mxu1 %v1726_v25  ;;  %v791_v24 = vrot.slane %v1151_v52, 1  ;;  %v792_v25 = vrot.slane %v1153_v53, 1 }
  0x96   : > { %877 = vmatmul.f32.gmra.mxu2 %v781_v40  ;;  %918 = vmatmul.f32.gmra.mxu3 %v784_v41 }
  0x97   : > { %v793_v62 = vsel %vm283_vm0, %v791_v24, %v792_v25 }
  0x9d   : > { %629 = vmatmul.f32.gmra.mxu0 %v1737_v38  ;;  %670 = vmatmul.f32.gmra.mxu1 %v1740_v39 }
  0x9e   : > { %880 = vmatmul.f32.gmra.mxu2 %v787_v50  ;;  %921 = vmatmul.f32.gmra.mxu3 %v790_v51 }
  0xa5   : > { %632 = vmatmul.f32.gmra.mxu0 %v1089_v60  ;;  %673 = vmatmul.f32.gmra.mxu1 %v1090_v61 }
  0xa6   : > { %883 = vmatmul.f32.gmra.mxu2 %v793_v62  ;;  %924 = vmatmul.f32.gmra.mxu3 %v796_v63 }
  0xa9   : > { %v398_v0 = vpop.f32.mrf.mxu0 }
  0xaa   : > { %v439_v38 = vpop.f32.mrf.mxu1 }
  0xab   : > { %v440_v28 = vadd.f32 %v439_v38, %v398_v0 }
  0xb1   : > { %v480_v1 = vpop.f32.mrf.mxu2  ;;  %v521_v39 = vpop.f32.mrf.mxu3 }
  0xb2   : > { %v401_v2 = vpop.f32.mrf.mxu0  ;;  %v442_v34 = vpop.f32.mrf.mxu1  ;;  %v481_v44 = vadd.f32 %v480_v1, %v440_v28 }
  0xb3   : > { %v443_v36 = vadd.f32 %v442_v34, %v401_v2 }
  0xb4   : > { %v522_v33 = vadd.f32 %v521_v39, %v481_v44 }
  0xb9   : > { %v483_v35 = vpop.f32.mrf.mxu2  ;;  %v524_v3 = vpop.f32.mrf.mxu3 }
  0xba   : > { %v404_v4 = vpop.f32.mrf.mxu0  ;;  %v445_v5 = vpop.f32.mrf.mxu1  ;;  %v484_v7 = vadd.f32 %v483_v35, %v443_v36 }
  0xbb   : > { %v446_v51 = vadd.f32 %v445_v5, %v404_v4 }
  0xbc   : > { %v525_v50 = vadd.f32 %v524_v3, %v484_v7 }
  0xc1   : > { %v486_v8 = vpop.f32.mrf.mxu2  ;;  %v527_v9 = vpop.f32.mrf.mxu3 }
  0xc2   : > { %v407_v10 = vpop.f32.mrf.mxu0  ;;  %v448_v11 = vpop.f32.mrf.mxu1  ;;  %v487_v60 = vadd.f32 %v486_v8, %v446_v51 }
  0xc3   : > { %v449_v38 = vadd.f32 %v448_v11, %v407_v10 }
  0xc4   : > { %v528_v0 = vadd.f32 %v527_v9, %v487_v60 }
  0xc9   : > { %v1808_v12 = vpop.f32.mrf.mxu2  ;;  %v1810_v58 = vpop.f32.mrf.mxu3 }
  0xca   : > { %v1812_v59 = vpop.f32.mrf.mxu0  ;;  %v1814_v13 = vpop.f32.mrf.mxu1  ;;  %v490_v28 = vadd.f32 %v1808_v12, %v449_v38 }
  0xcb   : > { %v452_v10 = vadd.f32 %v1814_v13, %v1812_v59 }
  0xcc   : > { %v531_v9 = vadd.f32 %v1810_v58, %v490_v28 }
  0xd1   : > { %v1816_v14 = vpop.f32.mrf.mxu2  ;;  %v1818_v15 = vpop.f32.mrf.mxu3 }
  0xd2   : > { %v1820_v16 = vpop.f32.mrf.mxu0  ;;  %v1822_v17 = vpop.f32.mrf.mxu1  ;;  %v493_v12 = vadd.f32 %v1816_v14, %v452_v10 }
  0xd3   : > { %v455_v59 = vadd.f32 %v1822_v17, %v1820_v16 }
  0xd9   : > { %v1824_v20 = vpop.f32.mrf.mxu2  ;;  %v1826_v21 = vpop.f32.mrf.mxu3 }
  0xda   : > { %v1828_v22 = vpop.f32.mrf.mxu0  ;;  %v1830_v18 = vpop.f32.mrf.mxu1  ;;  %v496_v14 = vadd.f32 %v1824_v20, %v455_v59 }
  0xdb   : > { %v458_v16 = vadd.f32 %v1830_v18, %v1828_v22 }
  0xe1   : > { %v1832_v19 = vpop.f32.mrf.mxu2  ;;  %v1834_v23 = vpop.f32.mrf.mxu3 }
  0xe2   : > { %v1836_v26 = vpop.f32.mrf.mxu0  ;;  %v1838_v27 = vpop.f32.mrf.mxu1  ;;  %v499_v20 = vadd.f32 %v1832_v19, %v458_v16 }
  0xe3   : > { %v461_v22 = vadd.f32 %v1838_v27, %v1836_v26 }
  0xe4   : > { %v540_v38 = vadd.f32 %v1834_v23, %v499_v20 }
  0xe9   : > { %v1840_v29 = vpop.f32.mrf.mxu2  ;;  %v1842_v30 = vpop.f32.mrf.mxu3 }
  0xea   : > { %v612_v31 = vpop.f32.mrf.mxu0  ;;  %v653_v32 = vpop.f32.mrf.mxu1 }
  0xeb   : > { %v654_v45 = vadd.f32 %v653_v32, %v612_v31 }
  0xed   : > { %v677_v41 = vadd.f32 %v654_v45, %v522_v33 }
  0xf1   : > { %v863_v37 = vpop.f32.mrf.mxu2  ;;  %v904_v40 = vpop.f32.mrf.mxu3 }
  0xf2   : > { %v905_v42 = vadd.f32 %v904_v40, %v863_v37  ;;  %v615_v46 = vpop.f32.mrf.mxu0  ;;  %v656_v6 = vpop.f32.mrf.mxu1 }
  0xf3   : > { %v657_v49 = vadd.f32 %v656_v6, %v615_v46  ;;  %v534_v6 = vadd.f32 %v1818_v15, %v493_v12 }
  0xf4   : > { %v928_v47 = vadd.f32 %v905_v42, %v677_v41 }
  0xf5   : > { %v678_v24 = vadd.f32 %v657_v49, %v525_v50 }
  0xf6   : > { %v940_v48 = vadd.f32 %v1847_v43, %v928_v47 }
  0xf8   : > { %vm948_vm1 = vcmp.ge.f32.partialorder %v940_v48, 0.0  ;;  %v956_v52 = vmul.f32 0.2, %v940_v48 }
  0xf9   : > { %v866_v53 = vpop.f32.mrf.mxu2  ;;  %v907_v54 = vpop.f32.mrf.mxu3 }
  0xfa   : > { %v964_v55 = vsel %vm948_vm1, %v940_v48, %v956_v52  ;;  %v908_v25 = vadd.f32 %v907_v54, %v866_v53  ;;  %v618_v56 = vpop.f32.mrf.mxu0  ;;  %v659_v57 = vpop.f32.mrf.mxu1 }
  0xfb   : > { %972 = vst [vmem:[%s1854_s9] sm:$0xff] %v964_v55  ;;  %v660_v63 = vadd.f32 %v659_v57, %v618_v56  ;;  %v537_v55 = vadd.f32 %v1826_v21, %v496_v14 }
  0xfc   : > { %v929_v61 = vadd.f32 %v908_v25, %v678_v24 }
  0xfd   : > { %v679_v35 = vadd.f32 %v660_v63, %v528_v0 }
  0xfe   : > { %v941_v62 = vadd.f32 %v1847_v43, %v929_v61 }
 0x100   : > { %vm949_vm2 = vcmp.ge.f32.partialorder %v941_v62, 0.0  ;;  %v957_v1 = vmul.f32 0.2, %v941_v62 }
 0x101   : > { %v869_v39 = vpop.f32.mrf.mxu2  ;;  %v910_v2 = vpop.f32.mrf.mxu3 }
 0x102   : > { %v965_v34 = vsel %vm949_vm2, %v941_v62, %v957_v1  ;;  %v911_v3 = vadd.f32 %v910_v2, %v869_v39  ;;  %v621_v4 = vpop.f32.mrf.mxu0  ;;  %v662_v5 = vpop.f32.mrf.mxu1 }
 0x103   : > { %973 = vst [vmem:[%s1854_s9 + $0x8] sm:$0xff] %v965_v34  ;;  %v663_v32 = vadd.f32 %v662_v5, %v621_v4  ;;  %v502_v4 = vadd.f32 %v1840_v29, %v461_v22 }
 0x104   : > { %v930_v8 = vadd.f32 %v911_v3, %v679_v35 }
 0x105   : > { %v680_v36 = vadd.f32 %v663_v32, %v531_v9  ;;  %v543_v26 = vadd.f32 %v1842_v30, %v502_v4 }
 0x106   : > { %v942_v31 = vadd.f32 %v1847_v43, %v930_v8 }
 0x108   : > { %vm950_vm3 = vcmp.ge.f32.partialorder %v942_v31, 0.0  ;;  %v958_v11 = vmul.f32 0.2, %v942_v31 }
 0x109   : > { %v872_v44 = vpop.f32.mrf.mxu2  ;;  %v913_v45 = vpop.f32.mrf.mxu3 }
 0x10a   : > { %v966_v33 = vsel %vm950_vm3, %v942_v31, %v958_v11  ;;  %v914_v37 = vadd.f32 %v913_v45, %v872_v44  ;;  %v624_v40 = vpop.f32.mrf.mxu0  ;;  %v665_v41 = vpop.f32.mrf.mxu1 }
 0x10b   : > { %974 = vst [vmem:[%s1854_s9 + $0x10] sm:$0xff] %v966_v33  ;;  %v666_v58 = vadd.f32 %v665_v41, %v624_v40 }
 0x10c   : > { %v931_v42 = vadd.f32 %v914_v37, %v680_v36 }
 0x10d   : > { %v681_v49 = vadd.f32 %v666_v58, %v534_v6 }
 0x10e   : > { %v943_v46 = vadd.f32 %v1847_v43, %v931_v42 }
 0x110   : > { %vm951_vm4 = vcmp.ge.f32.partialorder %v943_v46, 0.0  ;;  %v959_v13 = vmul.f32 0.2, %v943_v46 }
 0x111   : > { %v875_v7 = vpop.f32.mrf.mxu2  ;;  %v916_v47 = vpop.f32.mrf.mxu3 }
 0x112   : > { %v967_v48 = vsel %vm951_vm4, %v943_v46, %v959_v13  ;;  %v917_v50 = vadd.f32 %v916_v47, %v875_v7  ;;  %v627_v51 = vpop.f32.mrf.mxu0  ;;  %v668_v52 = vpop.f32.mrf.mxu1 }
 0x113   : > { %975 = vst [vmem:[%s1854_s9 + $0x18] sm:$0xff] %v967_v48  ;;  %v669_v15 = vadd.f32 %v668_v52, %v627_v51 }
 0x114   : > { %v932_v53 = vadd.f32 %v917_v50, %v681_v49 }
 0x115   : > { %v682_v57 = vadd.f32 %v669_v15, %v537_v55 }
 0x116   : > { %v944_v54 = vadd.f32 %v1847_v43, %v932_v53 }
 0x118   : > { %vm952_vm5 = vcmp.ge.f32.partialorder %v944_v54, 0.0  ;;  %v960_v17 = vmul.f32 0.2, %v944_v54 }
 0x119   : > { %v878_v24 = vpop.f32.mrf.mxu2  ;;  %v919_v25 = vpop.f32.mrf.mxu3 }
 0x11a   : > { %v968_v56 = vsel %vm952_vm5, %v944_v54, %v960_v17  ;;  %v920_v60 = vadd.f32 %v919_v25, %v878_v24  ;;  %v630_v61 = vpop.f32.mrf.mxu0  ;;  %v671_v62 = vpop.f32.mrf.mxu1 }
 0x11b   : > { %976 = vst [vmem:[%s1854_s9 + $0x20] sm:$0xff] %v968_v56  ;;  %v672_v21 = vadd.f32 %v671_v62, %v630_v61 }
 0x11c   : > { %v933_v63 = vadd.f32 %v920_v60, %v682_v57 }
 0x11d   : > { %v683_v34 = vadd.f32 %v672_v21, %v540_v38 }
 0x11e   : > { %v945_v0 = vadd.f32 %v1847_v43, %v933_v63 }
 0x120   : > { %vm953_vm6 = vcmp.ge.f32.partialorder %v945_v0, 0.0  ;;  %v961_v18 = vmul.f32 0.2, %v945_v0 }
 0x121   : > { %v881_v1 = vpop.f32.mrf.mxu2  ;;  %v922_v39 = vpop.f32.mrf.mxu3 }
 0x122   : > { %v969_v2 = vsel %vm953_vm6, %v945_v0, %v961_v18  ;;  %v923_v35 = vadd.f32 %v922_v39, %v881_v1  ;;  %v633_v3 = vpop.f32.mrf.mxu0  ;;  %v674_v19 = vpop.f32.mrf.mxu1 }
 0x123   : > { %977 = vst [vmem:[%s1854_s9 + $0x28] sm:$0xff] %v969_v2  ;;  %v675_v23 = vadd.f32 %v674_v19, %v633_v3 }
 0x124   : > { %v934_v5 = vadd.f32 %v923_v35, %v683_v34 }
 0x125   : > { %v684_v9 = vadd.f32 %v675_v23, %v543_v26 }
 0x126   : > { %v946_v28 = vadd.f32 %v1847_v43, %v934_v5 }
 0x128   : > { %vm954_vm7 = vcmp.ge.f32.partialorder %v946_v28, 0.0  ;;  %v962_v27 = vmul.f32 0.2, %v946_v28 }
 0x129   : > { %v884_v8 = vpop.f32.mrf.mxu2  ;;  %v925_v31 = vpop.f32.mrf.mxu3 }
 0x12a   : > { %v970_v32 = vsel %vm954_vm7, %v946_v28, %v962_v27  ;;  %v926_v10 = vadd.f32 %v925_v31, %v884_v8 }
 0x12b   : > { %978 = vst [vmem:[%s1854_s9 + $0x30] sm:$0xff] %v970_v32 }
 0x12c   : > { %v935_v11 = vadd.f32 %v926_v10, %v684_v9 }
 0x12e   : > { %v947_v44 = vadd.f32 %v1847_v43, %v935_v11 }
 0x130   : > { %vm955_vm8 = vcmp.ge.f32.partialorder %v947_v44, 0.0  ;;  %v963_v29 = vmul.f32 0.2, %v947_v44 }
 0x132   : > { %v971_v45 = vsel %vm955_vm8, %v947_v44, %v963_v29 }
 0x133   : > { %979 = vst [vmem:[%s1854_s9 + $0x38] sm:$0xff] %v971_v45 }
 0x134 PF: > { %s13_s12 = sadd.s32 1, %s1206_s12  }
 0x135   : > { %p10_p4 = scmp.ge.s32.totalorder %s13_s12, 4  }
 0x137   :  { %12 = sbr.rel (!%p10_p4) target bundleno = 1 (0x1), region = 66 }

// kernel: accnn_discriminator_forward.7
= control target key start
LH: loop header
LB: loop body
LE: loop exit
PB: predicated region body
PF: predicated region fallthrough
CT: control target
= control target key end

     0   :  { %s2967_s0 = inlined_call_operand.vmem [shape: f32[2,4096], index: 0, kind: input, shape index: {}]   ;;  %s2968_s1 = inlined_call_operand.vmem [shape: f32[4096,11], index: 1, kind: input, shape index: {}]   ;;  %s2969_s2 = inlined_call_operand.vmem [shape: f32[2,1], index: 2, kind: output, shape index: {0}]   ;;  %s2970_s3 = inlined_call_operand.hbm [shape: f32[2,10], index: 3, kind: output, shape index: {1}]  }
   0x1   :  { %v37_v0 = vld [vmem:[%s2968_s1 + $0x78] sm:$0xff]  ;;  %v36_v2 = vld [vmem:[%s2968_s1 + $0x70] sm:$0xff]  ;;  %v35_v6 = vld [vmem:[%s2968_s1 + $0x68] sm:$0xff] }
   0x2   :  { %v69_v1 = vld [vmem:[%s2968_s1 + $0x178] sm:$0xff]  ;;  %615 = vmatpush.msra.mxu0 %v37_v0  ;;  %v68_v4 = vld [vmem:[%s2968_s1 + $0x170] sm:$0xff]  ;;  %v67_v8 = vld [vmem:[%s2968_s1 + $0x168] sm:$0xff] }
   0x3   :  { %655 = vmatpush.msra.mxu2 %v69_v1  ;;  %v53_v3 = vld [vmem:[%s2968_s1 + $0xf8] sm:$0xff]  ;;  %v52_v7 = vld [vmem:[%s2968_s1 + $0xf0] sm:$0xff]  ;;  %v51_v10 = vld [vmem:[%s2968_s1 + $0xe8] sm:$0xff] }
   0x4   :  { %v85_v5 = vld [vmem:[%s2968_s1 + $0x1f8] sm:$0xff]  ;;  %635 = vmatpush.msra.mxu1 %v53_v3  ;;  %616 = vmatpush.msra.mxu0 %v36_v2  ;;  %v84_v9 = vld [vmem:[%s2968_s1 + $0x1f0] sm:$0xff]  ;;  %v34_v11 = vld [vmem:[%s2968_s1 + $0x60] sm:$0xff] }
   0x5   :  { %675 = vmatpush.msra.mxu3 %v85_v5  ;;  %656 = vmatpush.msra.mxu2 %v68_v4  ;;  %v66_v12 = vld [vmem:[%s2968_s1 + $0x160] sm:$0xff]  ;;  %v83_v13 = vld [vmem:[%s2968_s1 + $0x1e8] sm:$0xff]  ;;  %v33_v16 = vld [vmem:[%s2968_s1 + $0x58] sm:$0xff] }
   0x6   :  { %636 = vmatpush.msra.mxu1 %v52_v7  ;;  %617 = vmatpush.msra.mxu0 %v35_v6  ;;  %v50_v14 = vld [vmem:[%s2968_s1 + $0xe0] sm:$0xff]  ;;  %v65_v17 = vld [vmem:[%s2968_s1 + $0x158] sm:$0xff]  ;;  %v32_v20 = vld [vmem:[%s2968_s1 + $0x50] sm:$0xff] }
   0x7   :  { %676 = vmatpush.msra.mxu3 %v84_v9  ;;  %657 = vmatpush.msra.mxu2 %v67_v8  ;;  %v82_v15 = vld [vmem:[%s2968_s1 + $0x1e0] sm:$0xff]  ;;  %v49_v18 = vld [vmem:[%s2968_s1 + $0xd8] sm:$0xff]  ;;  %v64_v21 = vld [vmem:[%s2968_s1 + $0x150] sm:$0xff] }
   0x8   :  { %637 = vmatpush.msra.mxu1 %v51_v10  ;;  %618 = vmatpush.msra.mxu0 %v34_v11  ;;  %v81_v19 = vld [vmem:[%s2968_s1 + $0x1d8] sm:$0xff]  ;;  %v48_v22 = vld [vmem:[%s2968_s1 + $0xd0] sm:$0xff]  ;;  %v31_v24 = vld [vmem:[%s2968_s1 + $0x48] sm:$0xff] }
   0x9   :  { %677 = vmatpush.msra.mxu3 %v83_v13  ;;  %658 = vmatpush.msra.mxu2 %v66_v12  ;;  %v80_v23 = vld [vmem:[%s2968_s1 + $0x1d0] sm:$0xff]  ;;  %v63_v25 = vld [vmem:[%s2968_s1 + $0x148] sm:$0xff]  ;;  %v30_v28 = vld [vmem:[%s2968_s1 + $0x40] sm:$0xff] }
   0xa   :  { %638 = vmatpush.msra.mxu1 %v50_v14  ;;  %619 = vmatpush.msra.mxu0 %v33_v16  ;;  %v47_v26 = vld [vmem:[%s2968_s1 + $0xc8] sm:$0xff]  ;;  %v62_v29 = vld [vmem:[%s2968_s1 + $0x140] sm:$0xff]  ;;  %v29_v32 = vld [vmem:[%s2968_s1 + $0x38] sm:$0xff] }
   0xb   :  { %678 = vmatpush.msra.mxu3 %v82_v15  ;;  %659 = vmatpush.msra.mxu2 %v65_v17  ;;  %v79_v27 = vld [vmem:[%s2968_s1 + $0x1c8] sm:$0xff]  ;;  %v46_v30 = vld [vmem:[%s2968_s1 + $0xc0] sm:$0xff]  ;;  %v61_v33 = vld [vmem:[%s2968_s1 + $0x138] sm:$0xff] }
   0xc   :  { %639 = vmatpush.msra.mxu1 %v49_v18  ;;  %620 = vmatpush.msra.mxu0 %v32_v20  ;;  %v78_v31 = vld [vmem:[%s2968_s1 + $0x1c0] sm:$0xff]  ;;  %v45_v34 = vld [vmem:[%s2968_s1 + $0xb8] sm:$0xff]  ;;  %v28_v36 = vld [vmem:[%s2968_s1 + $0x30] sm:$0xff] }
   0xd   :  { %679 = vmatpush.msra.mxu3 %v81_v19  ;;  %660 = vmatpush.msra.mxu2 %v64_v21  ;;  %v77_v35 = vld [vmem:[%s2968_s1 + $0x1b8] sm:$0xff]  ;;  %v60_v37 = vld [vmem:[%s2968_s1 + $0x130] sm:$0xff]  ;;  %v27_v40 = vld [vmem:[%s2968_s1 + $0x28] sm:$0xff] }
   0xe   :  { %640 = vmatpush.msra.mxu1 %v48_v22  ;;  %621 = vmatpush.msra.mxu0 %v31_v24  ;;  %v44_v38 = vld [vmem:[%s2968_s1 + $0xb0] sm:$0xff]  ;;  %v59_v41 = vld [vmem:[%s2968_s1 + $0x128] sm:$0xff]  ;;  %v26_v44 = vld [vmem:[%s2968_s1 + $0x20] sm:$0xff] }
   0xf   :  { %680 = vmatpush.msra.mxu3 %v80_v23  ;;  %661 = vmatpush.msra.mxu2 %v63_v25  ;;  %v76_v39 = vld [vmem:[%s2968_s1 + $0x1b0] sm:$0xff]  ;;  %v43_v42 = vld [vmem:[%s2968_s1 + $0xa8] sm:$0xff]  ;;  %v58_v45 = vld [vmem:[%s2968_s1 + $0x120] sm:$0xff] }
  0x10   :  { %641 = vmatpush.msra.mxu1 %v47_v26  ;;  %622 = vmatpush.msra.mxu0 %v30_v28  ;;  %v75_v43 = vld [vmem:[%s2968_s1 + $0x1a8] sm:$0xff]  ;;  %v42_v46 = vld [vmem:[%s2968_s1 + $0xa0] sm:$0xff]  ;;  %v25_v48 = vld [vmem:[%s2968_s1 + $0x18] sm:$0xff] }
  0x11   :  { %681 = vmatpush.msra.mxu3 %v79_v27  ;;  %662 = vmatpush.msra.mxu2 %v62_v29  ;;  %v74_v47 = vld [vmem:[%s2968_s1 + $0x1a0] sm:$0xff]  ;;  %v57_v49 = vld [vmem:[%s2968_s1 + $0x118] sm:$0xff]  ;;  %v24_v52 = vld [vmem:[%s2968_s1 + $0x10] sm:$0xff] }
  0x12   :  { %642 = vmatpush.msra.mxu1 %v46_v30  ;;  %623 = vmatpush.msra.mxu0 %v29_v32  ;;  %v41_v50 = vld [vmem:[%s2968_s1 + $0x98] sm:$0xff]  ;;  %v56_v53 = vld [vmem:[%s2968_s1 + $0x110] sm:$0xff]  ;;  %v23_v56 = vld [vmem:[%s2968_s1 + $0x8] sm:$0xff] }
  0x13   :  { %682 = vmatpush.msra.mxu3 %v78_v31  ;;  %663 = vmatpush.msra.mxu2 %v61_v33  ;;  %v73_v51 = vld [vmem:[%s2968_s1 + $0x198] sm:$0xff]  ;;  %v40_v54 = vld [vmem:[%s2968_s1 + $0x90] sm:$0xff]  ;;  %v55_v57 = vld [vmem:[%s2968_s1 + $0x108] sm:$0xff] }
  0x14   :  { %643 = vmatpush.msra.mxu1 %v45_v34  ;;  %624 = vmatpush.msra.mxu0 %v28_v36  ;;  %v72_v55 = vld [vmem:[%s2968_s1 + $0x190] sm:$0xff]  ;;  %v39_v58 = vld [vmem:[%s2968_s1 + $0x88] sm:$0xff]  ;;  %v22_v60 = vld [vmem:[%s2968_s1] sm:$0xff] }
  0x15   :  { %683 = vmatpush.msra.mxu3 %v77_v35  ;;  %664 = vmatpush.msra.mxu2 %v60_v37  ;;  %v71_v59 = vld [vmem:[%s2968_s1 + $0x188] sm:$0xff]  ;;  %v54_v61 = vld [vmem:[%s2968_s1 + $0x100] sm:$0xff]  ;;  %v101_v62 = vld [vmem:[%s2968_s1 + $0x278] sm:$0xff] }
  0x16   :  { %644 = vmatpush.msra.mxu1 %v44_v38  ;;  %625 = vmatpush.msra.mxu0 %v27_v40  ;;  %v133_v63 = vld [vmem:[%s2968_s1 + $0x378] sm:$0xff]  ;;  %v38_v0 = vld [vmem:[%s2968_s1 + $0x80] sm:$0xff]  ;;  %v100_v2 = vld [vmem:[%s2968_s1 + $0x270] sm:$0xff] }
  0x17   :  { %684 = vmatpush.msra.mxu3 %v76_v39  ;;  %665 = vmatpush.msra.mxu2 %v59_v41  ;;  %v70_v1 = vld [vmem:[%s2968_s1 + $0x180] sm:$0xff]  ;;  %v117_v3 = vld [vmem:[%s2968_s1 + $0x2f8] sm:$0xff]  ;;  %v132_v4 = vld [vmem:[%s2968_s1 + $0x370] sm:$0xff] }
  0x18   :  { %645 = vmatpush.msra.mxu1 %v43_v42  ;;  %626 = vmatpush.msra.mxu0 %v26_v44  ;;  %v149_v5 = vld [vmem:[%s2968_s1 + $0x3f8] sm:$0xff]  ;;  %v99_v6 = vld [vmem:[%s2968_s1 + $0x268] sm:$0xff]  ;;  %v116_v7 = vld [vmem:[%s2968_s1 + $0x2f0] sm:$0xff] }
  0x19   :  { %685 = vmatpush.msra.mxu3 %v75_v43  ;;  %666 = vmatpush.msra.mxu2 %v58_v45  ;;  %v131_v8 = vld [vmem:[%s2968_s1 + $0x368] sm:$0xff]  ;;  %v148_v9 = vld [vmem:[%s2968_s1 + $0x3f0] sm:$0xff]  ;;  %v98_v10 = vld [vmem:[%s2968_s1 + $0x260] sm:$0xff] }
  0x1a   :  { %646 = vmatpush.msra.mxu1 %v42_v46  ;;  %627 = vmatpush.msra.mxu0 %v25_v48  ;;  %v115_v11 = vld [vmem:[%s2968_s1 + $0x2e8] sm:$0xff]  ;;  %v130_v12 = vld [vmem:[%s2968_s1 + $0x360] sm:$0xff]  ;;  %v97_v14 = vld [vmem:[%s2968_s1 + $0x258] sm:$0xff] }
  0x1b   :  { %686 = vmatpush.msra.mxu3 %v74_v47  ;;  %667 = vmatpush.msra.mxu2 %v57_v49  ;;  %v147_v13 = vld [vmem:[%s2968_s1 + $0x3e8] sm:$0xff]  ;;  %v114_v15 = vld [vmem:[%s2968_s1 + $0x2e0] sm:$0xff]  ;;  %v129_v16 = vld [vmem:[%s2968_s1 + $0x358] sm:$0xff] }
  0x1c   :  { %647 = vmatpush.msra.mxu1 %v41_v50  ;;  %628 = vmatpush.msra.mxu0 %v24_v52  ;;  %v146_v17 = vld [vmem:[%s2968_s1 + $0x3e0] sm:$0xff]  ;;  %v96_v18 = vld [vmem:[%s2968_s1 + $0x250] sm:$0xff]  ;;  %v113_v19 = vld [vmem:[%s2968_s1 + $0x2d8] sm:$0xff] }
  0x1d   :  { %687 = vmatpush.msra.mxu3 %v73_v51  ;;  %668 = vmatpush.msra.mxu2 %v56_v53  ;;  %v128_v20 = vld [vmem:[%s2968_s1 + $0x350] sm:$0xff]  ;;  %v145_v21 = vld [vmem:[%s2968_s1 + $0x3d8] sm:$0xff]  ;;  %v14_v22 = vld [vmem:[%s2967_s0] sm:$0xff] }
  0x1e   :  { %648 = vmatpush.msra.mxu1 %v40_v54  ;;  %629 = vmatpush.msra.mxu0 %v23_v56  ;;  %v95_v23 = vld [vmem:[%s2968_s1 + $0x248] sm:$0xff]  ;;  %v112_v24 = vld [vmem:[%s2968_s1 + $0x2d0] sm:$0xff]  ;;  %542 = vst [vmem:[#allocation1] ss:$4 sm:$0xff] %v14_v22  ;;  %v94_v27 = vld [vmem:[%s2968_s1 + $0x240] sm:$0xff] }
  0x1f   :  { %688 = vmatpush.msra.mxu3 %v72_v55  ;;  %669 = vmatpush.msra.mxu2 %v55_v57  ;;  %v127_v25 = vld [vmem:[%s2968_s1 + $0x348] sm:$0xff]  ;;  %v144_v26 = vld [vmem:[%s2968_s1 + $0x3d0] sm:$0xff]  ;;  %v126_v29 = vld [vmem:[%s2968_s1 + $0x340] sm:$0xff] }
  0x20   :  { %649 = vmatpush.msra.mxu1 %v39_v58  ;;  %630 = vmatpush.msra.mxu0 %v22_v60  ;;  %v111_v28 = vld [vmem:[%s2968_s1 + $0x2c8] sm:$0xff]  ;;  %v93_v31 = vld [vmem:[%s2968_s1 + $0x238] sm:$0xff]  ;;  %v110_v32 = vld [vmem:[%s2968_s1 + $0x2c0] sm:$0xff] }
  0x21   :  { %689 = vmatpush.msra.mxu3 %v71_v59  ;;  %670 = vmatpush.msra.mxu2 %v54_v61  ;;  %v143_v30 = vld [vmem:[%s2968_s1 + $0x3c8] sm:$0xff]  ;;  %v125_v33 = vld [vmem:[%s2968_s1 + $0x338] sm:$0xff]  ;;  %v142_v34 = vld [vmem:[%s2968_s1 + $0x3c0] sm:$0xff] }
  0x22   :  { %695 = vmatpush.msrb.mxu0 %v101_v62  ;;  %650 = vmatpush.msra.mxu1 %v38_v0  ;;  %v92_v35 = vld [vmem:[%s2968_s1 + $0x230] sm:$0xff]  ;;  %v109_v36 = vld [vmem:[%s2968_s1 + $0x2b8] sm:$0xff]  ;;  %v15_v39 = vld [vmem:[%s2967_s0 + $0x8] sm:$0xff] }
  0x23   :  { %735 = vmatpush.msrb.mxu2 %v133_v63  ;;  %690 = vmatpush.msra.mxu3 %v70_v1  ;;  %v124_v37 = vld [vmem:[%s2968_s1 + $0x330] sm:$0xff]  ;;  %v141_v38 = vld [vmem:[%s2968_s1 + $0x3b8] sm:$0xff]  ;;  %v91_v40 = vld [vmem:[%s2968_s1 + $0x228] sm:$0xff]  ;;  %544 = vst [vmem:[#allocation1 + $0x20] ss:$4 sm:$0xff] %v15_v39 }
  0x24   :  { %696 = vmatpush.msrb.mxu0 %v100_v2  ;;  %715 = vmatpush.msrb.mxu1 %v117_v3  ;;  %v108_v41 = vld [vmem:[%s2968_s1 + $0x2b0] sm:$0xff]  ;;  %v123_v43 = vld [vmem:[%s2968_s1 + $0x328] sm:$0xff]  ;;  %v90_v49 = vld [vmem:[%s2968_s1 + $0x220] sm:$0xff] }
  0x25   :  { %736 = vmatpush.msrb.mxu2 %v132_v4  ;;  %755 = vmatpush.msrb.mxu3 %v149_v5  ;;  %v16_v42 = vld [vmem:[%s2967_s0 + $0x10] sm:$0xff]  ;;  %v1680_v45 = vld.sshfl [vmem:[#allocation1] sm:$0xff pattern:$0x73625140]  ;;  %v107_v50 = vld [vmem:[%s2968_s1 + $0x2a8] sm:$0xff] }
  0x26   :  { %697 = vmatpush.msrb.mxu0 %v99_v6  ;;  %716 = vmatpush.msrb.mxu1 %v116_v7  ;;  %v547_v44 = vld.sshfl [vmem:[#allocation1 + $0x10] sm:$0xff pattern:$0x73625140]  ;;  %v1682_v46 = vld.sshfl [vmem:[#allocation1 + $0x18] sm:$0xff pattern:$0x73625140] }
  0x27   :  { %737 = vmatpush.msrb.mxu2 %v131_v8  ;;  %756 = vmatpush.msrb.mxu3 %v148_v9  ;;  %v1684_v47 = vld.sshfl [vmem:[#allocation1 + $0x8] sm:$0xff pattern:$0x73625140]  ;;  %v140_v48 = vld [vmem:[%s2968_s1 + $0x3b0] sm:$0xff]  ;;  %v122_v51 = vld [vmem:[%s2968_s1 + $0x320] sm:$0xff] }
  0x28   :  { %698 = vmatpush.msrb.mxu0 %v98_v10  ;;  %717 = vmatpush.msrb.mxu1 %v115_v11  ;;  %553 = vst [vmem:[#allocation1] ss:$4 sm:$0xff] %v16_v42  ;;  %v139_v52 = vld [vmem:[%s2968_s1 + $0x3a8] sm:$0xff]  ;;  %v89_v53 = vld [vmem:[%s2968_s1 + $0x218] sm:$0xff]  ;;  %v106_v54 = vld [vmem:[%s2968_s1 + $0x2a0] sm:$0xff] }
  0x29   :  { %738 = vmatpush.msrb.mxu2 %v130_v12  ;;  %757 = vmatpush.msrb.mxu3 %v147_v13  ;;  %v121_v55 = vld [vmem:[%s2968_s1 + $0x318] sm:$0xff]  ;;  %v138_v56 = vld [vmem:[%s2968_s1 + $0x3a0] sm:$0xff]  ;;  %v88_v57 = vld [vmem:[%s2968_s1 + $0x210] sm:$0xff] }
  0x2a   :  { %699 = vmatpush.msrb.mxu0 %v97_v14  ;;  %718 = vmatpush.msrb.mxu1 %v114_v15  ;;  %v105_v58 = vld [vmem:[%s2968_s1 + $0x298] sm:$0xff]  ;;  %v1722_v60 = vld.sshfl [vmem:[#allocation1 + $0x30] sm:$0xff pattern:$0x73625140]  ;;  %v87_v2 = vld [vmem:[%s2968_s1 + $0x208] sm:$0xff] }
  0x2b   :  { %739 = vmatpush.msrb.mxu2 %v129_v16  ;;  %758 = vmatpush.msrb.mxu3 %v146_v17  ;;  %v17_v59 = vld [vmem:[%s2967_s0 + $0x18] sm:$0xff]  ;;  %v1724_v61 = vld.sshfl [vmem:[#allocation1 + $0x20] sm:$0xff pattern:$0x73625140]  ;;  %v120_v0 = vld [vmem:[%s2968_s1 + $0x310] sm:$0xff] }
  0x2c   :  { %700 = vmatpush.msrb.mxu0 %v96_v18  ;;  %719 = vmatpush.msrb.mxu1 %v113_v19  ;;  %v1726_v62 = vld.sshfl [vmem:[#allocation1 + $0x38] sm:$0xff pattern:$0x73625140]  ;;  %v1728_v63 = vld.sshfl [vmem:[#allocation1 + $0x28] sm:$0xff pattern:$0x73625140] }
  0x2d   :  { %740 = vmatpush.msrb.mxu2 %v128_v20  ;;  %759 = vmatpush.msrb.mxu3 %v145_v21  ;;  %v137_v1 = vld [vmem:[%s2968_s1 + $0x398] sm:$0xff]  ;;  %554 = vst [vmem:[#allocation1 + $0x20] ss:$4 sm:$0xff] %v17_v59  ;;  %v104_v3 = vld [vmem:[%s2968_s1 + $0x290] sm:$0xff]  ;;  %v119_v4 = vld [vmem:[%s2968_s1 + $0x308] sm:$0xff] }
  0x2e   :  { %701 = vmatpush.msrb.mxu0 %v95_v23  ;;  %720 = vmatpush.msrb.mxu1 %v112_v24  ;;  %v136_v5 = vld [vmem:[%s2968_s1 + $0x390] sm:$0xff]  ;;  %v86_v6 = vld [vmem:[%s2968_s1 + $0x200] sm:$0xff]  ;;  %v103_v7 = vld [vmem:[%s2968_s1 + $0x288] sm:$0xff] }
  0x2f   :  { %741 = vmatpush.msrb.mxu2 %v127_v25  ;;  %760 = vmatpush.msrb.mxu3 %v144_v26  ;;  %v118_v8 = vld [vmem:[%s2968_s1 + $0x300] sm:$0xff]  ;;  %v135_v9 = vld [vmem:[%s2968_s1 + $0x388] sm:$0xff]  ;;  %v165_v10 = vld [vmem:[%s2968_s1 + $0x478] sm:$0xff] }
  0x30   :  { %702 = vmatpush.msrb.mxu0 %v94_v27  ;;  %721 = vmatpush.msrb.mxu1 %v111_v28  ;;  %v197_v11 = vld [vmem:[%s2968_s1 + $0x578] sm:$0xff]  ;;  %v102_v12 = vld [vmem:[%s2968_s1 + $0x280] sm:$0xff]  ;;  %v164_v14 = vld [vmem:[%s2968_s1 + $0x470] sm:$0xff] }
  0x31   :  { %742 = vmatpush.msrb.mxu2 %v126_v29  ;;  %761 = vmatpush.msrb.mxu3 %v143_v30  ;;  %v134_v13 = vld [vmem:[%s2968_s1 + $0x380] sm:$0xff]  ;;  %v181_v15 = vld [vmem:[%s2968_s1 + $0x4f8] sm:$0xff]  ;;  %v196_v16 = vld [vmem:[%s2968_s1 + $0x570] sm:$0xff] }
  0x32   :  { %703 = vmatpush.msrb.mxu0 %v93_v31  ;;  %722 = vmatpush.msrb.mxu1 %v110_v32  ;;  %v213_v17 = vld [vmem:[%s2968_s1 + $0x5f8] sm:$0xff]  ;;  %v163_v18 = vld [vmem:[%s2968_s1 + $0x468] sm:$0xff]  ;;  %v180_v19 = vld [vmem:[%s2968_s1 + $0x4f0] sm:$0xff] }
  0x33   :  { %743 = vmatpush.msrb.mxu2 %v125_v33  ;;  %762 = vmatpush.msrb.mxu3 %v142_v34  ;;  %v195_v20 = vld [vmem:[%s2968_s1 + $0x568] sm:$0xff]  ;;  %v212_v21 = vld [vmem:[%s2968_s1 + $0x5f0] sm:$0xff]  ;;  %v162_v22 = vld [vmem:[%s2968_s1 + $0x460] sm:$0xff] }
  0x34   :  { %704 = vmatpush.msrb.mxu0 %v92_v35  ;;  %723 = vmatpush.msrb.mxu1 %v109_v36  ;;  %v179_v23 = vld [vmem:[%s2968_s1 + $0x4e8] sm:$0xff]  ;;  %v194_v24 = vld [vmem:[%s2968_s1 + $0x560] sm:$0xff]  ;;  %v1810_v26 = vld.sshfl [vmem:[#allocation1 + $0x10] sm:$0xff pattern:$0x73625140] }
  0x35   :  { %744 = vmatpush.msrb.mxu2 %v124_v37  ;;  %763 = vmatpush.msrb.mxu3 %v141_v38  ;;  %v1808_v25 = vld.sshfl [vmem:[#allocation1] sm:$0xff pattern:$0x73625140]  ;;  %v1812_v27 = vld.sshfl [vmem:[#allocation1 + $0x8] sm:$0xff pattern:$0x73625140] }
  0x36   :  { %705 = vmatpush.msrb.mxu0 %v91_v40  ;;  %724 = vmatpush.msrb.mxu1 %v108_v41  ;;  %v211_v28 = vld [vmem:[%s2968_s1 + $0x5e8] sm:$0xff]  ;;  %v18_v29 = vld [vmem:[%s2967_s0 + $0x20] sm:$0xff]  ;;  %v1820_v30 = vld.sshfl [vmem:[#allocation1 + $0x18] sm:$0xff pattern:$0x73625140] }
  0x37   :  { %745 = vmatpush.msrb.mxu2 %v123_v43  ;;  %764 = vmatpush.msrb.mxu3 %v140_v48  ;;  %v161_v31 = vld [vmem:[%s2968_s1 + $0x458] sm:$0xff]  ;;  %563 = vst [vmem:[#allocation1] ss:$4 sm:$0xff] %v18_v29  ;;  %v178_v32 = vld [vmem:[%s2968_s1 + $0x4e0] sm:$0xff] }
  0x38   :  { %706 = vmatpush.msrb.mxu0 %v90_v49  ;;  %725 = vmatpush.msrb.mxu1 %v107_v50  ;;  %v193_v33 = vld [vmem:[%s2968_s1 + $0x558] sm:$0xff] }
  0x39   :  { %746 = vmatpush.msrb.mxu2 %v122_v51  ;;  %765 = vmatpush.msrb.mxu3 %v139_v52 }
  0x3a   :  { %707 = vmatpush.msrb.mxu0 %v89_v53  ;;  %726 = vmatpush.msrb.mxu1 %v106_v54 }
  0x3b   :  { %747 = vmatpush.msrb.mxu2 %v121_v55  ;;  %766 = vmatpush.msrb.mxu3 %v138_v56 }
  0x3c   :  { %708 = vmatpush.msrb.mxu0 %v88_v57  ;;  %727 = vmatpush.msrb.mxu1 %v105_v58 }
  0x3d   :  { %748 = vmatpush.msrb.mxu2 %v120_v0  ;;  %767 = vmatpush.msrb.mxu3 %v137_v1 }
  0x3e   :  { %709 = vmatpush.msrb.mxu0 %v87_v2  ;;  %728 = vmatpush.msrb.mxu1 %v104_v3 }
  0x3f   :  { %749 = vmatpush.msrb.mxu2 %v119_v4  ;;  %768 = vmatpush.msrb.mxu3 %v136_v5 }
  0x40   :  { %671 = vmatmul.f32.vlgmr.msra.gmra.mxu2 %v547_v44  ;;  %710 = vmatpush.msrb.mxu0 %v86_v6 }
  0x41   :  { %729 = vmatpush.msrb.mxu1 %v103_v7  ;;  %750 = vmatpush.msrb.mxu2 %v118_v8 }
  0x42   :  { %769 = vmatpush.msrb.mxu3 %v135_v9  ;;  %631 = vmatmul.f32.vlgmr.msra.gmra.mxu0 %v1680_v45 }
  0x43   :  { %691 = vmatmul.f32.vlgmr.msra.gmra.mxu3 %v1682_v46  ;;  %775 = vmatpush.msra.mxu0 %v165_v10 }
  0x44   :  { %815 = vmatpush.msra.mxu2 %v197_v11  ;;  %730 = vmatpush.msrb.mxu1 %v102_v12 }
  0x45   :  { %770 = vmatpush.msrb.mxu3 %v134_v13  ;;  %651 = vmatmul.f32.vlgmr.msra.gmra.mxu1 %v1684_v47 }
  0x46   :  { %776 = vmatpush.msra.mxu0 %v164_v14  ;;  %795 = vmatpush.msra.mxu1 %v181_v15 }
  0x47   :  { %816 = vmatpush.msra.mxu2 %v196_v16  ;;  %835 = vmatpush.msra.mxu3 %v213_v17 }
  0x48   :  { %777 = vmatpush.msra.mxu0 %v163_v18  ;;  %796 = vmatpush.msra.mxu1 %v180_v19 }
  0x49   :  { %817 = vmatpush.msra.mxu2 %v195_v20  ;;  %836 = vmatpush.msra.mxu3 %v212_v21 }
  0x4a   :  { %751 = vmatmul.f32.vlgmr.msrb.gmra.mxu2 %v1722_v60  ;;  %778 = vmatpush.msra.mxu0 %v162_v22 }
  0x4b   :  { %797 = vmatpush.msra.mxu1 %v179_v23  ;;  %818 = vmatpush.msra.mxu2 %v194_v24 }
  0x4c   :  { %9 = vsyncpa [#allocation3], 0  ;;  %837 = vmatpush.msra.mxu3 %v211_v28  ;;  %711 = vmatmul.f32.vlgmr.msrb.gmra.mxu0 %v1724_v61  ;;  %v210_v34 = vld [vmem:[%s2968_s1 + $0x5e0] sm:$0xff]  ;;  %v160_v35 = vld [vmem:[%s2968_s1 + $0x450] sm:$0xff]  ;;  %vm1274_vm3 = vcmask 1024   ;;  %s1335_s23 = smov [#allocation2]  }
  0x4d   :  { %771 = vmatmul.f32.vlgmr.msrb.gmra.mxu3 %v1726_v62  ;;  %779 = vmatpush.msra.mxu0 %v161_v31  ;;  %v177_v36 = vld [vmem:[%s2968_s1 + $0x4d8] sm:$0xff]  ;;  %v192_v37 = vld [vmem:[%s2968_s1 + $0x550] sm:$0xff]  ;;  %v159_v39 = vld [vmem:[%s2968_s1 + $0x448] sm:$0xff]  ;;  %s1289_s24 = sshll.u32 %s1335_s23, 4  ;;  %s1291_s26 = sshll.u32 %s2970_s3, 4  ;;  %vm1280_vm5 = vcmask 74752   ;;  %s1290_s24 = int_to_ptr.vmem [resolvable:$true] %s1289_s24  ;;  %s1292_s26 = int_to_ptr.hbm [resolvable:$true] %s1291_s26 }
  0x4e   :  { %798 = vmatpush.msra.mxu1 %v178_v32  ;;  %819 = vmatpush.msra.mxu2 %v193_v33  ;;  %v209_v38 = vld [vmem:[%s2968_s1 + $0x5d8] sm:$0xff]  ;;  %v176_v40 = vld [vmem:[%s2968_s1 + $0x4d0] sm:$0xff]  ;;  %v191_v41 = vld [vmem:[%s2968_s1 + $0x548] sm:$0xff] }
  0x4f   :  { %838 = vmatpush.msra.mxu3 %v210_v34  ;;  %731 = vmatmul.f32.vlgmr.msrb.gmra.mxu1 %v1728_v63  ;;  %v208_v42 = vld [vmem:[%s2968_s1 + $0x5d0] sm:$0xff]  ;;  %v158_v43 = vld [vmem:[%s2968_s1 + $0x440] sm:$0xff]  ;;  %v175_v44 = vld [vmem:[%s2968_s1 + $0x4c8] sm:$0xff] }
  0x50   :  { %780 = vmatpush.msra.mxu0 %v160_v35  ;;  %799 = vmatpush.msra.mxu1 %v177_v36  ;;  %v190_v45 = vld [vmem:[%s2968_s1 + $0x540] sm:$0xff]  ;;  %v207_v46 = vld [vmem:[%s2968_s1 + $0x5c8] sm:$0xff]  ;;  %v157_v47 = vld [vmem:[%s2968_s1 + $0x438] sm:$0xff] }
  0x51   :  { %820 = vmatpush.msra.mxu2 %v192_v37  ;;  %839 = vmatpush.msra.mxu3 %v209_v38  ;;  %v174_v48 = vld [vmem:[%s2968_s1 + $0x4c0] sm:$0xff]  ;;  %v189_v49 = vld [vmem:[%s2968_s1 + $0x538] sm:$0xff]  ;;  %v156_v51 = vld [vmem:[%s2968_s1 + $0x430] sm:$0xff] }
  0x52   :  { %781 = vmatpush.msra.mxu0 %v159_v39  ;;  %800 = vmatpush.msra.mxu1 %v176_v40  ;;  %v206_v50 = vld [vmem:[%s2968_s1 + $0x5c0] sm:$0xff]  ;;  %v173_v52 = vld [vmem:[%s2968_s1 + $0x4b8] sm:$0xff]  ;;  %v188_v53 = vld [vmem:[%s2968_s1 + $0x530] sm:$0xff] }
  0x53   :  { %821 = vmatpush.msra.mxu2 %v191_v41  ;;  %840 = vmatpush.msra.mxu3 %v208_v42  ;;  %v205_v54 = vld [vmem:[%s2968_s1 + $0x5b8] sm:$0xff]  ;;  %v155_v55 = vld [vmem:[%s2968_s1 + $0x428] sm:$0xff]  ;;  %v172_v56 = vld [vmem:[%s2968_s1 + $0x4b0] sm:$0xff] }
  0x54   :  { %782 = vmatpush.msra.mxu0 %v158_v43  ;;  %801 = vmatpush.msra.mxu1 %v175_v44  ;;  %v187_v57 = vld [vmem:[%s2968_s1 + $0x528] sm:$0xff]  ;;  %v204_v58 = vld [vmem:[%s2968_s1 + $0x5b0] sm:$0xff]  ;;  %v154_v59 = vld [vmem:[%s2968_s1 + $0x420] sm:$0xff] }
  0x55   :  { %822 = vmatpush.msra.mxu2 %v190_v45  ;;  %841 = vmatpush.msra.mxu3 %v207_v46  ;;  %v171_v60 = vld [vmem:[%s2968_s1 + $0x4a8] sm:$0xff]  ;;  %v186_v61 = vld [vmem:[%s2968_s1 + $0x520] sm:$0xff]  ;;  %v153_v63 = vld [vmem:[%s2968_s1 + $0x418] sm:$0xff] }
  0x56   :  { %783 = vmatpush.msra.mxu0 %v157_v47  ;;  %802 = vmatpush.msra.mxu1 %v174_v48  ;;  %v203_v62 = vld [vmem:[%s2968_s1 + $0x5a8] sm:$0xff]  ;;  %v170_v0 = vld [vmem:[%s2968_s1 + $0x4a0] sm:$0xff]  ;;  %v185_v1 = vld [vmem:[%s2968_s1 + $0x518] sm:$0xff] }
  0x57   :  { %823 = vmatpush.msra.mxu2 %v189_v49  ;;  %842 = vmatpush.msra.mxu3 %v206_v50  ;;  %v202_v2 = vld [vmem:[%s2968_s1 + $0x5a0] sm:$0xff]  ;;  %v152_v3 = vld [vmem:[%s2968_s1 + $0x410] sm:$0xff]  ;;  %v169_v4 = vld [vmem:[%s2968_s1 + $0x498] sm:$0xff] }
  0x58   :  { %784 = vmatpush.msra.mxu0 %v156_v51  ;;  %803 = vmatpush.msra.mxu1 %v173_v52  ;;  %v184_v5 = vld [vmem:[%s2968_s1 + $0x510] sm:$0xff]  ;;  %v201_v6 = vld [vmem:[%s2968_s1 + $0x598] sm:$0xff]  ;;  %v151_v7 = vld [vmem:[%s2968_s1 + $0x408] sm:$0xff] }
  0x59   :  { %824 = vmatpush.msra.mxu2 %v188_v53  ;;  %843 = vmatpush.msra.mxu3 %v205_v54  ;;  %v168_v8 = vld [vmem:[%s2968_s1 + $0x490] sm:$0xff]  ;;  %v183_v9 = vld [vmem:[%s2968_s1 + $0x508] sm:$0xff]  ;;  %v150_v11 = vld [vmem:[%s2968_s1 + $0x400] sm:$0xff] }
  0x5a   :  { %785 = vmatpush.msra.mxu0 %v155_v55  ;;  %804 = vmatpush.msra.mxu1 %v172_v56  ;;  %v200_v10 = vld [vmem:[%s2968_s1 + $0x590] sm:$0xff]  ;;  %v167_v12 = vld [vmem:[%s2968_s1 + $0x488] sm:$0xff]  ;;  %v182_v13 = vld [vmem:[%s2968_s1 + $0x500] sm:$0xff] }
  0x5b   :  { %825 = vmatpush.msra.mxu2 %v187_v57  ;;  %844 = vmatpush.msra.mxu3 %v204_v58  ;;  %v199_v14 = vld [vmem:[%s2968_s1 + $0x588] sm:$0xff]  ;;  %v229_v15 = vld [vmem:[%s2968_s1 + $0x678] sm:$0xff]  ;;  %v166_v17 = vld [vmem:[%s2968_s1 + $0x480] sm:$0xff] }
  0x5c   :  { %786 = vmatpush.msra.mxu0 %v154_v59  ;;  %805 = vmatpush.msra.mxu1 %v171_v60  ;;  %v261_v16 = vld [vmem:[%s2968_s1 + $0x778] sm:$0xff]  ;;  %v198_v18 = vld [vmem:[%s2968_s1 + $0x580] sm:$0xff]  ;;  %v228_v19 = vld [vmem:[%s2968_s1 + $0x670] sm:$0xff] }
  0x5d   :  { %826 = vmatpush.msra.mxu2 %v186_v61  ;;  %845 = vmatpush.msra.mxu3 %v203_v62  ;;  %v245_v20 = vld [vmem:[%s2968_s1 + $0x6f8] sm:$0xff]  ;;  %v260_v21 = vld [vmem:[%s2968_s1 + $0x770] sm:$0xff]  ;;  %v227_v23 = vld [vmem:[%s2968_s1 + $0x668] sm:$0xff] }
  0x5e   :  { %787 = vmatpush.msra.mxu0 %v153_v63  ;;  %806 = vmatpush.msra.mxu1 %v170_v0  ;;  %v277_v22 = vld [vmem:[%s2968_s1 + $0x7f8] sm:$0xff]  ;;  %v244_v24 = vld [vmem:[%s2968_s1 + $0x6f0] sm:$0xff]  ;;  %v226_v28 = vld [vmem:[%s2968_s1 + $0x660] sm:$0xff] }
  0x5f   :  { %827 = vmatpush.msra.mxu2 %v185_v1  ;;  %846 = vmatpush.msra.mxu3 %v202_v2  ;;  %v2013_v29 = vld.sshfl [vmem:[#allocation1 + $0x20] sm:$0xff pattern:$0x73625140]  ;;  %v2015_v31 = vld.sshfl [vmem:[#allocation1 + $0x30] sm:$0xff pattern:$0x73625140] }
  0x60   :  { %788 = vmatpush.msra.mxu0 %v152_v3  ;;  %807 = vmatpush.msra.mxu1 %v169_v4  ;;  %v2017_v32 = vld.sshfl [vmem:[#allocation1 + $0x28] sm:$0xff pattern:$0x73625140]  ;;  %v2025_v33 = vld.sshfl [vmem:[#allocation1 + $0x38] sm:$0xff pattern:$0x73625140] }
  0x61   :  { %828 = vmatpush.msra.mxu2 %v184_v5  ;;  %847 = vmatpush.msra.mxu3 %v201_v6  ;;  %v258_v34 = vld [vmem:[%s2968_s1 + $0x760] sm:$0xff]  ;;  %v275_v35 = vld [vmem:[%s2968_s1 + $0x7e8] sm:$0xff]  ;;  %v225_v36 = vld [vmem:[%s2968_s1 + $0x658] sm:$0xff] }
  0x62   :  { %789 = vmatpush.msra.mxu0 %v151_v7  ;;  %808 = vmatpush.msra.mxu1 %v168_v8  ;;  %v242_v37 = vld [vmem:[%s2968_s1 + $0x6e0] sm:$0xff]  ;;  %v257_v38 = vld [vmem:[%s2968_s1 + $0x758] sm:$0xff]  ;;  %v224_v40 = vld [vmem:[%s2968_s1 + $0x650] sm:$0xff] }
  0x63   :  { %829 = vmatpush.msra.mxu2 %v183_v9  ;;  %848 = vmatpush.msra.mxu3 %v200_v10  ;;  %v274_v39 = vld [vmem:[%s2968_s1 + $0x7e0] sm:$0xff]  ;;  %v241_v41 = vld [vmem:[%s2968_s1 + $0x6d8] sm:$0xff]  ;;  %v256_v42 = vld [vmem:[%s2968_s1 + $0x750] sm:$0xff] }
  0x64   :  { %790 = vmatpush.msra.mxu0 %v150_v11  ;;  %809 = vmatpush.msra.mxu1 %v167_v12  ;;  %v273_v43 = vld [vmem:[%s2968_s1 + $0x7d8] sm:$0xff]  ;;  %v223_v44 = vld [vmem:[%s2968_s1 + $0x648] sm:$0xff]  ;;  %v240_v45 = vld [vmem:[%s2968_s1 + $0x6d0] sm:$0xff] }
  0x65   :  { %830 = vmatpush.msra.mxu2 %v182_v13  ;;  %849 = vmatpush.msra.mxu3 %v199_v14  ;;  %v255_v46 = vld [vmem:[%s2968_s1 + $0x748] sm:$0xff]  ;;  %v272_v47 = vld [vmem:[%s2968_s1 + $0x7d0] sm:$0xff]  ;;  %v222_v48 = vld [vmem:[%s2968_s1 + $0x640] sm:$0xff] }
  0x66   :  { %791 = vmatmul.f32.vlgmr.msra.gmra.mxu0 %v1808_v25  ;;  %831 = vmatmul.f32.vlgmr.msra.gmra.mxu2 %v1810_v26  ;;  %v259_v25 = vld [vmem:[%s2968_s1 + $0x768] sm:$0xff]  ;;  %v276_v26 = vld [vmem:[%s2968_s1 + $0x7f0] sm:$0xff]  ;;  %v254_v50 = vld [vmem:[%s2968_s1 + $0x740] sm:$0xff] }
  0x67   :  { %855 = vmatpush.msrb.mxu0 %v229_v15  ;;  %895 = vmatpush.msrb.mxu2 %v261_v16  ;;  %v239_v49 = vld [vmem:[%s2968_s1 + $0x6c8] sm:$0xff]  ;;  %v221_v52 = vld [vmem:[%s2968_s1 + $0x638] sm:$0xff]  ;;  %v238_v53 = vld [vmem:[%s2968_s1 + $0x6c0] sm:$0xff] }
  0x68   :  { %810 = vmatpush.msra.mxu1 %v166_v17  ;;  %850 = vmatpush.msra.mxu3 %v198_v18  ;;  %v271_v51 = vld [vmem:[%s2968_s1 + $0x7c8] sm:$0xff]  ;;  %v253_v54 = vld [vmem:[%s2968_s1 + $0x738] sm:$0xff]  ;;  %v270_v55 = vld [vmem:[%s2968_s1 + $0x7c0] sm:$0xff] }
  0x69   :  { %811 = vmatmul.f32.vlgmr.msra.gmra.mxu1 %v1812_v27  ;;  %851 = vmatmul.f32.vlgmr.msra.gmra.mxu3 %v1820_v30  ;;  %v243_v27 = vld [vmem:[%s2968_s1 + $0x6e8] sm:$0xff]  ;;  %v220_v56 = vld [vmem:[%s2968_s1 + $0x630] sm:$0xff]  ;;  %v237_v57 = vld [vmem:[%s2968_s1 + $0x6b8] sm:$0xff] }
  0x6a   :  { %856 = vmatpush.msrb.mxu0 %v228_v19  ;;  %875 = vmatpush.msrb.mxu1 %v245_v20  ;;  %v19_v30 = vld [vmem:[%s2967_s0 + $0x28] sm:$0xff]  ;;  %v252_v58 = vld [vmem:[%s2968_s1 + $0x730] sm:$0xff]  ;;  %v269_v59 = vld [vmem:[%s2968_s1 + $0x7b8] sm:$0xff] }
  0x6b   :  { %896 = vmatpush.msrb.mxu2 %v260_v21  ;;  %915 = vmatpush.msrb.mxu3 %v277_v22  ;;  %564 = vst [vmem:[#allocation1 + $0x20] ss:$4 sm:$0xff] %v19_v30  ;;  %v219_v60 = vld [vmem:[%s2968_s1 + $0x628] sm:$0xff]  ;;  %v236_v61 = vld [vmem:[%s2968_s1 + $0x6b0] sm:$0xff]  ;;  %v218_v0 = vld [vmem:[%s2968_s1 + $0x620] sm:$0xff] }
  0x6c   :  { %857 = vmatpush.msrb.mxu0 %v227_v23  ;;  %876 = vmatpush.msrb.mxu1 %v244_v24  ;;  %v251_v62 = vld [vmem:[%s2968_s1 + $0x728] sm:$0xff]  ;;  %v268_v63 = vld [vmem:[%s2968_s1 + $0x7b0] sm:$0xff]  ;;  %v250_v2 = vld [vmem:[%s2968_s1 + $0x720] sm:$0xff] }
  0x6d   :  { %897 = vmatpush.msrb.mxu2 %v259_v25  ;;  %916 = vmatpush.msrb.mxu3 %v276_v26  ;;  %v235_v1 = vld [vmem:[%s2968_s1 + $0x6a8] sm:$0xff]  ;;  %v217_v4 = vld [vmem:[%s2968_s1 + $0x618] sm:$0xff]  ;;  %v234_v5 = vld [vmem:[%s2968_s1 + $0x6a0] sm:$0xff] }
  0x6e   :  { %858 = vmatpush.msrb.mxu0 %v226_v28  ;;  %877 = vmatpush.msrb.mxu1 %v243_v27  ;;  %v267_v3 = vld [vmem:[%s2968_s1 + $0x7a8] sm:$0xff]  ;;  %v249_v6 = vld [vmem:[%s2968_s1 + $0x718] sm:$0xff]  ;;  %v266_v7 = vld [vmem:[%s2968_s1 + $0x7a0] sm:$0xff] }
  0x6f   :  { %898 = vmatpush.msrb.mxu2 %v258_v34  ;;  %917 = vmatpush.msrb.mxu3 %v275_v35  ;;  %v216_v8 = vld [vmem:[%s2968_s1 + $0x610] sm:$0xff]  ;;  %v233_v9 = vld [vmem:[%s2968_s1 + $0x698] sm:$0xff]  ;;  %v215_v12 = vld [vmem:[%s2968_s1 + $0x608] sm:$0xff] }
  0x70   :  { %859 = vmatpush.msrb.mxu0 %v225_v36  ;;  %878 = vmatpush.msrb.mxu1 %v242_v37  ;;  %v248_v10 = vld [vmem:[%s2968_s1 + $0x710] sm:$0xff]  ;;  %v265_v11 = vld [vmem:[%s2968_s1 + $0x798] sm:$0xff]  ;;  %v247_v14 = vld [vmem:[%s2968_s1 + $0x708] sm:$0xff] }
  0x71   :  { %899 = vmatpush.msrb.mxu2 %v257_v38  ;;  %918 = vmatpush.msrb.mxu3 %v274_v39  ;;  %v232_v13 = vld [vmem:[%s2968_s1 + $0x690] sm:$0xff]  ;;  %v214_v16 = vld [vmem:[%s2968_s1 + $0x600] sm:$0xff]  ;;  %v231_v17 = vld [vmem:[%s2968_s1 + $0x688] sm:$0xff] }
  0x72   :  { %860 = vmatpush.msrb.mxu0 %v224_v40  ;;  %879 = vmatpush.msrb.mxu1 %v241_v41  ;;  %v264_v15 = vld [vmem:[%s2968_s1 + $0x790] sm:$0xff]  ;;  %v246_v18 = vld [vmem:[%s2968_s1 + $0x700] sm:$0xff]  ;;  %v263_v19 = vld [vmem:[%s2968_s1 + $0x788] sm:$0xff] }
  0x73   :  { %900 = vmatpush.msrb.mxu2 %v256_v42  ;;  %919 = vmatpush.msrb.mxu3 %v273_v43  ;;  %v293_v20 = vld [vmem:[%s2968_s1 + $0x878] sm:$0xff]  ;;  %v230_v22 = vld [vmem:[%s2968_s1 + $0x680] sm:$0xff]  ;;  %v292_v24 = vld [vmem:[%s2968_s1 + $0x870] sm:$0xff] }
  0x74   :  { %861 = vmatpush.msrb.mxu0 %v223_v44  ;;  %880 = vmatpush.msrb.mxu1 %v240_v45  ;;  %v325_v21 = vld [vmem:[%s2968_s1 + $0x978] sm:$0xff]  ;;  %v262_v23 = vld [vmem:[%s2968_s1 + $0x780] sm:$0xff]  ;;  %v324_v26 = vld [vmem:[%s2968_s1 + $0x970] sm:$0xff] }
  0x75   :  { %901 = vmatpush.msrb.mxu2 %v255_v46  ;;  %920 = vmatpush.msrb.mxu3 %v272_v47  ;;  %v309_v25 = vld [vmem:[%s2968_s1 + $0x8f8] sm:$0xff]  ;;  %v323_v27 = vld [vmem:[%s2968_s1 + $0x968] sm:$0xff]  ;;  %v290_v30 = vld [vmem:[%s2968_s1 + $0x860] sm:$0xff] }
  0x76   :  { %862 = vmatpush.msrb.mxu0 %v222_v48  ;;  %881 = vmatpush.msrb.mxu1 %v239_v49  ;;  %v341_v28 = vld [vmem:[%s2968_s1 + $0x9f8] sm:$0xff]  ;;  %v322_v34 = vld [vmem:[%s2968_s1 + $0x960] sm:$0xff]  ;;  %v339_v35 = vld [vmem:[%s2968_s1 + $0x9e8] sm:$0xff] }
  0x77   :  { %902 = vmatpush.msrb.mxu2 %v254_v50  ;;  %921 = vmatpush.msrb.mxu3 %v271_v51  ;;  %v289_v36 = vld [vmem:[%s2968_s1 + $0x858] sm:$0xff]  ;;  %v306_v37 = vld [vmem:[%s2968_s1 + $0x8e0] sm:$0xff]  ;;  %v288_v40 = vld [vmem:[%s2968_s1 + $0x850] sm:$0xff] }
  0x78   :  { %863 = vmatpush.msrb.mxu0 %v221_v52  ;;  %882 = vmatpush.msrb.mxu1 %v238_v53  ;;  %v321_v38 = vld [vmem:[%s2968_s1 + $0x958] sm:$0xff]  ;;  %v338_v39 = vld [vmem:[%s2968_s1 + $0x9e0] sm:$0xff]  ;;  %v320_v42 = vld [vmem:[%s2968_s1 + $0x950] sm:$0xff] }
  0x79   :  { %903 = vmatpush.msrb.mxu2 %v253_v54  ;;  %922 = vmatpush.msrb.mxu3 %v270_v55  ;;  %v305_v41 = vld [vmem:[%s2968_s1 + $0x8d8] sm:$0xff]  ;;  %v287_v44 = vld [vmem:[%s2968_s1 + $0x848] sm:$0xff]  ;;  %v304_v45 = vld [vmem:[%s2968_s1 + $0x8d0] sm:$0xff] }
  0x7a   :  { %864 = vmatpush.msrb.mxu0 %v220_v56  ;;  %883 = vmatpush.msrb.mxu1 %v237_v57  ;;  %v337_v43 = vld [vmem:[%s2968_s1 + $0x9d8] sm:$0xff]  ;;  %v319_v46 = vld [vmem:[%s2968_s1 + $0x948] sm:$0xff]  ;;  %v336_v47 = vld [vmem:[%s2968_s1 + $0x9d0] sm:$0xff] }
  0x7b   :  { %904 = vmatpush.msrb.mxu2 %v252_v58  ;;  %923 = vmatpush.msrb.mxu3 %v269_v59  ;;  %v286_v48 = vld [vmem:[%s2968_s1 + $0x840] sm:$0xff]  ;;  %v303_v49 = vld [vmem:[%s2968_s1 + $0x8c8] sm:$0xff]  ;;  %v285_v52 = vld [vmem:[%s2968_s1 + $0x838] sm:$0xff] }
  0x7c   :  { %865 = vmatpush.msrb.mxu0 %v219_v60  ;;  %884 = vmatpush.msrb.mxu1 %v236_v61  ;;  %v318_v50 = vld [vmem:[%s2968_s1 + $0x940] sm:$0xff]  ;;  %v335_v51 = vld [vmem:[%s2968_s1 + $0x9c8] sm:$0xff]  ;;  %v317_v54 = vld [vmem:[%s2968_s1 + $0x938] sm:$0xff] }
  0x7d   :  { %905 = vmatpush.msrb.mxu2 %v251_v62  ;;  %924 = vmatpush.msrb.mxu3 %v268_v63  ;;  %v302_v53 = vld [vmem:[%s2968_s1 + $0x8c0] sm:$0xff]  ;;  %v284_v56 = vld [vmem:[%s2968_s1 + $0x830] sm:$0xff]  ;;  %v301_v57 = vld [vmem:[%s2968_s1 + $0x8b8] sm:$0xff] }
  0x7e   :  { %866 = vmatpush.msrb.mxu0 %v218_v0  ;;  %885 = vmatpush.msrb.mxu1 %v235_v1  ;;  %v334_v55 = vld [vmem:[%s2968_s1 + $0x9c0] sm:$0xff]  ;;  %v316_v58 = vld [vmem:[%s2968_s1 + $0x930] sm:$0xff]  ;;  %v333_v59 = vld [vmem:[%s2968_s1 + $0x9b8] sm:$0xff] }
  0x7f   :  { %906 = vmatpush.msrb.mxu2 %v250_v2  ;;  %925 = vmatpush.msrb.mxu3 %v267_v3  ;;  %v283_v60 = vld [vmem:[%s2968_s1 + $0x828] sm:$0xff]  ;;  %v300_v61 = vld [vmem:[%s2968_s1 + $0x8b0] sm:$0xff]  ;;  %v282_v0 = vld [vmem:[%s2968_s1 + $0x820] sm:$0xff] }
  0x80   :  { %867 = vmatpush.msrb.mxu0 %v217_v4  ;;  %886 = vmatpush.msrb.mxu1 %v234_v5  ;;  %v315_v62 = vld [vmem:[%s2968_s1 + $0x928] sm:$0xff]  ;;  %v332_v63 = vld [vmem:[%s2968_s1 + $0x9b0] sm:$0xff]  ;;  %v314_v2 = vld [vmem:[%s2968_s1 + $0x920] sm:$0xff] }
  0x81   :  { %907 = vmatpush.msrb.mxu2 %v249_v6  ;;  %926 = vmatpush.msrb.mxu3 %v266_v7  ;;  %v299_v1 = vld [vmem:[%s2968_s1 + $0x8a8] sm:$0xff]  ;;  %v281_v4 = vld [vmem:[%s2968_s1 + $0x818] sm:$0xff]  ;;  %v298_v5 = vld [vmem:[%s2968_s1 + $0x8a0] sm:$0xff] }
  0x82   :  { %868 = vmatpush.msrb.mxu0 %v216_v8  ;;  %887 = vmatpush.msrb.mxu1 %v233_v9  ;;  %v331_v3 = vld [vmem:[%s2968_s1 + $0x9a8] sm:$0xff]  ;;  %v313_v6 = vld [vmem:[%s2968_s1 + $0x918] sm:$0xff]  ;;  %v330_v7 = vld [vmem:[%s2968_s1 + $0x9a0] sm:$0xff] }
  0x83   :  { %908 = vmatpush.msrb.mxu2 %v248_v10  ;;  %927 = vmatpush.msrb.mxu3 %v265_v11  ;;  %v280_v8 = vld [vmem:[%s2968_s1 + $0x810] sm:$0xff]  ;;  %v297_v9 = vld [vmem:[%s2968_s1 + $0x898] sm:$0xff] }
  0x84   :  { %869 = vmatpush.msrb.mxu0 %v215_v12  ;;  %888 = vmatpush.msrb.mxu1 %v232_v13  ;;  %v312_v10 = vld [vmem:[%s2968_s1 + $0x910] sm:$0xff]  ;;  %v329_v11 = vld [vmem:[%s2968_s1 + $0x998] sm:$0xff]  ;;  %v279_v12 = vld [vmem:[%s2968_s1 + $0x808] sm:$0xff] }
  0x85   :  { %909 = vmatpush.msrb.mxu2 %v247_v14  ;;  %928 = vmatpush.msrb.mxu3 %v264_v15  ;;  %v296_v13 = vld [vmem:[%s2968_s1 + $0x890] sm:$0xff]  ;;  %v311_v14 = vld [vmem:[%s2968_s1 + $0x908] sm:$0xff] }
  0x86   :  { %870 = vmatpush.msrb.mxu0 %v214_v16  ;;  %889 = vmatpush.msrb.mxu1 %v231_v17  ;;  %v328_v15 = vld [vmem:[%s2968_s1 + $0x990] sm:$0xff]  ;;  %v278_v16 = vld [vmem:[%s2968_s1 + $0x800] sm:$0xff]  ;;  %v295_v17 = vld [vmem:[%s2968_s1 + $0x888] sm:$0xff] }
  0x87   :  { %910 = vmatpush.msrb.mxu2 %v246_v18  ;;  %929 = vmatpush.msrb.mxu3 %v263_v19  ;;  %v310_v18 = vld [vmem:[%s2968_s1 + $0x900] sm:$0xff]  ;;  %v327_v19 = vld [vmem:[%s2968_s1 + $0x988] sm:$0xff] }
  0x88   :  { %871 = vmatmul.f32.vlgmr.msrb.gmra.mxu0 %v2013_v29  ;;  %911 = vmatmul.f32.vlgmr.msrb.gmra.mxu2 %v2015_v31  ;;  %v291_v29 = vld [vmem:[%s2968_s1 + $0x868] sm:$0xff]  ;;  %v308_v31 = vld [vmem:[%s2968_s1 + $0x8f0] sm:$0xff] }
  0x89   :  { %935 = vmatpush.msra.mxu0 %v293_v20  ;;  %975 = vmatpush.msra.mxu2 %v325_v21  ;;  %v565_v20 = vld.sshfl [vmem:[#allocation1] sm:$0xff pattern:$0x73625140]  ;;  %v567_v21 = vld.sshfl [vmem:[#allocation1 + $0x10] sm:$0xff pattern:$0x73625140] }
  0x8a   :  { %890 = vmatpush.msrb.mxu1 %v230_v22  ;;  %930 = vmatpush.msrb.mxu3 %v262_v23  ;;  %v357_v22 = vld [vmem:[%s2968_s1 + $0xa78] sm:$0xff] }
  0x8b   :  { %891 = vmatmul.f32.vlgmr.msrb.gmra.mxu1 %v2017_v32  ;;  %931 = vmatmul.f32.vlgmr.msrb.gmra.mxu3 %v2025_v33  ;;  %v340_v32 = vld [vmem:[%s2968_s1 + $0x9f0] sm:$0xff]  ;;  %v307_v33 = vld [vmem:[%s2968_s1 + $0x8e8] sm:$0xff]  ;;  %v389_v23 = vld [vmem:[%s2968_s1 + $0xb78] sm:$0xff] }
  0x8c   :  { %936 = vmatpush.msra.mxu0 %v292_v24  ;;  %955 = vmatpush.msra.mxu1 %v309_v25  ;;  %v294_v24 = vld [vmem:[%s2968_s1 + $0x880] sm:$0xff] }
  0x8d   :  { %976 = vmatpush.msra.mxu2 %v324_v26  ;;  %995 = vmatpush.msra.mxu3 %v341_v28  ;;  %v326_v25 = vld [vmem:[%s2968_s1 + $0x980] sm:$0xff]  ;;  %v566_v26 = vld.sshfl [vmem:[#allocation1 + $0x8] sm:$0xff pattern:$0x73625140] }
  0x8e   :  { %937 = vmatpush.msra.mxu0 %v291_v29  ;;  %956 = vmatpush.msra.mxu1 %v308_v31  ;;  %v568_v28 = vld.sshfl [vmem:[#allocation1 + $0x18] sm:$0xff pattern:$0x73625140]  ;;  %v356_v29 = vld [vmem:[%s2968_s1 + $0xa70] sm:$0xff] }
  0x8f   :  { %977 = vmatpush.msra.mxu2 %v323_v27  ;;  %996 = vmatpush.msra.mxu3 %v340_v32  ;;  %v373_v31 = vld [vmem:[%s2968_s1 + $0xaf8] sm:$0xff]  ;;  %v388_v27 = vld [vmem:[%s2968_s1 + $0xb70] sm:$0xff] }
  0x90   :  { %938 = vmatpush.msra.mxu0 %v290_v30  ;;  %957 = vmatpush.msra.mxu1 %v307_v33  ;;  %v405_v32 = vld [vmem:[%s2968_s1 + $0xbf8] sm:$0xff]  ;;  %v355_v30 = vld [vmem:[%s2968_s1 + $0xa68] sm:$0xff]  ;;  %v372_v33 = vld [vmem:[%s2968_s1 + $0xaf0] sm:$0xff] }
  0x91   :  { %978 = vmatpush.msra.mxu2 %v322_v34  ;;  %997 = vmatpush.msra.mxu3 %v339_v35  ;;  %v387_v34 = vld [vmem:[%s2968_s1 + $0xb68] sm:$0xff]  ;;  %v404_v35 = vld [vmem:[%s2968_s1 + $0xbf0] sm:$0xff] }
  0x92   :  { %939 = vmatpush.msra.mxu0 %v289_v36  ;;  %958 = vmatpush.msra.mxu1 %v306_v37  ;;  %v354_v36 = vld [vmem:[%s2968_s1 + $0xa60] sm:$0xff]  ;;  %v371_v37 = vld [vmem:[%s2968_s1 + $0xae8] sm:$0xff] }
  0x93   :  { %979 = vmatpush.msra.mxu2 %v321_v38  ;;  %998 = vmatpush.msra.mxu3 %v338_v39  ;;  %v386_v38 = vld [vmem:[%s2968_s1 + $0xb60] sm:$0xff]  ;;  %v403_v39 = vld [vmem:[%s2968_s1 + $0xbe8] sm:$0xff] }
  0x94   :  { %940 = vmatpush.msra.mxu0 %v288_v40  ;;  %959 = vmatpush.msra.mxu1 %v305_v41  ;;  %v353_v40 = vld [vmem:[%s2968_s1 + $0xa58] sm:$0xff]  ;;  %v370_v41 = vld [vmem:[%s2968_s1 + $0xae0] sm:$0xff] }
  0x95   :  { %980 = vmatpush.msra.mxu2 %v320_v42  ;;  %999 = vmatpush.msra.mxu3 %v337_v43  ;;  %v385_v42 = vld [vmem:[%s2968_s1 + $0xb58] sm:$0xff]  ;;  %v402_v43 = vld [vmem:[%s2968_s1 + $0xbe0] sm:$0xff] }
  0x96   :  { %941 = vmatpush.msra.mxu0 %v287_v44  ;;  %960 = vmatpush.msra.mxu1 %v304_v45  ;;  %v352_v44 = vld [vmem:[%s2968_s1 + $0xa50] sm:$0xff]  ;;  %v369_v45 = vld [vmem:[%s2968_s1 + $0xad8] sm:$0xff] }
  0x97   :  { %981 = vmatpush.msra.mxu2 %v319_v46  ;;  %1000 = vmatpush.msra.mxu3 %v336_v47  ;;  %v384_v46 = vld [vmem:[%s2968_s1 + $0xb50] sm:$0xff]  ;;  %v401_v47 = vld [vmem:[%s2968_s1 + $0xbd8] sm:$0xff] }
  0x98   :  { %942 = vmatpush.msra.mxu0 %v286_v48  ;;  %961 = vmatpush.msra.mxu1 %v303_v49  ;;  %v351_v48 = vld [vmem:[%s2968_s1 + $0xa48] sm:$0xff]  ;;  %v368_v49 = vld [vmem:[%s2968_s1 + $0xad0] sm:$0xff] }
  0x99   :  { %982 = vmatpush.msra.mxu2 %v318_v50  ;;  %1001 = vmatpush.msra.mxu3 %v335_v51  ;;  %v383_v50 = vld [vmem:[%s2968_s1 + $0xb48] sm:$0xff]  ;;  %v400_v51 = vld [vmem:[%s2968_s1 + $0xbd0] sm:$0xff] }
  0x9a   :  { %943 = vmatpush.msra.mxu0 %v285_v52  ;;  %962 = vmatpush.msra.mxu1 %v302_v53  ;;  %v350_v52 = vld [vmem:[%s2968_s1 + $0xa40] sm:$0xff]  ;;  %v367_v53 = vld [vmem:[%s2968_s1 + $0xac8] sm:$0xff] }
  0x9b   :  { %983 = vmatpush.msra.mxu2 %v317_v54  ;;  %1002 = vmatpush.msra.mxu3 %v334_v55  ;;  %v382_v54 = vld [vmem:[%s2968_s1 + $0xb40] sm:$0xff]  ;;  %v399_v55 = vld [vmem:[%s2968_s1 + $0xbc8] sm:$0xff] }
  0x9c   :  { %944 = vmatpush.msra.mxu0 %v284_v56  ;;  %963 = vmatpush.msra.mxu1 %v301_v57  ;;  %v349_v56 = vld [vmem:[%s2968_s1 + $0xa38] sm:$0xff]  ;;  %v366_v57 = vld [vmem:[%s2968_s1 + $0xac0] sm:$0xff] }
  0x9d   :  { %984 = vmatpush.msra.mxu2 %v316_v58  ;;  %1003 = vmatpush.msra.mxu3 %v333_v59  ;;  %v381_v58 = vld [vmem:[%s2968_s1 + $0xb38] sm:$0xff]  ;;  %v398_v59 = vld [vmem:[%s2968_s1 + $0xbc0] sm:$0xff] }
  0x9e   :  { %945 = vmatpush.msra.mxu0 %v283_v60  ;;  %964 = vmatpush.msra.mxu1 %v300_v61  ;;  %v348_v60 = vld [vmem:[%s2968_s1 + $0xa30] sm:$0xff]  ;;  %v365_v61 = vld [vmem:[%s2968_s1 + $0xab8] sm:$0xff] }
  0x9f   :  { %985 = vmatpush.msra.mxu2 %v315_v62  ;;  %1004 = vmatpush.msra.mxu3 %v332_v63  ;;  %v380_v62 = vld [vmem:[%s2968_s1 + $0xb30] sm:$0xff]  ;;  %v397_v63 = vld [vmem:[%s2968_s1 + $0xbb8] sm:$0xff] }
  0xa0   :  { %946 = vmatpush.msra.mxu0 %v282_v0  ;;  %965 = vmatpush.msra.mxu1 %v299_v1  ;;  %v347_v0 = vld [vmem:[%s2968_s1 + $0xa28] sm:$0xff]  ;;  %v364_v1 = vld [vmem:[%s2968_s1 + $0xab0] sm:$0xff] }
  0xa1   :  { %986 = vmatpush.msra.mxu2 %v314_v2  ;;  %1005 = vmatpush.msra.mxu3 %v331_v3  ;;  %v379_v2 = vld [vmem:[%s2968_s1 + $0xb28] sm:$0xff]  ;;  %v396_v3 = vld [vmem:[%s2968_s1 + $0xbb0] sm:$0xff] }
  0xa2   :  { %947 = vmatpush.msra.mxu0 %v281_v4  ;;  %966 = vmatpush.msra.mxu1 %v298_v5  ;;  %v346_v4 = vld [vmem:[%s2968_s1 + $0xa20] sm:$0xff]  ;;  %v363_v5 = vld [vmem:[%s2968_s1 + $0xaa8] sm:$0xff] }
  0xa3   :  { %987 = vmatpush.msra.mxu2 %v313_v6  ;;  %1006 = vmatpush.msra.mxu3 %v330_v7  ;;  %v378_v6 = vld [vmem:[%s2968_s1 + $0xb20] sm:$0xff]  ;;  %v395_v7 = vld [vmem:[%s2968_s1 + $0xba8] sm:$0xff] }
  0xa4   :  { %948 = vmatpush.msra.mxu0 %v280_v8  ;;  %967 = vmatpush.msra.mxu1 %v297_v9  ;;  %v345_v8 = vld [vmem:[%s2968_s1 + $0xa18] sm:$0xff]  ;;  %v362_v9 = vld [vmem:[%s2968_s1 + $0xaa0] sm:$0xff] }
  0xa5   :  { %988 = vmatpush.msra.mxu2 %v312_v10  ;;  %1007 = vmatpush.msra.mxu3 %v329_v11  ;;  %v377_v10 = vld [vmem:[%s2968_s1 + $0xb18] sm:$0xff]  ;;  %v394_v11 = vld [vmem:[%s2968_s1 + $0xba0] sm:$0xff] }
  0xa6   :  { %949 = vmatpush.msra.mxu0 %v279_v12  ;;  %968 = vmatpush.msra.mxu1 %v296_v13  ;;  %v344_v12 = vld [vmem:[%s2968_s1 + $0xa10] sm:$0xff]  ;;  %v361_v13 = vld [vmem:[%s2968_s1 + $0xa98] sm:$0xff] }
  0xa7   :  { %989 = vmatpush.msra.mxu2 %v311_v14  ;;  %1008 = vmatpush.msra.mxu3 %v328_v15  ;;  %v376_v14 = vld [vmem:[%s2968_s1 + $0xb10] sm:$0xff]  ;;  %v393_v15 = vld [vmem:[%s2968_s1 + $0xb98] sm:$0xff] }
  0xa8   :  { %950 = vmatpush.msra.mxu0 %v278_v16  ;;  %969 = vmatpush.msra.mxu1 %v295_v17  ;;  %v343_v16 = vld [vmem:[%s2968_s1 + $0xa08] sm:$0xff]  ;;  %v360_v17 = vld [vmem:[%s2968_s1 + $0xa90] sm:$0xff] }
  0xa9   :  { %990 = vmatpush.msra.mxu2 %v310_v18  ;;  %1009 = vmatpush.msra.mxu3 %v327_v19  ;;  %v20_v18 = vld [vmem:[%s2967_s0 + $0x30] sm:$0xff]  ;;  %v375_v19 = vld [vmem:[%s2968_s1 + $0xb08] sm:$0xff] }
  0xaa   :  { %951 = vmatmul.f32.vlgmr.msra.gmra.mxu0 %v565_v20  ;;  %991 = vmatmul.f32.vlgmr.msra.gmra.mxu2 %v567_v21  ;;  %v392_v20 = vld [vmem:[%s2968_s1 + $0xb90] sm:$0xff]  ;;  %573 = vst [vmem:[#allocation1] ss:$4 sm:$0xff] %v20_v18  ;;  %v342_v21 = vld [vmem:[%s2968_s1 + $0xa00] sm:$0xff]  ;;  %v425_v18 = vld [vmem:[%s2968_s1 + $0xc98] sm:$0xff] }
  0xab   :  { %1015 = vmatpush.msrb.mxu0 %v357_v22  ;;  %1055 = vmatpush.msrb.mxu2 %v389_v23  ;;  %v359_v22 = vld [vmem:[%s2968_s1 + $0xa88] sm:$0xff]  ;;  %v374_v23 = vld [vmem:[%s2968_s1 + $0xb00] sm:$0xff] }
  0xac   :  { %970 = vmatpush.msra.mxu1 %v294_v24  ;;  %1010 = vmatpush.msra.mxu3 %v326_v25  ;;  %v391_v24 = vld [vmem:[%s2968_s1 + $0xb88] sm:$0xff]  ;;  %v569_v25 = vld.sshfl [vmem:[#allocation1 + $0x20] sm:$0xff pattern:$0x73625140] }
  0xad   :  { %971 = vmatmul.f32.vlgmr.msra.gmra.mxu1 %v566_v26  ;;  %1011 = vmatmul.f32.vlgmr.msra.gmra.mxu3 %v568_v28  ;;  %v571_v26 = vld.sshfl [vmem:[#allocation1 + $0x30] sm:$0xff pattern:$0x73625140]  ;;  %v421_v28 = vld [vmem:[%s2968_s1 + $0xc78] sm:$0xff] }
  0xae   :  { %1016 = vmatpush.msrb.mxu0 %v356_v29  ;;  %1035 = vmatpush.msrb.mxu1 %v373_v31  ;;  %v453_v29 = vld [vmem:[%s2968_s1 + $0xd78] sm:$0xff]  ;;  %v358_v31 = vld [vmem:[%s2968_s1 + $0xa80] sm:$0xff] }
  0xaf   :  { %1056 = vmatpush.msrb.mxu2 %v388_v27  ;;  %1075 = vmatpush.msrb.mxu3 %v405_v32  ;;  %v390_v27 = vld [vmem:[%s2968_s1 + $0xb80] sm:$0xff]  ;;  %v570_v32 = vld.sshfl [vmem:[#allocation1 + $0x28] sm:$0xff pattern:$0x73625140] }
  0xb0   :  { %1017 = vmatpush.msrb.mxu0 %v355_v30  ;;  %1036 = vmatpush.msrb.mxu1 %v372_v33  ;;  %v572_v30 = vld.sshfl [vmem:[#allocation1 + $0x38] sm:$0xff pattern:$0x73625140]  ;;  %v420_v33 = vld [vmem:[%s2968_s1 + $0xc70] sm:$0xff] }
  0xb1   :  { %1057 = vmatpush.msrb.mxu2 %v387_v34  ;;  %1076 = vmatpush.msrb.mxu3 %v404_v35  ;;  %v437_v34 = vld [vmem:[%s2968_s1 + $0xcf8] sm:$0xff]  ;;  %v452_v35 = vld [vmem:[%s2968_s1 + $0xd70] sm:$0xff] }
  0xb2   :  { %1018 = vmatpush.msrb.mxu0 %v354_v36  ;;  %1037 = vmatpush.msrb.mxu1 %v371_v37  ;;  %v469_v36 = vld [vmem:[%s2968_s1 + $0xdf8] sm:$0xff]  ;;  %v419_v37 = vld [vmem:[%s2968_s1 + $0xc68] sm:$0xff] }
  0xb3   :  { %1058 = vmatpush.msrb.mxu2 %v386_v38  ;;  %1077 = vmatpush.msrb.mxu3 %v403_v39  ;;  %v436_v38 = vld [vmem:[%s2968_s1 + $0xcf0] sm:$0xff]  ;;  %v451_v39 = vld [vmem:[%s2968_s1 + $0xd68] sm:$0xff] }
  0xb4   :  { %1019 = vmatpush.msrb.mxu0 %v353_v40  ;;  %1038 = vmatpush.msrb.mxu1 %v370_v41  ;;  %v468_v40 = vld [vmem:[%s2968_s1 + $0xdf0] sm:$0xff]  ;;  %v418_v41 = vld [vmem:[%s2968_s1 + $0xc60] sm:$0xff] }
  0xb5   :  { %1059 = vmatpush.msrb.mxu2 %v385_v42  ;;  %1078 = vmatpush.msrb.mxu3 %v402_v43  ;;  %v435_v42 = vld [vmem:[%s2968_s1 + $0xce8] sm:$0xff]  ;;  %v450_v43 = vld [vmem:[%s2968_s1 + $0xd60] sm:$0xff] }
  0xb6   :  { %1020 = vmatpush.msrb.mxu0 %v352_v44  ;;  %1039 = vmatpush.msrb.mxu1 %v369_v45  ;;  %v467_v44 = vld [vmem:[%s2968_s1 + $0xde8] sm:$0xff]  ;;  %v417_v45 = vld [vmem:[%s2968_s1 + $0xc58] sm:$0xff] }
  0xb7   :  { %1060 = vmatpush.msrb.mxu2 %v384_v46  ;;  %1079 = vmatpush.msrb.mxu3 %v401_v47  ;;  %v434_v46 = vld [vmem:[%s2968_s1 + $0xce0] sm:$0xff]  ;;  %v449_v47 = vld [vmem:[%s2968_s1 + $0xd58] sm:$0xff] }
  0xb8   :  { %1021 = vmatpush.msrb.mxu0 %v351_v48  ;;  %1040 = vmatpush.msrb.mxu1 %v368_v49  ;;  %v466_v48 = vld [vmem:[%s2968_s1 + $0xde0] sm:$0xff]  ;;  %v416_v49 = vld [vmem:[%s2968_s1 + $0xc50] sm:$0xff] }
  0xb9   :  { %1061 = vmatpush.msrb.mxu2 %v383_v50  ;;  %1080 = vmatpush.msrb.mxu3 %v400_v51  ;;  %v433_v50 = vld [vmem:[%s2968_s1 + $0xcd8] sm:$0xff]  ;;  %v448_v51 = vld [vmem:[%s2968_s1 + $0xd50] sm:$0xff] }
  0xba   :  { %1022 = vmatpush.msrb.mxu0 %v350_v52  ;;  %1041 = vmatpush.msrb.mxu1 %v367_v53  ;;  %v465_v52 = vld [vmem:[%s2968_s1 + $0xdd8] sm:$0xff]  ;;  %v415_v53 = vld [vmem:[%s2968_s1 + $0xc48] sm:$0xff] }
  0xbb   :  { %1062 = vmatpush.msrb.mxu2 %v382_v54  ;;  %1081 = vmatpush.msrb.mxu3 %v399_v55  ;;  %v432_v54 = vld [vmem:[%s2968_s1 + $0xcd0] sm:$0xff]  ;;  %v447_v55 = vld [vmem:[%s2968_s1 + $0xd48] sm:$0xff] }
  0xbc   :  { %1023 = vmatpush.msrb.mxu0 %v349_v56  ;;  %1042 = vmatpush.msrb.mxu1 %v366_v57  ;;  %v464_v56 = vld [vmem:[%s2968_s1 + $0xdd0] sm:$0xff]  ;;  %v414_v57 = vld [vmem:[%s2968_s1 + $0xc40] sm:$0xff] }
  0xbd   :  { %1063 = vmatpush.msrb.mxu2 %v381_v58  ;;  %1082 = vmatpush.msrb.mxu3 %v398_v59  ;;  %v431_v58 = vld [vmem:[%s2968_s1 + $0xcc8] sm:$0xff]  ;;  %v446_v59 = vld [vmem:[%s2968_s1 + $0xd40] sm:$0xff] }
  0xbe   :  { %1024 = vmatpush.msrb.mxu0 %v348_v60  ;;  %1043 = vmatpush.msrb.mxu1 %v365_v61  ;;  %v463_v60 = vld [vmem:[%s2968_s1 + $0xdc8] sm:$0xff]  ;;  %v413_v61 = vld [vmem:[%s2968_s1 + $0xc38] sm:$0xff] }
  0xbf   :  { %1064 = vmatpush.msrb.mxu2 %v380_v62  ;;  %1083 = vmatpush.msrb.mxu3 %v397_v63  ;;  %v430_v62 = vld [vmem:[%s2968_s1 + $0xcc0] sm:$0xff]  ;;  %v445_v63 = vld [vmem:[%s2968_s1 + $0xd38] sm:$0xff] }
  0xc0   :  { %1025 = vmatpush.msrb.mxu0 %v347_v0  ;;  %1044 = vmatpush.msrb.mxu1 %v364_v1  ;;  %v462_v0 = vld [vmem:[%s2968_s1 + $0xdc0] sm:$0xff]  ;;  %v412_v1 = vld [vmem:[%s2968_s1 + $0xc30] sm:$0xff] }
  0xc1   :  { %1065 = vmatpush.msrb.mxu2 %v379_v2  ;;  %1084 = vmatpush.msrb.mxu3 %v396_v3  ;;  %v429_v2 = vld [vmem:[%s2968_s1 + $0xcb8] sm:$0xff]  ;;  %v444_v3 = vld [vmem:[%s2968_s1 + $0xd30] sm:$0xff] }
  0xc2   :  { %1026 = vmatpush.msrb.mxu0 %v346_v4  ;;  %1045 = vmatpush.msrb.mxu1 %v363_v5  ;;  %v461_v4 = vld [vmem:[%s2968_s1 + $0xdb8] sm:$0xff]  ;;  %v411_v5 = vld [vmem:[%s2968_s1 + $0xc28] sm:$0xff] }
  0xc3   :  { %1066 = vmatpush.msrb.mxu2 %v378_v6  ;;  %1085 = vmatpush.msrb.mxu3 %v395_v7  ;;  %v428_v6 = vld [vmem:[%s2968_s1 + $0xcb0] sm:$0xff]  ;;  %v443_v7 = vld [vmem:[%s2968_s1 + $0xd28] sm:$0xff] }
  0xc4   :  { %1027 = vmatpush.msrb.mxu0 %v345_v8  ;;  %1046 = vmatpush.msrb.mxu1 %v362_v9  ;;  %v460_v8 = vld [vmem:[%s2968_s1 + $0xdb0] sm:$0xff]  ;;  %v410_v9 = vld [vmem:[%s2968_s1 + $0xc20] sm:$0xff] }
  0xc5   :  { %1067 = vmatpush.msrb.mxu2 %v377_v10  ;;  %1086 = vmatpush.msrb.mxu3 %v394_v11  ;;  %v427_v10 = vld [vmem:[%s2968_s1 + $0xca8] sm:$0xff]  ;;  %v442_v11 = vld [vmem:[%s2968_s1 + $0xd20] sm:$0xff] }
  0xc6   :  { %1028 = vmatpush.msrb.mxu0 %v344_v12  ;;  %1047 = vmatpush.msrb.mxu1 %v361_v13  ;;  %v459_v12 = vld [vmem:[%s2968_s1 + $0xda8] sm:$0xff]  ;;  %v409_v13 = vld [vmem:[%s2968_s1 + $0xc18] sm:$0xff] }
  0xc7   :  { %1068 = vmatpush.msrb.mxu2 %v376_v14  ;;  %1087 = vmatpush.msrb.mxu3 %v393_v15  ;;  %v426_v14 = vld [vmem:[%s2968_s1 + $0xca0] sm:$0xff]  ;;  %v441_v15 = vld [vmem:[%s2968_s1 + $0xd18] sm:$0xff] }
  0xc8   :  { %1029 = vmatpush.msrb.mxu0 %v343_v16  ;;  %1048 = vmatpush.msrb.mxu1 %v360_v17  ;;  %v458_v16 = vld [vmem:[%s2968_s1 + $0xda0] sm:$0xff]  ;;  %v408_v17 = vld [vmem:[%s2968_s1 + $0xc10] sm:$0xff] }
  0xc9   :  { %1069 = vmatpush.msrb.mxu2 %v375_v19  ;;  %1088 = vmatpush.msrb.mxu3 %v392_v20  ;;  %v440_v19 = vld [vmem:[%s2968_s1 + $0xd10] sm:$0xff]  ;;  %v457_v20 = vld [vmem:[%s2968_s1 + $0xd98] sm:$0xff] }
  0xca   :  { %1030 = vmatpush.msrb.mxu0 %v342_v21  ;;  %1049 = vmatpush.msrb.mxu1 %v359_v22  ;;  %v407_v21 = vld [vmem:[%s2968_s1 + $0xc08] sm:$0xff]  ;;  %v424_v22 = vld [vmem:[%s2968_s1 + $0xc90] sm:$0xff] }
  0xcb   :  { %1070 = vmatpush.msrb.mxu2 %v374_v23  ;;  %1089 = vmatpush.msrb.mxu3 %v391_v24  ;;  %v21_v23 = vld [vmem:[%s2967_s0 + $0x38] sm:$0xff]  ;;  %v439_v24 = vld [vmem:[%s2968_s1 + $0xd08] sm:$0xff] }
  0xcc   :  { %1031 = vmatmul.f32.vlgmr.msrb.gmra.mxu0 %v569_v25  ;;  %1071 = vmatmul.f32.vlgmr.msrb.gmra.mxu2 %v571_v26  ;;  %v456_v25 = vld [vmem:[%s2968_s1 + $0xd90] sm:$0xff]  ;;  %574 = vst [vmem:[#allocation1 + $0x20] ss:$4 sm:$0xff] %v21_v23  ;;  %v406_v26 = vld [vmem:[%s2968_s1 + $0xc00] sm:$0xff]  ;;  %v489_v23 = vld [vmem:[%s2968_s1 + $0xe98] sm:$0xff] }
  0xcd   :  { %1095 = vmatpush.msra.mxu0 %v421_v28  ;;  %1135 = vmatpush.msra.mxu2 %v453_v29  ;;  %v423_v28 = vld [vmem:[%s2968_s1 + $0xc88] sm:$0xff]  ;;  %v438_v29 = vld [vmem:[%s2968_s1 + $0xd00] sm:$0xff] }
  0xce   :  { %1050 = vmatpush.msrb.mxu1 %v358_v31  ;;  %1090 = vmatpush.msrb.mxu3 %v390_v27  ;;  %v455_v31 = vld [vmem:[%s2968_s1 + $0xd88] sm:$0xff]  ;;  %v575_v27 = vld.sshfl [vmem:[#allocation1] sm:$0xff pattern:$0x73625140] }
  0xcf   :  { %1051 = vmatmul.f32.vlgmr.msrb.gmra.mxu1 %v570_v32  ;;  %1091 = vmatmul.f32.vlgmr.msrb.gmra.mxu3 %v572_v30  ;;  %v577_v32 = vld.sshfl [vmem:[#allocation1 + $0x10] sm:$0xff pattern:$0x73625140]  ;;  %v485_v30 = vld [vmem:[%s2968_s1 + $0xe78] sm:$0xff] }
  0xd0   :  { %1096 = vmatpush.msra.mxu0 %v420_v33  ;;  %1115 = vmatpush.msra.mxu1 %v437_v34  ;;  %v517_v33 = vld [vmem:[%s2968_s1 + $0xf78] sm:$0xff]  ;;  %v422_v34 = vld [vmem:[%s2968_s1 + $0xc80] sm:$0xff] }
  0xd1   :  { %1136 = vmatpush.msra.mxu2 %v452_v35  ;;  %1155 = vmatpush.msra.mxu3 %v469_v36  ;;  %v454_v35 = vld [vmem:[%s2968_s1 + $0xd80] sm:$0xff]  ;;  %v576_v36 = vld.sshfl [vmem:[#allocation1 + $0x8] sm:$0xff pattern:$0x73625140] }
  0xd2   :  { %1097 = vmatpush.msra.mxu0 %v419_v37  ;;  %1116 = vmatpush.msra.mxu1 %v436_v38  ;;  %v578_v37 = vld.sshfl [vmem:[#allocation1 + $0x18] sm:$0xff pattern:$0x73625140]  ;;  %v484_v38 = vld [vmem:[%s2968_s1 + $0xe70] sm:$0xff] }
  0xd3   :  { %1137 = vmatpush.msra.mxu2 %v451_v39  ;;  %1156 = vmatpush.msra.mxu3 %v468_v40  ;;  %v501_v39 = vld [vmem:[%s2968_s1 + $0xef8] sm:$0xff]  ;;  %v516_v40 = vld [vmem:[%s2968_s1 + $0xf70] sm:$0xff] }
  0xd4   :  { %1098 = vmatpush.msra.mxu0 %v418_v41  ;;  %1117 = vmatpush.msra.mxu1 %v435_v42  ;;  %v533_v41 = vld [vmem:[%s2968_s1 + $0xff8] sm:$0xff]  ;;  %v483_v42 = vld [vmem:[%s2968_s1 + $0xe68] sm:$0xff] }
  0xd5   :  { %1138 = vmatpush.msra.mxu2 %v450_v43  ;;  %1157 = vmatpush.msra.mxu3 %v467_v44  ;;  %v500_v43 = vld [vmem:[%s2968_s1 + $0xef0] sm:$0xff]  ;;  %v515_v44 = vld [vmem:[%s2968_s1 + $0xf68] sm:$0xff] }
  0xd6   :  { %1099 = vmatpush.msra.mxu0 %v417_v45  ;;  %1118 = vmatpush.msra.mxu1 %v434_v46  ;;  %v532_v45 = vld [vmem:[%s2968_s1 + $0xff0] sm:$0xff]  ;;  %v482_v46 = vld [vmem:[%s2968_s1 + $0xe60] sm:$0xff] }
  0xd7   :  { %1139 = vmatpush.msra.mxu2 %v449_v47  ;;  %1158 = vmatpush.msra.mxu3 %v466_v48  ;;  %v499_v47 = vld [vmem:[%s2968_s1 + $0xee8] sm:$0xff]  ;;  %v514_v48 = vld [vmem:[%s2968_s1 + $0xf60] sm:$0xff] }
  0xd8   :  { %1100 = vmatpush.msra.mxu0 %v416_v49  ;;  %1119 = vmatpush.msra.mxu1 %v433_v50  ;;  %v531_v49 = vld [vmem:[%s2968_s1 + $0xfe8] sm:$0xff]  ;;  %v481_v50 = vld [vmem:[%s2968_s1 + $0xe58] sm:$0xff] }
  0xd9   :  { %1140 = vmatpush.msra.mxu2 %v448_v51  ;;  %1159 = vmatpush.msra.mxu3 %v465_v52  ;;  %v498_v51 = vld [vmem:[%s2968_s1 + $0xee0] sm:$0xff]  ;;  %v513_v52 = vld [vmem:[%s2968_s1 + $0xf58] sm:$0xff] }
  0xda   :  { %1101 = vmatpush.msra.mxu0 %v415_v53  ;;  %1120 = vmatpush.msra.mxu1 %v432_v54  ;;  %v530_v53 = vld [vmem:[%s2968_s1 + $0xfe0] sm:$0xff]  ;;  %v480_v54 = vld [vmem:[%s2968_s1 + $0xe50] sm:$0xff] }
  0xdb   :  { %1141 = vmatpush.msra.mxu2 %v447_v55  ;;  %1160 = vmatpush.msra.mxu3 %v464_v56  ;;  %v497_v55 = vld [vmem:[%s2968_s1 + $0xed8] sm:$0xff]  ;;  %v512_v56 = vld [vmem:[%s2968_s1 + $0xf50] sm:$0xff] }
  0xdc   :  { %1102 = vmatpush.msra.mxu0 %v414_v57  ;;  %1121 = vmatpush.msra.mxu1 %v431_v58  ;;  %v529_v57 = vld [vmem:[%s2968_s1 + $0xfd8] sm:$0xff]  ;;  %v479_v58 = vld [vmem:[%s2968_s1 + $0xe48] sm:$0xff] }
  0xdd   :  { %1142 = vmatpush.msra.mxu2 %v446_v59  ;;  %1161 = vmatpush.msra.mxu3 %v463_v60  ;;  %v496_v59 = vld [vmem:[%s2968_s1 + $0xed0] sm:$0xff]  ;;  %v511_v60 = vld [vmem:[%s2968_s1 + $0xf48] sm:$0xff] }
  0xde   :  { %1103 = vmatpush.msra.mxu0 %v413_v61  ;;  %1122 = vmatpush.msra.mxu1 %v430_v62  ;;  %v528_v61 = vld [vmem:[%s2968_s1 + $0xfd0] sm:$0xff]  ;;  %v478_v62 = vld [vmem:[%s2968_s1 + $0xe40] sm:$0xff] }
  0xdf   :  { %1143 = vmatpush.msra.mxu2 %v445_v63  ;;  %1162 = vmatpush.msra.mxu3 %v462_v0  ;;  %v495_v63 = vld [vmem:[%s2968_s1 + $0xec8] sm:$0xff]  ;;  %v510_v0 = vld [vmem:[%s2968_s1 + $0xf40] sm:$0xff] }
  0xe0   :  { %1104 = vmatpush.msra.mxu0 %v412_v1  ;;  %1123 = vmatpush.msra.mxu1 %v429_v2  ;;  %v527_v1 = vld [vmem:[%s2968_s1 + $0xfc8] sm:$0xff]  ;;  %v477_v2 = vld [vmem:[%s2968_s1 + $0xe38] sm:$0xff] }
  0xe1   :  { %1144 = vmatpush.msra.mxu2 %v444_v3  ;;  %1163 = vmatpush.msra.mxu3 %v461_v4  ;;  %v494_v3 = vld [vmem:[%s2968_s1 + $0xec0] sm:$0xff]  ;;  %v509_v4 = vld [vmem:[%s2968_s1 + $0xf38] sm:$0xff] }
  0xe2   :  { %1105 = vmatpush.msra.mxu0 %v411_v5  ;;  %1124 = vmatpush.msra.mxu1 %v428_v6  ;;  %v526_v5 = vld [vmem:[%s2968_s1 + $0xfc0] sm:$0xff]  ;;  %v476_v6 = vld [vmem:[%s2968_s1 + $0xe30] sm:$0xff] }
  0xe3   :  { %1145 = vmatpush.msra.mxu2 %v443_v7  ;;  %1164 = vmatpush.msra.mxu3 %v460_v8  ;;  %v493_v7 = vld [vmem:[%s2968_s1 + $0xeb8] sm:$0xff]  ;;  %v508_v8 = vld [vmem:[%s2968_s1 + $0xf30] sm:$0xff] }
  0xe4   :  { %1106 = vmatpush.msra.mxu0 %v410_v9  ;;  %1125 = vmatpush.msra.mxu1 %v427_v10  ;;  %v525_v9 = vld [vmem:[%s2968_s1 + $0xfb8] sm:$0xff]  ;;  %v475_v10 = vld [vmem:[%s2968_s1 + $0xe28] sm:$0xff] }
  0xe5   :  { %1146 = vmatpush.msra.mxu2 %v442_v11  ;;  %1165 = vmatpush.msra.mxu3 %v459_v12  ;;  %v492_v11 = vld [vmem:[%s2968_s1 + $0xeb0] sm:$0xff]  ;;  %v507_v12 = vld [vmem:[%s2968_s1 + $0xf28] sm:$0xff] }
  0xe6   :  { %1107 = vmatpush.msra.mxu0 %v409_v13  ;;  %1126 = vmatpush.msra.mxu1 %v426_v14  ;;  %v524_v13 = vld [vmem:[%s2968_s1 + $0xfb0] sm:$0xff]  ;;  %v474_v14 = vld [vmem:[%s2968_s1 + $0xe20] sm:$0xff] }
  0xe7   :  { %1147 = vmatpush.msra.mxu2 %v441_v15  ;;  %1166 = vmatpush.msra.mxu3 %v458_v16  ;;  %v491_v15 = vld [vmem:[%s2968_s1 + $0xea8] sm:$0xff]  ;;  %v506_v16 = vld [vmem:[%s2968_s1 + $0xf20] sm:$0xff] }
  0xe8   :  { %1108 = vmatpush.msra.mxu0 %v408_v17  ;;  %1127 = vmatpush.msra.mxu1 %v425_v18  ;;  %v523_v17 = vld [vmem:[%s2968_s1 + $0xfa8] sm:$0xff]  ;;  %v473_v18 = vld [vmem:[%s2968_s1 + $0xe18] sm:$0xff] }
  0xe9   :  { %1148 = vmatpush.msra.mxu2 %v440_v19  ;;  %1167 = vmatpush.msra.mxu3 %v457_v20  ;;  %v490_v19 = vld [vmem:[%s2968_s1 + $0xea0] sm:$0xff]  ;;  %v505_v20 = vld [vmem:[%s2968_s1 + $0xf18] sm:$0xff] }
  0xea   :  { %1109 = vmatpush.msra.mxu0 %v407_v21  ;;  %1128 = vmatpush.msra.mxu1 %v424_v22  ;;  %v522_v21 = vld [vmem:[%s2968_s1 + $0xfa0] sm:$0xff]  ;;  %v472_v22 = vld [vmem:[%s2968_s1 + $0xe10] sm:$0xff] }
  0xeb   :  { %1149 = vmatpush.msra.mxu2 %v439_v24  ;;  %1168 = vmatpush.msra.mxu3 %v456_v25  ;;  %v504_v24 = vld [vmem:[%s2968_s1 + $0xf10] sm:$0xff]  ;;  %v521_v25 = vld [vmem:[%s2968_s1 + $0xf98] sm:$0xff] }
  0xec   :  { %1110 = vmatpush.msra.mxu0 %v406_v26  ;;  %1129 = vmatpush.msra.mxu1 %v423_v28  ;;  %v471_v26 = vld [vmem:[%s2968_s1 + $0xe08] sm:$0xff]  ;;  %v488_v28 = vld [vmem:[%s2968_s1 + $0xe90] sm:$0xff] }
  0xed   :  { %1150 = vmatpush.msra.mxu2 %v438_v29  ;;  %1169 = vmatpush.msra.mxu3 %v455_v31  ;;  %v503_v29 = vld [vmem:[%s2968_s1 + $0xf08] sm:$0xff]  ;;  %v520_v31 = vld [vmem:[%s2968_s1 + $0xf90] sm:$0xff] }
  0xee   :  { %1111 = vmatmul.f32.vlgmr.msra.gmra.mxu0 %v575_v27  ;;  %1151 = vmatmul.f32.vlgmr.msra.gmra.mxu2 %v577_v32  ;;  %v470_v27 = vld [vmem:[%s2968_s1 + $0xe00] sm:$0xff]  ;;  %v487_v32 = vld [vmem:[%s2968_s1 + $0xe88] sm:$0xff] }
  0xef   :  { %1175 = vmatpush.msrb.mxu0 %v485_v30  ;;  %1215 = vmatpush.msrb.mxu2 %v517_v33  ;;  %v502_v30 = vld [vmem:[%s2968_s1 + $0xf00] sm:$0xff]  ;;  %v519_v33 = vld [vmem:[%s2968_s1 + $0xf88] sm:$0xff] }
  0xf0   :  { %1130 = vmatpush.msra.mxu1 %v422_v34  ;;  %1170 = vmatpush.msra.mxu3 %v454_v35  ;;  %v579_v34 = vld.sshfl [vmem:[#allocation1 + $0x20] sm:$0xff pattern:$0x73625140]  ;;  %v581_v35 = vld.sshfl [vmem:[#allocation1 + $0x30] sm:$0xff pattern:$0x73625140] }
  0xf1   :  { %1131 = vmatmul.f32.vlgmr.msra.gmra.mxu1 %v576_v36  ;;  %1171 = vmatmul.f32.vlgmr.msra.gmra.mxu3 %v578_v37  ;;  %v486_v36 = vld [vmem:[%s2968_s1 + $0xe80] sm:$0xff] }
  0xf2   :  { %1176 = vmatpush.msrb.mxu0 %v484_v38  ;;  %1195 = vmatpush.msrb.mxu1 %v501_v39  ;;  %v518_v37 = vld [vmem:[%s2968_s1 + $0xf80] sm:$0xff]  ;;  %v580_v38 = vld.sshfl [vmem:[#allocation1 + $0x28] sm:$0xff pattern:$0x73625140]  ;;  %s1334_s1 = smov 127  }
  0xf3   :  { %1216 = vmatpush.msrb.mxu2 %v516_v40  ;;  %1235 = vmatpush.msrb.mxu3 %v533_v41  ;;  %v582_v39 = vld.sshfl [vmem:[#allocation1 + $0x38] sm:$0xff pattern:$0x73625140]  ;;  %v652_v40 = vpop.f32.mrf.mxu1  ;;  %v632_v41 = vpop.f32.mrf.mxu0 }
  0xf4   :  { %1177 = vmatpush.msrb.mxu0 %v483_v42  ;;  %1196 = vmatpush.msrb.mxu1 %v500_v43  ;;  %v653_v42 = vadd.f32 %v652_v40, %v632_v41  ;;  %v672_v43 = vpop.f32.mrf.mxu2 }
  0xf5   :  { %1217 = vmatpush.msrb.mxu2 %v515_v44  ;;  %1236 = vmatpush.msrb.mxu3 %v532_v45  ;;  %v692_v45 = vpop.f32.mrf.mxu3 }
  0xf6   :  { %1178 = vmatpush.msrb.mxu0 %v482_v46  ;;  %1197 = vmatpush.msrb.mxu1 %v499_v47  ;;  %v673_v44 = vadd.f32 %v672_v43, %v653_v42 }
  0xf7   :  { %1218 = vmatpush.msrb.mxu2 %v514_v48  ;;  %1237 = vmatpush.msrb.mxu3 %v531_v49 }
  0xf8   :  { %1179 = vmatpush.msrb.mxu0 %v481_v50  ;;  %1198 = vmatpush.msrb.mxu1 %v498_v51  ;;  %v693_v46 = vadd.f32 %v692_v45, %v673_v44 }
  0xf9   :  { %1219 = vmatpush.msrb.mxu2 %v513_v52  ;;  %1238 = vmatpush.msrb.mxu3 %v530_v53 }
  0xfa   :  { %1180 = vmatpush.msrb.mxu0 %v480_v54  ;;  %1199 = vmatpush.msrb.mxu1 %v497_v55 }
  0xfb   :  { %1220 = vmatpush.msrb.mxu2 %v512_v56  ;;  %1239 = vmatpush.msrb.mxu3 %v529_v57  ;;  %v712_v47 = vpop.f32.mrf.mxu0  ;;  %v732_v49 = vpop.f32.mrf.mxu1 }
  0xfc   :  { %1181 = vmatpush.msrb.mxu0 %v479_v58  ;;  %1200 = vmatpush.msrb.mxu1 %v496_v59  ;;  %v713_v48 = vadd.f32 %v712_v47, %v693_v46  ;;  %v752_v51 = vpop.f32.mrf.mxu2 }
  0xfd   :  { %1221 = vmatpush.msrb.mxu2 %v511_v60  ;;  %1240 = vmatpush.msrb.mxu3 %v528_v61  ;;  %v772_v53 = vpop.f32.mrf.mxu3 }
  0xfe   :  { %1182 = vmatpush.msrb.mxu0 %v478_v62  ;;  %1201 = vmatpush.msrb.mxu1 %v495_v63  ;;  %v733_v50 = vadd.f32 %v732_v49, %v713_v48 }
  0xff   :  { %1222 = vmatpush.msrb.mxu2 %v510_v0  ;;  %1241 = vmatpush.msrb.mxu3 %v527_v1 }
 0x100   :  { %1183 = vmatpush.msrb.mxu0 %v477_v2  ;;  %1202 = vmatpush.msrb.mxu1 %v494_v3  ;;  %v753_v52 = vadd.f32 %v752_v51, %v733_v50 }
 0x101   :  { %1223 = vmatpush.msrb.mxu2 %v509_v4  ;;  %1242 = vmatpush.msrb.mxu3 %v526_v5 }
 0x102   :  { %1184 = vmatpush.msrb.mxu0 %v476_v6  ;;  %1203 = vmatpush.msrb.mxu1 %v493_v7  ;;  %v773_v55 = vadd.f32 %v772_v53, %v753_v52 }
 0x103   :  { %1224 = vmatpush.msrb.mxu2 %v508_v8  ;;  %1243 = vmatpush.msrb.mxu3 %v525_v9  ;;  %v792_v54 = vpop.f32.mrf.mxu0  ;;  %v812_v57 = vpop.f32.mrf.mxu1 }
 0x104   :  { %1185 = vmatpush.msrb.mxu0 %v475_v10  ;;  %1204 = vmatpush.msrb.mxu1 %v492_v11  ;;  %v793_v56 = vadd.f32 %v792_v54, %v773_v55  ;;  %v832_v58 = vpop.f32.mrf.mxu2 }
 0x105   :  { %1225 = vmatpush.msrb.mxu2 %v507_v12  ;;  %1244 = vmatpush.msrb.mxu3 %v524_v13  ;;  %v852_v61 = vpop.f32.mrf.mxu3 }
 0x106   :  { %1186 = vmatpush.msrb.mxu0 %v474_v14  ;;  %1205 = vmatpush.msrb.mxu1 %v491_v15  ;;  %v813_v59 = vadd.f32 %v812_v57, %v793_v56 }
 0x107   :  { %1226 = vmatpush.msrb.mxu2 %v506_v16  ;;  %1245 = vmatpush.msrb.mxu3 %v523_v17 }
 0x108   :  { %1187 = vmatpush.msrb.mxu0 %v473_v18  ;;  %1206 = vmatpush.msrb.mxu1 %v490_v19  ;;  %v833_v60 = vadd.f32 %v832_v58, %v813_v59 }
 0x109   :  { %1227 = vmatpush.msrb.mxu2 %v505_v20  ;;  %1246 = vmatpush.msrb.mxu3 %v522_v21 }
 0x10a   :  { %1188 = vmatpush.msrb.mxu0 %v472_v22  ;;  %1207 = vmatpush.msrb.mxu1 %v489_v23  ;;  %v853_v63 = vadd.f32 %v852_v61, %v833_v60 }
 0x10b   :  { %1228 = vmatpush.msrb.mxu2 %v504_v24  ;;  %1247 = vmatpush.msrb.mxu3 %v521_v25  ;;  %v872_v62 = vpop.f32.mrf.mxu0  ;;  %v892_v1 = vpop.f32.mrf.mxu1 }
 0x10c   :  { %1189 = vmatpush.msrb.mxu0 %v471_v26  ;;  %1208 = vmatpush.msrb.mxu1 %v488_v28  ;;  %v873_v0 = vadd.f32 %v872_v62, %v853_v63  ;;  %v912_v2 = vpop.f32.mrf.mxu2 }
 0x10d   :  { %1229 = vmatpush.msrb.mxu2 %v503_v29  ;;  %1248 = vmatpush.msrb.mxu3 %v520_v31 }
 0x10e   :  { %1190 = vmatpush.msrb.mxu0 %v470_v27  ;;  %1209 = vmatpush.msrb.mxu1 %v487_v32  ;;  %v893_v3 = vadd.f32 %v892_v1, %v873_v0  ;;  %v932_v5 = vpop.f32.mrf.mxu3 }
 0x10f   :  { %1230 = vmatpush.msrb.mxu2 %v502_v30  ;;  %1249 = vmatpush.msrb.mxu3 %v519_v33 }
 0x110   :  { %1191 = vmatmul.f32.vlgmr.msrb.gmra.mxu0 %v579_v34  ;;  %1231 = vmatmul.f32.vlgmr.msrb.gmra.mxu2 %v581_v35  ;;  %v913_v4 = vadd.f32 %v912_v2, %v893_v3 }
 0x111   :  { %1210 = vmatpush.msrb.mxu1 %v486_v36  ;;  %1250 = vmatpush.msrb.mxu3 %v518_v37 }
 0x112   :  { %1211 = vmatmul.f32.vlgmr.msrb.gmra.mxu1 %v580_v38  ;;  %1251 = vmatmul.f32.vlgmr.msrb.gmra.mxu3 %v582_v39  ;;  %v933_v7 = vadd.f32 %v932_v5, %v913_v4 }
 0x127   :  { %v952_v6 = vpop.f32.mrf.mxu0 }
 0x128   :  { %v953_v8 = vadd.f32 %v952_v6, %v933_v7 }
 0x12a   :  { %v972_v9 = vpop.f32.mrf.mxu1 }
 0x12b   :  { %v973_v11 = vadd.f32 %v972_v9, %v953_v8 }
 0x12d   :  { %v992_v10 = vpop.f32.mrf.mxu2 }
 0x12e   :  { %v993_v12 = vadd.f32 %v992_v10, %v973_v11 }
 0x130   :  { %v1012_v13 = vpop.f32.mrf.mxu3 }
 0x131   :  { %v1013_v15 = vadd.f32 %v1012_v13, %v993_v12 }
 0x149   :  { %v1032_v14 = vpop.f32.mrf.mxu0 }
 0x14a   :  { %v1033_v16 = vadd.f32 %v1032_v14, %v1013_v15 }
 0x14c   :  { %v1052_v17 = vpop.f32.mrf.mxu1 }
 0x14d   :  { %v1053_v19 = vadd.f32 %v1052_v17, %v1033_v16 }
 0x14f   :  { %v1072_v18 = vpop.f32.mrf.mxu2 }
 0x150   :  { %v1073_v20 = vadd.f32 %v1072_v18, %v1053_v19 }
 0x152   :  { %v1092_v21 = vpop.f32.mrf.mxu3 }
 0x153   :  { %v1093_v23 = vadd.f32 %v1092_v21, %v1073_v20 }
 0x16b   :  { %v1112_v22 = vpop.f32.mrf.mxu0 }
 0x16c   :  { %v1113_v24 = vadd.f32 %v1112_v22, %v1093_v23 }
 0x16e   :  { %v1132_v25 = vpop.f32.mrf.mxu1 }
 0x16f   :  { %v1133_v28 = vadd.f32 %v1132_v25, %v1113_v24 }
 0x171   :  { %v1152_v26 = vpop.f32.mrf.mxu2 }
 0x172   :  { %v1153_v29 = vadd.f32 %v1152_v26, %v1133_v28 }
 0x174   :  { %v1172_v31 = vpop.f32.mrf.mxu3 }
 0x175   :  { %v1173_v27 = vadd.f32 %v1172_v31, %v1153_v29 }
 0x18d   :  { %v1192_v32 = vpop.f32.mrf.mxu0 }
 0x18e   :  { %v1193_v30 = vadd.f32 %v1192_v32, %v1173_v27 }
 0x18f   :  { %v1212_v33 = vpop.f32.mrf.mxu1 }
 0x190   :  { %v1213_v34 = vadd.f32 %v1212_v33, %v1193_v30 }
 0x193   :  { %v1232_v35 = vpop.f32.mrf.mxu2 }
 0x194   :  { %v1233_v36 = vadd.f32 %v1232_v35, %v1213_v34 }
 0x195   :  { %v1252_v37 = vpop.f32.mrf.mxu3 }
 0x196   :  { %v1253_v38 = vadd.f32 %v1252_v37, %v1233_v36 }
 0x198   :  { %v1255_v39 = vsub.f32 0.0, %v1253_v38  ;;  %1277 = vrot.lane.b32.xlu0 %v1253_v38, %s1334_s1 }
 0x19a   :  { %v1256_v40 = vmul.f32 1.442695, %v1255_v39 }
 0x19c   :  { %1304 = vpow2.f32 %v1256_v40 }
 0x1a2   :  { %v1305_v41 = vpop.eup %1304 }
 0x1a3   :  { %v1258_v42 = vadd.f32 1.0, %v1305_v41 }
 0x1a5   :  { %1306 = vrcp.f32 %v1258_v42  ;;  %v1270_v46 = vand.u32 2147483648, %v1258_v42  ;;  %v1268_v48 = vand.u32 2147483647, %v1258_v42  ;;  %vm1264_vm1 = vweird.f32 %v1258_v42 }
 0x1a7   :  { %v1271_v50 = vor.u32 1.1754944e-38, %v1270_v46  ;;  %vm1269_vm4 = vcmp.eq.f32.partialorder %v1268_v48, 8.507059e+37 }
 0x1ab   :  { %v1307_v43 = vpop.eup %1306 }
 0x1ac   :  { %v1260_v44 = vmul.f32 %v1307_v43, %v1258_v42  ;;  %vm1265_vm0 = vweird.f32 %v1307_v43 }
 0x1ad   :  { %vm1266_vm2 = vmor %vm1264_vm1, %vm1265_vm0 }
 0x1ae   :  { %v1261_v45 = vsub.f32 1.0, %v1260_v44 }
 0x1b0   :  { %v1262_v47 = vmul.f32 %v1307_v43, %v1261_v45 }
 0x1b2   :  { %v1263_v49 = vadd.f32 %v1307_v43, %v1262_v47 }
 0x1b4   :  { %v1267_v51 = vsel %vm1266_vm2, %v1307_v43, %v1263_v49 }
 0x1b5   :  { %v1272_v52 = vsel %vm1269_vm4, %v1271_v50, %v1267_v51 }
 0x1b6   :  { %1275 = vst.msk [vmem:[%s2969_s2] sm:$0x3] %vm1274_vm3, %v1272_v52 }
 0x20a   :  { %v1278_v53 = vpop.permute.xlu0 %1277 }
 0x20b   :  { %1281 = vst.msk [vmem:[#allocation2] sm:$0x3] %vm1280_vm5, %v1278_v53 }
 0x20c   :  { %1294 = dma.vmem_to_hbm [thread:$0]  %s1290_s24, 32, %s1292_s26, [#allocation3]  }
 0x20d   :  { %1332 = dma.done.wait [#allocation3], 32  }
 0x20e   :  { %1333 = vsyncadd [#allocation3], 4294967264 }
 0x20f   :  { %1301 = vsyncpa [#allocation3], 1 }

// kernel: accnn_discriminator_forward.6
= control target key start
LH: loop header
LB: loop body
LE: loop exit
PB: predicated region body
PF: predicated region fallthrough
CT: control target
= control target key end

     0   :  { %s2440_s12 = smov 0   ;;  %s4315_s0 = inlined_call_operand.vmem [shape: f32[2,5,5,512], index: 0, kind: input, shape index: {}]   ;;  %s4316_s1 = inlined_call_operand.vmem [shape: f32[2,2,512,256], index: 1, kind: input, shape index: {}]   ;;  %s4317_s2 = inlined_call_operand.vmem [shape: f32[1,256], index: 2, kind: input, shape index: {}]   ;;  %s4318_s3 = inlined_call_operand.vmem [shape: f32[2,4,4,256], index: 3, kind: output, shape index: {}]  }
   0x1 LB: > { %s1944_s13 = sadd.s32 4294967295, %s2418_s12   ;;  %p1948_p0 = scmp.ge.s32.totalorder %s2418_s12, 1  ;;  %s2418_s12 = sphi %s2440_s12, %s13_s12  }
   0x2   : > { %p137_p1 = scmp.lt.s32.totalorder %s2418_s12, 3 }
   0x4   : > { %p138_p2 = pnand %p1948_p0, %p137_p1 }
   0x5   : > { %p2624_p3 = scmp.lt.s32.totalorder (!%p138_p2), %s1944_s13, 1 }
   0x6   : > { %141 = sbr.rel (%p138_p2) target bundleno = 452 (0x1c4), region = 32 }
   0xb   : > { %v1998_v0 = vld [vmem:[%s4316_s1 + $0x4f0] sm:$0xff]  ;;  %v1996_v2 = vld [vmem:[%s4316_s1 + $0x4e0] sm:$0xff]  ;;  %v1999_v62 = vld [vmem:[%s4316_s1 + $0x4f8] sm:$0xff]  ;;  %s4323_s13 = smov (!%p2624_p3, %s1944_s13), 1  ;;  %vm211_vm0 = vcmask 1043456   ;;  %vm412_vm1 = vcmask 1042432  }
   0xc   : > { %v2062_v1 = vld [vmem:[%s4316_s1 + $0x6f0] sm:$0xff]  ;;  %607 = vmatpush.msra.mxu0 %v1998_v0  ;;  %v2060_v4 = vld [vmem:[%s4316_s1 + $0x6e0] sm:$0xff]  ;;  %v2063_v63 = vld [vmem:[%s4316_s1 + $0x6f8] sm:$0xff]  ;;  %s2403_s11 = smul.u32 160, %s4323_s13  ;;  %vm413_vm2 = vcmask 1046532   ;;  %s2402_s9 = sshll.u32 %s4323_s13, 5 }
   0xd   : > { %653 = vmatpush.msra.mxu2 %v2062_v1  ;;  %v2030_v3 = vld [vmem:[%s4316_s1 + $0x5f0] sm:$0xff]  ;;  %v2028_v7 = vld [vmem:[%s4316_s1 + $0x5e0] sm:$0xff]  ;;  %vm2767_vm3 = vmor %vm412_vm1, %vm413_vm2  ;;  %s170_s16 = scalar_lea.vmem %s4318_s3, %s2402_s9 }
   0xe   : > { %v2094_v5 = vld [vmem:[%s4316_s1 + $0x7f0] sm:$0xff]  ;;  %630 = vmatpush.msra.mxu1 %v2030_v3  ;;  %608 = vmatpush.msra.mxu0 %v1996_v2  ;;  %v2092_v9 = vld [vmem:[%s4316_s1 + $0x7e0] sm:$0xff]  ;;  %v1997_v2 = vld [vmem:[%s4316_s1 + $0x4e8] sm:$0xff]  ;;  %s2719_s14 = scalar_lea.vmem %s4315_s0, %s2403_s11 }
   0xf   : > { %676 = vmatpush.msra.mxu3 %v2094_v5  ;;  %v1994_v6 = vld [vmem:[%s4316_s1 + $0x4d0] sm:$0xff]  ;;  %654 = vmatpush.msra.mxu2 %v2060_v4  ;;  %v1992_v11 = vld [vmem:[%s4316_s1 + $0x4c0] sm:$0xff]  ;;  %v2031_v3 = vld [vmem:[%s4316_s1 + $0x5f8] sm:$0xff] }
  0x10   : > { %v2058_v8 = vld [vmem:[%s4316_s1 + $0x6d0] sm:$0xff]  ;;  %631 = vmatpush.msra.mxu1 %v2028_v7  ;;  %v2056_v12 = vld [vmem:[%s4316_s1 + $0x6c0] sm:$0xff]  ;;  %609 = vmatpush.msra.mxu0 %v1994_v6  ;;  %v2061_v4 = vld [vmem:[%s4316_s1 + $0x6e8] sm:$0xff] }
  0x11   : > { %v2026_v10 = vld [vmem:[%s4316_s1 + $0x5d0] sm:$0xff]  ;;  %677 = vmatpush.msra.mxu3 %v2092_v9  ;;  %655 = vmatpush.msra.mxu2 %v2058_v8  ;;  %v2024_v14 = vld [vmem:[%s4316_s1 + $0x5c0] sm:$0xff]  ;;  %v2095_v5 = vld [vmem:[%s4316_s1 + $0x7f8] sm:$0xff] }
  0x12   : > { %v2090_v13 = vld [vmem:[%s4316_s1 + $0x7d0] sm:$0xff]  ;;  %v2088_v15 = vld [vmem:[%s4316_s1 + $0x7c0] sm:$0xff]  ;;  %632 = vmatpush.msra.mxu1 %v2026_v10  ;;  %610 = vmatpush.msra.mxu0 %v1992_v11  ;;  %v1995_v6 = vld [vmem:[%s4316_s1 + $0x4d8] sm:$0xff] }
  0x13   : > { %678 = vmatpush.msra.mxu3 %v2090_v13  ;;  %v1990_v16 = vld [vmem:[%s4316_s1 + $0x4b0] sm:$0xff]  ;;  %656 = vmatpush.msra.mxu2 %v2056_v12  ;;  %v1988_v20 = vld [vmem:[%s4316_s1 + $0x4a0] sm:$0xff]  ;;  %v2029_v7 = vld [vmem:[%s4316_s1 + $0x5e8] sm:$0xff] }
  0x14   : > { %v2054_v17 = vld [vmem:[%s4316_s1 + $0x6b0] sm:$0xff]  ;;  %633 = vmatpush.msra.mxu1 %v2024_v14  ;;  %v2052_v21 = vld [vmem:[%s4316_s1 + $0x6a0] sm:$0xff]  ;;  %611 = vmatpush.msra.mxu0 %v1990_v16  ;;  %v2059_v8 = vld [vmem:[%s4316_s1 + $0x6d8] sm:$0xff] }
  0x15   : > { %v2022_v18 = vld [vmem:[%s4316_s1 + $0x5b0] sm:$0xff]  ;;  %679 = vmatpush.msra.mxu3 %v2088_v15  ;;  %657 = vmatpush.msra.mxu2 %v2054_v17  ;;  %v2020_v22 = vld [vmem:[%s4316_s1 + $0x5a0] sm:$0xff]  ;;  %v2093_v9 = vld [vmem:[%s4316_s1 + $0x7e8] sm:$0xff] }
  0x16   : > { %v2086_v19 = vld [vmem:[%s4316_s1 + $0x7b0] sm:$0xff]  ;;  %v2084_v23 = vld [vmem:[%s4316_s1 + $0x7a0] sm:$0xff]  ;;  %634 = vmatpush.msra.mxu1 %v2022_v18  ;;  %612 = vmatpush.msra.mxu0 %v1988_v20  ;;  %v1993_v10 = vld [vmem:[%s4316_s1 + $0x4c8] sm:$0xff] }
  0x17   : > { %680 = vmatpush.msra.mxu3 %v2086_v19  ;;  %v1986_v24 = vld [vmem:[%s4316_s1 + $0x490] sm:$0xff]  ;;  %658 = vmatpush.msra.mxu2 %v2052_v21  ;;  %v1984_v28 = vld [vmem:[%s4316_s1 + $0x480] sm:$0xff]  ;;  %v2027_v11 = vld [vmem:[%s4316_s1 + $0x5d8] sm:$0xff] }
  0x18   : > { %v2050_v25 = vld [vmem:[%s4316_s1 + $0x690] sm:$0xff]  ;;  %635 = vmatpush.msra.mxu1 %v2020_v22  ;;  %v2048_v29 = vld [vmem:[%s4316_s1 + $0x680] sm:$0xff]  ;;  %613 = vmatpush.msra.mxu0 %v1986_v24  ;;  %v2057_v12 = vld [vmem:[%s4316_s1 + $0x6c8] sm:$0xff] }
  0x19   : > { %v2018_v26 = vld [vmem:[%s4316_s1 + $0x590] sm:$0xff]  ;;  %681 = vmatpush.msra.mxu3 %v2084_v23  ;;  %659 = vmatpush.msra.mxu2 %v2050_v25  ;;  %v2016_v30 = vld [vmem:[%s4316_s1 + $0x580] sm:$0xff]  ;;  %v2091_v13 = vld [vmem:[%s4316_s1 + $0x7d8] sm:$0xff] }
  0x1a   : > { %v2082_v27 = vld [vmem:[%s4316_s1 + $0x790] sm:$0xff]  ;;  %v2080_v31 = vld [vmem:[%s4316_s1 + $0x780] sm:$0xff]  ;;  %636 = vmatpush.msra.mxu1 %v2018_v26  ;;  %614 = vmatpush.msra.mxu0 %v1984_v28  ;;  %v1991_v14 = vld [vmem:[%s4316_s1 + $0x4b8] sm:$0xff] }
  0x1b   : > { %682 = vmatpush.msra.mxu3 %v2082_v27  ;;  %v1982_v32 = vld [vmem:[%s4316_s1 + $0x470] sm:$0xff]  ;;  %660 = vmatpush.msra.mxu2 %v2048_v29  ;;  %v1980_v36 = vld [vmem:[%s4316_s1 + $0x460] sm:$0xff]  ;;  %v2025_v15 = vld [vmem:[%s4316_s1 + $0x5c8] sm:$0xff] }
  0x1c   : > { %v2046_v33 = vld [vmem:[%s4316_s1 + $0x670] sm:$0xff]  ;;  %637 = vmatpush.msra.mxu1 %v2016_v30  ;;  %v2044_v37 = vld [vmem:[%s4316_s1 + $0x660] sm:$0xff]  ;;  %615 = vmatpush.msra.mxu0 %v1982_v32  ;;  %v2055_v16 = vld [vmem:[%s4316_s1 + $0x6b8] sm:$0xff] }
  0x1d   : > { %v2014_v34 = vld [vmem:[%s4316_s1 + $0x570] sm:$0xff]  ;;  %683 = vmatpush.msra.mxu3 %v2080_v31  ;;  %661 = vmatpush.msra.mxu2 %v2046_v33  ;;  %v2012_v38 = vld [vmem:[%s4316_s1 + $0x560] sm:$0xff]  ;;  %v2089_v17 = vld [vmem:[%s4316_s1 + $0x7c8] sm:$0xff] }
  0x1e   : > { %v2078_v35 = vld [vmem:[%s4316_s1 + $0x770] sm:$0xff]  ;;  %v2076_v39 = vld [vmem:[%s4316_s1 + $0x760] sm:$0xff]  ;;  %638 = vmatpush.msra.mxu1 %v2014_v34  ;;  %616 = vmatpush.msra.mxu0 %v1980_v36  ;;  %v1989_v18 = vld [vmem:[%s4316_s1 + $0x4a8] sm:$0xff] }
  0x1f   : > { %684 = vmatpush.msra.mxu3 %v2078_v35  ;;  %v1978_v40 = vld [vmem:[%s4316_s1 + $0x450] sm:$0xff]  ;;  %662 = vmatpush.msra.mxu2 %v2044_v37  ;;  %v1976_v44 = vld [vmem:[%s4316_s1 + $0x440] sm:$0xff]  ;;  %v2023_v19 = vld [vmem:[%s4316_s1 + $0x5b8] sm:$0xff] }
  0x20   : > { %v2042_v41 = vld [vmem:[%s4316_s1 + $0x650] sm:$0xff]  ;;  %639 = vmatpush.msra.mxu1 %v2012_v38  ;;  %v2040_v45 = vld [vmem:[%s4316_s1 + $0x640] sm:$0xff]  ;;  %617 = vmatpush.msra.mxu0 %v1978_v40  ;;  %v2053_v20 = vld [vmem:[%s4316_s1 + $0x6a8] sm:$0xff] }
  0x21   : > { %v2010_v42 = vld [vmem:[%s4316_s1 + $0x550] sm:$0xff]  ;;  %685 = vmatpush.msra.mxu3 %v2076_v39  ;;  %663 = vmatpush.msra.mxu2 %v2042_v41  ;;  %v2008_v46 = vld [vmem:[%s4316_s1 + $0x540] sm:$0xff]  ;;  %v2087_v21 = vld [vmem:[%s4316_s1 + $0x7b8] sm:$0xff] }
  0x22   : > { %v2074_v43 = vld [vmem:[%s4316_s1 + $0x750] sm:$0xff]  ;;  %v2072_v47 = vld [vmem:[%s4316_s1 + $0x740] sm:$0xff]  ;;  %640 = vmatpush.msra.mxu1 %v2010_v42  ;;  %618 = vmatpush.msra.mxu0 %v1976_v44  ;;  %v1987_v22 = vld [vmem:[%s4316_s1 + $0x498] sm:$0xff] }
  0x23   : > { %686 = vmatpush.msra.mxu3 %v2074_v43  ;;  %v1974_v48 = vld [vmem:[%s4316_s1 + $0x430] sm:$0xff]  ;;  %664 = vmatpush.msra.mxu2 %v2040_v45  ;;  %v1972_v52 = vld [vmem:[%s4316_s1 + $0x420] sm:$0xff]  ;;  %v2021_v23 = vld [vmem:[%s4316_s1 + $0x5a8] sm:$0xff] }
  0x24   : > { %v2038_v49 = vld [vmem:[%s4316_s1 + $0x630] sm:$0xff]  ;;  %641 = vmatpush.msra.mxu1 %v2008_v46  ;;  %v2036_v53 = vld [vmem:[%s4316_s1 + $0x620] sm:$0xff]  ;;  %619 = vmatpush.msra.mxu0 %v1974_v48  ;;  %v2051_v24 = vld [vmem:[%s4316_s1 + $0x698] sm:$0xff] }
  0x25   : > { %v2006_v50 = vld [vmem:[%s4316_s1 + $0x530] sm:$0xff]  ;;  %687 = vmatpush.msra.mxu3 %v2072_v47  ;;  %665 = vmatpush.msra.mxu2 %v2038_v49  ;;  %v2004_v54 = vld [vmem:[%s4316_s1 + $0x520] sm:$0xff]  ;;  %v2085_v25 = vld [vmem:[%s4316_s1 + $0x7a8] sm:$0xff] }
  0x26   : > { %v2070_v51 = vld [vmem:[%s4316_s1 + $0x730] sm:$0xff]  ;;  %v2068_v55 = vld [vmem:[%s4316_s1 + $0x720] sm:$0xff]  ;;  %642 = vmatpush.msra.mxu1 %v2006_v50  ;;  %620 = vmatpush.msra.mxu0 %v1972_v52  ;;  %v1985_v27 = vld [vmem:[%s4316_s1 + $0x488] sm:$0xff] }
  0x27   : > { %688 = vmatpush.msra.mxu3 %v2070_v51  ;;  %v1970_v56 = vld [vmem:[%s4316_s1 + $0x410] sm:$0xff]  ;;  %666 = vmatpush.msra.mxu2 %v2036_v53  ;;  %v1968_v60 = vld [vmem:[%s4316_s1 + $0x400] sm:$0xff]  ;;  %v2019_v28 = vld [vmem:[%s4316_s1 + $0x598] sm:$0xff] }
  0x28   : > { %v2034_v57 = vld [vmem:[%s4316_s1 + $0x610] sm:$0xff]  ;;  %643 = vmatpush.msra.mxu1 %v2004_v54  ;;  %v2032_v61 = vld [vmem:[%s4316_s1 + $0x600] sm:$0xff]  ;;  %621 = vmatpush.msra.mxu0 %v1970_v56  ;;  %v349_v29 = vld [vmem:[%s2719_s14 + $0x8] sm:$0x1e] }
  0x29   : > { %v2002_v58 = vld [vmem:[%s4316_s1 + $0x510] sm:$0xff]  ;;  %689 = vmatpush.msra.mxu3 %v2068_v55  ;;  %667 = vmatpush.msra.mxu2 %v2034_v57  ;;  %v2000_v0 = vld [vmem:[%s4316_s1 + $0x500] sm:$0xff]  ;;  %v353_v31 = vld [vmem:[%s2719_s14 + $0x28] sm:$0x1e]  ;;  %v380_v33 = vrot.slane %v349_v29, 4 }
  0x2a   : > { %v2066_v59 = vld [vmem:[%s4316_s1 + $0x710] sm:$0xff]  ;;  %644 = vmatpush.msra.mxu1 %v2002_v58  ;;  %v2064_v1 = vld [vmem:[%s4316_s1 + $0x700] sm:$0xff]  ;;  %622 = vmatpush.msra.mxu0 %v1968_v60  ;;  %v2049_v32 = vld [vmem:[%s4316_s1 + $0x688] sm:$0xff]  ;;  %v382_v34 = vrot.slane %v353_v31, 4 }
  0x2b   : > { %690 = vmatpush.msra.mxu3 %v2066_v59  ;;  %668 = vmatpush.msra.mxu2 %v2032_v61  ;;  %v348_v26 = vld [vmem:[%s2719_s14] sm:$0x1e]  ;;  %v350_v35 = vld [vmem:[%s2719_s14 + $0x10] sm:$0x1e]  ;;  %v351_v36 = vld [vmem:[%s2719_s14 + $0x18] sm:$0x1e] }
  0x2c   : > { %699 = vmatpush.msrb.mxu0 %v1999_v62  ;;  %645 = vmatpush.msra.mxu1 %v2000_v0  ;;  %v352_v30 = vld [vmem:[%s2719_s14 + $0x20] sm:$0x1e]  ;;  %v2083_v37 = vld [vmem:[%s4316_s1 + $0x798] sm:$0xff]  ;;  %v354_v38 = vld [vmem:[%s2719_s14 + $0x30] sm:$0x1e]  ;;  %v381_v40 = vrot.slane %v351_v36, 4  ;;  %v388_v43 = vsel %vm211_vm0, %v348_v26, %v380_v33  ;;  %v390_v44 = vsel %vm211_vm0, %v380_v33, %v348_v26 }
  0x2d   : > { %745 = vmatpush.msrb.mxu2 %v2063_v63  ;;  %691 = vmatpush.msra.mxu3 %v2064_v1  ;;  %v355_v39 = vld [vmem:[%s2719_s14 + $0x38] sm:$0x1e]  ;;  %v2017_v42 = vld [vmem:[%s4316_s1 + $0x588] sm:$0xff]  ;;  %v394_v45 = vsel %vm211_vm0, %v352_v30, %v382_v34  ;;  %v396_v51 = vsel %vm211_vm0, %v382_v34, %v352_v30  ;;  %v1952_v52 = vrot.slane %v388_v43, 9  ;;  %v1953_v53 = vrot.slane %v390_v44, 9  ;;  %v2116_v46 = vld [vmem:[%s4316_s1 + $0x820] sm:$0xff] }
  0x2e   : > { %700 = vmatpush.msrb.mxu0 %v1997_v2  ;;  %722 = vmatpush.msrb.mxu1 %v2031_v3  ;;  %v1983_v41 = vld [vmem:[%s4316_s1 + $0x478] sm:$0xff]  ;;  %v383_v47 = vrot.slane %v355_v39, 4  ;;  %v2081_v49 = vld [vmem:[%s4316_s1 + $0x788] sm:$0xff]  ;;  %v1956_v54 = vrot.slane %v394_v45, 9  ;;  %v1957_v58 = vrot.slane %v396_v51, 9  ;;  %v389_v59 = vsel %vm211_vm0, %v350_v35, %v381_v40 }
  0x2f   : > { %746 = vmatpush.msrb.mxu2 %v2061_v4  ;;  %768 = vmatpush.msrb.mxu3 %v2095_v5  ;;  %v2047_v48 = vld [vmem:[%s4316_s1 + $0x678] sm:$0xff]  ;;  %v1981_v50 = vld [vmem:[%s4316_s1 + $0x468] sm:$0xff]  ;;  %v392_v60 = vsel %vm211_vm0, %v381_v40, %v350_v35  ;;  %v418_v0 = vsel %vm2767_vm3, %v1952_v52, %v1953_v53  ;;  %v1954_v2 = vrot.slane %v389_v59, 9  ;;  %v173_v33 = vld [vmem:[%s2719_s14 + $0x10] sm:$0xf] }
  0x30   : > { %701 = vmatpush.msrb.mxu0 %v1995_v6  ;;  %723 = vmatpush.msrb.mxu1 %v2029_v7  ;;  %v2015_v55 = vld [vmem:[%s4316_s1 + $0x578] sm:$0xff]  ;;  %v2045_v56 = vld [vmem:[%s4316_s1 + $0x668] sm:$0xff]  ;;  %v395_v61 = vsel %vm211_vm0, %v354_v38, %v383_v47  ;;  %v398_v1 = vsel %vm211_vm0, %v383_v47, %v354_v38  ;;  %v1955_v3 = vrot.slane %v392_v60, 9  ;;  %v426_v7 = vsel %vm2767_vm3, %v1956_v54, %v1957_v58  ;;  %v177_v34 = vld [vmem:[%s2719_s14 + $0x30] sm:$0xf] }
  0x31   : > { %747 = vmatpush.msrb.mxu2 %v2059_v8  ;;  %769 = vmatpush.msrb.mxu3 %v2093_v9  ;;  %v2079_v57 = vld [vmem:[%s4316_s1 + $0x778] sm:$0xff]  ;;  %v2013_v63 = vld [vmem:[%s4316_s1 + $0x568] sm:$0xff]  ;;  %576 = vst [vmem:[#allocation1] ss:$2 sm:$0xff] %v418_v0  ;;  %v1958_v8 = vrot.slane %v395_v61, 9  ;;  %v1959_v9 = vrot.slane %v398_v1, 9 }
  0x32   : > { %702 = vmatpush.msrb.mxu0 %v1993_v10  ;;  %724 = vmatpush.msrb.mxu1 %v2027_v11  ;;  %v1979_v62 = vld [vmem:[%s4316_s1 + $0x458] sm:$0xff]  ;;  %v172_v4 = vld [vmem:[%s2719_s14 + $0x8] sm:$0xf]  ;;  %578 = vst [vmem:[#allocation1 + $0x1] ss:$2 sm:$0xff] %v426_v7  ;;  %v250_v60 = vld [vmem:[%s4316_s1 + $0xf0] sm:$0xff] }
  0x33   : > { %748 = vmatpush.msrb.mxu2 %v2057_v12  ;;  %770 = vmatpush.msrb.mxu3 %v2091_v13  ;;  %v2043_v5 = vld [vmem:[%s4316_s1 + $0x658] sm:$0xff]  ;;  %v2077_v6 = vld [vmem:[%s4316_s1 + $0x768] sm:$0xff]  ;;  %v422_v13 = vsel %vm2767_vm3, %v1954_v2, %v1955_v3  ;;  %v356_v39 = vld [vmem:[%s2719_s14 + $0x40] sm:$0x1e] }
  0x34   : > { %703 = vmatpush.msrb.mxu0 %v1991_v14  ;;  %725 = vmatpush.msrb.mxu1 %v2025_v15  ;;  %v176_v10 = vld [vmem:[%s2719_s14 + $0x28] sm:$0xf]  ;;  %v2011_v12 = vld [vmem:[%s4316_s1 + $0x558] sm:$0xff]  ;;  %v171_v14 = vld [vmem:[%s2719_s14] sm:$0xf] }
  0x35   : > { %749 = vmatpush.msrb.mxu2 %v2055_v16  ;;  %771 = vmatpush.msrb.mxu3 %v2089_v17  ;;  %v1977_v11 = vld [vmem:[%s4316_s1 + $0x448] sm:$0xff]  ;;  %v2075_v16 = vld [vmem:[%s4316_s1 + $0x758] sm:$0xff]  ;;  %v430_v17 = vsel %vm2767_vm3, %v1958_v8, %v1959_v9  ;;  %580 = vst [vmem:[#allocation1 + $0x10] ss:$2 sm:$0xff] %v422_v13  ;;  %v314_v61 = vld [vmem:[%s4316_s1 + $0x2f0] sm:$0xff] }
  0x36   : > { %704 = vmatpush.msrb.mxu0 %v1989_v18  ;;  %726 = vmatpush.msrb.mxu1 %v2023_v19  ;;  %v2041_v15 = vld [vmem:[%s4316_s1 + $0x648] sm:$0xff]  ;;  %v203_v18 = vrot.slane %v172_v4, 4  ;;  %v174_v19 = vld [vmem:[%s2719_s14 + $0x18] sm:$0xf]  ;;  %582 = vst [vmem:[#allocation1 + $0x11] ss:$2 sm:$0xff] %v430_v17 }
  0x37   : > { %750 = vmatpush.msrb.mxu2 %v2053_v20  ;;  %772 = vmatpush.msrb.mxu3 %v2087_v21  ;;  %v1975_v20 = vld [vmem:[%s4316_s1 + $0x438] sm:$0xff]  ;;  %v205_v21 = vrot.slane %v176_v10, 4  ;;  %v2073_v26 = vld [vmem:[%s4316_s1 + $0x748] sm:$0xff]  ;;  %v204_v29 = vrot.slane %v174_v19, 4  ;;  %v362_v8 = vld [vmem:[%s2719_s14 + $0x70] sm:$0x1e] }
  0x38   : > { %705 = vmatpush.msrb.mxu0 %v1987_v22  ;;  %727 = vmatpush.msrb.mxu1 %v2021_v23  ;;  %v178_v22 = vld [vmem:[%s2719_s14 + $0x38] sm:$0xf]  ;;  %v2009_v23 = vld [vmem:[%s4316_s1 + $0x548] sm:$0xff]  ;;  %v282_v13 = vld [vmem:[%s4316_s1 + $0x1f0] sm:$0xff] }
  0x39   : > { %751 = vmatpush.msrb.mxu2 %v2051_v24  ;;  %773 = vmatpush.msrb.mxu3 %v2085_v25  ;;  %v2039_v24 = vld [vmem:[%s4316_s1 + $0x638] sm:$0xff]  ;;  %v175_v25 = vld [vmem:[%s2719_s14 + $0x20] sm:$0xf]  ;;  %v2037_v30 = vld [vmem:[%s4316_s1 + $0x628] sm:$0xff]  ;;  %v206_v35 = vrot.slane %v178_v22, 4  ;;  %v213_v45 = vsel %vm211_vm0, %v173_v33, %v204_v29 }
  0x3a   : > { %706 = vmatpush.msrb.mxu0 %v1985_v27  ;;  %728 = vmatpush.msrb.mxu1 %v2019_v28  ;;  %v1973_v27 = vld [vmem:[%s4316_s1 + $0x428] sm:$0xff]  ;;  %v2007_v28 = vld [vmem:[%s4316_s1 + $0x538] sm:$0xff]  ;;  %v214_v38 = vsel %vm211_vm0, %v175_v25, %v205_v21  ;;  %v346_v17 = vld [vmem:[%s4316_s1 + $0x3f0] sm:$0xff] }
  0x3b   : > { %752 = vmatpush.msrb.mxu2 %v2049_v32  ;;  %774 = vmatpush.msrb.mxu3 %v2083_v37  ;;  %v2071_v31 = vld [vmem:[%s4316_s1 + $0x738] sm:$0xff]  ;;  %v212_v32 = vsel %vm211_vm0, %v171_v14, %v203_v18  ;;  %v2005_v37 = vld [vmem:[%s4316_s1 + $0x528] sm:$0xff]  ;;  %v215_v52 = vsel %vm211_vm0, %v177_v34, %v206_v35  ;;  %v246_v21 = vld [vmem:[%s4316_s1 + $0xd0] sm:$0xff] }
  0x3c   : > { %707 = vmatpush.msrb.mxu0 %v1983_v41  ;;  %729 = vmatpush.msrb.mxu1 %v2017_v42  ;;  %v1971_v36 = vld [vmem:[%s4316_s1 + $0x418] sm:$0xff]  ;;  %v357_v40 = vld [vmem:[%s2719_s14 + $0x48] sm:$0x1e]  ;;  %v360_v41 = vld [vmem:[%s2719_s14 + $0x60] sm:$0x1e] }
  0x3d   : > { %753 = vmatpush.msrb.mxu2 %v2047_v48  ;;  %775 = vmatpush.msrb.mxu3 %v2081_v49  ;;  %v2869_v42 = vld.sshfl [vmem:[#allocation1] sm:$0xff pattern:$0x75316420]  ;;  %v2871_v43 = vld.sshfl [vmem:[#allocation1 + $0x8] sm:$0xff pattern:$0x75316420] }
  0x3e   : > { %708 = vmatpush.msrb.mxu0 %v1981_v50  ;;  %730 = vmatpush.msrb.mxu1 %v2015_v55  ;;  %v2035_v44 = vld [vmem:[%s4316_s1 + $0x618] sm:$0xff]  ;;  %791 = vst [vmem:[#allocation1] ss:$2 sm:$0xff] %v212_v32  ;;  %v361_v47 = vld [vmem:[%s2719_s14 + $0x68] sm:$0x1e]  ;;  %v384_v48 = vrot.slane %v357_v40, 4 }
  0x3f   : > { %754 = vmatpush.msrb.mxu2 %v2045_v56  ;;  %776 = vmatpush.msrb.mxu3 %v2079_v57  ;;  %v2069_v49 = vld [vmem:[%s4316_s1 + $0x728] sm:$0xff]  ;;  %v2003_v51 = vld [vmem:[%s4316_s1 + $0x518] sm:$0xff]  ;;  %793 = vst [vmem:[#allocation1 + $0x1] ss:$2 sm:$0xff] %v214_v38  ;;  %v386_v53 = vrot.slane %v361_v47, 4  ;;  %v280_v22 = vld [vmem:[%s4316_s1 + $0x1e0] sm:$0xff] }
  0x40   : > { %709 = vmatpush.msrb.mxu0 %v1979_v62  ;;  %731 = vmatpush.msrb.mxu1 %v2013_v63  ;;  %v1969_v50 = vld [vmem:[%s4316_s1 + $0x408] sm:$0xff]  ;;  %v2888_v54 = vld.sshfl [vmem:[#allocation1 + $0x10] sm:$0xff pattern:$0x75316420]  ;;  %v2067_v56 = vld [vmem:[%s4316_s1 + $0x718] sm:$0xff]  ;;  %v400_v58 = vsel %vm211_vm0, %v356_v39, %v384_v48  ;;  %v402_v59 = vsel %vm211_vm0, %v384_v48, %v356_v39 }
  0x41   : > { %755 = vmatpush.msrb.mxu2 %v2043_v5  ;;  %777 = vmatpush.msrb.mxu3 %v2077_v6  ;;  %v2033_v55 = vld [vmem:[%s4316_s1 + $0x608] sm:$0xff]  ;;  %v2896_v57 = vld.sshfl [vmem:[#allocation1 + $0x18] sm:$0xff pattern:$0x75316420]  ;;  %v406_v62 = vsel %vm211_vm0, %v360_v41, %v386_v53  ;;  %v408_v63 = vsel %vm211_vm0, %v386_v53, %v360_v41  ;;  %v1960_v0 = vrot.slane %v400_v58, 9  ;;  %v1961_v1 = vrot.slane %v402_v59, 9 }
  0x42   : > { %710 = vmatpush.msrb.mxu0 %v1977_v11  ;;  %732 = vmatpush.msrb.mxu1 %v2011_v12  ;;  %795 = vst [vmem:[#allocation1 + $0x10] ss:$2 sm:$0xff] %v213_v45  ;;  %v359_v2 = vld [vmem:[%s2719_s14 + $0x58] sm:$0x1e]  ;;  %v1964_v3 = vrot.slane %v406_v62, 9  ;;  %v1965_v4 = vrot.slane %v408_v63, 9 }
  0x43   : > { %756 = vmatpush.msrb.mxu2 %v2041_v15  ;;  %778 = vmatpush.msrb.mxu3 %v2075_v16  ;;  %797 = vst [vmem:[#allocation1 + $0x11] ss:$2 sm:$0xff] %v215_v52  ;;  %v358_v5 = vld [vmem:[%s2719_s14 + $0x50] sm:$0x1e]  ;;  %v2001_v6 = vld [vmem:[%s4316_s1 + $0x508] sm:$0xff]  ;;  %v434_v7 = vsel %vm2767_vm3, %v1960_v0, %v1961_v1  ;;  %v385_v10 = vrot.slane %v359_v2, 4 }
  0x44   : > { %711 = vmatpush.msrb.mxu0 %v1975_v20  ;;  %733 = vmatpush.msrb.mxu1 %v2009_v23  ;;  %v363_v9 = vld [vmem:[%s2719_s14 + $0x78] sm:$0x1e]  ;;  %v2065_v11 = vld [vmem:[%s4316_s1 + $0x708] sm:$0xff]  ;;  %v248_v12 = vld [vmem:[%s4316_s1 + $0xe0] sm:$0xff]  ;;  %v442_v14 = vsel %vm2767_vm3, %v1964_v3, %v1965_v4  ;;  %584 = vst [vmem:[#allocation1 + $0x20] ss:$2 sm:$0xff] %v434_v7 }
  0x45   : > { %757 = vmatpush.msrb.mxu2 %v2039_v24  ;;  %779 = vmatpush.msrb.mxu3 %v2073_v26  ;;  %v387_v15 = vrot.slane %v363_v9, 4  ;;  %v312_v16 = vld [vmem:[%s4316_s1 + $0x2e0] sm:$0xff]  ;;  %586 = vst [vmem:[#allocation1 + $0x21] ss:$2 sm:$0xff] %v442_v14  ;;  %v401_v18 = vsel %vm211_vm0, %v358_v5, %v385_v10  ;;  %v404_v19 = vsel %vm211_vm0, %v385_v10, %v358_v5  ;;  %v180_v20 = vld [vmem:[%s2719_s14 + $0x48] sm:$0xf] }
  0x46   : > { %712 = vmatpush.msrb.mxu0 %v1973_v27  ;;  %734 = vmatpush.msrb.mxu1 %v2007_v28  ;;  %v1962_v25 = vrot.slane %v401_v18, 9  ;;  %v1963_v26 = vrot.slane %v404_v19, 9  ;;  %v184_v27 = vld [vmem:[%s2719_s14 + $0x68] sm:$0xf]  ;;  %v183_v34 = vld [vmem:[%s2719_s14 + $0x60] sm:$0xf] }
  0x47   : > { %758 = vmatpush.msrb.mxu2 %v2037_v30  ;;  %780 = vmatpush.msrb.mxu3 %v2071_v31  ;;  %v407_v23 = vsel %vm211_vm0, %v362_v8, %v387_v15  ;;  %v410_v24 = vsel %vm211_vm0, %v387_v15, %v362_v8  ;;  %v179_v30 = vld [vmem:[%s2719_s14 + $0x40] sm:$0xf]  ;;  %v207_v31 = vrot.slane %v180_v20, 4  ;;  %v209_v32 = vrot.slane %v184_v27, 4  ;;  %v182_v35 = vld [vmem:[%s2719_s14 + $0x58] sm:$0xf] }
  0x48   : > { %713 = vmatpush.msrb.mxu0 %v1971_v36  ;;  %735 = vmatpush.msrb.mxu1 %v2005_v37  ;;  %v1966_v28 = vrot.slane %v407_v23, 9  ;;  %v1967_v29 = vrot.slane %v410_v24, 9  ;;  %v438_v33 = vsel %vm2767_vm3, %v1962_v25, %v1963_v26  ;;  %v186_v36 = vld [vmem:[%s2719_s14 + $0x78] sm:$0xf]  ;;  %v310_v37 = vld [vmem:[%s4316_s1 + $0x2d0] sm:$0xff]  ;;  %v344_v38 = vld [vmem:[%s4316_s1 + $0x3e0] sm:$0xff] }
  0x49   : > { %759 = vmatpush.msrb.mxu2 %v2035_v44  ;;  %781 = vmatpush.msrb.mxu3 %v2069_v49  ;;  %588 = vst [vmem:[#allocation1 + $0x30] ss:$2 sm:$0xff] %v438_v33  ;;  %v244_v40 = vld [vmem:[%s4316_s1 + $0xc0] sm:$0xff]  ;;  %v278_v41 = vld [vmem:[%s4316_s1 + $0x1d0] sm:$0xff]  ;;  %v216_v45 = vsel %vm211_vm0, %v179_v30, %v207_v31  ;;  %v218_v49 = vsel %vm211_vm0, %v183_v34, %v209_v32  ;;  %v210_v52 = vrot.slane %v186_v36, 4 }
  0x4a   : > { %623 = vmatmul.f32.vlgmr.msra.gmra.mxu0 %v2869_v42  ;;  %669 = vmatmul.f32.vlgmr.msra.gmra.mxu2 %v2888_v54  ;;  %v446_v39 = vsel %vm2767_vm3, %v1966_v28, %v1967_v29  ;;  %v308_v44 = vld [vmem:[%s4316_s1 + $0x2c0] sm:$0xff]  ;;  %v342_v47 = vld [vmem:[%s4316_s1 + $0x3d0] sm:$0xff]  ;;  %v2097_v26 = vld [vmem:[%s2719_s14 + $0x28] sm:$0xf] }
  0x4b   : > { %714 = vmatpush.msrb.mxu0 %v1969_v50  ;;  %736 = vmatpush.msrb.mxu1 %v2003_v51  ;;  %590 = vst [vmem:[#allocation1 + $0x31] ss:$2 sm:$0xff] %v446_v39  ;;  %v276_v48 = vld [vmem:[%s4316_s1 + $0x1c0] sm:$0xff]  ;;  %v181_v50 = vld [vmem:[%s2719_s14 + $0x50] sm:$0xf]  ;;  %v208_v51 = vrot.slane %v182_v35, 4 }
  0x4c   : > { %760 = vmatpush.msrb.mxu2 %v2033_v55  ;;  %782 = vmatpush.msrb.mxu3 %v2067_v56  ;;  %v2982_v53 = vld.sshfl [vmem:[#allocation1 + $0x20] sm:$0xff pattern:$0x75316420]  ;;  %v2984_v55 = vld.sshfl [vmem:[#allocation1 + $0x28] sm:$0xff pattern:$0x75316420] }
  0x4d   : > { %822 = vmatpush.msra.mxu0 %v250_v60  ;;  %646 = vmatmul.f32.vlgmr.msra.gmra.mxu1 %v2871_v43  ;;  %v242_v56 = vld [vmem:[%s4316_s1 + $0xb0] sm:$0xff]  ;;  %799 = vst [vmem:[#allocation1 + $0x20] ss:$2 sm:$0xff] %v216_v45  ;;  %v340_v60 = vld [vmem:[%s4316_s1 + $0x3c0] sm:$0xff]  ;;  %v2101_v28 = vld [vmem:[%s2719_s14 + $0x48] sm:$0xf] }
  0x4e   : > { %868 = vmatpush.msra.mxu2 %v314_v61  ;;  %692 = vmatmul.f32.vlgmr.msra.gmra.mxu3 %v2896_v57  ;;  %v306_v58 = vld [vmem:[%s4316_s1 + $0x2b0] sm:$0xff]  ;;  %801 = vst [vmem:[#allocation1 + $0x21] ss:$2 sm:$0xff] %v218_v49  ;;  %v217_v61 = vsel %vm211_vm0, %v181_v50, %v208_v51  ;;  %v240_v62 = vld [vmem:[%s4316_s1 + $0xa0] sm:$0xff]  ;;  %v1039_v30 = vrot.slane %v2097_v26, 4  ;;  %v1041_v31 = vrot.slane %v2101_v28, 4 }
  0x4f   : > { %737 = vmatpush.msrb.mxu1 %v2001_v6  ;;  %783 = vmatpush.msrb.mxu3 %v2065_v11  ;;  %v185_v59 = vld [vmem:[%s2719_s14 + $0x70] sm:$0xf]  ;;  %v304_v1 = vld [vmem:[%s4316_s1 + $0x2a0] sm:$0xff]  ;;  %v3097_v29 = vld.sshfl [vmem:[#allocation1 + $0x8] sm:$0xff pattern:$0x75316420] }
  0x50   : > { %823 = vmatpush.msra.mxu0 %v248_v12  ;;  %869 = vmatpush.msra.mxu2 %v312_v16  ;;  %v219_v63 = vsel %vm211_vm0, %v185_v59, %v210_v52  ;;  %v274_v0 = vld [vmem:[%s4316_s1 + $0x1b0] sm:$0xff]  ;;  %v272_v6 = vld [vmem:[%s4316_s1 + $0x1a0] sm:$0xff]  ;;  %v2099_v34 = vld [vmem:[%s2719_s14 + $0x38] sm:$0xf] }
  0x51   : > { %845 = vmatpush.msra.mxu1 %v282_v13  ;;  %891 = vmatpush.msra.mxu3 %v346_v17  ;;  %v338_v2 = vld [vmem:[%s4316_s1 + $0x3b0] sm:$0xff]  ;;  %v336_v8 = vld [vmem:[%s4316_s1 + $0x3a0] sm:$0xff]  ;;  %v2103_v39 = vld [vmem:[%s2719_s14 + $0x58] sm:$0xf] }
  0x52   : > { %824 = vmatpush.msra.mxu0 %v246_v21  ;;  %870 = vmatpush.msra.mxu2 %v310_v37  ;;  %v3011_v3 = vld.sshfl [vmem:[#allocation1 + $0x30] sm:$0xff pattern:$0x75316420]  ;;  %v3014_v4 = vld.sshfl [vmem:[#allocation1 + $0x38] sm:$0xff pattern:$0x75316420] }
  0x53   : > { %846 = vmatpush.msra.mxu1 %v280_v22  ;;  %892 = vmatpush.msra.mxu3 %v344_v38  ;;  %803 = vst [vmem:[#allocation1 + $0x30] ss:$2 sm:$0xff] %v217_v61  ;;  %v238_v5 = vld [vmem:[%s4316_s1 + $0x90] sm:$0xff]  ;;  %v236_v9 = vld [vmem:[%s4316_s1 + $0x80] sm:$0xff]  ;;  %v313_v26 = vld [vmem:[%s4316_s1 + $0x2e8] sm:$0xff] }
  0x54   : > { %825 = vmatpush.msra.mxu0 %v244_v40  ;;  %871 = vmatpush.msra.mxu2 %v308_v44  ;;  %805 = vst [vmem:[#allocation1 + $0x31] ss:$2 sm:$0xff] %v219_v63  ;;  %v302_v7 = vld [vmem:[%s4316_s1 + $0x290] sm:$0xff]  ;;  %v300_v11 = vld [vmem:[%s4316_s1 + $0x280] sm:$0xff]  ;;  %v1040_v40 = vrot.slane %v2099_v34, 4  ;;  %v1042_v44 = vrot.slane %v2103_v39, 4 }
  0x55   : > { %847 = vmatpush.msra.mxu1 %v278_v41  ;;  %893 = vmatpush.msra.mxu3 %v342_v47  ;;  %v270_v10 = vld [vmem:[%s4316_s1 + $0x190] sm:$0xff]  ;;  %v268_v13 = vld [vmem:[%s4316_s1 + $0x180] sm:$0xff]  ;;  %v3116_v47 = vld.sshfl [vmem:[#allocation1 + $0x18] sm:$0xff pattern:$0x75316420] }
  0x56   : > { %626 = vmatmul.f32.gmra.mxu0 %v2982_v53  ;;  %872 = vmatpush.msra.mxu2 %v306_v58  ;;  %v334_v12 = vld [vmem:[%s4316_s1 + $0x390] sm:$0xff]  ;;  %v332_v16 = vld [vmem:[%s4316_s1 + $0x380] sm:$0xff]  ;;  %v247_v28 = vld [vmem:[%s4316_s1 + $0xd8] sm:$0xff] }
  0x57   : > { %848 = vmatpush.msra.mxu1 %v276_v48  ;;  %826 = vmatpush.msra.mxu0 %v242_v56  ;;  %v234_v14 = vld [vmem:[%s4316_s1 + $0x70] sm:$0xff]  ;;  %v232_v17 = vld [vmem:[%s4316_s1 + $0x60] sm:$0xff]  ;;  %v309_v34 = vld [vmem:[%s4316_s1 + $0x2c8] sm:$0xff] }
  0x58   : > { %894 = vmatpush.msra.mxu3 %v340_v60  ;;  %649 = vmatmul.f32.gmra.mxu1 %v2984_v55  ;;  %v298_v15 = vld [vmem:[%s4316_s1 + $0x270] sm:$0xff]  ;;  %v296_v19 = vld [vmem:[%s4316_s1 + $0x260] sm:$0xff]  ;;  %v341_v39 = vld [vmem:[%s4316_s1 + $0x3c8] sm:$0xff] }
  0x59   : > { %672 = vmatmul.f32.gmra.mxu2 %v3011_v3  ;;  %695 = vmatmul.f32.gmra.mxu3 %v3014_v4  ;;  %v266_v18 = vld [vmem:[%s4316_s1 + $0x170] sm:$0xff]  ;;  %v264_v21 = vld [vmem:[%s4316_s1 + $0x160] sm:$0xff] }
  0x5a   : > { %827 = vmatpush.msra.mxu0 %v240_v62  ;;  %849 = vmatpush.msra.mxu1 %v274_v0  ;;  %v230_v20 = vld [vmem:[%s4316_s1 + $0x50] sm:$0xff]  ;;  %v328_v22 = vld [vmem:[%s4316_s1 + $0x360] sm:$0xff] }
  0x5b   : > { %873 = vmatpush.msra.mxu2 %v304_v1  ;;  %895 = vmatpush.msra.mxu3 %v338_v2  ;;  %v2096_v23 = vld [vmem:[%s2719_s14 + $0x20] sm:$0xf]  ;;  %v262_v25 = vld [vmem:[%s4316_s1 + $0x150] sm:$0xff]  ;;  %v2105_v2 = vld [vmem:[%s2719_s14 + $0x68] sm:$0xf] }
  0x5c   : > { %828 = vmatpush.msra.mxu0 %v238_v5  ;;  %850 = vmatpush.msra.mxu1 %v272_v6  ;;  %v228_v24 = vld [vmem:[%s4316_s1 + $0x40] sm:$0xff]  ;;  %v326_v32 = vld [vmem:[%s4316_s1 + $0x350] sm:$0xff]  ;;  %v1047_v36 = vsel %vm211_vm0, %v2096_v23, %v1039_v30  ;;  %v2109_v5 = vld [vmem:[%s2719_s14 + $0x88] sm:$0xf] }
  0x5d   : > { %874 = vmatpush.msra.mxu2 %v302_v7  ;;  %896 = vmatpush.msra.mxu3 %v336_v8  ;;  %v2100_v27 = vld [vmem:[%s2719_s14 + $0x40] sm:$0xf]  ;;  %v2098_v33 = vld [vmem:[%s2719_s14 + $0x30] sm:$0xf]  ;;  %v1043_v7 = vrot.slane %v2105_v2, 4  ;;  %v1045_v8 = vrot.slane %v2109_v5, 4 }
  0x5e   : > { %829 = vmatpush.msra.mxu0 %v236_v9  ;;  %851 = vmatpush.msra.mxu1 %v270_v10  ;;  %v226_v35 = vld [vmem:[%s4316_s1 + $0x30] sm:$0xff]  ;;  %v1049_v37 = vsel %vm211_vm0, %v2100_v27, %v1041_v31  ;;  %v260_v45 = vld [vmem:[%s4316_s1 + $0x140] sm:$0xff]  ;;  %v1048_v48 = vsel %vm211_vm0, %v2098_v33, %v1040_v40  ;;  %v3169_v6 = vld.sshfl [vmem:[#allocation1 + $0x28] sm:$0xff pattern:$0x75316420] }
  0x5f   : > { %875 = vmatpush.msra.mxu2 %v300_v11  ;;  %897 = vmatpush.msra.mxu3 %v334_v12  ;;  %v2102_v38 = vld [vmem:[%s2719_s14 + $0x50] sm:$0xf]  ;;  %v324_v50 = vld [vmem:[%s4316_s1 + $0x340] sm:$0xff]  ;;  %v2107_v11 = vld [vmem:[%s2719_s14 + $0x78] sm:$0xf] }
  0x60   : > { %715 = vmatmul.f32.vlgmr.msrb.gmra.mxu0 %v2869_v42  ;;  %852 = vmatpush.msra.mxu1 %v268_v13  ;;  %v330_v42 = vld [vmem:[%s4316_s1 + $0x370] sm:$0xff]  ;;  %v1050_v51 = vsel %vm211_vm0, %v2102_v38, %v1042_v44  ;;  %v224_v52 = vld [vmem:[%s4316_s1 + $0x20] sm:$0xff]  ;;  %v251_v12 = vld [vmem:[%s4316_s1 + $0xf8] sm:$0xff] }
  0x61   : > { %761 = vmatmul.f32.vlgmr.msrb.gmra.mxu2 %v2888_v54  ;;  %830 = vmatpush.msra.mxu0 %v234_v14  ;;  %v294_v54 = vld [vmem:[%s4316_s1 + $0x250] sm:$0xff]  ;;  %v288_v58 = vld [vmem:[%s4316_s1 + $0x220] sm:$0xff]  ;;  %v347_v27 = vld [vmem:[%s4316_s1 + $0x3f8] sm:$0xff] }
  0x62   : > { %876 = vmatpush.msra.mxu2 %v298_v15  ;;  %898 = vmatpush.msra.mxu3 %v332_v16  ;;  %v3111_v41 = vld.sshfl [vmem:[#allocation1 + $0x10] sm:$0xff pattern:$0x75316420]  ;;  %v256_v60 = vld [vmem:[%s4316_s1 + $0x120] sm:$0xff]  ;;  %v2111_v16 = vld [vmem:[%s2719_s14 + $0x98] sm:$0xf] }
  0x63   : > { %738 = vmatmul.f32.vlgmr.msrb.gmra.mxu1 %v2871_v43  ;;  %784 = vmatmul.f32.vlgmr.msrb.gmra.mxu3 %v2896_v57  ;;  %v292_v43 = vld [vmem:[%s4316_s1 + $0x240] sm:$0xff]  ;;  %v290_v49 = vld [vmem:[%s4316_s1 + $0x230] sm:$0xff]  ;;  %1188 = vst [vmem:[#allocation1 + $0x10] ss:$2 sm:$0xff] %v1048_v48  ;;  %v311_v30 = vld [vmem:[%s4316_s1 + $0x2d8] sm:$0xff] }
  0x64   : > { %831 = vmatpush.msra.mxu0 %v232_v17  ;;  %853 = vmatpush.msra.mxu1 %v266_v18  ;;  %v3095_v57 = vld.sshfl [vmem:[#allocation1] sm:$0xff pattern:$0x75316420]  ;;  %v258_v56 = vld [vmem:[%s4316_s1 + $0x130] sm:$0xff]  ;;  %1190 = vst [vmem:[#allocation1 + $0x11] ss:$2 sm:$0xff] %v1050_v51 }
  0x65   : > { %877 = vmatpush.msra.mxu2 %v296_v19  ;;  %899 = vmatpush.msra.mxu3 %v330_v42  ;;  %1184 = vst [vmem:[#allocation1] ss:$2 sm:$0xff] %v1047_v36  ;;  %v222_v59 = vld [vmem:[%s4316_s1 + $0x10] sm:$0xff]  ;;  %v320_v62 = vld [vmem:[%s4316_s1 + $0x320] sm:$0xff]  ;;  %v1044_v17 = vrot.slane %v2107_v11, 4  ;;  %v1046_v19 = vrot.slane %v2111_v16, 4 }
  0x66   : > { %832 = vmatpush.msra.mxu0 %v230_v20  ;;  %854 = vmatpush.msra.mxu1 %v264_v21  ;;  %1186 = vst [vmem:[#allocation1 + $0x1] ss:$2 sm:$0xff] %v1049_v37  ;;  %v286_v61 = vld [vmem:[%s4316_s1 + $0x210] sm:$0xff]  ;;  %v2104_v63 = vld [vmem:[%s2719_s14 + $0x60] sm:$0xf]  ;;  %v315_v42 = vld [vmem:[%s4316_s1 + $0x2f8] sm:$0xff] }
  0x67   : > { %878 = vmatpush.msra.mxu2 %v294_v54  ;;  %900 = vmatpush.msra.mxu3 %v328_v22  ;;  %v220_v0 = vld [vmem:[%s4316_s1] sm:$0xff]  ;;  %v254_v1 = vld [vmem:[%s4316_s1 + $0x110] sm:$0xff]  ;;  %v1051_v13 = vsel %vm211_vm0, %v2104_v63, %v1043_v7  ;;  %v3188_v20 = vld.sshfl [vmem:[#allocation1 + $0x38] sm:$0xff pattern:$0x75316420] }
  0x68   : > { %833 = vmatpush.msra.mxu0 %v228_v24  ;;  %855 = vmatpush.msra.mxu1 %v262_v25  ;;  %v318_v9 = vld [vmem:[%s4316_s1 + $0x310] sm:$0xff]  ;;  %v252_v54 = vld [vmem:[%s4316_s1 + $0x100] sm:$0xff]  ;;  %v249_v24 = vld [vmem:[%s4316_s1 + $0xe8] sm:$0xff] }
  0x69   : > { %879 = vmatpush.msra.mxu2 %v292_v43  ;;  %901 = vmatpush.msra.mxu3 %v326_v32  ;;  %v2106_v10 = vld [vmem:[%s2719_s14 + $0x70] sm:$0xf]  ;;  %v316_v22 = vld [vmem:[%s4316_s1 + $0x300] sm:$0xff]  ;;  %v283_v25 = vld [vmem:[%s4316_s1 + $0x1f8] sm:$0xff] }
  0x6a   : > { %718 = vmatmul.f32.gmra.mxu0 %v2982_v53  ;;  %764 = vmatmul.f32.gmra.mxu2 %v3011_v3  ;;  %v322_v53 = vld [vmem:[%s4316_s1 + $0x330] sm:$0xff]  ;;  %v2108_v3 = vld [vmem:[%s2719_s14 + $0x80] sm:$0xf]  ;;  %v1052_v21 = vsel %vm211_vm0, %v2106_v10, %v1044_v17  ;;  %v281_v43 = vld [vmem:[%s4316_s1 + $0x1e8] sm:$0xff] }
  0x6b   : > { %834 = vmatpush.msra.mxu0 %v226_v35  ;;  %856 = vmatpush.msra.mxu1 %v260_v45  ;;  %v1053_v14 = vsel %vm211_vm0, %v2108_v3, %v1045_v8  ;;  %v2110_v15 = vld [vmem:[%s2719_s14 + $0x90] sm:$0xf]  ;;  %v345_v31 = vld [vmem:[%s4316_s1 + $0x3e8] sm:$0xff]  ;;  %v279_v33 = vld [vmem:[%s4316_s1 + $0x1d8] sm:$0xff] }
  0x6c   : > { %880 = vmatpush.msra.mxu2 %v290_v49  ;;  %902 = vmatpush.msra.mxu3 %v324_v50  ;;  %v3183_v18 = vld.sshfl [vmem:[#allocation1 + $0x30] sm:$0xff pattern:$0x75316420]  ;;  %v1054_v23 = vsel %vm211_vm0, %v2110_v15, %v1046_v19  ;;  %v245_v32 = vld [vmem:[%s4316_s1 + $0xc8] sm:$0xff]  ;;  %v343_v35 = vld [vmem:[%s4316_s1 + $0x3d8] sm:$0xff] }
  0x6d   : > { %741 = vmatmul.f32.gmra.mxu1 %v2984_v55  ;;  %787 = vmatmul.f32.gmra.mxu3 %v3014_v4  ;;  %v284_v55 = vld [vmem:[%s4316_s1 + $0x200] sm:$0xff]  ;;  %1196 = vst [vmem:[#allocation1 + $0x30] ss:$2 sm:$0xff] %v1052_v21  ;;  %v243_v36 = vld [vmem:[%s4316_s1 + $0xb8] sm:$0xff]  ;;  %v277_v37 = vld [vmem:[%s4316_s1 + $0x1c8] sm:$0xff] }
  0x6e   : > { %835 = vmatpush.msra.mxu0 %v224_v52  ;;  %857 = vmatpush.msra.mxu1 %v258_v56  ;;  %v3167_v4 = vld.sshfl [vmem:[#allocation1 + $0x20] sm:$0xff pattern:$0x75316420]  ;;  %1198 = vst [vmem:[#allocation1 + $0x31] ss:$2 sm:$0xff] %v1054_v23  ;;  %v307_v38 = vld [vmem:[%s4316_s1 + $0x2b8] sm:$0xff] }
  0x6f   : > { %881 = vmatpush.msra.mxu2 %v288_v58  ;;  %903 = vmatpush.msra.mxu3 %v322_v53  ;;  %1192 = vst [vmem:[#allocation1 + $0x20] ss:$2 sm:$0xff] %v1051_v13  ;;  %v241_v40 = vld [vmem:[%s4316_s1 + $0xa8] sm:$0xff]  ;;  %v275_v44 = vld [vmem:[%s4316_s1 + $0x1b8] sm:$0xff] }
  0x70   : > { %836 = vmatpush.msra.mxu0 %v222_v59  ;;  %858 = vmatpush.msra.mxu1 %v256_v60  ;;  %1194 = vst [vmem:[#allocation1 + $0x21] ss:$2 sm:$0xff] %v1053_v14  ;;  %v305_v45 = vld [vmem:[%s4316_s1 + $0x2a8] sm:$0xff]  ;;  %v339_v48 = vld [vmem:[%s4316_s1 + $0x3b8] sm:$0xff] }
  0x71   : > { %882 = vmatpush.msra.mxu2 %v286_v61  ;;  %904 = vmatpush.msra.mxu3 %v320_v62  ;;  %v239_v49 = vld [vmem:[%s4316_s1 + $0x98] sm:$0xff]  ;;  %v273_v50 = vld [vmem:[%s4316_s1 + $0x1a8] sm:$0xff] }
  0x72   : > { %837 = vmatpush.msra.mxu0 %v220_v0  ;;  %859 = vmatpush.msra.mxu1 %v254_v1  ;;  %v303_v51 = vld [vmem:[%s4316_s1 + $0x298] sm:$0xff]  ;;  %v337_v52 = vld [vmem:[%s4316_s1 + $0x3a8] sm:$0xff] }
  0x73   : > { %883 = vmatpush.msra.mxu2 %v284_v55  ;;  %905 = vmatpush.msra.mxu3 %v318_v9  ;;  %v237_v56 = vld [vmem:[%s4316_s1 + $0x88] sm:$0xff]  ;;  %v271_v58 = vld [vmem:[%s4316_s1 + $0x198] sm:$0xff] }
  0x74   : > { %838 = vmatmul.f32.vlgmr.msra.gmra.mxu0 %v3095_v57  ;;  %884 = vmatmul.f32.vlgmr.msra.gmra.mxu2 %v3111_v41  ;;  %v301_v53 = vld [vmem:[%s4316_s1 + $0x288] sm:$0xff]  ;;  %v335_v59 = vld [vmem:[%s4316_s1 + $0x398] sm:$0xff] }
  0x75   : > { %914 = vmatpush.msrb.mxu0 %v251_v12  ;;  %960 = vmatpush.msrb.mxu2 %v315_v42  ;;  %v235_v60 = vld [vmem:[%s4316_s1 + $0x78] sm:$0xff]  ;;  %v269_v61 = vld [vmem:[%s4316_s1 + $0x188] sm:$0xff] }
  0x76   : > { %860 = vmatpush.msra.mxu1 %v252_v54  ;;  %906 = vmatpush.msra.mxu3 %v316_v22  ;;  %v299_v62 = vld [vmem:[%s4316_s1 + $0x278] sm:$0xff]  ;;  %v333_v63 = vld [vmem:[%s4316_s1 + $0x388] sm:$0xff] }
  0x77   : > { %861 = vmatmul.f32.vlgmr.msra.gmra.mxu1 %v3097_v29  ;;  %907 = vmatmul.f32.vlgmr.msra.gmra.mxu3 %v3116_v47  ;;  %v233_v0 = vld [vmem:[%s4316_s1 + $0x68] sm:$0xff]  ;;  %v267_v1 = vld [vmem:[%s4316_s1 + $0x178] sm:$0xff] }
  0x78   : > { %915 = vmatpush.msrb.mxu0 %v249_v24  ;;  %937 = vmatpush.msrb.mxu1 %v283_v25  ;;  %v297_v2 = vld [vmem:[%s4316_s1 + $0x268] sm:$0xff]  ;;  %v331_v3 = vld [vmem:[%s4316_s1 + $0x378] sm:$0xff] }
  0x79   : > { %961 = vmatpush.msrb.mxu2 %v313_v26  ;;  %983 = vmatpush.msrb.mxu3 %v347_v27  ;;  %v231_v5 = vld [vmem:[%s4316_s1 + $0x58] sm:$0xff]  ;;  %v265_v55 = vld [vmem:[%s4316_s1 + $0x168] sm:$0xff] }
  0x7a   : > { %916 = vmatpush.msrb.mxu0 %v247_v28  ;;  %938 = vmatpush.msrb.mxu1 %v281_v43  ;;  %v295_v7 = vld [vmem:[%s4316_s1 + $0x258] sm:$0xff]  ;;  %v329_v8 = vld [vmem:[%s4316_s1 + $0x368] sm:$0xff]  ;;  %v2206_v43 = vld [vmem:[%s4316_s1 + $0xaf0] sm:$0xff] }
  0x7b   : > { %962 = vmatpush.msrb.mxu2 %v311_v30  ;;  %984 = vmatpush.msrb.mxu3 %v345_v31  ;;  %v229_v9 = vld [vmem:[%s4316_s1 + $0x48] sm:$0xff]  ;;  %v263_v10 = vld [vmem:[%s4316_s1 + $0x158] sm:$0xff] }
  0x7c   : > { %917 = vmatpush.msrb.mxu0 %v245_v32  ;;  %939 = vmatpush.msrb.mxu1 %v279_v33  ;;  %v293_v11 = vld [vmem:[%s4316_s1 + $0x248] sm:$0xff]  ;;  %v327_v12 = vld [vmem:[%s4316_s1 + $0x358] sm:$0xff]  ;;  %v2204_v32 = vld [vmem:[%s4316_s1 + $0xae0] sm:$0xff] }
  0x7d   : > { %963 = vmatpush.msrb.mxu2 %v309_v34  ;;  %985 = vmatpush.msrb.mxu3 %v343_v35  ;;  %v227_v13 = vld [vmem:[%s4316_s1 + $0x38] sm:$0xff]  ;;  %v261_v14 = vld [vmem:[%s4316_s1 + $0x148] sm:$0xff]  ;;  %v2238_v33 = vld [vmem:[%s4316_s1 + $0xbf0] sm:$0xff] }
  0x7e   : > { %841 = vmatmul.f32.gmra.mxu0 %v3167_v4  ;;  %887 = vmatmul.f32.gmra.mxu2 %v3183_v18  ;;  %v291_v15 = vld [vmem:[%s4316_s1 + $0x238] sm:$0xff]  ;;  %v325_v16 = vld [vmem:[%s4316_s1 + $0x348] sm:$0xff]  ;;  %v2142_v34 = vld [vmem:[%s4316_s1 + $0x8f0] sm:$0xff] }
  0x7f   : > { %918 = vmatpush.msrb.mxu0 %v243_v36  ;;  %940 = vmatpush.msrb.mxu1 %v277_v37  ;;  %v225_v17 = vld [vmem:[%s4316_s1 + $0x28] sm:$0xff]  ;;  %v259_v19 = vld [vmem:[%s4316_s1 + $0x138] sm:$0xff]  ;;  %v2236_v35 = vld [vmem:[%s4316_s1 + $0xbe0] sm:$0xff] }
  0x80   : > { %964 = vmatpush.msrb.mxu2 %v307_v38  ;;  %986 = vmatpush.msrb.mxu3 %v341_v39  ;;  %v289_v42 = vld [vmem:[%s4316_s1 + $0x228] sm:$0xff]  ;;  %v323_v21 = vld [vmem:[%s4316_s1 + $0x338] sm:$0xff]  ;;  %v2172_v36 = vld [vmem:[%s4316_s1 + $0x9e0] sm:$0xff] }
  0x81   : > { %864 = vmatmul.f32.gmra.mxu1 %v3169_v6  ;;  %910 = vmatmul.f32.gmra.mxu3 %v3188_v20  ;;  %v223_v54 = vld [vmem:[%s4316_s1 + $0x18] sm:$0xff]  ;;  %v257_v22 = vld [vmem:[%s4316_s1 + $0x128] sm:$0xff]  ;;  %v2234_v37 = vld [vmem:[%s4316_s1 + $0xbd0] sm:$0xff] }
  0x82   : > { %919 = vmatpush.msrb.mxu0 %v241_v40  ;;  %941 = vmatpush.msrb.mxu1 %v275_v44  ;;  %v287_v23 = vld [vmem:[%s4316_s1 + $0x218] sm:$0xff]  ;;  %v321_v24 = vld [vmem:[%s4316_s1 + $0x328] sm:$0xff]  ;;  %v2138_v38 = vld [vmem:[%s4316_s1 + $0x8d0] sm:$0xff] }
  0x83   : > { %965 = vmatpush.msrb.mxu2 %v305_v45  ;;  %987 = vmatpush.msrb.mxu3 %v339_v48  ;;  %v221_v25 = vld [vmem:[%s4316_s1 + $0x8] sm:$0xff]  ;;  %v255_v26 = vld [vmem:[%s4316_s1 + $0x118] sm:$0xff]  ;;  %v2242_v39 = vld [vmem:[%s2719_s14 + $0x30] sm:$0x1e] }
  0x84   : > { %920 = vmatpush.msrb.mxu0 %v239_v49  ;;  %942 = vmatpush.msrb.mxu1 %v273_v50  ;;  %v285_v27 = vld [vmem:[%s4316_s1 + $0x208] sm:$0xff]  ;;  %v319_v28 = vld [vmem:[%s4316_s1 + $0x318] sm:$0xff]  ;;  %v2170_v44 = vld [vmem:[%s4316_s1 + $0x9d0] sm:$0xff] }
  0x85   : > { %966 = vmatpush.msrb.mxu2 %v303_v51  ;;  %988 = vmatpush.msrb.mxu3 %v337_v52  ;;  %v253_v30 = vld [vmem:[%s4316_s1 + $0x108] sm:$0xff]  ;;  %v2243_v40 = vld [vmem:[%s2719_s14 + $0x38] sm:$0x1e]  ;;  %v2246_v45 = vld [vmem:[%s2719_s14 + $0x50] sm:$0x1e] }
  0x86   : > { %921 = vmatpush.msrb.mxu0 %v237_v56  ;;  %943 = vmatpush.msrb.mxu1 %v271_v58  ;;  %v317_v31 = vld [vmem:[%s4316_s1 + $0x308] sm:$0xff]  ;;  %v2247_v48 = vld [vmem:[%s2719_s14 + $0x58] sm:$0x1e]  ;;  %v1436_v49 = vrot.slane %v2243_v40, 4  ;;  %v2198_v50 = vld [vmem:[%s4316_s1 + $0xab0] sm:$0xff] }
  0x87   : > { %967 = vmatpush.msrb.mxu2 %v301_v53  ;;  %989 = vmatpush.msrb.mxu3 %v335_v59  ;;  %v2232_v51 = vld [vmem:[%s4316_s1 + $0xbc0] sm:$0xff]  ;;  %v1438_v56 = vrot.slane %v2247_v48, 4  ;;  %v2126_v40 = vld [vmem:[%s4316_s1 + $0x870] sm:$0xff] }
  0x88   : > { %922 = vmatpush.msrb.mxu0 %v235_v60  ;;  %944 = vmatpush.msrb.mxu1 %v269_v61  ;;  %v2136_v52 = vld [vmem:[%s4316_s1 + $0x8c0] sm:$0xff]  ;;  %v1444_v59 = vsel %vm211_vm0, %v2242_v39, %v1436_v49  ;;  %v1447_v60 = vsel %vm211_vm0, %v1436_v49, %v2242_v39  ;;  %v2222_v39 = vld [vmem:[%s4316_s1 + $0xb70] sm:$0xff] }
  0x89   : > { %968 = vmatpush.msrb.mxu2 %v299_v62  ;;  %990 = vmatpush.msrb.mxu3 %v333_v63  ;;  %v2168_v58 = vld [vmem:[%s4316_s1 + $0x9c0] sm:$0xff]  ;;  %v2134_v62 = vld [vmem:[%s4316_s1 + $0x8b0] sm:$0xff] }
  0x8a   : > { %923 = vmatpush.msrb.mxu0 %v233_v0  ;;  %945 = vmatpush.msrb.mxu1 %v267_v1  ;;  %v2196_v53 = vld [vmem:[%s4316_s1 + $0xaa0] sm:$0xff]  ;;  %v3465_v63 = vld.sshfl [vmem:[#allocation1 + $0x10] sm:$0xff pattern:$0x75316420]  ;;  %v1450_v0 = vsel %vm211_vm0, %v2246_v45, %v1438_v56  ;;  %v1453_v1 = vsel %vm211_vm0, %v1438_v56, %v2246_v45 }
  0x8b   : > { %969 = vmatpush.msrb.mxu2 %v297_v2  ;;  %991 = vmatpush.msrb.mxu3 %v331_v3  ;;  %v2240_v61 = vld [vmem:[%s2719_s14 + $0x20] sm:$0x1e]  ;;  %v2258_v2 = vrot.slane %v1444_v59, 9  ;;  %v2259_v3 = vrot.slane %v1447_v60, 9  ;;  %v2186_v48 = vld [vmem:[%s4316_s1 + $0xa50] sm:$0xff] }
  0x8c   : > { %924 = vmatpush.msrb.mxu0 %v231_v5  ;;  %946 = vmatpush.msrb.mxu1 %v265_v55  ;;  %v2241_v5 = vld [vmem:[%s2719_s14 + $0x28] sm:$0x1e]  ;;  %v2166_v55 = vld [vmem:[%s4316_s1 + $0x9b0] sm:$0xff]  ;;  %v2220_v49 = vld [vmem:[%s4316_s1 + $0xb60] sm:$0xff] }
  0x8d   : > { %970 = vmatpush.msrb.mxu2 %v295_v7  ;;  %992 = vmatpush.msrb.mxu3 %v329_v8  ;;  %v2262_v7 = vrot.slane %v1450_v0, 9  ;;  %v2263_v8 = vrot.slane %v1453_v1, 9  ;;  %v3556_v56 = vld.sshfl [vmem:[#allocation1 + $0x30] sm:$0xff pattern:$0x75316420] }
  0x8e   : > { %925 = vmatpush.msrb.mxu0 %v229_v9  ;;  %947 = vmatpush.msrb.mxu1 %v263_v10  ;;  %v2245_v9 = vld [vmem:[%s2719_s14 + $0x48] sm:$0x1e]  ;;  %v1435_v10 = vrot.slane %v2241_v5, 4  ;;  %v2156_v5 = vld [vmem:[%s4316_s1 + $0x960] sm:$0xff] }
  0x8f   : > { %971 = vmatpush.msrb.mxu2 %v293_v11  ;;  %993 = vmatpush.msrb.mxu3 %v327_v12  ;;  %v2194_v11 = vld [vmem:[%s4316_s1 + $0xa90] sm:$0xff]  ;;  %v2228_v12 = vld [vmem:[%s4316_s1 + $0xba0] sm:$0xff] }
  0x90   : > { %926 = vmatpush.msrb.mxu0 %v227_v13  ;;  %948 = vmatpush.msrb.mxu1 %v261_v14  ;;  %v3482_v13 = vld.sshfl [vmem:[#allocation1 + $0x18] sm:$0xff pattern:$0x75316420]  ;;  %v1474_v14 = vsel %vm2767_vm3, %v2258_v2, %v2259_v3  ;;  %v2253_v2 = vld [vmem:[%s2719_s14 + $0x88] sm:$0x1e] }
  0x91   : > { %972 = vmatpush.msrb.mxu2 %v291_v15  ;;  %994 = vmatpush.msrb.mxu3 %v325_v16  ;;  %v1437_v15 = vrot.slane %v2245_v9, 4  ;;  %v2164_v16 = vld [vmem:[%s4316_s1 + $0x9a0] sm:$0xff]  ;;  %1632 = vst [vmem:[#allocation1 + $0x10] ss:$2 sm:$0xff] %v1474_v14  ;;  %v2218_v9 = vld [vmem:[%s4316_s1 + $0xb50] sm:$0xff] }
  0x92   : > { %927 = vmatpush.msrb.mxu0 %v225_v17  ;;  %949 = vmatpush.msrb.mxu1 %v259_v19  ;;  %v2192_v17 = vld [vmem:[%s4316_s1 + $0xa80] sm:$0xff]  ;;  %v1482_v19 = vsel %vm2767_vm3, %v2262_v7, %v2263_v8  ;;  %v1441_v8 = vrot.slane %v2253_v2, 4  ;;  %v2197_v2 = vld [vmem:[%s4316_s1 + $0xaa8] sm:$0xff] }
  0x93   : > { %973 = vmatpush.msrb.mxu2 %v289_v42  ;;  %995 = vmatpush.msrb.mxu3 %v323_v21  ;;  %v1443_v42 = vsel %vm211_vm0, %v2240_v61, %v1435_v10  ;;  %v2226_v21 = vld [vmem:[%s4316_s1 + $0xb90] sm:$0xff]  ;;  %1634 = vst [vmem:[#allocation1 + $0x11] ss:$2 sm:$0xff] %v1482_v19 }
  0x94   : > { %928 = vmatpush.msrb.mxu0 %v223_v54  ;;  %950 = vmatpush.msrb.mxu1 %v257_v22  ;;  %v2130_v54 = vld [vmem:[%s4316_s1 + $0x890] sm:$0xff] }
  0x95   : > { %974 = vmatpush.msrb.mxu2 %v287_v23  ;;  %996 = vmatpush.msrb.mxu3 %v321_v24  ;;  %v2256_v24 = vrot.slane %v1443_v42, 9 }
  0x96   : > { %929 = vmatpush.msrb.mxu0 %v221_v25  ;;  %951 = vmatpush.msrb.mxu1 %v255_v26  ;;  %v2162_v26 = vld [vmem:[%s4316_s1 + $0x990] sm:$0xff] }
  0x97   : > { %975 = vmatpush.msrb.mxu2 %v285_v27  ;;  %997 = vmatpush.msrb.mxu3 %v319_v28  ;;  %v2190_v27 = vld [vmem:[%s4316_s1 + $0xa70] sm:$0xff]  ;;  %v3514_v28 = vld.sshfl [vmem:[#allocation1] sm:$0xff pattern:$0x75316420] }
  0x98   : > { %930 = vmatmul.f32.vlgmr.msrb.gmra.mxu0 %v3095_v57  ;;  %976 = vmatmul.f32.vlgmr.msrb.gmra.mxu2 %v3111_v41  ;;  %v2174_v57 = vld [vmem:[%s4316_s1 + $0x9f0] sm:$0xff] }
  0x99   : > { %1261 = vmatpush.msra.mxu2 %v2206_v43  ;;  %952 = vmatpush.msrb.mxu1 %v253_v30  ;;  %v2202_v41 = vld [vmem:[%s4316_s1 + $0xad0] sm:$0xff] }
  0x9a   : > { %998 = vmatpush.msrb.mxu3 %v317_v31  ;;  %953 = vmatmul.f32.vlgmr.msrb.gmra.mxu1 %v3097_v29  ;;  %v2140_v29 = vld [vmem:[%s4316_s1 + $0x8e0] sm:$0xff] }
  0x9b   : > { %999 = vmatmul.f32.vlgmr.msrb.gmra.mxu3 %v3116_v47  ;;  %1262 = vmatpush.msra.mxu2 %v2204_v32  ;;  %v2200_v47 = vld [vmem:[%s4316_s1 + $0xac0] sm:$0xff] }
  0x9c   : > { %1284 = vmatpush.msra.mxu3 %v2238_v33  ;;  %1215 = vmatpush.msra.mxu0 %v2142_v34  ;;  %v2224_v31 = vld [vmem:[%s4316_s1 + $0xb80] sm:$0xff]  ;;  %v3522_v33 = vld.sshfl [vmem:[#allocation1 + $0x8] sm:$0xff pattern:$0x75316420] }
  0x9d   : > { %1238 = vmatpush.msra.mxu1 %v2174_v57  ;;  %1263 = vmatpush.msra.mxu2 %v2202_v41  ;;  %v2128_v32 = vld [vmem:[%s4316_s1 + $0x880] sm:$0xff]  ;;  %v2250_v57 = vld [vmem:[%s2719_s14 + $0x70] sm:$0x1e] }
  0x9e   : > { %1285 = vmatpush.msra.mxu3 %v2236_v35  ;;  %1216 = vmatpush.msra.mxu0 %v2140_v29  ;;  %v2160_v41 = vld [vmem:[%s4316_s1 + $0x980] sm:$0xff]  ;;  %v2251_v29 = vld [vmem:[%s2719_s14 + $0x78] sm:$0x1e] }
  0x9f   : > { %1239 = vmatpush.msra.mxu1 %v2172_v36  ;;  %1264 = vmatpush.msra.mxu2 %v2200_v47  ;;  %v2254_v36 = vld [vmem:[%s2719_s14 + $0x90] sm:$0x1e]  ;;  %v2188_v47 = vld [vmem:[%s4316_s1 + $0xa60] sm:$0xff] }
  0xa0   : > { %1286 = vmatpush.msra.mxu3 %v2234_v37  ;;  %933 = vmatmul.f32.gmra.mxu0 %v3167_v4  ;;  %v2230_v4 = vld [vmem:[%s4316_s1 + $0xbb0] sm:$0xff]  ;;  %v2255_v37 = vld [vmem:[%s2719_s14 + $0x98] sm:$0x1e] }
  0xa1   : > { %979 = vmatmul.f32.gmra.mxu2 %v3183_v18  ;;  %1217 = vmatpush.msra.mxu0 %v2138_v38  ;;  %v2244_v18 = vld [vmem:[%s2719_s14 + $0x40] sm:$0x1e]  ;;  %v1440_v38 = vrot.slane %v2251_v29, 4  ;;  %v1442_v45 = vrot.slane %v2255_v37, 4  ;;  %v2210_v29 = vld [vmem:[%s4316_s1 + $0xb10] sm:$0xff] }
  0xa2   : > { %1240 = vmatpush.msra.mxu1 %v2170_v44  ;;  %1265 = vmatpush.msra.mxu2 %v2198_v50  ;;  %v1449_v22 = vsel %vm211_vm0, %v2244_v18, %v1437_v15  ;;  %v1451_v23 = vsel %vm211_vm0, %v1437_v15, %v2244_v18  ;;  %v2158_v44 = vld [vmem:[%s4316_s1 + $0x970] sm:$0xff]  ;;  %v2184_v18 = vld [vmem:[%s4316_s1 + $0xa40] sm:$0xff] }
  0xa3   : > { %1287 = vmatpush.msra.mxu3 %v2232_v51  ;;  %956 = vmatmul.f32.gmra.mxu1 %v3169_v6  ;;  %v2132_v6 = vld [vmem:[%s4316_s1 + $0x8a0] sm:$0xff]  ;;  %v2260_v43 = vrot.slane %v1449_v22, 9  ;;  %v2261_v30 = vrot.slane %v1451_v23, 9  ;;  %v1456_v50 = vsel %vm211_vm0, %v2250_v57, %v1440_v38  ;;  %v1459_v51 = vsel %vm211_vm0, %v1440_v38, %v2250_v57  ;;  %v2146_v37 = vld [vmem:[%s4316_s1 + $0x910] sm:$0xff] }
  0xa4   : > { %1002 = vmatmul.f32.gmra.mxu3 %v3188_v20  ;;  %1218 = vmatpush.msra.mxu0 %v2136_v52  ;;  %v1445_v20 = vsel %vm211_vm0, %v1435_v10, %v2240_v61  ;;  %v2248_v52 = vld [vmem:[%s2719_s14 + $0x60] sm:$0x1e]  ;;  %v2266_v59 = vrot.slane %v1456_v50, 9  ;;  %v2267_v60 = vrot.slane %v1459_v51, 9  ;;  %v2249_v61 = vld [vmem:[%s2719_s14 + $0x68] sm:$0x1e] }
  0xa5   : > { %1241 = vmatpush.msra.mxu1 %v2168_v58  ;;  %1266 = vmatpush.msra.mxu2 %v2196_v53  ;;  %v2257_v25 = vrot.slane %v1445_v20, 9  ;;  %v1478_v35 = vsel %vm2767_vm3, %v2260_v43, %v2261_v30  ;;  %v1462_v58 = vsel %vm211_vm0, %v2254_v36, %v1442_v45  ;;  %v1465_v53 = vsel %vm211_vm0, %v1442_v45, %v2254_v36  ;;  %v2122_v10 = vld [vmem:[%s4316_s1 + $0x850] sm:$0xff]  ;;  %v2180_v22 = vld [vmem:[%s4316_s1 + $0xa20] sm:$0xff]  ;;  %v2207_v36 = vld [vmem:[%s4316_s1 + $0xaf8] sm:$0xff] }
  0xa6   : > { %1288 = vmatpush.msra.mxu3 %v2230_v4  ;;  %1219 = vmatpush.msra.mxu0 %v2134_v62  ;;  %1630 = vst [vmem:[#allocation1 + $0x1] ss:$2 sm:$0xff] %v1478_v35  ;;  %v2252_v4 = vld [vmem:[%s2719_s14 + $0x80] sm:$0x1e]  ;;  %v2270_v0 = vrot.slane %v1462_v58, 9  ;;  %v2271_v1 = vrot.slane %v1465_v53, 9  ;;  %v1490_v7 = vsel %vm2767_vm3, %v2266_v59, %v2267_v60 }
  0xa7   : > { %1242 = vmatpush.msra.mxu1 %v2166_v55  ;;  %1267 = vmatpush.msra.mxu2 %v2194_v11  ;;  %v1470_v34 = vsel %vm2767_vm3, %v2256_v24, %v2257_v25  ;;  %v2124_v62 = vld [vmem:[%s4316_s1 + $0x860] sm:$0xff]  ;;  %v1439_v3 = vrot.slane %v2249_v61, 4  ;;  %v3572_v55 = vld.sshfl [vmem:[#allocation1 + $0x38] sm:$0xff pattern:$0x75316420]  ;;  %v2154_v11 = vld [vmem:[%s4316_s1 + $0x950] sm:$0xff]  ;;  %v1463_v19 = vsel %vm211_vm0, %v1441_v8, %v2252_v4 }
  0xa8   : > { %1289 = vmatpush.msra.mxu3 %v2228_v12  ;;  %1220 = vmatpush.msra.mxu0 %v2132_v6  ;;  %1628 = vst [vmem:[#allocation1] ss:$2 sm:$0xff] %v1470_v34  ;;  %v1498_v12 = vsel %vm2767_vm3, %v2270_v0, %v2271_v1  ;;  %v2182_v6 = vld [vmem:[%s4316_s1 + $0xa30] sm:$0xff]  ;;  %v2269_v24 = vrot.slane %v1463_v19, 9  ;;  %v2212_v57 = vld [vmem:[%s4316_s1 + $0xb20] sm:$0xff]  ;;  %v2203_v50 = vld [vmem:[%s4316_s1 + $0xad8] sm:$0xff] }
  0xa9   : > { %1243 = vmatpush.msra.mxu1 %v2164_v16  ;;  %1268 = vmatpush.msra.mxu2 %v2192_v17  ;;  %1640 = vst [vmem:[#allocation1 + $0x30] ss:$2 sm:$0xff] %v1490_v7  ;;  %v1455_v14 = vsel %vm211_vm0, %v2248_v52, %v1439_v3  ;;  %v1457_v15 = vsel %vm211_vm0, %v1439_v3, %v2248_v52  ;;  %v2216_v16 = vld [vmem:[%s4316_s1 + $0xb40] sm:$0xff]  ;;  %v2214_v43 = vld [vmem:[%s4316_s1 + $0xb30] sm:$0xff]  ;;  %v2237_v51 = vld [vmem:[%s4316_s1 + $0xbe8] sm:$0xff] }
  0xaa   : > { %1290 = vmatpush.msra.mxu3 %v2226_v21  ;;  %1221 = vmatpush.msra.mxu0 %v2130_v54  ;;  %1642 = vst [vmem:[#allocation1 + $0x31] ss:$2 sm:$0xff] %v1498_v12  ;;  %v1461_v17 = vsel %vm211_vm0, %v2252_v4, %v1441_v8  ;;  %v2264_v42 = vrot.slane %v1455_v14, 9  ;;  %v2265_v20 = vrot.slane %v1457_v15, 9  ;;  %v2120_v21 = vld [vmem:[%s4316_s1 + $0x840] sm:$0xff]  ;;  %v2118_v30 = vld [vmem:[%s4316_s1 + $0x830] sm:$0xff] }
  0xab   : > { %1244 = vmatpush.msra.mxu1 %v2162_v26  ;;  %1269 = vmatpush.msra.mxu2 %v2190_v27  ;;  %v2152_v54 = vld [vmem:[%s4316_s1 + $0x940] sm:$0xff]  ;;  %v2268_v23 = vrot.slane %v1461_v17, 9  ;;  %v3608_v26 = vld.sshfl [vmem:[#allocation1 + $0x28] sm:$0xff pattern:$0x75316420]  ;;  %v2178_v34 = vld [vmem:[%s4316_s1 + $0xa10] sm:$0xff] }
  0xac   : > { %1291 = vmatpush.msra.mxu3 %v2224_v31  ;;  %1222 = vmatpush.msra.mxu0 %v2128_v32  ;;  %v3606_v25 = vld.sshfl [vmem:[#allocation1 + $0x20] sm:$0xff pattern:$0x75316420]  ;;  %v1486_v27 = vsel %vm2767_vm3, %v2264_v42, %v2265_v20  ;;  %v2150_v32 = vld [vmem:[%s4316_s1 + $0x930] sm:$0xff]  ;;  %v2141_v52 = vld [vmem:[%s4316_s1 + $0x8e8] sm:$0xff] }
  0xad   : > { %1245 = vmatpush.msra.mxu1 %v2160_v41  ;;  %1270 = vmatpush.msra.mxu2 %v2188_v47  ;;  %v1494_v31 = vsel %vm2767_vm3, %v2268_v23, %v2269_v24  ;;  %1636 = vst [vmem:[#allocation1 + $0x20] ss:$2 sm:$0xff] %v1486_v27  ;;  %v2148_v41 = vld [vmem:[%s4316_s1 + $0x920] sm:$0xff]  ;;  %v2114_v47 = vld [vmem:[%s4316_s1 + $0x810] sm:$0xff]  ;;  %v2173_v58 = vld [vmem:[%s4316_s1 + $0x9e8] sm:$0xff] }
  0xae   : > { %1292 = vmatpush.msra.mxu3 %v2222_v39  ;;  %1223 = vmatpush.msra.mxu0 %v2126_v40  ;;  %1638 = vst [vmem:[#allocation1 + $0x21] ss:$2 sm:$0xff] %v1494_v31  ;;  %v2176_v35 = vld [vmem:[%s4316_s1 + $0xa00] sm:$0xff]  ;;  %v2205_v39 = vld [vmem:[%s4316_s1 + $0xae8] sm:$0xff]  ;;  %v2239_v40 = vld [vmem:[%s4316_s1 + $0xbf8] sm:$0xff] }
  0xaf   : > { %1246 = vmatpush.msra.mxu1 %v2158_v44  ;;  %1271 = vmatpush.msra.mxu2 %v2186_v48  ;;  %v2208_v38 = vld [vmem:[%s4316_s1 + $0xb00] sm:$0xff]  ;;  %v2143_v48 = vld [vmem:[%s4316_s1 + $0x8f8] sm:$0xff]  ;;  %v2201_v53 = vld [vmem:[%s4316_s1 + $0xac8] sm:$0xff] }
  0xb0   : > { %1293 = vmatpush.msra.mxu3 %v2220_v49  ;;  %1224 = vmatpush.msra.mxu0 %v2124_v62  ;;  %v2112_v44 = vld [vmem:[%s4316_s1 + $0x800] sm:$0xff]  ;;  %v2175_v49 = vld [vmem:[%s4316_s1 + $0x9f8] sm:$0xff]  ;;  %v2233_v62 = vld [vmem:[%s4316_s1 + $0xbc8] sm:$0xff] }
  0xb1   : > { %1247 = vmatpush.msra.mxu1 %v2156_v5  ;;  %1272 = vmatpush.msra.mxu2 %v2184_v18  ;;  %v2144_v45 = vld [vmem:[%s4316_s1 + $0x900] sm:$0xff]  ;;  %v2235_v59 = vld [vmem:[%s4316_s1 + $0xbd8] sm:$0xff]  ;;  %v2137_v0 = vld [vmem:[%s4316_s1 + $0x8c8] sm:$0xff] }
  0xb2   : > { %1294 = vmatpush.msra.mxu3 %v2218_v9  ;;  %1225 = vmatpush.msra.mxu0 %v2122_v10  ;;  %v2139_v60 = vld [vmem:[%s4316_s1 + $0x8d8] sm:$0xff]  ;;  %v2169_v1 = vld [vmem:[%s4316_s1 + $0x9c8] sm:$0xff] }
  0xb3   : > { %1248 = vmatpush.msra.mxu1 %v2154_v11  ;;  %1273 = vmatpush.msra.mxu2 %v2182_v6  ;;  %v2171_v61 = vld [vmem:[%s4316_s1 + $0x9d8] sm:$0xff]  ;;  %v2229_v8 = vld [vmem:[%s4316_s1 + $0xba8] sm:$0xff] }
  0xb4   : > { %1295 = vmatpush.msra.mxu3 %v2216_v16  ;;  %1226 = vmatpush.msra.mxu0 %v2120_v21  ;;  %v2199_v4 = vld [vmem:[%s4316_s1 + $0xab8] sm:$0xff]  ;;  %v2133_v9 = vld [vmem:[%s4316_s1 + $0x8a8] sm:$0xff] }
  0xb5   : > { %1249 = vmatpush.msra.mxu1 %v2152_v54  ;;  %1274 = vmatpush.msra.mxu2 %v2180_v22  ;;  %v2231_v3 = vld [vmem:[%s4316_s1 + $0xbb8] sm:$0xff]  ;;  %v2165_v11 = vld [vmem:[%s4316_s1 + $0x9a8] sm:$0xff] }
  0xb6   : > { %1296 = vmatpush.msra.mxu3 %v2214_v43  ;;  %1227 = vmatpush.msra.mxu0 %v2118_v30  ;;  %v2135_v5 = vld [vmem:[%s4316_s1 + $0x8b8] sm:$0xff]  ;;  %v2193_v12 = vld [vmem:[%s4316_s1 + $0xa88] sm:$0xff] }
  0xb7   : > { %1250 = vmatpush.msra.mxu1 %v2150_v32  ;;  %1275 = vmatpush.msra.mxu2 %v2178_v34  ;;  %v2167_v18 = vld [vmem:[%s4316_s1 + $0x9b8] sm:$0xff]  ;;  %v2225_v42 = vld [vmem:[%s4316_s1 + $0xb88] sm:$0xff] }
  0xb8   : > { %1297 = vmatpush.msra.mxu3 %v2212_v57  ;;  %1228 = vmatpush.msra.mxu0 %v2116_v46  ;;  %v2195_v7 = vld [vmem:[%s4316_s1 + $0xa98] sm:$0xff]  ;;  %v2129_v20 = vld [vmem:[%s4316_s1 + $0x888] sm:$0xff] }
  0xb9   : > { %1251 = vmatpush.msra.mxu1 %v2148_v41  ;;  %1276 = vmatpush.msra.mxu2 %v2176_v35  ;;  %v2227_v14 = vld [vmem:[%s4316_s1 + $0xb98] sm:$0xff]  ;;  %v2161_v54 = vld [vmem:[%s4316_s1 + $0x988] sm:$0xff] }
  0xba   : > { %1298 = vmatpush.msra.mxu3 %v2210_v29  ;;  %1277 = vmatmul.f32.vlgmr.msra.gmra.mxu2 %v3465_v63  ;;  %v2131_v15 = vld [vmem:[%s4316_s1 + $0x898] sm:$0xff]  ;;  %v2189_v22 = vld [vmem:[%s4316_s1 + $0xa68] sm:$0xff] }
  0xbb   : > { %1353 = vmatpush.msrb.mxu2 %v2207_v36  ;;  %1229 = vmatpush.msra.mxu0 %v2114_v47  ;;  %v2163_v16 = vld [vmem:[%s4316_s1 + $0x998] sm:$0xff]  ;;  %v2221_v31 = vld [vmem:[%s4316_s1 + $0xb68] sm:$0xff] }
  0xbc   : > { %1252 = vmatpush.msra.mxu1 %v2146_v37  ;;  %1299 = vmatpush.msra.mxu3 %v2208_v38  ;;  %v2191_v17 = vld [vmem:[%s4316_s1 + $0xa78] sm:$0xff]  ;;  %v2125_v32 = vld [vmem:[%s4316_s1 + $0x868] sm:$0xff] }
  0xbd   : > { %1300 = vmatmul.f32.vlgmr.msra.gmra.mxu3 %v3482_v13  ;;  %1354 = vmatpush.msrb.mxu2 %v2205_v39  ;;  %v2223_v24 = vld [vmem:[%s4316_s1 + $0xb78] sm:$0xff]  ;;  %v2157_v57 = vld [vmem:[%s4316_s1 + $0x968] sm:$0xff] }
  0xbe   : > { %1376 = vmatpush.msrb.mxu3 %v2239_v40  ;;  %1230 = vmatpush.msra.mxu0 %v2112_v44  ;;  %v2127_v27 = vld [vmem:[%s4316_s1 + $0x878] sm:$0xff]  ;;  %v2185_v46 = vld [vmem:[%s4316_s1 + $0xa48] sm:$0xff] }
  0xbf   : > { %1253 = vmatpush.msra.mxu1 %v2144_v45  ;;  %1231 = vmatmul.f32.vlgmr.msra.gmra.mxu0 %v3514_v28  ;;  %v2159_v43 = vld [vmem:[%s4316_s1 + $0x978] sm:$0xff]  ;;  %v2217_v38 = vld [vmem:[%s4316_s1 + $0xb48] sm:$0xff] }
  0xc0   : > { %1254 = vmatmul.f32.vlgmr.msra.gmra.mxu1 %v3522_v33  ;;  %1307 = vmatpush.msrb.mxu0 %v2143_v48  ;;  %v2187_v30 = vld [vmem:[%s4316_s1 + $0xa58] sm:$0xff]  ;;  %v2121_v39 = vld [vmem:[%s4316_s1 + $0x848] sm:$0xff] }
  0xc1   : > { %1330 = vmatpush.msrb.mxu1 %v2175_v49  ;;  %1355 = vmatpush.msrb.mxu2 %v2203_v50  ;;  %v2219_v35 = vld [vmem:[%s4316_s1 + $0xb58] sm:$0xff]  ;;  %v2153_v44 = vld [vmem:[%s4316_s1 + $0x948] sm:$0xff] }
  0xc2   : > { %1377 = vmatpush.msrb.mxu3 %v2237_v51  ;;  %1308 = vmatpush.msrb.mxu0 %v2141_v52  ;;  %v2123_v29 = vld [vmem:[%s4316_s1 + $0x858] sm:$0xff]  ;;  %v2181_v45 = vld [vmem:[%s4316_s1 + $0xa28] sm:$0xff] }
  0xc3   : > { %1331 = vmatpush.msrb.mxu1 %v2173_v58  ;;  %1356 = vmatpush.msrb.mxu2 %v2201_v53  ;;  %v2155_v47 = vld [vmem:[%s4316_s1 + $0x958] sm:$0xff]  ;;  %v2213_v58 = vld [vmem:[%s4316_s1 + $0xb28] sm:$0xff] }
  0xc4   : > { %1378 = vmatpush.msrb.mxu3 %v2235_v59  ;;  %1280 = vmatmul.f32.gmra.mxu2 %v3556_v56  ;;  %v2183_v37 = vld [vmem:[%s4316_s1 + $0xa38] sm:$0xff]  ;;  %v2117_v53 = vld [vmem:[%s4316_s1 + $0x828] sm:$0xff] }
  0xc5   : > { %1309 = vmatpush.msrb.mxu0 %v2139_v60  ;;  %1332 = vmatpush.msrb.mxu1 %v2171_v61  ;;  %v2215_v49 = vld [vmem:[%s4316_s1 + $0xb38] sm:$0xff]  ;;  %v2149_v59 = vld [vmem:[%s4316_s1 + $0x928] sm:$0xff] }
  0xc6   : > { %1357 = vmatpush.msrb.mxu2 %v2199_v4  ;;  %1379 = vmatpush.msrb.mxu3 %v2233_v62  ;;  %v2119_v50 = vld [vmem:[%s4316_s1 + $0x838] sm:$0xff]  ;;  %v2177_v60 = vld [vmem:[%s4316_s1 + $0xa08] sm:$0xff]  ;;  %v2366_v4 = vld [vmem:[%s4316_s1 + $0xef0] sm:$0xff] }
  0xc7   : > { %1303 = vmatmul.f32.gmra.mxu3 %v3572_v55  ;;  %1310 = vmatpush.msrb.mxu0 %v2137_v0  ;;  %v624_v10 = vpop.f32.mrf.mxu0  ;;  %v2151_v51 = vld [vmem:[%s4316_s1 + $0x938] sm:$0xff] }
  0xc8   : > { %1333 = vmatpush.msrb.mxu1 %v2169_v1  ;;  %1358 = vmatpush.msrb.mxu2 %v2197_v2  ;;  %v2179_v52 = vld [vmem:[%s4316_s1 + $0xa18] sm:$0xff] }
  0xc9   : > { %1380 = vmatpush.msrb.mxu3 %v2231_v3  ;;  %1234 = vmatmul.f32.gmra.mxu0 %v3606_v25  ;;  %v2211_v61 = vld [vmem:[%s4316_s1 + $0xb18] sm:$0xff]  ;;  %v2209_v3 = vld [vmem:[%s4316_s1 + $0xb08] sm:$0xff] }
  0xca   : > { %1257 = vmatmul.f32.gmra.mxu1 %v3608_v26  ;;  %1311 = vmatpush.msrb.mxu0 %v2135_v5  ;;  %v647_v6 = vpop.f32.mrf.mxu1  ;;  %v2115_v62 = vld [vmem:[%s4316_s1 + $0x818] sm:$0xff] }
  0xcb   : > { %1334 = vmatpush.msrb.mxu1 %v2167_v18  ;;  %1359 = vmatpush.msrb.mxu2 %v2195_v7  ;;  %v648_v19 = vadd.f32 %v647_v6, %v624_v10  ;;  %v2147_v2 = vld [vmem:[%s4316_s1 + $0x918] sm:$0xff]  ;;  %v2364_v7 = vld [vmem:[%s4316_s1 + $0xee0] sm:$0xff]  ;;  %v2362_v6 = vld [vmem:[%s4316_s1 + $0xed0] sm:$0xff] }
  0xcc   : > { %1381 = vmatpush.msrb.mxu3 %v2229_v8  ;;  %1312 = vmatpush.msrb.mxu0 %v2133_v9  ;;  %v2398_v8 = vld [vmem:[%s4316_s1 + $0xff0] sm:$0xff]  ;;  %v2113_v9 = vld [vmem:[%s4316_s1 + $0x808] sm:$0xff] }
  0xcd   : > { %1335 = vmatpush.msrb.mxu1 %v2165_v11  ;;  %1360 = vmatpush.msrb.mxu2 %v2193_v12  ;;  %v670_v21 = vpop.f32.mrf.mxu2  ;;  %v2302_v12 = vld [vmem:[%s4316_s1 + $0xcf0] sm:$0xff] }
  0xce   : > { %1382 = vmatpush.msrb.mxu3 %v2227_v14  ;;  %1313 = vmatpush.msrb.mxu0 %v2131_v15  ;;  %v671_v23 = vadd.f32 %v670_v21, %v648_v19  ;;  %v2334_v15 = vld [vmem:[%s4316_s1 + $0xdf0] sm:$0xff]  ;;  %v2360_v19 = vld [vmem:[%s4316_s1 + $0xec0] sm:$0xff] }
  0xcf   : > { %1336 = vmatpush.msrb.mxu1 %v2163_v16  ;;  %1361 = vmatpush.msrb.mxu2 %v2191_v17  ;;  %v2300_v16 = vld [vmem:[%s4316_s1 + $0xce0] sm:$0xff]  ;;  %v2330_v21 = vld [vmem:[%s4316_s1 + $0xdd0] sm:$0xff] }
  0xd0   : > { %1383 = vmatpush.msrb.mxu3 %v2225_v42  ;;  %1314 = vmatpush.msrb.mxu0 %v2129_v20  ;;  %v2332_v17 = vld [vmem:[%s4316_s1 + $0xde0] sm:$0xff]  ;;  %v2394_v42 = vld [vmem:[%s4316_s1 + $0xfd0] sm:$0xff] }
  0xd1   : > { %1337 = vmatpush.msrb.mxu1 %v2161_v54  ;;  %1362 = vmatpush.msrb.mxu2 %v2189_v22  ;;  %v693_v34 = vpop.f32.mrf.mxu3  ;;  %v2358_v22 = vld [vmem:[%s4316_s1 + $0xeb0] sm:$0xff] }
  0xd2   : > { %1384 = vmatpush.msrb.mxu3 %v2223_v24  ;;  %1315 = vmatpush.msrb.mxu0 %v2127_v27  ;;  %v3790_v41 = vadd.f32 %v693_v34, %v671_v23  ;;  %v2392_v23 = vld [vmem:[%s4316_s1 + $0xfc0] sm:$0xff]  ;;  %v2294_v34 = vld [vmem:[%s4316_s1 + $0xcb0] sm:$0xff] }
  0xd3   : > { %1338 = vmatpush.msrb.mxu1 %v2159_v43  ;;  %1363 = vmatpush.msrb.mxu2 %v2187_v30  ;;  %v627_v36 = vpop.f32.mrf.mxu0  ;;  %v2296_v43 = vld [vmem:[%s4316_s1 + $0xcc0] sm:$0xff] }
  0xd4   : > { %1385 = vmatpush.msrb.mxu3 %v2221_v31  ;;  %1316 = vmatpush.msrb.mxu0 %v2125_v32  ;;  %v2328_v30 = vld [vmem:[%s4316_s1 + $0xdc0] sm:$0xff] }
  0xd5   : > { %1339 = vmatpush.msrb.mxu1 %v2157_v57  ;;  %1364 = vmatpush.msrb.mxu2 %v2185_v46  ;;  %v650_v40 = vpop.f32.mrf.mxu1  ;;  %v2356_v31 = vld [vmem:[%s4316_s1 + $0xea0] sm:$0xff]  ;;  %v2326_v46 = vld [vmem:[%s4316_s1 + $0xdb0] sm:$0xff] }
  0xd6   : > { %1386 = vmatpush.msrb.mxu3 %v2219_v35  ;;  %1317 = vmatpush.msrb.mxu0 %v2123_v29  ;;  %v651_v48 = vadd.f32 %v650_v40, %v627_v36  ;;  %v2354_v35 = vld [vmem:[%s4316_s1 + $0xe90] sm:$0xff]  ;;  %v2292_v29 = vld [vmem:[%s4316_s1 + $0xca0] sm:$0xff] }
  0xd7   : > { %1340 = vmatpush.msrb.mxu1 %v2155_v47  ;;  %1365 = vmatpush.msrb.mxu2 %v2183_v37  ;;  %v2324_v47 = vld [vmem:[%s4316_s1 + $0xda0] sm:$0xff]  ;;  %v2350_v40 = vld [vmem:[%s4316_s1 + $0xe70] sm:$0xff] }
  0xd8   : > { %1387 = vmatpush.msrb.mxu3 %v2217_v38  ;;  %1318 = vmatpush.msrb.mxu0 %v2121_v39  ;;  %v2386_v38 = vld [vmem:[%s4316_s1 + $0xf90] sm:$0xff] }
  0xd9   : > { %1341 = vmatpush.msrb.mxu1 %v2153_v44  ;;  %1366 = vmatpush.msrb.mxu2 %v2181_v45  ;;  %v2322_v39 = vld [vmem:[%s4316_s1 + $0xd90] sm:$0xff]  ;;  %v2384_v45 = vld [vmem:[%s4316_s1 + $0xf80] sm:$0xff] }
  0xda   : > { %1388 = vmatpush.msrb.mxu3 %v2215_v49  ;;  %1319 = vmatpush.msrb.mxu0 %v2119_v50 }
  0xdb   : > { %1342 = vmatpush.msrb.mxu1 %v2151_v51  ;;  %1367 = vmatpush.msrb.mxu2 %v2179_v52  ;;  %v2320_v51 = vld [vmem:[%s4316_s1 + $0xd80] sm:$0xff] }
  0xdc   : > { %1389 = vmatpush.msrb.mxu3 %v2213_v58  ;;  %1320 = vmatpush.msrb.mxu0 %v2117_v53  ;;  %v673_v0 = vpop.f32.mrf.mxu2  ;;  %v696_v1 = vpop.f32.mrf.mxu3  ;;  %v2348_v52 = vld [vmem:[%s4316_s1 + $0xe60] sm:$0xff]  ;;  %v2382_v53 = vld [vmem:[%s4316_s1 + $0xf70] sm:$0xff] }
  0xdd   : > { %1343 = vmatpush.msrb.mxu1 %v2149_v59  ;;  %1368 = vmatpush.msrb.mxu2 %v2177_v60  ;;  %v674_v5 = vadd.f32 %v673_v0, %v651_v48  ;;  %v716_v18 = vpop.f32.mrf.mxu0  ;;  %v2288_v48 = vld [vmem:[%s4316_s1 + $0xc80] sm:$0xff]  ;;  %v2286_v59 = vld [vmem:[%s4316_s1 + $0xc70] sm:$0xff] }
  0xde   : > { %1390 = vmatpush.msrb.mxu3 %v2211_v61  ;;  %1369 = vmatmul.f32.vlgmr.msrb.gmra.mxu2 %v3465_v63  ;;  %v2145_v63 = vld [vmem:[%s4316_s1 + $0x908] sm:$0xff]  ;;  %v2318_v60 = vld [vmem:[%s4316_s1 + $0xd70] sm:$0xff] }
  0xdf   : > { %1705 = vmatpush.msra.mxu2 %v2366_v4  ;;  %1321 = vmatpush.msrb.mxu0 %v2115_v62  ;;  %v3865_v10 = vadd.f32 %v696_v1, %v674_v5  ;;  %v2380_v4 = vld [vmem:[%s4316_s1 + $0xf60] sm:$0xff]  ;;  %v2282_v5 = vld [vmem:[%s4316_s1 + $0xc50] sm:$0xff] }
  0xe0   : > { %1344 = vmatpush.msrb.mxu1 %v2147_v2  ;;  %1391 = vmatpush.msrb.mxu3 %v2209_v3  ;;  %v739_v11 = vpop.f32.mrf.mxu1  ;;  %v2284_v62 = vld [vmem:[%s4316_s1 + $0xc60] sm:$0xff]  ;;  %v2378_v3 = vld [vmem:[%s4316_s1 + $0xf50] sm:$0xff] }
  0xe1   : > { %1392 = vmatmul.f32.vlgmr.msrb.gmra.mxu3 %v3482_v13  ;;  %1706 = vmatpush.msra.mxu2 %v2364_v7  ;;  %v740_v14 = vadd.f32 %v739_v11, %v716_v18  ;;  %v2396_v13 = vld [vmem:[%s4316_s1 + $0xfe0] sm:$0xff]  ;;  %v2314_v7 = vld [vmem:[%s4316_s1 + $0xd50] sm:$0xff] }
  0xe2   : > { %1728 = vmatpush.msra.mxu3 %v2398_v8  ;;  %1322 = vmatpush.msrb.mxu0 %v2113_v9  ;;  %v2316_v1 = vld [vmem:[%s4316_s1 + $0xd60] sm:$0xff]  ;;  %v2342_v8 = vld [vmem:[%s4316_s1 + $0xe30] sm:$0xff] }
  0xe3   : > { %1345 = vmatpush.msrb.mxu1 %v2145_v63  ;;  %1323 = vmatmul.f32.vlgmr.msrb.gmra.mxu0 %v3514_v28  ;;  %v2344_v2 = vld [vmem:[%s4316_s1 + $0xe40] sm:$0xff] }
  0xe4   : > { %1346 = vmatmul.f32.vlgmr.msrb.gmra.mxu1 %v3522_v33  ;;  %1659 = vmatpush.msra.mxu0 %v2302_v12  ;;  %v762_v28 = vpop.f32.mrf.mxu2  ;;  %v2298_v33 = vld [vmem:[%s4316_s1 + $0xcd0] sm:$0xff]  ;;  %v2376_v63 = vld [vmem:[%s4316_s1 + $0xf40] sm:$0xff] }
  0xe5   : > { %1682 = vmatpush.msra.mxu1 %v2334_v15  ;;  %1707 = vmatpush.msra.mxu2 %v2362_v6  ;;  %v763_v20 = vadd.f32 %v762_v28, %v740_v14  ;;  %v2280_v11 = vld [vmem:[%s4316_s1 + $0xc40] sm:$0xff]  ;;  %v2374_v6 = vld [vmem:[%s4316_s1 + $0xf30] sm:$0xff] }
  0xe6   : > { %1729 = vmatpush.msra.mxu3 %v2396_v13  ;;  %1660 = vmatpush.msra.mxu0 %v2300_v16  ;;  %v785_v54 = vpop.f32.mrf.mxu3  ;;  %v2312_v12 = vld [vmem:[%s4316_s1 + $0xd40] sm:$0xff]  ;;  %v2278_v13 = vld [vmem:[%s4316_s1 + $0xc30] sm:$0xff] }
  0xe7   : > { %1683 = vmatpush.msra.mxu1 %v2332_v17  ;;  %1708 = vmatpush.msra.mxu2 %v2360_v19  ;;  %v719_v24 = vpop.f32.mrf.mxu0  ;;  %v3909_v27 = vadd.f32 %v785_v54, %v763_v20  ;;  %v2340_v14 = vld [vmem:[%s4316_s1 + $0xe20] sm:$0xff]  ;;  %v2310_v19 = vld [vmem:[%s4316_s1 + $0xd30] sm:$0xff] }
  0xe8   : > { %1730 = vmatpush.msra.mxu3 %v2394_v42  ;;  %1372 = vmatmul.f32.gmra.mxu2 %v3556_v56  ;;  %v2390_v56 = vld [vmem:[%s4316_s1 + $0xfb0] sm:$0xff]  ;;  %v2372_v20 = vld [vmem:[%s4316_s1 + $0xf20] sm:$0xff] }
  0xe9   : > { %1661 = vmatpush.msra.mxu0 %v2298_v33  ;;  %1684 = vmatpush.msra.mxu1 %v2330_v21  ;;  %v2338_v28 = vld [vmem:[%s4316_s1 + $0xe10] sm:$0xff]  ;;  %v2276_v33 = vld [vmem:[%s4316_s1 + $0xc20] sm:$0xff] }
  0xea   : > { %1709 = vmatpush.msra.mxu2 %v2358_v22  ;;  %1731 = vmatpush.msra.mxu3 %v2392_v23  ;;  %v742_v32 = vpop.f32.mrf.mxu1  ;;  %v2308_v21 = vld [vmem:[%s4316_s1 + $0xd20] sm:$0xff]  ;;  %v2370_v22 = vld [vmem:[%s4316_s1 + $0xf10] sm:$0xff] }
  0xeb   : > { %1395 = vmatmul.f32.gmra.mxu3 %v3572_v55  ;;  %1662 = vmatpush.msra.mxu0 %v2296_v43  ;;  %v743_v57 = vadd.f32 %v742_v32, %v719_v24  ;;  %v2388_v55 = vld [vmem:[%s4316_s1 + $0xfa0] sm:$0xff]  ;;  %v4053_v23 = vld.sshfl [vmem:[#allocation1 + $0x10] sm:$0xff pattern:$0x75316420]  ;;  %v2367_v43 = vld [vmem:[%s4316_s1 + $0xef8] sm:$0xff] }
  0xec   : > { %1685 = vmatpush.msra.mxu1 %v2328_v30  ;;  %1710 = vmatpush.msra.mxu2 %v2356_v31  ;;  %v2274_v30 = vld [vmem:[%s4316_s1 + $0xc10] sm:$0xff] }
  0xed   : > { %1732 = vmatpush.msra.mxu3 %v2390_v56  ;;  %1326 = vmatmul.f32.gmra.mxu0 %v3606_v25  ;;  %v765_v36 = vpop.f32.mrf.mxu2  ;;  %v2352_v25 = vld [vmem:[%s4316_s1 + $0xe80] sm:$0xff]  ;;  %v2306_v31 = vld [vmem:[%s4316_s1 + $0xd10] sm:$0xff] }
  0xee   : > { %1349 = vmatmul.f32.gmra.mxu1 %v3608_v26  ;;  %1663 = vmatpush.msra.mxu0 %v2294_v34  ;;  %v766_v37 = vadd.f32 %v765_v36, %v743_v57  ;;  %v2290_v26 = vld [vmem:[%s4316_s1 + $0xc90] sm:$0xff]  ;;  %v2368_v56 = vld [vmem:[%s4316_s1 + $0xf00] sm:$0xff]  ;;  %v4068_v34 = vld.sshfl [vmem:[#allocation1 + $0x18] sm:$0xff pattern:$0x75316420] }
  0xef   : > { %1686 = vmatpush.msra.mxu1 %v2326_v46  ;;  %1711 = vmatpush.msra.mxu2 %v2354_v35  ;;  %v2365_v57 = vld [vmem:[%s4316_s1 + $0xee8] sm:$0xff]  ;;  %v2399_v35 = vld [vmem:[%s4316_s1 + $0xff8] sm:$0xff]  ;;  %v4082_v36 = vld.sshfl [vmem:[#allocation1] sm:$0xff pattern:$0x75316420] }
  0xf0   : > { %1733 = vmatpush.msra.mxu3 %v2388_v55  ;;  %1664 = vmatpush.msra.mxu0 %v2292_v29  ;;  %v788_v44 = vpop.f32.mrf.mxu3  ;;  %v2272_v55 = vld [vmem:[%s4316_s1 + $0xc00] sm:$0xff] }
  0xf1   : > { %1687 = vmatpush.msra.mxu1 %v2324_v47  ;;  %1712 = vmatpush.msra.mxu2 %v2352_v25  ;;  %v3966_v49 = vadd.f32 %v788_v44, %v766_v37  ;;  %v839_v50 = vpop.f32.mrf.mxu0  ;;  %v2304_v29 = vld [vmem:[%s4316_s1 + $0xd00] sm:$0xff]  ;;  %v4085_v25 = vld.sshfl [vmem:[#allocation1 + $0x8] sm:$0xff pattern:$0x75316420]  ;;  %v2303_v37 = vld [vmem:[%s4316_s1 + $0xcf8] sm:$0xff] }
  0xf2   : > { %1734 = vmatpush.msra.mxu3 %v2386_v38  ;;  %1665 = vmatpush.msra.mxu0 %v2290_v26  ;;  %v840_v58 = vadd.f32 %v839_v50, %v3790_v41  ;;  %v2346_v41 = vld [vmem:[%s4316_s1 + $0xe50] sm:$0xff]  ;;  %v2335_v26 = vld [vmem:[%s4316_s1 + $0xdf8] sm:$0xff]  ;;  %v2301_v44 = vld [vmem:[%s4316_s1 + $0xce8] sm:$0xff] }
  0xf3   : > { %1688 = vmatpush.msra.mxu1 %v2322_v39  ;;  %1713 = vmatpush.msra.mxu2 %v2350_v40  ;;  %v2363_v39 = vld [vmem:[%s4316_s1 + $0xed8] sm:$0xff]  ;;  %v2397_v40 = vld [vmem:[%s4316_s1 + $0xfe8] sm:$0xff] }
  0xf4   : > { %1735 = vmatpush.msra.mxu3 %v2384_v45  ;;  %1666 = vmatpush.msra.mxu0 %v2288_v48  ;;  %v862_v61 = vpop.f32.mrf.mxu1  ;;  %v2333_v45 = vld [vmem:[%s4316_s1 + $0xde8] sm:$0xff]  ;;  %v2395_v50 = vld [vmem:[%s4316_s1 + $0xfd8] sm:$0xff] }
  0xf5   : > { %1689 = vmatpush.msra.mxu1 %v2320_v51  ;;  %1714 = vmatpush.msra.mxu2 %v2348_v52  ;;  %v863_v0 = vadd.f32 %v862_v61, %v840_v58  ;;  %v2361_v48 = vld [vmem:[%s4316_s1 + $0xec8] sm:$0xff]  ;;  %v4115_v51 = vld.sshfl [vmem:[#allocation1 + $0x30] sm:$0xff pattern:$0x75316420]  ;;  %v2299_v52 = vld [vmem:[%s4316_s1 + $0xcd8] sm:$0xff] }
  0xf6   : > { %1736 = vmatpush.msra.mxu3 %v2382_v53  ;;  %1667 = vmatpush.msra.mxu0 %v2286_v59  ;;  %v2331_v58 = vld [vmem:[%s4316_s1 + $0xdd8] sm:$0xff]  ;;  %v2393_v59 = vld [vmem:[%s4316_s1 + $0xfc8] sm:$0xff] }
  0xf7   : > { %1690 = vmatpush.msra.mxu1 %v2318_v60  ;;  %1715 = vmatpush.msra.mxu2 %v2346_v41  ;;  %v885_v18 = vpop.f32.mrf.mxu2  ;;  %v2359_v53 = vld [vmem:[%s4316_s1 + $0xeb8] sm:$0xff]  ;;  %v2297_v41 = vld [vmem:[%s4316_s1 + $0xcc8] sm:$0xff] }
  0xf8   : > { %1737 = vmatpush.msra.mxu3 %v2380_v4  ;;  %1668 = vmatpush.msra.mxu0 %v2284_v62  ;;  %v886_v9 = vadd.f32 %v885_v18, %v863_v0  ;;  %v4130_v60 = vld.sshfl [vmem:[#allocation1 + $0x38] sm:$0xff pattern:$0x75316420]  ;;  %v2329_v61 = vld [vmem:[%s4316_s1 + $0xdc8] sm:$0xff] }
  0xf9   : > { %1691 = vmatpush.msra.mxu1 %v2316_v1  ;;  %1716 = vmatpush.msra.mxu2 %v2344_v2  ;;  %v2357_v4 = vld [vmem:[%s4316_s1 + $0xea8] sm:$0xff]  ;;  %v2391_v62 = vld [vmem:[%s4316_s1 + $0xfb8] sm:$0xff]  ;;  %v4144_v0 = vld.sshfl [vmem:[#allocation1 + $0x20] sm:$0xff pattern:$0x75316420] }
  0xfa   : > { %1738 = vmatpush.msra.mxu3 %v2378_v3  ;;  %1669 = vmatpush.msra.mxu0 %v2282_v5  ;;  %v908_v15 = vpop.f32.mrf.mxu3  ;;  %v4147_v1 = vld.sshfl [vmem:[#allocation1 + $0x28] sm:$0xff pattern:$0x75316420]  ;;  %v2295_v2 = vld [vmem:[%s4316_s1 + $0xcb8] sm:$0xff] }
  0xfb   : > { %1692 = vmatpush.msra.mxu1 %v2314_v7  ;;  %1717 = vmatpush.msra.mxu2 %v2342_v8  ;;  %v842_v16 = vpop.f32.mrf.mxu0  ;;  %v4029_v17 = vadd.f32 %v908_v15, %v886_v9  ;;  %v2327_v3 = vld [vmem:[%s4316_s1 + $0xdb8] sm:$0xff]  ;;  %v2389_v18 = vld [vmem:[%s4316_s1 + $0xfa8] sm:$0xff] }
  0xfc   : > { %1739 = vmatpush.msra.mxu3 %v2376_v63  ;;  %1670 = vmatpush.msra.mxu0 %v2280_v11  ;;  %v843_v42 = vadd.f32 %v842_v16, %v3865_v10  ;;  %v2336_v10 = vld [vmem:[%s4316_s1 + $0xe00] sm:$0xff]  ;;  %v2355_v5 = vld [vmem:[%s4316_s1 + $0xe98] sm:$0xff]  ;;  %v2293_v7 = vld [vmem:[%s4316_s1 + $0xca8] sm:$0xff] }
  0xfd   : > { %1693 = vmatpush.msra.mxu1 %v2312_v12  ;;  %1718 = vmatpush.msra.mxu2 %v2340_v14  ;;  %v2325_v8 = vld [vmem:[%s4316_s1 + $0xda8] sm:$0xff]  ;;  %v2387_v63 = vld [vmem:[%s4316_s1 + $0xf98] sm:$0xff] }
  0xfe   : > { %1740 = vmatpush.msra.mxu3 %v2374_v6  ;;  %1671 = vmatpush.msra.mxu0 %v2278_v13  ;;  %v865_v54 = vpop.f32.mrf.mxu1  ;;  %v2353_v9 = vld [vmem:[%s4316_s1 + $0xe88] sm:$0xff]  ;;  %v2291_v11 = vld [vmem:[%s4316_s1 + $0xc98] sm:$0xff] }
  0xff   : > { %1694 = vmatpush.msra.mxu1 %v2310_v19  ;;  %1719 = vmatpush.msra.mxu2 %v2338_v28  ;;  %v866_v24 = vadd.f32 %v865_v54, %v843_v42  ;;  %v2323_v12 = vld [vmem:[%s4316_s1 + $0xd98] sm:$0xff]  ;;  %v2385_v15 = vld [vmem:[%s4316_s1 + $0xf88] sm:$0xff] }
 0x100   : > { %1741 = vmatpush.msra.mxu3 %v2372_v20  ;;  %1672 = vmatpush.msra.mxu0 %v2276_v33  ;;  %v2351_v14 = vld [vmem:[%s4316_s1 + $0xe78] sm:$0xff]  ;;  %v2289_v6 = vld [vmem:[%s4316_s1 + $0xc88] sm:$0xff] }
 0x101   : > { %1695 = vmatpush.msra.mxu1 %v2308_v21  ;;  %1720 = vmatpush.msra.mxu2 %v2336_v10  ;;  %v888_v32 = vpop.f32.mrf.mxu2  ;;  %v2321_v13 = vld [vmem:[%s4316_s1 + $0xd88] sm:$0xff]  ;;  %v2383_v19 = vld [vmem:[%s4316_s1 + $0xf78] sm:$0xff] }
 0x102   : > { %1742 = vmatpush.msra.mxu3 %v2370_v22  ;;  %1721 = vmatmul.f32.vlgmr.msra.gmra.mxu2 %v4053_v23  ;;  %v889_v46 = vadd.f32 %v888_v32, %v866_v24  ;;  %v2349_v16 = vld [vmem:[%s4316_s1 + $0xe68] sm:$0xff]  ;;  %v2287_v28 = vld [vmem:[%s4316_s1 + $0xc78] sm:$0xff] }
 0x103   : > { %1797 = vmatpush.msrb.mxu2 %v2367_v43  ;;  %1673 = vmatpush.msra.mxu0 %v2274_v30  ;;  %v2319_v42 = vld [vmem:[%s4316_s1 + $0xd78] sm:$0xff]  ;;  %v2381_v33 = vld [vmem:[%s4316_s1 + $0xf68] sm:$0xff] }
 0x104   : > { %1696 = vmatpush.msra.mxu1 %v2306_v31  ;;  %1743 = vmatpush.msra.mxu3 %v2368_v56  ;;  %v911_v47 = vpop.f32.mrf.mxu3  ;;  %v2347_v20 = vld [vmem:[%s4316_s1 + $0xe58] sm:$0xff]  ;;  %v2285_v21 = vld [vmem:[%s4316_s1 + $0xc68] sm:$0xff] }
 0x105   : > { %1744 = vmatmul.f32.vlgmr.msra.gmra.mxu3 %v4068_v34  ;;  %1798 = vmatpush.msrb.mxu2 %v2365_v57  ;;  %v4090_v38 = vadd.f32 %v911_v47, %v889_v46  ;;  %v2317_v10 = vld [vmem:[%s4316_s1 + $0xd68] sm:$0xff]  ;;  %v2379_v22 = vld [vmem:[%s4316_s1 + $0xf58] sm:$0xff] }
 0x106   : > { %1820 = vmatpush.msrb.mxu3 %v2399_v35  ;;  %1674 = vmatpush.msra.mxu0 %v2272_v55  ;;  %v2345_v54 = vld [vmem:[%s4316_s1 + $0xe48] sm:$0xff]  ;;  %v2283_v24 = vld [vmem:[%s4316_s1 + $0xc58] sm:$0xff] }
 0x107   : > { %1697 = vmatpush.msra.mxu1 %v2304_v29  ;;  %1675 = vmatmul.f32.vlgmr.msra.gmra.mxu0 %v4082_v36  ;;  %v2315_v43 = vld [vmem:[%s4316_s1 + $0xd58] sm:$0xff]  ;;  %v2377_v31 = vld [vmem:[%s4316_s1 + $0xf48] sm:$0xff] }
 0x108   : > { %1698 = vmatmul.f32.vlgmr.msra.gmra.mxu1 %v4085_v25  ;;  %1751 = vmatpush.msrb.mxu0 %v2303_v37  ;;  %v2343_v30 = vld [vmem:[%s4316_s1 + $0xe38] sm:$0xff]  ;;  %v2281_v56 = vld [vmem:[%s4316_s1 + $0xc48] sm:$0xff] }
 0x109   : > { %1774 = vmatpush.msrb.mxu1 %v2335_v26  ;;  %1799 = vmatpush.msrb.mxu2 %v2363_v39  ;;  %v2313_v32 = vld [vmem:[%s4316_s1 + $0xd48] sm:$0xff]  ;;  %v2375_v46 = vld [vmem:[%s4316_s1 + $0xf38] sm:$0xff] }
 0x10a   : > { %1821 = vmatpush.msrb.mxu3 %v2397_v40  ;;  %1752 = vmatpush.msrb.mxu0 %v2301_v44  ;;  %v2341_v57 = vld [vmem:[%s4316_s1 + $0xe28] sm:$0xff]  ;;  %v2279_v35 = vld [vmem:[%s4316_s1 + $0xc38] sm:$0xff] }
 0x10b   : > { %1775 = vmatpush.msrb.mxu1 %v2333_v45  ;;  %1800 = vmatpush.msrb.mxu2 %v2361_v48  ;;  %v2311_v55 = vld [vmem:[%s4316_s1 + $0xd38] sm:$0xff]  ;;  %v2373_v47 = vld [vmem:[%s4316_s1 + $0xf28] sm:$0xff] }
 0x10c   : > { %1822 = vmatpush.msrb.mxu3 %v2395_v50  ;;  %1724 = vmatmul.f32.gmra.mxu2 %v4115_v51  ;;  %v2339_v29 = vld [vmem:[%s4316_s1 + $0xe18] sm:$0xff]  ;;  %v2277_v37 = vld [vmem:[%s4316_s1 + $0xc28] sm:$0xff] }
 0x10d   : > { %1753 = vmatpush.msrb.mxu0 %v2299_v52  ;;  %1776 = vmatpush.msrb.mxu1 %v2331_v58  ;;  %v2309_v26 = vld [vmem:[%s4316_s1 + $0xd28] sm:$0xff]  ;;  %v2371_v40 = vld [vmem:[%s4316_s1 + $0xf18] sm:$0xff] }
 0x10e   : > { %1801 = vmatpush.msrb.mxu2 %v2359_v53  ;;  %1823 = vmatpush.msrb.mxu3 %v2393_v59  ;;  %v2337_v39 = vld [vmem:[%s4316_s1 + $0xe08] sm:$0xff]  ;;  %v2275_v44 = vld [vmem:[%s4316_s1 + $0xc18] sm:$0xff] }
 0x10f   : > { %1747 = vmatmul.f32.gmra.mxu3 %v4130_v60  ;;  %1754 = vmatpush.msrb.mxu0 %v2297_v41  ;;  %v2307_v45 = vld [vmem:[%s4316_s1 + $0xd18] sm:$0xff]  ;;  %v2369_v48 = vld [vmem:[%s4316_s1 + $0xf08] sm:$0xff] }
 0x110   : > { %1777 = vmatpush.msrb.mxu1 %v2329_v61  ;;  %1802 = vmatpush.msrb.mxu2 %v2357_v4  ;;  %v2273_v50 = vld [vmem:[%s4316_s1 + $0xc08] sm:$0xff] }
 0x111   : > { %1824 = vmatpush.msrb.mxu3 %v2391_v62  ;;  %1678 = vmatmul.f32.gmra.mxu0 %v4144_v0  ;;  %v2305_v52 = vld [vmem:[%s4316_s1 + $0xd08] sm:$0xff] }
 0x112   : > { %1701 = vmatmul.f32.gmra.mxu1 %v4147_v1  ;;  %1755 = vmatpush.msrb.mxu0 %v2295_v2 }
 0x113   : > { %1778 = vmatpush.msrb.mxu1 %v2327_v3  ;;  %1803 = vmatpush.msrb.mxu2 %v2355_v5 }
 0x114   : > { %1825 = vmatpush.msrb.mxu3 %v2389_v18  ;;  %1756 = vmatpush.msrb.mxu0 %v2293_v7 }
 0x115   : > { %1779 = vmatpush.msrb.mxu1 %v2325_v8  ;;  %1804 = vmatpush.msrb.mxu2 %v2353_v9 }
 0x116   : > { %1826 = vmatpush.msrb.mxu3 %v2387_v63  ;;  %1757 = vmatpush.msrb.mxu0 %v2291_v11 }
 0x117   : > { %1780 = vmatpush.msrb.mxu1 %v2323_v12  ;;  %1805 = vmatpush.msrb.mxu2 %v2351_v14  ;;  %v954_v58 = vpop.f32.mrf.mxu1 }
 0x118   : > { %1827 = vmatpush.msrb.mxu3 %v2385_v15  ;;  %1758 = vmatpush.msrb.mxu0 %v2289_v6 }
 0x119   : > { %1781 = vmatpush.msrb.mxu1 %v2321_v13  ;;  %1806 = vmatpush.msrb.mxu2 %v2349_v16 }
 0x11a   : > { %1828 = vmatpush.msrb.mxu3 %v2383_v19  ;;  %1759 = vmatpush.msrb.mxu0 %v2287_v28 }
 0x11b   : > { %1782 = vmatpush.msrb.mxu1 %v2319_v42  ;;  %1807 = vmatpush.msrb.mxu2 %v2347_v20  ;;  %v977_v53 = vpop.f32.mrf.mxu2 }
 0x11c   : > { %1829 = vmatpush.msrb.mxu3 %v2381_v33  ;;  %1760 = vmatpush.msrb.mxu0 %v2285_v21 }
 0x11d   : > { %1783 = vmatpush.msrb.mxu1 %v2317_v10  ;;  %1808 = vmatpush.msrb.mxu2 %v2345_v54 }
 0x11e   : > { %1830 = vmatpush.msrb.mxu3 %v2379_v22  ;;  %1761 = vmatpush.msrb.mxu0 %v2283_v24  ;;  %v1000_v59 = vpop.f32.mrf.mxu3 }
 0x11f   : > { %1784 = vmatpush.msrb.mxu1 %v2315_v43  ;;  %1809 = vmatpush.msrb.mxu2 %v2343_v30 }
 0x120   : > { %1831 = vmatpush.msrb.mxu3 %v2377_v31  ;;  %1762 = vmatpush.msrb.mxu0 %v2281_v56 }
 0x121   : > { %1785 = vmatpush.msrb.mxu1 %v2313_v32  ;;  %1810 = vmatpush.msrb.mxu2 %v2341_v57  ;;  %v1847_v32 = vld [vmem:[%s4317_s2] sm:$0x3] }
 0x122   : > { %1832 = vmatpush.msrb.mxu3 %v2375_v46  ;;  %1763 = vmatpush.msrb.mxu0 %v2279_v35 }
 0x123   : > { %1786 = vmatpush.msrb.mxu1 %v2311_v55  ;;  %1811 = vmatpush.msrb.mxu2 %v2339_v29 }
 0x124   : > { %1833 = vmatpush.msrb.mxu3 %v2373_v47  ;;  %1764 = vmatpush.msrb.mxu0 %v2277_v37  ;;  %v980_v61 = vpop.f32.mrf.mxu2 }
 0x125   : > { %1787 = vmatpush.msrb.mxu1 %v2309_v26  ;;  %1812 = vmatpush.msrb.mxu2 %v2337_v39 }
 0x126   : > { %1834 = vmatpush.msrb.mxu3 %v2371_v40  ;;  %1813 = vmatmul.f32.vlgmr.msrb.gmra.mxu2 %v4053_v23  ;;  %v931_v23 = vpop.f32.mrf.mxu0 }
 0x127   : > { %1765 = vmatpush.msrb.mxu0 %v2275_v44  ;;  %1788 = vmatpush.msrb.mxu1 %v2307_v45  ;;  %v4294_v4 = vpop.f32.mrf.mxu3  ;;  %v932_v20 = vadd.f32 %v931_v23, %v3909_v27  ;;  %v1849_v44 = vperm.slane %v1847_v32, 0 }
 0x128   : > { %1835 = vmatpush.msrb.mxu3 %v2369_v48 }
 0x129   : > { %1836 = vmatmul.f32.vlgmr.msrb.gmra.mxu3 %v4068_v34  ;;  %1766 = vmatpush.msrb.mxu0 %v2273_v50  ;;  %v957_v34 = vpop.f32.mrf.mxu1  ;;  %v955_v43 = vadd.f32 %v954_v58, %v932_v20 }
 0x12a   : > { %1789 = vmatpush.msrb.mxu1 %v2305_v52  ;;  %1767 = vmatmul.f32.vlgmr.msrb.gmra.mxu0 %v4082_v36 }
 0x12b   : > { %1790 = vmatmul.f32.vlgmr.msrb.gmra.mxu1 %v4085_v25  ;;  %v978_v56 = vadd.f32 %v977_v53, %v955_v43 }
 0x12d   : > { %v1001_v45 = vadd.f32 %v1000_v59, %v978_v56 }
 0x12e   : > { %1816 = vmatmul.f32.gmra.mxu2 %v4115_v51  ;;  %v934_v41 = vpop.f32.mrf.mxu0 }
 0x12f   : > { %v935_v35 = vadd.f32 %v934_v41, %v3966_v49  ;;  %v1850_v49 = vperm.slane %v1847_v32, 1 }
 0x131   : > { %1839 = vmatmul.f32.gmra.mxu3 %v4130_v60  ;;  %v958_v52 = vadd.f32 %v957_v34, %v935_v35 }
 0x132   : > { %1770 = vmatmul.f32.gmra.mxu0 %v4144_v0 }
 0x133   : > { %1793 = vmatmul.f32.gmra.mxu1 %v4147_v1 }
 0x13c   : > { %v1232_v36 = vpop.f32.mrf.mxu0 }
 0x13d   : > { %v1255_v62 = vpop.f32.mrf.mxu1  ;;  %v1278_v25 = vpop.f32.mrf.mxu2 }
 0x13e   : > { %v1256_v13 = vadd.f32 %v1255_v62, %v1232_v36 }
 0x140   : > { %v1301_v2 = vpop.f32.mrf.mxu3  ;;  %v1279_v28 = vadd.f32 %v1278_v25, %v1256_v13 }
 0x142   : > { %v1302_v54 = vadd.f32 %v1301_v2, %v1279_v28 }
 0x144   : > { %v1399_v27 = vadd.f32 %v1302_v54, %v4029_v17  ;;  %v981_v17 = vadd.f32 %v980_v61, %v958_v52 }
 0x146   : > { %v1235_v51 = vpop.f32.mrf.mxu0  ;;  %v1004_v34 = vadd.f32 %v4294_v4, %v981_v17 }
 0x147   : > { %v1258_v3 = vpop.f32.mrf.mxu1  ;;  %v1281_v60 = vpop.f32.mrf.mxu2 }
 0x148   : > { %v1259_v22 = vadd.f32 %v1258_v3, %v1235_v51 }
 0x14a   : > { %v1304_v5 = vpop.f32.mrf.mxu3  ;;  %v1282_v55 = vadd.f32 %v1281_v60, %v1259_v22 }
 0x14c   : > { %v1305_v23 = vadd.f32 %v1304_v5, %v1282_v55 }
 0x14e   : > { %v1401_v60 = vadd.f32 %v1305_v23, %v4090_v38 }
 0x160   : > { %v1324_v0 = vpop.f32.mrf.mxu0 }
 0x161   : > { %v1347_v18 = vpop.f32.mrf.mxu1  ;;  %v1370_v1 = vpop.f32.mrf.mxu2 }
 0x162   : > { %v1348_v33 = vadd.f32 %v1347_v18, %v1324_v0 }
 0x164   : > { %v1393_v7 = vpop.f32.mrf.mxu3  ;;  %v1371_v30 = vadd.f32 %v1370_v1, %v1348_v33 }
 0x166   : > { %v1394_v47 = vadd.f32 %v1393_v7, %v1371_v30 }
 0x168   : > { %v1400_v53 = vadd.f32 %v1394_v47, %v1001_v45 }
 0x16a   : > { %v1327_v8 = vpop.f32.mrf.mxu0 }
 0x16b   : > { %v1350_v9 = vpop.f32.mrf.mxu1  ;;  %v1373_v63 = vpop.f32.mrf.mxu2 }
 0x16c   : > { %v1351_v37 = vadd.f32 %v1350_v9, %v1327_v8 }
 0x16e   : > { %v1396_v11 = vpop.f32.mrf.mxu3  ;;  %v1374_v36 = vadd.f32 %v1373_v63, %v1351_v37 }
 0x170   : > { %v1397_v0 = vadd.f32 %v1396_v11, %v1374_v36 }
 0x172   : > { %v1402_v63 = vadd.f32 %v1397_v0, %v1004_v34 }
 0x184   : > { %v1676_v12 = vpop.f32.mrf.mxu0 }
 0x185   : > { %v1699_v14 = vpop.f32.mrf.mxu1  ;;  %v1722_v15 = vpop.f32.mrf.mxu2 }
 0x186   : > { %v1700_v16 = vadd.f32 %v1699_v14, %v1676_v12 }
 0x188   : > { %v1745_v6 = vpop.f32.mrf.mxu3  ;;  %v1723_v10 = vadd.f32 %v1722_v15, %v1700_v16 }
 0x18a   : > { %v1746_v31 = vadd.f32 %v1745_v6, %v1723_v10 }
 0x18c   : > { %v1843_v40 = vadd.f32 %v1746_v31, %v1399_v27 }
 0x18e   : > { %v1679_v19 = vpop.f32.mrf.mxu0  ;;  %v1853_v41 = vadd.f32 %v1849_v44, %v1843_v40 }
 0x18f   : > { %v1702_v42 = vpop.f32.mrf.mxu1  ;;  %v1725_v21 = vpop.f32.mrf.mxu2 }
 0x190   : > { %v1703_v57 = vadd.f32 %v1702_v42, %v1679_v19  ;;  %v1861_v5 = vmul.f32 0.2, %v1853_v41  ;;  %vm1857_vm5 = vcmp.ge.f32.partialorder %v1853_v41, 0.0 }
 0x192   : > { %v1748_v24 = vpop.f32.mrf.mxu3  ;;  %v1726_v48 = vadd.f32 %v1725_v21, %v1703_v57  ;;  %v1865_v11 = vsel %vm1857_vm5, %v1853_v41, %v1861_v5 }
 0x194   : > { %v1749_v25 = vadd.f32 %v1748_v24, %v1726_v48 }
 0x196   : > { %v1845_v7 = vadd.f32 %v1749_v25, %v1401_v60 }
 0x198   : > { %v1855_v15 = vadd.f32 %v1849_v44, %v1845_v7 }
 0x19a   : > { %v1863_v28 = vmul.f32 0.2, %v1855_v15  ;;  %vm1859_vm7 = vcmp.ge.f32.partialorder %v1855_v15, 0.0 }
 0x19c   : > { %v1867_v21 = vsel %vm1859_vm7, %v1855_v15, %v1863_v28 }
 0x1a7   : > { %v1768_v46 = vpop.f32.mrf.mxu0 }
 0x1a8   : > { %v1791_v29 = vpop.f32.mrf.mxu1 }
 0x1a9   : > { %v1792_v26 = vadd.f32 %v1791_v29, %v1768_v46  ;;  %v1814_v39 = vpop.f32.mrf.mxu2 }
 0x1ab   : > { %v1815_v50 = vadd.f32 %v1814_v39, %v1792_v26 }
 0x1ac   : > { %v1837_v58 = vpop.f32.mrf.mxu3 }
 0x1ad   : > { %v1838_v62 = vadd.f32 %v1837_v58, %v1815_v50 }
 0x1af   : > { %v1844_v2 = vadd.f32 %v1838_v62, %v1400_v53  ;;  %v1771_v51 = vpop.f32.mrf.mxu0 }
 0x1b0   : > { %v1794_v3 = vpop.f32.mrf.mxu1 }
 0x1b1   : > { %v1854_v59 = vadd.f32 %v1850_v49, %v1844_v2  ;;  %v1795_v18 = vadd.f32 %v1794_v3, %v1771_v51  ;;  %v1817_v1 = vpop.f32.mrf.mxu2 }
 0x1b3   : > { %vm1858_vm4 = vcmp.ge.f32.partialorder %v1854_v59, 0.0  ;;  %v1862_v8 = vmul.f32 0.2, %v1854_v59  ;;  %v1818_v9 = vadd.f32 %v1817_v1, %v1795_v18 }
 0x1b4   : > { %v1840_v61 = vpop.f32.mrf.mxu3 }
 0x1b5   : > { %v1866_v12 = vsel %vm1858_vm4, %v1854_v59, %v1862_v8  ;;  %v1841_v14 = vadd.f32 %v1840_v61, %v1818_v9 }
 0x1b6   : > { %v1873_v38 = vrot.slane %v1866_v12, 4 }
 0x1b7   : > { %v1846_v6 = vadd.f32 %v1841_v14, %v1402_v63 }
 0x1b8   : > { %v1875_v4 = vsel %vm211_vm0, %v1865_v11, %v1873_v38  ;;  %v1876_v13 = vsel %vm211_vm0, %v1873_v38, %v1865_v11 }
 0x1b9   : > { %v1877_v16 = vrot.slane %v1876_v13, 4  ;;  %1885 = vst [vmem:[%s170_s16] sm:$0xff] %v1875_v4  ;;  %v1856_v19 = vadd.f32 %v1850_v49, %v1846_v6 }
 0x1bb   : > { %1886 = vst [vmem:[%s170_s16 + $0x8] sm:$0xff] %v1877_v16  ;;  %vm1860_vm6 = vcmp.ge.f32.partialorder %v1856_v19, 0.0  ;;  %v1864_v42 = vmul.f32 0.2, %v1856_v19 }
 0x1bd   : > { %v1868_v20 = vsel %vm1860_vm6, %v1856_v19, %v1864_v42 }
 0x1be   : > { %v1874_v33 = vrot.slane %v1868_v20, 4 }
 0x1c0   : > { %v1878_v10 = vsel %vm211_vm0, %v1867_v21, %v1874_v33  ;;  %v1879_v54 = vsel %vm211_vm0, %v1874_v33, %v1867_v21 }
 0x1c1   : > { %v1880_v22 = vrot.slane %v1879_v54, 4  ;;  %1887 = vst [vmem:[%s170_s16 + $0x10] sm:$0xff] %v1878_v10 }
 0x1c3   : > { %1888 = vst [vmem:[%s170_s16 + $0x18] sm:$0xff] %v1880_v22 }
 0x1c4 PF: > { %s13_s12 = sadd.s32 1, %s2418_s12  }
 0x1c5   : > { %p10_p4 = scmp.ge.s32.totalorder %s13_s12, 4  }
 0x1c7   :  { %12 = sbr.rel (!%p10_p4) target bundleno = 1 (0x1), region = 94 }

</bundles_post_ra>
